<compile_context>
chip_gen: v7x
topology: tpu7x:2x2x1
jax: 0.10.0
libtpu: 0.0.40
codegen_flags: <defaults>
</compile_context>

<pallas_src>
import functools

import jax
import jax.numpy as jnp
from jax import lax
from jax.experimental import pallas as pl
from jax.experimental.pallas import tpu as pltpu

KSZ = 11          # conv kernel size
CPAD = 1          # conv padding
CSTRIDE = 2       # conv stride


def _round_up(x, m):
    return ((x + m - 1) // m) * m


# ---------------------------------------------------------------------------
# In-kernel helpers (operate on loaded VMEM values)
# ---------------------------------------------------------------------------

def _ln_pad(x, g, b, e_true, eps=1e-5):
    """LayerNorm over the last dim of a zero-padded activation.

    x: (N, E_pad) f32 with padded lanes == 0; g/b are zero-padded (1, E_pad).
    Mean / variance use the true embed dim as divisor (padded lanes contribute 0 to the
    sums; the centered-variance term is corrected for the (E_pad - E) constant -mu lanes).
    """
    e_pad = x.shape[-1]
    mu = jnp.sum(x, axis=-1, keepdims=True) / e_true
    xc = x - mu
    ss = jnp.sum(xc * xc, axis=-1, keepdims=True) - (e_pad - e_true) * (mu * mu)
    var = ss / e_true
    return xc * lax.rsqrt(var + eps) * g + b


def _attention(q_all, k_all, v_all, wout_ref, bout_ref, o_sc, *,
               batch, sq, sk, num_heads, dh_pad, causal):
    """Multi-head attention over a flattened (batch*seq, H*Dh_pad) layout.

    All head slices are 128-aligned (Dh_pad is a multiple of 128); scores use dot_general
    contracting the last dims (no materialized K transpose); per-head outputs go into the
    aligned VMEM scratch `o_sc` and the output projection is a single dot.
    The 1/sqrt(Dh) scale is already folded into the Q projection weights/bias.
    """
    if causal:
        row = lax.broadcasted_iota(jnp.int32, (sq, sk), 0)
        col = lax.broadcasted_iota(jnp.int32, (sq, sk), 1)
        allow = col <= row
    # Static, fully unrolled loops: batch and num_heads are small here.  For large batch,
    # batch would move back to a grid axis instead.
    for b in range(batch):
        rq = slice(b * sq, (b + 1) * sq)
        rk = slice(b * sk, (b + 1) * sk)
        for h in range(num_heads):
            cs = slice(h * dh_pad, (h + 1) * dh_pad)
            q = q_all[rq, cs].astype(jnp.bfloat16)
            k = k_all[rk, cs].astype(jnp.bfloat16)
            v = v_all[rk, cs].astype(jnp.bfloat16)
            s = lax.dot_general(q, k, (((1,), (1,)), ((), ())),
                                preferred_element_type=jnp.float32)
            if causal:
                s = jnp.where(allow, s, -1e30)
            s = s - jnp.max(s, axis=-1, keepdims=True)
            p = jnp.exp(s)
            inv = pl.reciprocal(jnp.sum(p, axis=-1, keepdims=True), approx=True)
            o_sc[rq, cs] = jnp.dot((p * inv).astype(jnp.bfloat16), v,
                                   preferred_element_type=jnp.float32)
    return jnp.dot(o_sc[...].astype(jnp.bfloat16), wout_ref[...],
                   preferred_element_type=jnp.float32) + bout_ref[...]


def _ffn(xn, w1_ref, b1_ref, w2_ref, b2_ref):
    h = jnp.maximum(
        jnp.dot(xn.astype(jnp.bfloat16), w1_ref[...],
                preferred_element_type=jnp.float32) + b1_ref[...], 0.0)
    return jnp.dot(h.astype(jnp.bfloat16), w2_ref[...],
                   preferred_element_type=jnp.float32) + b2_ref[...]


# ---------------------------------------------------------------------------
# Fused Conv1d(k=11, stride=2, pad=1) + ReLU  x3  (whole embedding in ONE call)
# ---------------------------------------------------------------------------

def _conv_layer(v, w_ref, b_ref):
    """One Conv1d(stride=2, pad=1, k=11) + bias + ReLU on a channels-last value.

    v: (L_in, C_in) f32; w_ref: (K, C_in, C_out) bf16; b_ref: (1, C_out) f32.
    The padded input is phase-split (even / odd positions) with small selection matmuls so
    the stride-2 taps become contiguous static slices; out-of-range rows are zeros by
    construction (selection rows select nothing), so all slices stay in bounds.
    """
    l_in = v.shape[0]
    l_out = (l_in + 2 * CPAD - KSZ) // CSTRIDE + 1
    n_ph = _round_up(l_out + 5, 8)              # max even-tap offset is l_out - 1 + 5

    rows = lax.broadcasted_iota(jnp.int32, (n_ph, l_in), 0)
    cols = lax.broadcasted_iota(jnp.int32, (n_ph, l_in), 1)
    # Padded input P[p] = v[p-1] (zeros at both ends).  Pe[j] = P[2j], Po[j] = P[2j+1].
    se = (cols == 2 * rows - 1).astype(jnp.float32)
    so = (cols == 2 * rows).astype(jnp.float32)
    pe = jnp.dot(se, v, preferred_element_type=jnp.float32)
    po = jnp.dot(so, v, preferred_element_type=jnp.float32)

    acc = jnp.zeros((l_out, w_ref.shape[-1]), jnp.float32)
    for k in range(KSZ):
        src = pe if k % 2 == 0 else po
        start = k // 2
        xk = src[start:start + l_out, :].astype(jnp.bfloat16)
        acc = acc + jnp.dot(xk, w_ref[k], preferred_element_type=jnp.float32)
    return jnp.maximum(acc + b_ref[...], 0.0)


def _conv_stack_kernel(x_ref, w1_ref, b1_ref, w2_ref, b2_ref, w3_ref, b3_ref, o_ref):
    v = x_ref[...]                              # (L, C_in) f32, channels-last
    v = _conv_layer(v, w1_ref, b1_ref)
    v = _conv_layer(v, w2_ref, b2_ref)
    v = _conv_layer(v, w3_ref, b3_ref)
    o_ref[...] = v


def conv_stack(x, p):
    """x: (B, L, C_in) channels-last -> (B, L3, E_pad)."""
    bsz, l, c_in = x.shape
    l1 = (l + 2 * CPAD - KSZ) // CSTRIDE + 1
    l2 = (l1 + 2 * CPAD - KSZ) // CSTRIDE + 1
    l3 = (l2 + 2 * CPAD - KSZ) // CSTRIDE + 1
    assert l1 >= 1 and l2 >= 1 and l3 >= 1, "input too short for three stride-2 convs"
    c_out = p["conv1_w"].shape[-1]
    return pl.pallas_call(
        _conv_stack_kernel,
        out_shape=jax.ShapeDtypeStruct((bsz, l3, c_out), jnp.float32),
        grid=(bsz,),
        in_specs=[
            pl.BlockSpec((None, l, c_in), lambda bi: (bi, 0, 0)),
            pl.BlockSpec(p["conv1_w"].shape, lambda bi: (0, 0, 0)),
            pl.BlockSpec((1, c_out), lambda bi: (0, 0)),
            pl.BlockSpec(p["conv2_w"].shape, lambda bi: (0, 0, 0)),
            pl.BlockSpec((1, c_out), lambda bi: (0, 0)),
            pl.BlockSpec(p["conv3_w"].shape, lambda bi: (0, 0, 0)),
            pl.BlockSpec((1, c_out), lambda bi: (0, 0)),
        ],
        out_specs=pl.BlockSpec((None, l3, c_out), lambda bi: (bi, 0, 0)),
        compiler_params=pltpu.CompilerParams(dimension_semantics=("parallel",)),
    )(x, p["conv1_w"], p["conv1_b"], p["conv2_w"], p["conv2_b"],
      p["conv3_w"], p["conv3_b"])


# ---------------------------------------------------------------------------
# Fused pre-LN TransformerEncoder stack (all layers + final LN in one call)
# ---------------------------------------------------------------------------

def _encoder_stack_kernel(x0_ref, win_ref, bin_ref, wout_ref, bout_ref,
                          w1_ref, b1_ref, w2_ref, b2_ref,
                          n1g_ref, n1b_ref, n2g_ref, n2b_ref,
                          fng_ref, fnb_ref,
                          o_ref, x_sc, attn_sc,
                          *, batch, seq, num_heads, dh_pad, e_true):
    layer = pl.program_id(0)

    @pl.when(layer == 0)
    def _():
        x_sc[...] = x0_ref[...]

    hdp = num_heads * dh_pad
    x = x_sc[...]                                        # (B*S, E_pad) f32

    # --- self-attention block (norm_first=True); dropout is identity at inference ---
    xn = _ln_pad(x, n1g_ref[...], n1b_ref[...], e_true)
    qkv = jnp.dot(xn.astype(jnp.bfloat16), win_ref[...],
                  preferred_element_type=jnp.float32) + bin_ref[...]
    attn = _attention(qkv[:, :hdp], qkv[:, hdp:2 * hdp], qkv[:, 2 * hdp:],
                      wout_ref, bout_ref, attn_sc,
                      batch=batch, sq=seq, sk=seq,
                      num_heads=num_heads, dh_pad=dh_pad, causal=False)
    x = x + attn

    # --- feed-forward block ---
    xn = _ln_pad(x, n2g_ref[...], n2b_ref[...], e_true)
    x = x + _ffn(xn, w1_ref, b1_ref, w2_ref, b2_ref)

    x_sc[...] = x

    @pl.when(layer == pl.num_programs(0) - 1)
    def _():
        o_ref[...] = _ln_pad(x, fng_ref[...], fnb_ref[...], e_true)


def encoder_stack(x0, p, *, batch, seq, num_heads, dh_pad, e_true):
    n, e_pad = x0.shape
    nl = p["win"].shape[0]
    hdp = num_heads * dh_pad
    f_pad = p["w1"].shape[-1]
    amap = lambda li: (0, 0)
    wmap = lambda li: (li, 0, 0)
    cmap = lambda li: (0, 0)
    return pl.pallas_call(
        functools.partial(_encoder_stack_kernel, batch=batch, seq=seq,
                          num_heads=num_heads, dh_pad=dh_pad, e_true=e_true),
        out_shape=jax.ShapeDtypeStruct((n, e_pad), jnp.float32),
        grid=(nl,),
        in_specs=[
            pl.BlockSpec((n, e_pad), amap),                  # x0 (fetched once)
            pl.BlockSpec((None, e_pad, 3 * hdp), wmap),      # in_w (q pre-scaled)
            pl.BlockSpec((None, 1, 3 * hdp), wmap),          # in_b
            pl.BlockSpec((None, hdp, e_pad), wmap),          # out_w
            pl.BlockSpec((None, 1, e_pad), wmap),            # out_b
            pl.BlockSpec((None, e_pad, f_pad), wmap),        # ff1_w
            pl.BlockSpec((None, 1, f_pad), wmap),            # ff1_b
            pl.BlockSpec((None, f_pad, e_pad), wmap),        # ff2_w
            pl.BlockSpec((None, 1, e_pad), wmap),            # ff2_b
            pl.BlockSpec((None, 1, e_pad), wmap),            # n1_g
            pl.BlockSpec((None, 1, e_pad), wmap),            # n1_b
            pl.BlockSpec((None, 1, e_pad), wmap),            # n2_g
            pl.BlockSpec((None, 1, e_pad), wmap),            # n2_b
            pl.BlockSpec((1, e_pad), cmap),                  # final norm gamma
            pl.BlockSpec((1, e_pad), cmap),                  # final norm beta
        ],
        out_specs=pl.BlockSpec((n, e_pad), amap),
        scratch_shapes=[pltpu.VMEM((n, e_pad), jnp.float32),
                        pltpu.VMEM((n, hdp), jnp.float32)],
        compiler_params=pltpu.CompilerParams(
            dimension_semantics=("arbitrary",),
            vmem_limit_bytes=32 * 1024 * 1024),
    )(x0, p["win"], p["bin"], p["wout"], p["bout"],
      p["w1"], p["b1"], p["w2"], p["b2"],
      p["n1g"], p["n1b"], p["n2g"], p["n2b"],
      p["fng"], p["fnb"])


# ---------------------------------------------------------------------------
# Fused pre-LN TransformerDecoder stack + final LN + classifier (one call)
# ---------------------------------------------------------------------------

def _decoder_stack_kernel(x0_ref, mem_ref,
                          sa_win_ref, sa_bin_ref, sa_wout_ref, sa_bout_ref,
                          ca_wq_ref, ca_bq_ref, ca_wkv_ref, ca_bkv_ref,
                          ca_wout_ref, ca_bout_ref,
                          w1_ref, b1_ref, w2_ref, b2_ref,
                          n1g_ref, n1b_ref, n2g_ref, n2b_ref, n3g_ref, n3b_ref,
                          fng_ref, fnb_ref, cls_w_ref, cls_b_ref,
                          o_ref, x_sc, attn_sc,
                          *, batch, tgt_len, mem_len, num_heads, dh_pad, e_true):
    layer = pl.program_id(0)

    @pl.when(layer == 0)
    def _():
        x_sc[...] = x0_ref[...]

    hdp = num_heads * dh_pad
    x = x_sc[...]                                        # (B*T, E_pad) f32
    mem = mem_ref[...]                                   # (B*S, E_pad) f32

    # --- masked self-attention (causal == triu(-inf, diag=1) of make_mask) ---
    xn = _ln_pad(x, n1g_ref[...], n1b_ref[...], e_true)
    qkv = jnp.dot(xn.astype(jnp.bfloat16), sa_win_ref[...],
                  preferred_element_type=jnp.float32) + sa_bin_ref[...]
    attn = _attention(qkv[:, :hdp], qkv[:, hdp:2 * hdp], qkv[:, 2 * hdp:],
                      sa_wout_ref, sa_bout_ref, attn_sc,
                      batch=batch, sq=tgt_len, sk=tgt_len,
                      num_heads=num_heads, dh_pad=dh_pad, causal=True)
    x = x + attn

    # --- cross-attention over encoder memory ---
    xn = _ln_pad(x, n2g_ref[...], n2b_ref[...], e_true)
    q = jnp.dot(xn.astype(jnp.bfloat16), ca_wq_ref[...],
                preferred_element_type=jnp.float32) + ca_bq_ref[...]
    kv = jnp.dot(mem.astype(jnp.bfloat16), ca_wkv_ref[...],
                 preferred_element_type=jnp.float32) + ca_bkv_ref[...]
    attn = _attention(q, kv[:, :hdp], kv[:, hdp:],
                      ca_wout_ref, ca_bout_ref, attn_sc,
                      batch=batch, sq=tgt_len, sk=mem_len,
                      num_heads=num_heads, dh_pad=dh_pad, causal=False)
    x = x + attn

    # --- feed-forward ---
    xn = _ln_pad(x, n3g_ref[...], n3b_ref[...], e_true)
    x = x + _ffn(xn, w1_ref, b1_ref, w2_ref, b2_ref)

    x_sc[...] = x

    @pl.when(layer == pl.num_programs(0) - 1)
    def _():
        y = _ln_pad(x, fng_ref[...], fnb_ref[...], e_true)  # final norm of TransformerDecoder
        o_ref[...] = jnp.dot(y.astype(jnp.bfloat16), cls_w_ref[...],
                             preferred_element_type=jnp.float32) + cls_b_ref[...]


def decoder_stack(x0, mem, p, *, batch, tgt_len, mem_len, num_heads, dh_pad, e_true):
    n_t, e_pad = x0.shape
    n_s = mem.shape[0]
    nl = p["sa_win"].shape[0]
    hdp = num_heads * dh_pad
    f_pad = p["w1"].shape[-1]
    c_pad = p["cls_w"].shape[-1]
    tmap = lambda li: (0, 0)
    wmap = lambda li: (li, 0, 0)
    cmap = lambda li: (0, 0)
    return pl.pallas_call(
        functools.partial(_decoder_stack_kernel, batch=batch, tgt_len=tgt_len,
                          mem_len=mem_len, num_heads=num_heads, dh_pad=dh_pad,
                          e_true=e_true),
        out_shape=jax.ShapeDtypeStruct((n_t, c_pad), jnp.float32),
        grid=(nl,),
        in_specs=[
            pl.BlockSpec((n_t, e_pad), tmap),                # tgt embedding
            pl.BlockSpec((n_s, e_pad), tmap),                # encoder memory
            pl.BlockSpec((None, e_pad, 3 * hdp), wmap),      # sa_in_w
            pl.BlockSpec((None, 1, 3 * hdp), wmap),          # sa_in_b
            pl.BlockSpec((None, hdp, e_pad), wmap),          # sa_out_w
            pl.BlockSpec((None, 1, e_pad), wmap),            # sa_out_b
            pl.BlockSpec((None, e_pad, hdp), wmap),          # ca_q_w
            pl.BlockSpec((None, 1, hdp), wmap),              # ca_q_b
            pl.BlockSpec((None, e_pad, 2 * hdp), wmap),      # ca_kv_w
            pl.BlockSpec((None, 1, 2 * hdp), wmap),          # ca_kv_b
            pl.BlockSpec((None, hdp, e_pad), wmap),          # ca_out_w
            pl.BlockSpec((None, 1, e_pad), wmap),            # ca_out_b
            pl.BlockSpec((None, e_pad, f_pad), wmap),        # ff1_w
            pl.BlockSpec((None, 1, f_pad), wmap),            # ff1_b
            pl.BlockSpec((None, f_pad, e_pad), wmap),        # ff2_w
            pl.BlockSpec((None, 1, e_pad), wmap),            # ff2_b
            pl.BlockSpec((None, 1, e_pad), wmap),            # n1_g
            pl.BlockSpec((None, 1, e_pad), wmap),            # n1_b
            pl.BlockSpec((None, 1, e_pad), wmap),            # n2_g
            pl.BlockSpec((None, 1, e_pad), wmap),            # n2_b
            pl.BlockSpec((None, 1, e_pad), wmap),            # n3_g
            pl.BlockSpec((None, 1, e_pad), wmap),            # n3_b
            pl.BlockSpec((1, e_pad), cmap),                  # final norm gamma
            pl.BlockSpec((1, e_pad), cmap),                  # final norm beta
            pl.BlockSpec((e_pad, c_pad), cmap),              # classifier weight (padded classes)
            pl.BlockSpec((1, c_pad), cmap),                  # classifier bias
        ],
        out_specs=pl.BlockSpec((n_t, c_pad), tmap),
        scratch_shapes=[pltpu.VMEM((n_t, e_pad), jnp.float32),
                        pltpu.VMEM((n_t, hdp), jnp.float32)],
        compiler_params=pltpu.CompilerParams(
            dimension_semantics=("arbitrary",),
            vmem_limit_bytes=32 * 1024 * 1024),
    )(x0, mem,
      p["sa_win"], p["sa_bin"], p["sa_wout"], p["sa_bout"],
      p["ca_wq"], p["ca_bq"], p["ca_wkv"], p["ca_bkv"], p["ca_wout"], p["ca_bout"],
      p["w1"], p["b1"], p["w2"], p["b2"],
      p["n1g"], p["n1b"], p["n2g"], p["n2b"], p["n3g"], p["n3b"],
      p["fng"], p["fnb"], p["cls_w"], p["cls_b"])


# ---------------------------------------------------------------------------
# Parameters (padded / head-rearranged / pre-folded once at init) and forward
# ---------------------------------------------------------------------------

def init_params(key, *, embed_dim, num_heads, ff_dim, num_layers_enc,
                num_layers_dec, num_classes, tgt_len, in_channels=129):
    e, f = embed_dim, ff_dim
    h = num_heads
    assert e % h == 0
    dh = e // h
    e_pad = _round_up(e, 128)
    f_pad = _round_up(f, 128)
    dh_pad = _round_up(dh, 128)
    c_pad = _round_up(num_classes, 128)
    hdp = h * dh_pad
    qscale = 1.0 / float(dh) ** 0.5

    keys = iter(jax.random.split(key, 1024))

    def nrm(shape, s=0.05):
        return jax.random.normal(next(keys), shape, jnp.float32) * s

    def pad2(a, r, c):
        return jnp.pad(a, ((0, r - a.shape[0]), (0, c - a.shape[1])))

    def head_cols(w):          # (E, E) x@W layout -> (E_pad, H*Dh_pad), heads 128-aligned
        w = w.reshape(e, h, dh)
        w = jnp.pad(w, ((0, e_pad - e), (0, 0), (0, dh_pad - dh)))
        return w.reshape(e_pad, hdp)

    def head_cols_b(b):        # (E,) -> (1, H*Dh_pad)
        b = b.reshape(h, dh)
        b = jnp.pad(b, ((0, 0), (0, dh_pad - dh)))
        return b.reshape(1, hdp)

    def head_rows(w):          # (E, E) head-concat rows -> (H*Dh_pad, E_pad)
        w = w.reshape(h, dh, e)
        w = jnp.pad(w, ((0, 0), (0, dh_pad - dh), (0, e_pad - e)))
        return w.reshape(hdp, e_pad)

    def attn_self():
        wq, wk, wv = nrm((e, e)), nrm((e, e)), nrm((e, e))
        bq, bk, bv = nrm((e,)), nrm((e,)), nrm((e,))
        win = jnp.concatenate([head_cols(wq * qscale), head_cols(wk), head_cols(wv)], axis=1)
        bin_ = jnp.concatenate([head_cols_b(bq * qscale), head_cols_b(bk), head_cols_b(bv)],
                               axis=1)
        wo, bo = nrm((e, e)), nrm((e,))
        return (win.astype(jnp.bfloat16), bin_,
                head_rows(wo).astype(jnp.bfloat16), pad2(bo.reshape(1, e), 1, e_pad))

    def attn_cross():
        wq, wk, wv = nrm((e, e)), nrm((e, e)), nrm((e, e))
        bq, bk, bv = nrm((e,)), nrm((e,)), nrm((e,))
        wq_l = head_cols(wq * qscale).astype(jnp.bfloat16)
        bq_l = head_cols_b(bq * qscale)
        wkv = jnp.concatenate([head_cols(wk), head_cols(wv)], axis=1).astype(jnp.bfloat16)
        bkv = jnp.concatenate([head_cols_b(bk), head_cols_b(bv)], axis=1)
        wo, bo = nrm((e, e)), nrm((e,))
        return (wq_l, bq_l, wkv, bkv,
                head_rows(wo).astype(jnp.bfloat16), pad2(bo.reshape(1, e), 1, e_pad))

    def ffn():
        w1, b1 = nrm((e, f)), nrm((f,))
        w2, b2 = nrm((f, e)), nrm((e,))
        return (pad2(w1, e_pad, f_pad).astype(jnp.bfloat16),
                pad2(b1.reshape(1, f), 1, f_pad),
                pad2(w2, f_pad, e_pad).astype(jnp.bfloat16),
                pad2(b2.reshape(1, e), 1, e_pad))

    def ln():
        return (pad2(jnp.ones((1, e), jnp.float32), 1, e_pad),
                pad2(jnp.zeros((1, e), jnp.float32), 1, e_pad))

    p = {}

    # --- convs: PyTorch (Cout, Cin, K) -> (K, Cin(_pad), Cout_pad) bf16, channel-padded ---
    def conv(cin, cin_pad, cout):
        w = nrm((cout, cin, KSZ))
        b = nrm((cout,))
        wk = jnp.transpose(w, (2, 1, 0))
        wk = jnp.pad(wk, ((0, 0), (0, cin_pad - cin), (0, e_pad - cout)))
        return wk.astype(jnp.bfloat16), pad2(b.reshape(1, cout), 1, e_pad)

    p["conv1_w"], p["conv1_b"] = conv(in_channels, in_channels, e)
    p["conv2_w"], p["conv2_b"] = conv(e, e_pad, e)
    p["conv3_w"], p["conv3_b"] = conv(e, e_pad, e)

    # --- encoder layers ---
    enc_layers = []
    for _ in range(num_layers_enc):
        win, bin_, wout, bout = attn_self()
        w1, b1, w2, b2 = ffn()
        n1g, n1b = ln()
        n2g, n2b = ln()
        enc_layers.append(dict(win=win, bin=bin_, wout=wout, bout=bout,
                               w1=w1, b1=b1, w2=w2, b2=b2,
                               n1g=n1g, n1b=n1b, n2g=n2g, n2b=n2b))
    enc = {k: jnp.stack([lyr[k] for lyr in enc_layers]) for k in enc_layers[0]}
    enc["fng"], enc["fnb"] = ln()
    p["enc"] = enc

    # --- decoder layers ---
    dec_layers = []
    for _ in range(num_layers_dec):
        sa_win, sa_bin, sa_wout, sa_bout = attn_self()
        ca_wq, ca_bq, ca_wkv, ca_bkv, ca_wout, ca_bout = attn_cross()
        w1, b1, w2, b2 = ffn()
        n1g, n1b = ln()
        n2g, n2b = ln()
        n3g, n3b = ln()
        dec_layers.append(dict(sa_win=sa_win, sa_bin=sa_bin, sa_wout=sa_wout, sa_bout=sa_bout,
                               ca_wq=ca_wq, ca_bq=ca_bq, ca_wkv=ca_wkv, ca_bkv=ca_bkv,
                               ca_wout=ca_wout, ca_bout=ca_bout,
                               w1=w1, b1=b1, w2=w2, b2=b2,
                               n1g=n1g, n1b=n1b, n2g=n2g, n2b=n2b, n3g=n3g, n3b=n3b))
    dec = {k: jnp.stack([lyr[k] for lyr in dec_layers]) for k in dec_layers[0]}
    dec["fng"], dec["fnb"] = ln()
    dec["tok_emb"] = pad2(nrm((num_classes, e), 0.5), num_classes, e_pad)
    dec["pos_emb"] = pad2(nrm((tgt_len, e), 0.5), tgt_len, e_pad)
    dec["cls_w"] = pad2(nrm((e, num_classes)), e_pad, c_pad).astype(jnp.bfloat16)
    dec["cls_b"] = pad2(nrm((1, num_classes)), 1, c_pad)
    p["dec"] = dec
    return p


def transformer_forward(x, tgt, params, *, embed_dim, num_heads, num_classes):
    dh_pad = _round_up(embed_dim // num_heads, 128)

    # ---- Encoder: convs in channels-last layout == x.permute(0, 2, 1) after embedding ----
    h = jnp.transpose(x, (0, 2, 1))                                   # (B, T, 129)
    conv_out = conv_stack(h, params)                                  # (B, S, E_pad)
    b, s, e_pad = conv_out.shape
    mem = encoder_stack(conv_out.reshape(b * s, e_pad), params["enc"],
                        batch=b, seq=s, num_heads=num_heads, dh_pad=dh_pad,
                        e_true=embed_dim)                             # (B*S, E_pad)

    # ---- Decoder: token + positional embedding, then fused decoder stack + classifier ----
    # TODO(synk): embedding lookup (nn.Embedding gather) stays in XLA; dropout is identity (eval).
    dec = params["dec"]
    t = tgt.shape[1]
    tgt_emb = dec["tok_emb"][tgt] + dec["pos_emb"][None, :t, :]       # (B, T, E_pad)
    logits = decoder_stack(tgt_emb.reshape(b * t, e_pad), mem, dec,
                           batch=b, tgt_len=t, mem_len=s,
                           num_heads=num_heads, dh_pad=dh_pad,
                           e_true=embed_dim)                          # (B*T, C_pad)
    return logits.reshape(b, t, -1)[:, :, :num_classes]


if __name__ == "__main__":
    embed_dim = 32
    num_heads = 4
    ff_dim = 64
    num_layers_enc = 2
    num_layers_dec = 1
    num_classes = 16
    tgt_len = 8

    B, C_in, T_in = 2, 129, 115      # three stride-2 convs (k=11, pad=1) -> S = 8

    key = jax.random.PRNGKey(0)
    k_x, k_t, k_p = jax.random.split(key, 3)
    x = jax.random.normal(k_x, (B, C_in, T_in), jnp.float32)
    tgt = jax.random.randint(k_t, (B, tgt_len), 0, num_classes, dtype=jnp.int32)
    params = init_params(k_p, embed_dim=embed_dim, num_heads=num_heads, ff_dim=ff_dim,
                         num_layers_enc=num_layers_enc, num_layers_dec=num_layers_dec,
                         num_classes=num_classes, tgt_len=tgt_len, in_channels=C_in)

    fwd = jax.jit(functools.partial(transformer_forward, embed_dim=embed_dim,
                                    num_heads=num_heads, num_classes=num_classes))
    out = jax.block_until_ready(fwd(x, tgt, params))
    assert out.shape == (B, tgt_len, num_classes), out.shape
    assert bool(jnp.all(jnp.isfinite(out)))
    print("KERNEL_OK")
</pallas_src>

<mosaic_0001>
module attributes {stable_mosaic.version = 11 : i64} {
  func.func @_conv_stack_kernel(%arg0: i32, %arg1: memref<1x115x129xf32, #tpu.memory_space<vmem>>, %arg2: memref<11x129x128xbf16, #tpu.memory_space<vmem>>, %arg3: memref<1x128xf32, #tpu.memory_space<vmem>>, %arg4: memref<11x128x128xbf16, #tpu.memory_space<vmem>>, %arg5: memref<1x128xf32, #tpu.memory_space<vmem>>, %arg6: memref<11x128x128xbf16, #tpu.memory_space<vmem>>, %arg7: memref<1x128xf32, #tpu.memory_space<vmem>>, %arg8: memref<1x8x128xf32, #tpu.memory_space<vmem>>) attributes {dimension_semantics = [#tpu.dimension_semantics<parallel>], iteration_bounds = array<i64: 2>, scalar_prefetch = 0 : i64, scratch_operands = 0 : i64, tpu.core_type = #tpu.core_type<tc>, window_params = [{transform_indices = @transform_0, window_bounds = array<i64: 1, 115, 129>}, {pipeline_mode = #tpu.pipeline_mode<synchronous>, transform_indices = @transform_1, window_bounds = array<i64: 11, 129, 128>}, {pipeline_mode = #tpu.pipeline_mode<synchronous>, transform_indices = @transform_2, window_bounds = array<i64: 1, 128>}, {pipeline_mode = #tpu.pipeline_mode<synchronous>, transform_indices = @transform_3, window_bounds = array<i64: 11, 128, 128>}, {pipeline_mode = #tpu.pipeline_mode<synchronous>, transform_indices = @transform_4, window_bounds = array<i64: 1, 128>}, {pipeline_mode = #tpu.pipeline_mode<synchronous>, transform_indices = @transform_5, window_bounds = array<i64: 11, 128, 128>}, {pipeline_mode = #tpu.pipeline_mode<synchronous>, transform_indices = @transform_6, window_bounds = array<i64: 1, 128>}, {transform_indices = @transform_7, window_bounds = array<i64: 1, 8, 128>}]} {
    %c0 = arith.constant 0 : index
    %c0_0 = arith.constant 0 : index
    %c0_1 = arith.constant 0 : index
    %0 = vector.load %arg1[%c0, %c0_0, %c0_1] : memref<1x115x129xf32, #tpu.memory_space<vmem>>, vector<1x115x129xf32>
    %1 = vector.shape_cast %0 : vector<1x115x129xf32> to vector<115x129xf32>
    %2 = tpu.iota {dimensions = array<i32: 0>} : vector<64x115xi32>
    %3 = tpu.iota {dimensions = array<i32: 1>} : vector<64x115xi32>
    %c2_i32 = arith.constant 2 : i32
    %4 = vector.broadcast %c2_i32 : i32 to vector<64x115xi32>
    %5 = arith.muli %4, %2 : vector<64x115xi32>
    %c1_i32 = arith.constant 1 : i32
    %6 = vector.broadcast %c1_i32 : i32 to vector<64x115xi32>
    %7 = arith.subi %5, %6 : vector<64x115xi32>
    %8 = arith.cmpi eq, %3, %7 : vector<64x115xi32>
    %9 = arith.extui %8 : vector<64x115xi1> to vector<64x115xi32>
    %10 = arith.sitofp %9 : vector<64x115xi32> to vector<64x115xf32>
    %c2_i32_2 = arith.constant 2 : i32
    %11 = vector.broadcast %c2_i32_2 : i32 to vector<64x115xi32>
    %12 = arith.muli %11, %2 : vector<64x115xi32>
    %13 = arith.cmpi eq, %3, %12 : vector<64x115xi32>
    %14 = arith.extui %13 : vector<64x115xi1> to vector<64x115xi32>
    %15 = arith.sitofp %14 : vector<64x115xi32> to vector<64x115xf32>
    %cst = arith.constant dense<0.000000e+00> : vector<64x129xf32>
    %16 = tpu.matmul %10, %1, %cst {dimension_numbers = #tpu.dot_dimension_numbers<[1], [0], [0], [1], [0, 0, 1, 1], [], []>} : vector<64x115xf32>, vector<115x129xf32>, vector<64x129xf32> -> vector<64x129xf32>
    %cst_3 = arith.constant dense<0.000000e+00> : vector<64x129xf32>
    %17 = tpu.matmul %15, %1, %cst_3 {dimension_numbers = #tpu.dot_dimension_numbers<[1], [0], [0], [1], [0, 0, 1, 1], [], []>} : vector<64x115xf32>, vector<115x129xf32>, vector<64x129xf32> -> vector<64x129xf32>
    %cst_4 = arith.constant 0.000000e+00 : f32
    %18 = vector.broadcast %cst_4 : f32 to vector<54x128xf32>
    %19 = vector.extract_strided_slice %16 {offsets = [0, 0], sizes = [54, 129], strides = [1, 1]} : vector<64x129xf32> to vector<54x129xf32>
    %20 = arith.truncf %19 : vector<54x129xf32> to vector<54x129xbf16>
    %c0_5 = arith.constant 0 : index
    %c0_6 = arith.constant 0 : index
    %c0_7 = arith.constant 0 : index
    %21 = vector.load %arg2[%c0_5, %c0_6, %c0_7] : memref<11x129x128xbf16, #tpu.memory_space<vmem>>, vector<1x129x128xbf16>
    %22 = vector.shape_cast %21 : vector<1x129x128xbf16> to vector<129x128xbf16>
    %cst_8 = arith.constant dense<0.000000e+00> : vector<54x128xf32>
    %23 = tpu.matmul %20, %22, %cst_8 {dimension_numbers = #tpu.dot_dimension_numbers<[1], [0], [0], [1], [0, 0, 1, 1], [], []>} : vector<54x129xbf16>, vector<129x128xbf16>, vector<54x128xf32> -> vector<54x128xf32>
    %24 = arith.addf %18, %23 : vector<54x128xf32>
    %25 = vector.extract_strided_slice %17 {offsets = [0, 0], sizes = [54, 129], strides = [1, 1]} : vector<64x129xf32> to vector<54x129xf32>
    %26 = arith.truncf %25 : vector<54x129xf32> to vector<54x129xbf16>
    %c1 = arith.constant 1 : index
    %c0_9 = arith.constant 0 : index
    %c0_10 = arith.constant 0 : index
    %27 = vector.load %arg2[%c1, %c0_9, %c0_10] : memref<11x129x128xbf16, #tpu.memory_space<vmem>>, vector<1x129x128xbf16>
    %28 = vector.shape_cast %27 : vector<1x129x128xbf16> to vector<129x128xbf16>
    %cst_11 = arith.constant dense<0.000000e+00> : vector<54x128xf32>
    %29 = tpu.matmul %26, %28, %cst_11 {dimension_numbers = #tpu.dot_dimension_numbers<[1], [0], [0], [1], [0, 0, 1, 1], [], []>} : vector<54x129xbf16>, vector<129x128xbf16>, vector<54x128xf32> -> vector<54x128xf32>
    %30 = arith.addf %24, %29 : vector<54x128xf32>
    %31 = vector.extract_strided_slice %16 {offsets = [1, 0], sizes = [54, 129], strides = [1, 1]} : vector<64x129xf32> to vector<54x129xf32>
    %32 = arith.truncf %31 : vector<54x129xf32> to vector<54x129xbf16>
    %c2 = arith.constant 2 : index
    %c0_12 = arith.constant 0 : index
    %c0_13 = arith.constant 0 : index
    %33 = vector.load %arg2[%c2, %c0_12, %c0_13] : memref<11x129x128xbf16, #tpu.memory_space<vmem>>, vector<1x129x128xbf16>
    %34 = vector.shape_cast %33 : vector<1x129x128xbf16> to vector<129x128xbf16>
    %cst_14 = arith.constant dense<0.000000e+00> : vector<54x128xf32>
    %35 = tpu.matmul %32, %34, %cst_14 {dimension_numbers = #tpu.dot_dimension_numbers<[1], [0], [0], [1], [0, 0, 1, 1], [], []>} : vector<54x129xbf16>, vector<129x128xbf16>, vector<54x128xf32> -> vector<54x128xf32>
    %36 = arith.addf %30, %35 : vector<54x128xf32>
    %37 = vector.extract_strided_slice %17 {offsets = [1, 0], sizes = [54, 129], strides = [1, 1]} : vector<64x129xf32> to vector<54x129xf32>
    %38 = arith.truncf %37 : vector<54x129xf32> to vector<54x129xbf16>
    %c3 = arith.constant 3 : index
    %c0_15 = arith.constant 0 : index
    %c0_16 = arith.constant 0 : index
    %39 = vector.load %arg2[%c3, %c0_15, %c0_16] : memref<11x129x128xbf16, #tpu.memory_space<vmem>>, vector<1x129x128xbf16>
    %40 = vector.shape_cast %39 : vector<1x129x128xbf16> to vector<129x128xbf16>
    %cst_17 = arith.constant dense<0.000000e+00> : vector<54x128xf32>
    %41 = tpu.matmul %38, %40, %cst_17 {dimension_numbers = #tpu.dot_dimension_numbers<[1], [0], [0], [1], [0, 0, 1, 1], [], []>} : vector<54x129xbf16>, vector<129x128xbf16>, vector<54x128xf32> -> vector<54x128xf32>
    %42 = arith.addf %36, %41 : vector<54x128xf32>
    %43 = vector.extract_strided_slice %16 {offsets = [2, 0], sizes = [54, 129], strides = [1, 1]} : vector<64x129xf32> to vector<54x129xf32>
    %44 = arith.truncf %43 : vector<54x129xf32> to vector<54x129xbf16>
    %c4 = arith.constant 4 : index
    %c0_18 = arith.constant 0 : index
    %c0_19 = arith.constant 0 : index
    %45 = vector.load %arg2[%c4, %c0_18, %c0_19] : memref<11x129x128xbf16, #tpu.memory_space<vmem>>, vector<1x129x128xbf16>
    %46 = vector.shape_cast %45 : vector<1x129x128xbf16> to vector<129x128xbf16>
    %cst_20 = arith.constant dense<0.000000e+00> : vector<54x128xf32>
    %47 = tpu.matmul %44, %46, %cst_20 {dimension_numbers = #tpu.dot_dimension_numbers<[1], [0], [0], [1], [0, 0, 1, 1], [], []>} : vector<54x129xbf16>, vector<129x128xbf16>, vector<54x128xf32> -> vector<54x128xf32>
    %48 = arith.addf %42, %47 : vector<54x128xf32>
    %49 = vector.extract_strided_slice %17 {offsets = [2, 0], sizes = [54, 129], strides = [1, 1]} : vector<64x129xf32> to vector<54x129xf32>
    %50 = arith.truncf %49 : vector<54x129xf32> to vector<54x129xbf16>
    %c5 = arith.constant 5 : index
    %c0_21 = arith.constant 0 : index
    %c0_22 = arith.constant 0 : index
    %51 = vector.load %arg2[%c5, %c0_21, %c0_22] : memref<11x129x128xbf16, #tpu.memory_space<vmem>>, vector<1x129x128xbf16>
    %52 = vector.shape_cast %51 : vector<1x129x128xbf16> to vector<129x128xbf16>
    %cst_23 = arith.constant dense<0.000000e+00> : vector<54x128xf32>
    %53 = tpu.matmul %50, %52, %cst_23 {dimension_numbers = #tpu.dot_dimension_numbers<[1], [0], [0], [1], [0, 0, 1, 1], [], []>} : vector<54x129xbf16>, vector<129x128xbf16>, vector<54x128xf32> -> vector<54x128xf32>
    %54 = arith.addf %48, %53 : vector<54x128xf32>
    %55 = vector.extract_strided_slice %16 {offsets = [3, 0], sizes = [54, 129], strides = [1, 1]} : vector<64x129xf32> to vector<54x129xf32>
    %56 = arith.truncf %55 : vector<54x129xf32> to vector<54x129xbf16>
    %c6 = arith.constant 6 : index
    %c0_24 = arith.constant 0 : index
    %c0_25 = arith.constant 0 : index
    %57 = vector.load %arg2[%c6, %c0_24, %c0_25] : memref<11x129x128xbf16, #tpu.memory_space<vmem>>, vector<1x129x128xbf16>
    %58 = vector.shape_cast %57 : vector<1x129x128xbf16> to vector<129x128xbf16>
    %cst_26 = arith.constant dense<0.000000e+00> : vector<54x128xf32>
    %59 = tpu.matmul %56, %58, %cst_26 {dimension_numbers = #tpu.dot_dimension_numbers<[1], [0], [0], [1], [0, 0, 1, 1], [], []>} : vector<54x129xbf16>, vector<129x128xbf16>, vector<54x128xf32> -> vector<54x128xf32>
    %60 = arith.addf %54, %59 : vector<54x128xf32>
    %61 = vector.extract_strided_slice %17 {offsets = [3, 0], sizes = [54, 129], strides = [1, 1]} : vector<64x129xf32> to vector<54x129xf32>
    %62 = arith.truncf %61 : vector<54x129xf32> to vector<54x129xbf16>
    %c7 = arith.constant 7 : index
    %c0_27 = arith.constant 0 : index
    %c0_28 = arith.constant 0 : index
    %63 = vector.load %arg2[%c7, %c0_27, %c0_28] : memref<11x129x128xbf16, #tpu.memory_space<vmem>>, vector<1x129x128xbf16>
    %64 = vector.shape_cast %63 : vector<1x129x128xbf16> to vector<129x128xbf16>
    %cst_29 = arith.constant dense<0.000000e+00> : vector<54x128xf32>
    %65 = tpu.matmul %62, %64, %cst_29 {dimension_numbers = #tpu.dot_dimension_numbers<[1], [0], [0], [1], [0, 0, 1, 1], [], []>} : vector<54x129xbf16>, vector<129x128xbf16>, vector<54x128xf32> -> vector<54x128xf32>
    %66 = arith.addf %60, %65 : vector<54x128xf32>
    %67 = vector.extract_strided_slice %16 {offsets = [4, 0], sizes = [54, 129], strides = [1, 1]} : vector<64x129xf32> to vector<54x129xf32>
    %68 = arith.truncf %67 : vector<54x129xf32> to vector<54x129xbf16>
    %c8 = arith.constant 8 : index
    %c0_30 = arith.constant 0 : index
    %c0_31 = arith.constant 0 : index
    %69 = vector.load %arg2[%c8, %c0_30, %c0_31] : memref<11x129x128xbf16, #tpu.memory_space<vmem>>, vector<1x129x128xbf16>
    %70 = vector.shape_cast %69 : vector<1x129x128xbf16> to vector<129x128xbf16>
    %cst_32 = arith.constant dense<0.000000e+00> : vector<54x128xf32>
    %71 = tpu.matmul %68, %70, %cst_32 {dimension_numbers = #tpu.dot_dimension_numbers<[1], [0], [0], [1], [0, 0, 1, 1], [], []>} : vector<54x129xbf16>, vector<129x128xbf16>, vector<54x128xf32> -> vector<54x128xf32>
    %72 = arith.addf %66, %71 : vector<54x128xf32>
    %73 = vector.extract_strided_slice %17 {offsets = [4, 0], sizes = [54, 129], strides = [1, 1]} : vector<64x129xf32> to vector<54x129xf32>
    %74 = arith.truncf %73 : vector<54x129xf32> to vector<54x129xbf16>
    %c9 = arith.constant 9 : index
    %c0_33 = arith.constant 0 : index
    %c0_34 = arith.constant 0 : index
    %75 = vector.load %arg2[%c9, %c0_33, %c0_34] : memref<11x129x128xbf16, #tpu.memory_space<vmem>>, vector<1x129x128xbf16>
    %76 = vector.shape_cast %75 : vector<1x129x128xbf16> to vector<129x128xbf16>
    %cst_35 = arith.constant dense<0.000000e+00> : vector<54x128xf32>
    %77 = tpu.matmul %74, %76, %cst_35 {dimension_numbers = #tpu.dot_dimension_numbers<[1], [0], [0], [1], [0, 0, 1, 1], [], []>} : vector<54x129xbf16>, vector<129x128xbf16>, vector<54x128xf32> -> vector<54x128xf32>
    %78 = arith.addf %72, %77 : vector<54x128xf32>
    %79 = vector.extract_strided_slice %16 {offsets = [5, 0], sizes = [54, 129], strides = [1, 1]} : vector<64x129xf32> to vector<54x129xf32>
    %80 = arith.truncf %79 : vector<54x129xf32> to vector<54x129xbf16>
    %c10 = arith.constant 10 : index
    %c0_36 = arith.constant 0 : index
    %c0_37 = arith.constant 0 : index
    %81 = vector.load %arg2[%c10, %c0_36, %c0_37] : memref<11x129x128xbf16, #tpu.memory_space<vmem>>, vector<1x129x128xbf16>
    %82 = vector.shape_cast %81 : vector<1x129x128xbf16> to vector<129x128xbf16>
    %cst_38 = arith.constant dense<0.000000e+00> : vector<54x128xf32>
    %83 = tpu.matmul %80, %82, %cst_38 {dimension_numbers = #tpu.dot_dimension_numbers<[1], [0], [0], [1], [0, 0, 1, 1], [], []>} : vector<54x129xbf16>, vector<129x128xbf16>, vector<54x128xf32> -> vector<54x128xf32>
    %84 = arith.addf %78, %83 : vector<54x128xf32>
    %c0_39 = arith.constant 0 : index
    %c0_40 = arith.constant 0 : index
    %85 = vector.load %arg3[%c0_39, %c0_40] : memref<1x128xf32, #tpu.memory_space<vmem>>, vector<1x128xf32>
    %86 = vector.broadcast %85 : vector<1x128xf32> to vector<54x128xf32>
    %87 = arith.addf %84, %86 : vector<54x128xf32>
    %cst_41 = arith.constant 0.000000e+00 : f32
    %88 = vector.broadcast %cst_41 : f32 to vector<54x128xf32>
    %89 = arith.maximumf %87, %88 : vector<54x128xf32>
    %90 = tpu.iota {dimensions = array<i32: 0>} : vector<32x54xi32>
    %91 = tpu.iota {dimensions = array<i32: 1>} : vector<32x54xi32>
    %c2_i32_42 = arith.constant 2 : i32
    %92 = vector.broadcast %c2_i32_42 : i32 to vector<32x54xi32>
    %93 = arith.muli %92, %90 : vector<32x54xi32>
    %c1_i32_43 = arith.constant 1 : i32
    %94 = vector.broadcast %c1_i32_43 : i32 to vector<32x54xi32>
    %95 = arith.subi %93, %94 : vector<32x54xi32>
    %96 = arith.cmpi eq, %91, %95 : vector<32x54xi32>
    %97 = arith.extui %96 : vector<32x54xi1> to vector<32x54xi32>
    %98 = arith.sitofp %97 : vector<32x54xi32> to vector<32x54xf32>
    %c2_i32_44 = arith.constant 2 : i32
    %99 = vector.broadcast %c2_i32_44 : i32 to vector<32x54xi32>
    %100 = arith.muli %99, %90 : vector<32x54xi32>
    %101 = arith.cmpi eq, %91, %100 : vector<32x54xi32>
    %102 = arith.extui %101 : vector<32x54xi1> to vector<32x54xi32>
    %103 = arith.sitofp %102 : vector<32x54xi32> to vector<32x54xf32>
    %cst_45 = arith.constant dense<0.000000e+00> : vector<32x128xf32>
    %104 = tpu.matmul %98, %89, %cst_45 {dimension_numbers = #tpu.dot_dimension_numbers<[1], [0], [0], [1], [0, 0, 1, 1], [], []>} : vector<32x54xf32>, vector<54x128xf32>, vector<32x128xf32> -> vector<32x128xf32>
    %cst_46 = arith.constant dense<0.000000e+00> : vector<32x128xf32>
    %105 = tpu.matmul %103, %89, %cst_46 {dimension_numbers = #tpu.dot_dimension_numbers<[1], [0], [0], [1], [0, 0, 1, 1], [], []>} : vector<32x54xf32>, vector<54x128xf32>, vector<32x128xf32> -> vector<32x128xf32>
    %cst_47 = arith.constant 0.000000e+00 : f32
    %106 = vector.broadcast %cst_47 : f32 to vector<23x128xf32>
    %107 = vector.extract_strided_slice %104 {offsets = [0, 0], sizes = [23, 128], strides = [1, 1]} : vector<32x128xf32> to vector<23x128xf32>
    %108 = arith.truncf %107 : vector<23x128xf32> to vector<23x128xbf16>
    %c0_48 = arith.constant 0 : index
    %c0_49 = arith.constant 0 : index
    %c0_50 = arith.constant 0 : index
    %109 = vector.load %arg4[%c0_48, %c0_49, %c0_50] : memref<11x128x128xbf16, #tpu.memory_space<vmem>>, vector<1x128x128xbf16>
    %110 = vector.shape_cast %109 : vector<1x128x128xbf16> to vector<128x128xbf16>
    %cst_51 = arith.constant dense<0.000000e+00> : vector<23x128xf32>
    %111 = tpu.matmul %108, %110, %cst_51 {dimension_numbers = #tpu.dot_dimension_numbers<[1], [0], [0], [1], [0, 0, 1, 1], [], []>} : vector<23x128xbf16>, vector<128x128xbf16>, vector<23x128xf32> -> vector<23x128xf32>
    %112 = arith.addf %106, %111 : vector<23x128xf32>
    %113 = vector.extract_strided_slice %105 {offsets = [0, 0], sizes = [23, 128], strides = [1, 1]} : vector<32x128xf32> to vector<23x128xf32>
    %114 = arith.truncf %113 : vector<23x128xf32> to vector<23x128xbf16>
    %c1_52 = arith.constant 1 : index
    %c0_53 = arith.constant 0 : index
    %c0_54 = arith.constant 0 : index
    %115 = vector.load %arg4[%c1_52, %c0_53, %c0_54] : memref<11x128x128xbf16, #tpu.memory_space<vmem>>, vector<1x128x128xbf16>
    %116 = vector.shape_cast %115 : vector<1x128x128xbf16> to vector<128x128xbf16>
    %cst_55 = arith.constant dense<0.000000e+00> : vector<23x128xf32>
    %117 = tpu.matmul %114, %116, %cst_55 {dimension_numbers = #tpu.dot_dimension_numbers<[1], [0], [0], [1], [0, 0, 1, 1], [], []>} : vector<23x128xbf16>, vector<128x128xbf16>, vector<23x128xf32> -> vector<23x128xf32>
    %118 = arith.addf %112, %117 : vector<23x128xf32>
    %119 = vector.extract_strided_slice %104 {offsets = [1, 0], sizes = [23, 128], strides = [1, 1]} : vector<32x128xf32> to vector<23x128xf32>
    %120 = arith.truncf %119 : vector<23x128xf32> to vector<23x128xbf16>
    %c2_56 = arith.constant 2 : index
    %c0_57 = arith.constant 0 : index
    %c0_58 = arith.constant 0 : index
    %121 = vector.load %arg4[%c2_56, %c0_57, %c0_58] : memref<11x128x128xbf16, #tpu.memory_space<vmem>>, vector<1x128x128xbf16>
    %122 = vector.shape_cast %121 : vector<1x128x128xbf16> to vector<128x128xbf16>
    %cst_59 = arith.constant dense<0.000000e+00> : vector<23x128xf32>
    %123 = tpu.matmul %120, %122, %cst_59 {dimension_numbers = #tpu.dot_dimension_numbers<[1], [0], [0], [1], [0, 0, 1, 1], [], []>} : vector<23x128xbf16>, vector<128x128xbf16>, vector<23x128xf32> -> vector<23x128xf32>
    %124 = arith.addf %118, %123 : vector<23x128xf32>
    %125 = vector.extract_strided_slice %105 {offsets = [1, 0], sizes = [23, 128], strides = [1, 1]} : vector<32x128xf32> to vector<23x128xf32>
    %126 = arith.truncf %125 : vector<23x128xf32> to vector<23x128xbf16>
    %c3_60 = arith.constant 3 : index
    %c0_61 = arith.constant 0 : index
    %c0_62 = arith.constant 0 : index
    %127 = vector.load %arg4[%c3_60, %c0_61, %c0_62] : memref<11x128x128xbf16, #tpu.memory_space<vmem>>, vector<1x128x128xbf16>
    %128 = vector.shape_cast %127 : vector<1x128x128xbf16> to vector<128x128xbf16>
    %cst_63 = arith.constant dense<0.000000e+00> : vector<23x128xf32>
    %129 = tpu.matmul %126, %128, %cst_63 {dimension_numbers = #tpu.dot_dimension_numbers<[1], [0], [0], [1], [0, 0, 1, 1], [], []>} : vector<23x128xbf16>, vector<128x128xbf16>, vector<23x128xf32> -> vector<23x128xf32>
    %130 = arith.addf %124, %129 : vector<23x128xf32>
    %131 = vector.extract_strided_slice %104 {offsets = [2, 0], sizes = [23, 128], strides = [1, 1]} : vector<32x128xf32> to vector<23x128xf32>
    %132 = arith.truncf %131 : vector<23x128xf32> to vector<23x128xbf16>
    %c4_64 = arith.constant 4 : index
    %c0_65 = arith.constant 0 : index
    %c0_66 = arith.constant 0 : index
    %133 = vector.load %arg4[%c4_64, %c0_65, %c0_66] : memref<11x128x128xbf16, #tpu.memory_space<vmem>>, vector<1x128x128xbf16>
    %134 = vector.shape_cast %133 : vector<1x128x128xbf16> to vector<128x128xbf16>
    %cst_67 = arith.constant dense<0.000000e+00> : vector<23x128xf32>
    %135 = tpu.matmul %132, %134, %cst_67 {dimension_numbers = #tpu.dot_dimension_numbers<[1], [0], [0], [1], [0, 0, 1, 1], [], []>} : vector<23x128xbf16>, vector<128x128xbf16>, vector<23x128xf32> -> vector<23x128xf32>
    %136 = arith.addf %130, %135 : vector<23x128xf32>
    %137 = vector.extract_strided_slice %105 {offsets = [2, 0], sizes = [23, 128], strides = [1, 1]} : vector<32x128xf32> to vector<23x128xf32>
    %138 = arith.truncf %137 : vector<23x128xf32> to vector<23x128xbf16>
    %c5_68 = arith.constant 5 : index
    %c0_69 = arith.constant 0 : index
    %c0_70 = arith.constant 0 : index
    %139 = vector.load %arg4[%c5_68, %c0_69, %c0_70] : memref<11x128x128xbf16, #tpu.memory_space<vmem>>, vector<1x128x128xbf16>
    %140 = vector.shape_cast %139 : vector<1x128x128xbf16> to vector<128x128xbf16>
    %cst_71 = arith.constant dense<0.000000e+00> : vector<23x128xf32>
    %141 = tpu.matmul %138, %140, %cst_71 {dimension_numbers = #tpu.dot_dimension_numbers<[1], [0], [0], [1], [0, 0, 1, 1], [], []>} : vector<23x128xbf16>, vector<128x128xbf16>, vector<23x128xf32> -> vector<23x128xf32>
    %142 = arith.addf %136, %141 : vector<23x128xf32>
    %143 = vector.extract_strided_slice %104 {offsets = [3, 0], sizes = [23, 128], strides = [1, 1]} : vector<32x128xf32> to vector<23x128xf32>
    %144 = arith.truncf %143 : vector<23x128xf32> to vector<23x128xbf16>
    %c6_72 = arith.constant 6 : index
    %c0_73 = arith.constant 0 : index
    %c0_74 = arith.constant 0 : index
    %145 = vector.load %arg4[%c6_72, %c0_73, %c0_74] : memref<11x128x128xbf16, #tpu.memory_space<vmem>>, vector<1x128x128xbf16>
    %146 = vector.shape_cast %145 : vector<1x128x128xbf16> to vector<128x128xbf16>
    %cst_75 = arith.constant dense<0.000000e+00> : vector<23x128xf32>
    %147 = tpu.matmul %144, %146, %cst_75 {dimension_numbers = #tpu.dot_dimension_numbers<[1], [0], [0], [1], [0, 0, 1, 1], [], []>} : vector<23x128xbf16>, vector<128x128xbf16>, vector<23x128xf32> -> vector<23x128xf32>
    %148 = arith.addf %142, %147 : vector<23x128xf32>
    %149 = vector.extract_strided_slice %105 {offsets = [3, 0], sizes = [23, 128], strides = [1, 1]} : vector<32x128xf32> to vector<23x128xf32>
    %150 = arith.truncf %149 : vector<23x128xf32> to vector<23x128xbf16>
    %c7_76 = arith.constant 7 : index
    %c0_77 = arith.constant 0 : index
    %c0_78 = arith.constant 0 : index
    %151 = vector.load %arg4[%c7_76, %c0_77, %c0_78] : memref<11x128x128xbf16, #tpu.memory_space<vmem>>, vector<1x128x128xbf16>
    %152 = vector.shape_cast %151 : vector<1x128x128xbf16> to vector<128x128xbf16>
    %cst_79 = arith.constant dense<0.000000e+00> : vector<23x128xf32>
    %153 = tpu.matmul %150, %152, %cst_79 {dimension_numbers = #tpu.dot_dimension_numbers<[1], [0], [0], [1], [0, 0, 1, 1], [], []>} : vector<23x128xbf16>, vector<128x128xbf16>, vector<23x128xf32> -> vector<23x128xf32>
    %154 = arith.addf %148, %153 : vector<23x128xf32>
    %155 = vector.extract_strided_slice %104 {offsets = [4, 0], sizes = [23, 128], strides = [1, 1]} : vector<32x128xf32> to vector<23x128xf32>
    %156 = arith.truncf %155 : vector<23x128xf32> to vector<23x128xbf16>
    %c8_80 = arith.constant 8 : index
    %c0_81 = arith.constant 0 : index
    %c0_82 = arith.constant 0 : index
    %157 = vector.load %arg4[%c8_80, %c0_81, %c0_82] : memref<11x128x128xbf16, #tpu.memory_space<vmem>>, vector<1x128x128xbf16>
    %158 = vector.shape_cast %157 : vector<1x128x128xbf16> to vector<128x128xbf16>
    %cst_83 = arith.constant dense<0.000000e+00> : vector<23x128xf32>
    %159 = tpu.matmul %156, %158, %cst_83 {dimension_numbers = #tpu.dot_dimension_numbers<[1], [0], [0], [1], [0, 0, 1, 1], [], []>} : vector<23x128xbf16>, vector<128x128xbf16>, vector<23x128xf32> -> vector<23x128xf32>
    %160 = arith.addf %154, %159 : vector<23x128xf32>
    %161 = vector.extract_strided_slice %105 {offsets = [4, 0], sizes = [23, 128], strides = [1, 1]} : vector<32x128xf32> to vector<23x128xf32>
    %162 = arith.truncf %161 : vector<23x128xf32> to vector<23x128xbf16>
    %c9_84 = arith.constant 9 : index
    %c0_85 = arith.constant 0 : index
    %c0_86 = arith.constant 0 : index
    %163 = vector.load %arg4[%c9_84, %c0_85, %c0_86] : memref<11x128x128xbf16, #tpu.memory_space<vmem>>, vector<1x128x128xbf16>
    %164 = vector.shape_cast %163 : vector<1x128x128xbf16> to vector<128x128xbf16>
    %cst_87 = arith.constant dense<0.000000e+00> : vector<23x128xf32>
    %165 = tpu.matmul %162, %164, %cst_87 {dimension_numbers = #tpu.dot_dimension_numbers<[1], [0], [0], [1], [0, 0, 1, 1], [], []>} : vector<23x128xbf16>, vector<128x128xbf16>, vector<23x128xf32> -> vector<23x128xf32>
    %166 = arith.addf %160, %165 : vector<23x128xf32>
    %167 = vector.extract_strided_slice %104 {offsets = [5, 0], sizes = [23, 128], strides = [1, 1]} : vector<32x128xf32> to vector<23x128xf32>
    %168 = arith.truncf %167 : vector<23x128xf32> to vector<23x128xbf16>
    %c10_88 = arith.constant 10 : index
    %c0_89 = arith.constant 0 : index
    %c0_90 = arith.constant 0 : index
    %169 = vector.load %arg4[%c10_88, %c0_89, %c0_90] : memref<11x128x128xbf16, #tpu.memory_space<vmem>>, vector<1x128x128xbf16>
    %170 = vector.shape_cast %169 : vector<1x128x128xbf16> to vector<128x128xbf16>
    %cst_91 = arith.constant dense<0.000000e+00> : vector<23x128xf32>
    %171 = tpu.matmul %168, %170, %cst_91 {dimension_numbers = #tpu.dot_dimension_numbers<[1], [0], [0], [1], [0, 0, 1, 1], [], []>} : vector<23x128xbf16>, vector<128x128xbf16>, vector<23x128xf32> -> vector<23x128xf32>
    %172 = arith.addf %166, %171 : vector<23x128xf32>
    %c0_92 = arith.constant 0 : index
    %c0_93 = arith.constant 0 : index
    %173 = vector.load %arg5[%c0_92, %c0_93] : memref<1x128xf32, #tpu.memory_space<vmem>>, vector<1x128xf32>
    %174 = vector.broadcast %173 : vector<1x128xf32> to vector<23x128xf32>
    %175 = arith.addf %172, %174 : vector<23x128xf32>
    %cst_94 = arith.constant 0.000000e+00 : f32
    %176 = vector.broadcast %cst_94 : f32 to vector<23x128xf32>
    %177 = arith.maximumf %175, %176 : vector<23x128xf32>
    %178 = tpu.iota {dimensions = array<i32: 0>} : vector<16x23xi32>
    %179 = tpu.iota {dimensions = array<i32: 1>} : vector<16x23xi32>
    %c2_i32_95 = arith.constant 2 : i32
    %180 = vector.broadcast %c2_i32_95 : i32 to vector<16x23xi32>
    %181 = arith.muli %180, %178 : vector<16x23xi32>
    %c1_i32_96 = arith.constant 1 : i32
    %182 = vector.broadcast %c1_i32_96 : i32 to vector<16x23xi32>
    %183 = arith.subi %181, %182 : vector<16x23xi32>
    %184 = arith.cmpi eq, %179, %183 : vector<16x23xi32>
    %185 = arith.extui %184 : vector<16x23xi1> to vector<16x23xi32>
    %186 = arith.sitofp %185 : vector<16x23xi32> to vector<16x23xf32>
    %c2_i32_97 = arith.constant 2 : i32
    %187 = vector.broadcast %c2_i32_97 : i32 to vector<16x23xi32>
    %188 = arith.muli %187, %178 : vector<16x23xi32>
    %189 = arith.cmpi eq, %179, %188 : vector<16x23xi32>
    %190 = arith.extui %189 : vector<16x23xi1> to vector<16x23xi32>
    %191 = arith.sitofp %190 : vector<16x23xi32> to vector<16x23xf32>
    %cst_98 = arith.constant dense<0.000000e+00> : vector<16x128xf32>
    %192 = tpu.matmul %186, %177, %cst_98 {dimension_numbers = #tpu.dot_dimension_numbers<[1], [0], [0], [1], [0, 0, 1, 1], [], []>} : vector<16x23xf32>, vector<23x128xf32>, vector<16x128xf32> -> vector<16x128xf32>
    %cst_99 = arith.constant dense<0.000000e+00> : vector<16x128xf32>
    %193 = tpu.matmul %191, %177, %cst_99 {dimension_numbers = #tpu.dot_dimension_numbers<[1], [0], [0], [1], [0, 0, 1, 1], [], []>} : vector<16x23xf32>, vector<23x128xf32>, vector<16x128xf32> -> vector<16x128xf32>
    %cst_100 = arith.constant 0.000000e+00 : f32
    %194 = vector.broadcast %cst_100 : f32 to vector<8x128xf32>
    %195 = vector.extract_strided_slice %192 {offsets = [0, 0], sizes = [8, 128], strides = [1, 1]} : vector<16x128xf32> to vector<8x128xf32>
    %196 = arith.truncf %195 : vector<8x128xf32> to vector<8x128xbf16>
    %c0_101 = arith.constant 0 : index
    %c0_102 = arith.constant 0 : index
    %c0_103 = arith.constant 0 : index
    %197 = vector.load %arg6[%c0_101, %c0_102, %c0_103] : memref<11x128x128xbf16, #tpu.memory_space<vmem>>, vector<1x128x128xbf16>
    %198 = vector.shape_cast %197 : vector<1x128x128xbf16> to vector<128x128xbf16>
    %cst_104 = arith.constant dense<0.000000e+00> : vector<8x128xf32>
    %199 = tpu.matmul %196, %198, %cst_104 {dimension_numbers = #tpu.dot_dimension_numbers<[1], [0], [0], [1], [0, 0, 1, 1], [], []>} : vector<8x128xbf16>, vector<128x128xbf16>, vector<8x128xf32> -> vector<8x128xf32>
    %200 = arith.addf %194, %199 : vector<8x128xf32>
    %201 = vector.extract_strided_slice %193 {offsets = [0, 0], sizes = [8, 128], strides = [1, 1]} : vector<16x128xf32> to vector<8x128xf32>
    %202 = arith.truncf %201 : vector<8x128xf32> to vector<8x128xbf16>
    %c1_105 = arith.constant 1 : index
    %c0_106 = arith.constant 0 : index
    %c0_107 = arith.constant 0 : index
    %203 = vector.load %arg6[%c1_105, %c0_106, %c0_107] : memref<11x128x128xbf16, #tpu.memory_space<vmem>>, vector<1x128x128xbf16>
    %204 = vector.shape_cast %203 : vector<1x128x128xbf16> to vector<128x128xbf16>
    %cst_108 = arith.constant dense<0.000000e+00> : vector<8x128xf32>
    %205 = tpu.matmul %202, %204, %cst_108 {dimension_numbers = #tpu.dot_dimension_numbers<[1], [0], [0], [1], [0, 0, 1, 1], [], []>} : vector<8x128xbf16>, vector<128x128xbf16>, vector<8x128xf32> -> vector<8x128xf32>
    %206 = arith.addf %200, %205 : vector<8x128xf32>
    %207 = vector.extract_strided_slice %192 {offsets = [1, 0], sizes = [8, 128], strides = [1, 1]} : vector<16x128xf32> to vector<8x128xf32>
    %208 = arith.truncf %207 : vector<8x128xf32> to vector<8x128xbf16>
    %c2_109 = arith.constant 2 : index
    %c0_110 = arith.constant 0 : index
    %c0_111 = arith.constant 0 : index
    %209 = vector.load %arg6[%c2_109, %c0_110, %c0_111] : memref<11x128x128xbf16, #tpu.memory_space<vmem>>, vector<1x128x128xbf16>
    %210 = vector.shape_cast %209 : vector<1x128x128xbf16> to vector<128x128xbf16>
    %cst_112 = arith.constant dense<0.000000e+00> : vector<8x128xf32>
    %211 = tpu.matmul %208, %210, %cst_112 {dimension_numbers = #tpu.dot_dimension_numbers<[1], [0], [0], [1], [0, 0, 1, 1], [], []>} : vector<8x128xbf16>, vector<128x128xbf16>, vector<8x128xf32> -> vector<8x128xf32>
    %212 = arith.addf %206, %211 : vector<8x128xf32>
    %213 = vector.extract_strided_slice %193 {offsets = [1, 0], sizes = [8, 128], strides = [1, 1]} : vector<16x128xf32> to vector<8x128xf32>
    %214 = arith.truncf %213 : vector<8x128xf32> to vector<8x128xbf16>
    %c3_113 = arith.constant 3 : index
    %c0_114 = arith.constant 0 : index
    %c0_115 = arith.constant 0 : index
    %215 = vector.load %arg6[%c3_113, %c0_114, %c0_115] : memref<11x128x128xbf16, #tpu.memory_space<vmem>>, vector<1x128x128xbf16>
    %216 = vector.shape_cast %215 : vector<1x128x128xbf16> to vector<128x128xbf16>
    %cst_116 = arith.constant dense<0.000000e+00> : vector<8x128xf32>
    %217 = tpu.matmul %214, %216, %cst_116 {dimension_numbers = #tpu.dot_dimension_numbers<[1], [0], [0], [1], [0, 0, 1, 1], [], []>} : vector<8x128xbf16>, vector<128x128xbf16>, vector<8x128xf32> -> vector<8x128xf32>
    %218 = arith.addf %212, %217 : vector<8x128xf32>
    %219 = vector.extract_strided_slice %192 {offsets = [2, 0], sizes = [8, 128], strides = [1, 1]} : vector<16x128xf32> to vector<8x128xf32>
    %220 = arith.truncf %219 : vector<8x128xf32> to vector<8x128xbf16>
    %c4_117 = arith.constant 4 : index
    %c0_118 = arith.constant 0 : index
    %c0_119 = arith.constant 0 : index
    %221 = vector.load %arg6[%c4_117, %c0_118, %c0_119] : memref<11x128x128xbf16, #tpu.memory_space<vmem>>, vector<1x128x128xbf16>
    %222 = vector.shape_cast %221 : vector<1x128x128xbf16> to vector<128x128xbf16>
    %cst_120 = arith.constant dense<0.000000e+00> : vector<8x128xf32>
    %223 = tpu.matmul %220, %222, %cst_120 {dimension_numbers = #tpu.dot_dimension_numbers<[1], [0], [0], [1], [0, 0, 1, 1], [], []>} : vector<8x128xbf16>, vector<128x128xbf16>, vector<8x128xf32> -> vector<8x128xf32>
    %224 = arith.addf %218, %223 : vector<8x128xf32>
    %225 = vector.extract_strided_slice %193 {offsets = [2, 0], sizes = [8, 128], strides = [1, 1]} : vector<16x128xf32> to vector<8x128xf32>
    %226 = arith.truncf %225 : vector<8x128xf32> to vector<8x128xbf16>
    %c5_121 = arith.constant 5 : index
    %c0_122 = arith.constant 0 : index
    %c0_123 = arith.constant 0 : index
    %227 = vector.load %arg6[%c5_121, %c0_122, %c0_123] : memref<11x128x128xbf16, #tpu.memory_space<vmem>>, vector<1x128x128xbf16>
    %228 = vector.shape_cast %227 : vector<1x128x128xbf16> to vector<128x128xbf16>
    %cst_124 = arith.constant dense<0.000000e+00> : vector<8x128xf32>
    %229 = tpu.matmul %226, %228, %cst_124 {dimension_numbers = #tpu.dot_dimension_numbers<[1], [0], [0], [1], [0, 0, 1, 1], [], []>} : vector<8x128xbf16>, vector<128x128xbf16>, vector<8x128xf32> -> vector<8x128xf32>
    %230 = arith.addf %224, %229 : vector<8x128xf32>
    %231 = vector.extract_strided_slice %192 {offsets = [3, 0], sizes = [8, 128], strides = [1, 1]} : vector<16x128xf32> to vector<8x128xf32>
    %232 = arith.truncf %231 : vector<8x128xf32> to vector<8x128xbf16>
    %c6_125 = arith.constant 6 : index
    %c0_126 = arith.constant 0 : index
    %c0_127 = arith.constant 0 : index
    %233 = vector.load %arg6[%c6_125, %c0_126, %c0_127] : memref<11x128x128xbf16, #tpu.memory_space<vmem>>, vector<1x128x128xbf16>
    %234 = vector.shape_cast %233 : vector<1x128x128xbf16> to vector<128x128xbf16>
    %cst_128 = arith.constant dense<0.000000e+00> : vector<8x128xf32>
    %235 = tpu.matmul %232, %234, %cst_128 {dimension_numbers = #tpu.dot_dimension_numbers<[1], [0], [0], [1], [0, 0, 1, 1], [], []>} : vector<8x128xbf16>, vector<128x128xbf16>, vector<8x128xf32> -> vector<8x128xf32>
    %236 = arith.addf %230, %235 : vector<8x128xf32>
    %237 = vector.extract_strided_slice %193 {offsets = [3, 0], sizes = [8, 128], strides = [1, 1]} : vector<16x128xf32> to vector<8x128xf32>
    %238 = arith.truncf %237 : vector<8x128xf32> to vector<8x128xbf16>
    %c7_129 = arith.constant 7 : index
    %c0_130 = arith.constant 0 : index
    %c0_131 = arith.constant 0 : index
    %239 = vector.load %arg6[%c7_129, %c0_130, %c0_131] : memref<11x128x128xbf16, #tpu.memory_space<vmem>>, vector<1x128x128xbf16>
    %240 = vector.shape_cast %239 : vector<1x128x128xbf16> to vector<128x128xbf16>
    %cst_132 = arith.constant dense<0.000000e+00> : vector<8x128xf32>
    %241 = tpu.matmul %238, %240, %cst_132 {dimension_numbers = #tpu.dot_dimension_numbers<[1], [0], [0], [1], [0, 0, 1, 1], [], []>} : vector<8x128xbf16>, vector<128x128xbf16>, vector<8x128xf32> -> vector<8x128xf32>
    %242 = arith.addf %236, %241 : vector<8x128xf32>
    %243 = vector.extract_strided_slice %192 {offsets = [4, 0], sizes = [8, 128], strides = [1, 1]} : vector<16x128xf32> to vector<8x128xf32>
    %244 = arith.truncf %243 : vector<8x128xf32> to vector<8x128xbf16>
    %c8_133 = arith.constant 8 : index
    %c0_134 = arith.constant 0 : index
    %c0_135 = arith.constant 0 : index
    %245 = vector.load %arg6[%c8_133, %c0_134, %c0_135] : memref<11x128x128xbf16, #tpu.memory_space<vmem>>, vector<1x128x128xbf16>
    %246 = vector.shape_cast %245 : vector<1x128x128xbf16> to vector<128x128xbf16>
    %cst_136 = arith.constant dense<0.000000e+00> : vector<8x128xf32>
    %247 = tpu.matmul %244, %246, %cst_136 {dimension_numbers = #tpu.dot_dimension_numbers<[1], [0], [0], [1], [0, 0, 1, 1], [], []>} : vector<8x128xbf16>, vector<128x128xbf16>, vector<8x128xf32> -> vector<8x128xf32>
    %248 = arith.addf %242, %247 : vector<8x128xf32>
    %249 = vector.extract_strided_slice %193 {offsets = [4, 0], sizes = [8, 128], strides = [1, 1]} : vector<16x128xf32> to vector<8x128xf32>
    %250 = arith.truncf %249 : vector<8x128xf32> to vector<8x128xbf16>
    %c9_137 = arith.constant 9 : index
    %c0_138 = arith.constant 0 : index
    %c0_139 = arith.constant 0 : index
    %251 = vector.load %arg6[%c9_137, %c0_138, %c0_139] : memref<11x128x128xbf16, #tpu.memory_space<vmem>>, vector<1x128x128xbf16>
    %252 = vector.shape_cast %251 : vector<1x128x128xbf16> to vector<128x128xbf16>
    %cst_140 = arith.constant dense<0.000000e+00> : vector<8x128xf32>
    %253 = tpu.matmul %250, %252, %cst_140 {dimension_numbers = #tpu.dot_dimension_numbers<[1], [0], [0], [1], [0, 0, 1, 1], [], []>} : vector<8x128xbf16>, vector<128x128xbf16>, vector<8x128xf32> -> vector<8x128xf32>
    %254 = arith.addf %248, %253 : vector<8x128xf32>
    %255 = vector.extract_strided_slice %192 {offsets = [5, 0], sizes = [8, 128], strides = [1, 1]} : vector<16x128xf32> to vector<8x128xf32>
    %256 = arith.truncf %255 : vector<8x128xf32> to vector<8x128xbf16>
    %c10_141 = arith.constant 10 : index
    %c0_142 = arith.constant 0 : index
    %c0_143 = arith.constant 0 : index
    %257 = vector.load %arg6[%c10_141, %c0_142, %c0_143] : memref<11x128x128xbf16, #tpu.memory_space<vmem>>, vector<1x128x128xbf16>
    %258 = vector.shape_cast %257 : vector<1x128x128xbf16> to vector<128x128xbf16>
    %cst_144 = arith.constant dense<0.000000e+00> : vector<8x128xf32>
    %259 = tpu.matmul %256, %258, %cst_144 {dimension_numbers = #tpu.dot_dimension_numbers<[1], [0], [0], [1], [0, 0, 1, 1], [], []>} : vector<8x128xbf16>, vector<128x128xbf16>, vector<8x128xf32> -> vector<8x128xf32>
    %260 = arith.addf %254, %259 : vector<8x128xf32>
    %c0_145 = arith.constant 0 : index
    %c0_146 = arith.constant 0 : index
    %261 = vector.load %arg7[%c0_145, %c0_146] : memref<1x128xf32, #tpu.memory_space<vmem>>, vector<1x128xf32>
    %262 = vector.broadcast %261 : vector<1x128xf32> to vector<8x128xf32>
    %263 = arith.addf %260, %262 : vector<8x128xf32>
    %cst_147 = arith.constant 0.000000e+00 : f32
    %264 = vector.broadcast %cst_147 : f32 to vector<8x128xf32>
    %265 = arith.maximumf %263, %264 : vector<8x128xf32>
    %c0_148 = arith.constant 0 : index
    %c0_149 = arith.constant 0 : index
    %c0_150 = arith.constant 0 : index
    %266 = vector.load %arg8[%c0_148, %c0_149, %c0_150] : memref<1x8x128xf32, #tpu.memory_space<vmem>>, vector<1x8x128xf32>
    %267 = vector.shape_cast %266 : vector<1x8x128xf32> to vector<8x128xf32>
    %268 = vector.shape_cast %265 : vector<8x128xf32> to vector<1x8x128xf32>
    tpu.vector_store %arg8[%c0_148, %c0_149, %c0_150], %268 {strides = array<i32>} : memref<1x8x128xf32, #tpu.memory_space<vmem>>, vector<1x8x128xf32>,
    return
  }
  func.func @transform_0(%arg0: i32) -> (i32, i32, i32) {
    %c0_i32 = arith.constant 0 : i32
    %c0_i32_0 = arith.constant 0 : i32
    %c0_i32_1 = arith.constant 0 : i32
    return %arg0, %c0_i32, %c0_i32_0 : i32, i32, i32
  }
  func.func @transform_1(%arg0: i32) -> (i32, i32, i32) {
    %c0_i32 = arith.constant 0 : i32
    %c0_i32_0 = arith.constant 0 : i32
    %c0_i32_1 = arith.constant 0 : i32
    %c0_i32_2 = arith.constant 0 : i32
    return %c0_i32, %c0_i32_0, %c0_i32_1 : i32, i32, i32
  }
  func.func @transform_2(%arg0: i32) -> (i32, i32) {
    %c0_i32 = arith.constant 0 : i32
    %c0_i32_0 = arith.constant 0 : i32
    %c0_i32_1 = arith.constant 0 : i32
    return %c0_i32, %c0_i32_0 : i32, i32
  }
  func.func @transform_3(%arg0: i32) -> (i32, i32, i32) {
    %c0_i32 = arith.constant 0 : i32
    %c0_i32_0 = arith.constant 0 : i32
    %c0_i32_1 = arith.constant 0 : i32
    %c0_i32_2 = arith.constant 0 : i32
    return %c0_i32, %c0_i32_0, %c0_i32_1 : i32, i32, i32
  }
  func.func @transform_4(%arg0: i32) -> (i32, i32) {
    %c0_i32 = arith.constant 0 : i32
    %c0_i32_0 = arith.constant 0 : i32
    %c0_i32_1 = arith.constant 0 : i32
    return %c0_i32, %c0_i32_0 : i32, i32
  }
  func.func @transform_5(%arg0: i32) -> (i32, i32, i32) {
    %c0_i32 = arith.constant 0 : i32
    %c0_i32_0 = arith.constant 0 : i32
    %c0_i32_1 = arith.constant 0 : i32
    %c0_i32_2 = arith.constant 0 : i32
    return %c0_i32, %c0_i32_0, %c0_i32_1 : i32, i32, i32
  }
  func.func @transform_6(%arg0: i32) -> (i32, i32) {
    %c0_i32 = arith.constant 0 : i32
    %c0_i32_0 = arith.constant 0 : i32
    %c0_i32_1 = arith.constant 0 : i32
    return %c0_i32, %c0_i32_0 : i32, i32
  }
  func.func @transform_7(%arg0: i32) -> (i32, i32, i32) {
    %c0_i32 = arith.constant 0 : i32
    %c0_i32_0 = arith.constant 0 : i32
    %c0_i32_1 = arith.constant 0 : i32
    return %arg0, %c0_i32, %c0_i32_0 : i32, i32, i32
  }
}

module attributes {stable_mosaic.version = 11 : i64} {
  func.func @_encoder_stack_kernel(%arg0: i32, %arg1: memref<16x128xf32, #tpu.memory_space<vmem>>, %arg2: memref<1x128x1536xbf16, #tpu.memory_space<vmem>>, %arg3: memref<1x1x1536xf32, #tpu.memory_space<vmem>>, %arg4: memref<1x512x128xbf16, #tpu.memory_space<vmem>>, %arg5: memref<1x1x128xf32, #tpu.memory_space<vmem>>, %arg6: memref<1x128x128xbf16, #tpu.memory_space<vmem>>, %arg7: memref<1x1x128xf32, #tpu.memory_space<vmem>>, %arg8: memref<1x128x128xbf16, #tpu.memory_space<vmem>>, %arg9: memref<1x1x128xf32, #tpu.memory_space<vmem>>, %arg10: memref<1x1x128xf32, #tpu.memory_space<vmem>>, %arg11: memref<1x1x128xf32, #tpu.memory_space<vmem>>, %arg12: memref<1x1x128xf32, #tpu.memory_space<vmem>>, %arg13: memref<1x1x128xf32, #tpu.memory_space<vmem>>, %arg14: memref<1x128xf32, #tpu.memory_space<vmem>>, %arg15: memref<1x128xf32, #tpu.memory_space<vmem>>, %arg16: memref<16x128xf32, #tpu.memory_space<vmem>>, %arg17: memref<16x128xf32, #tpu.memory_space<vmem>>, %arg18: memref<16x512xf32, #tpu.memory_space<vmem>>) attributes {dimension_semantics = [#tpu.dimension_semantics<arbitrary>], iteration_bounds = array<i64: 2>, scalar_prefetch = 0 : i64, scratch_operands = 2 : i64, tpu.core_type = #tpu.core_type<tc>, window_params = [{pipeline_mode = #tpu.pipeline_mode<synchronous>, transform_indices = @transform_0, window_bounds = array<i64: 16, 128>}, {transform_indices = @transform_1, window_bounds = array<i64: 1, 128, 1536>}, {transform_indices = @transform_2, window_bounds = array<i64: 1, 1, 1536>}, {transform_indices = @transform_3, window_bounds = array<i64: 1, 512, 128>}, {transform_indices = @transform_4, window_bounds = array<i64: 1, 1, 128>}, {transform_indices = @transform_5, window_bounds = array<i64: 1, 128, 128>}, {transform_indices = @transform_6, window_bounds = array<i64: 1, 1, 128>}, {transform_indices = @transform_7, window_bounds = array<i64: 1, 128, 128>}, {transform_indices = @transform_8, window_bounds = array<i64: 1, 1, 128>}, {transform_indices = @transform_9, window_bounds = array<i64: 1, 1, 128>}, {transform_indices = @transform_10, window_bounds = array<i64: 1, 1, 128>}, {transform_indices = @transform_11, window_bounds = array<i64: 1, 1, 128>}, {transform_indices = @transform_12, window_bounds = array<i64: 1, 1, 128>}, {pipeline_mode = #tpu.pipeline_mode<synchronous>, transform_indices = @transform_13, window_bounds = array<i64: 1, 128>}, {pipeline_mode = #tpu.pipeline_mode<synchronous>, transform_indices = @transform_14, window_bounds = array<i64: 1, 128>}, {pipeline_mode = #tpu.pipeline_mode<synchronous>, transform_indices = @transform_15, window_bounds = array<i64: 16, 128>}]} {
    %c0_i32 = arith.constant 0 : i32
    %0 = arith.cmpi eq, %arg0, %c0_i32 : i32
    %1 = arith.extui %0 : i1 to i32
    %c0_i32_0 = arith.constant 0 : i32
    %2 = arith.cmpi ne, %1, %c0_i32_0 : i32
    scf.if %2 {
      %c0_103 = arith.constant 0 : index
      %c0_104 = arith.constant 0 : index
      %264 = vector.load %arg1[%c0_103, %c0_104] : memref<16x128xf32, #tpu.memory_space<vmem>>, vector<16x128xf32>
      %c0_105 = arith.constant 0 : index
      %c0_106 = arith.constant 0 : index
      %265 = vector.load %arg17[%c0_105, %c0_106] : memref<16x128xf32, #tpu.memory_space<vmem>>, vector<16x128xf32>
      tpu.vector_store %arg17[%c0_105, %c0_106], %264 {strides = array<i32>} : memref<16x128xf32, #tpu.memory_space<vmem>>, vector<16x128xf32>,
    } else {
    }
    %c0 = arith.constant 0 : index
    %c0_1 = arith.constant 0 : index
    %3 = vector.load %arg17[%c0, %c0_1] : memref<16x128xf32, #tpu.memory_space<vmem>>, vector<16x128xf32>
    %c0_2 = arith.constant 0 : index
    %c0_3 = arith.constant 0 : index
    %c0_4 = arith.constant 0 : index
    %4 = vector.load %arg10[%c0_2, %c0_3, %c0_4] : memref<1x1x128xf32, #tpu.memory_space<vmem>>, vector<1x1x128xf32>
    %5 = vector.shape_cast %4 : vector<1x1x128xf32> to vector<1x128xf32>
    %c0_5 = arith.constant 0 : index
    %c0_6 = arith.constant 0 : index
    %c0_7 = arith.constant 0 : index
    %6 = vector.load %arg11[%c0_5, %c0_6, %c0_7] : memref<1x1x128xf32, #tpu.memory_space<vmem>>, vector<1x1x128xf32>
    %7 = vector.shape_cast %6 : vector<1x1x128xf32> to vector<1x128xf32>
    %cst = arith.constant dense<0.000000e+00> : vector<16xf32>
    %8 = vector.multi_reduction <add>, %3, %cst [1] : vector<16x128xf32> to vector<16xf32>
    %9 = vector.shape_cast %8 : vector<16xf32> to vector<16x1xf32>
    %cst_8 = arith.constant 3.200000e+01 : f32
    %10 = vector.broadcast %cst_8 : f32 to vector<16x1xf32>
    %11 = arith.divf %9, %10 : vector<16x1xf32>
    %12 = vector.broadcast %11 : vector<16x1xf32> to vector<16x128xf32>
    %13 = arith.subf %3, %12 : vector<16x128xf32>
    %14 = arith.mulf %13, %13 : vector<16x128xf32>
    %cst_9 = arith.constant dense<0.000000e+00> : vector<16xf32>
    %15 = vector.multi_reduction <add>, %14, %cst_9 [1] : vector<16x128xf32> to vector<16xf32>
    %16 = vector.shape_cast %15 : vector<16xf32> to vector<16x1xf32>
    %17 = arith.mulf %11, %11 : vector<16x1xf32>
    %cst_10 = arith.constant 9.600000e+01 : f32
    %18 = vector.broadcast %cst_10 : f32 to vector<16x1xf32>
    %19 = arith.mulf %18, %17 : vector<16x1xf32>
    %20 = arith.subf %16, %19 : vector<16x1xf32>
    %cst_11 = arith.constant 3.200000e+01 : f32
    %21 = vector.broadcast %cst_11 : f32 to vector<16x1xf32>
    %22 = arith.divf %20, %21 : vector<16x1xf32>
    %cst_12 = arith.constant 9.99999974E-6 : f32
    %23 = vector.broadcast %cst_12 : f32 to vector<16x1xf32>
    %24 = arith.addf %22, %23 : vector<16x1xf32>
    %25 = math.rsqrt %24 : vector<16x1xf32>
    %26 = vector.broadcast %25 : vector<16x1xf32> to vector<16x128xf32>
    %27 = arith.mulf %13, %26 : vector<16x128xf32>
    %28 = vector.broadcast %5 : vector<1x128xf32> to vector<16x128xf32>
    %29 = arith.mulf %27, %28 : vector<16x128xf32>
    %30 = vector.broadcast %7 : vector<1x128xf32> to vector<16x128xf32>
    %31 = arith.addf %29, %30 : vector<16x128xf32>
    %32 = arith.truncf %31 : vector<16x128xf32> to vector<16x128xbf16>
    %c0_13 = arith.constant 0 : index
    %c0_14 = arith.constant 0 : index
    %c0_15 = arith.constant 0 : index
    %33 = vector.load %arg2[%c0_13, %c0_14, %c0_15] : memref<1x128x1536xbf16, #tpu.memory_space<vmem>>, vector<1x128x1536xbf16>
    %34 = vector.shape_cast %33 : vector<1x128x1536xbf16> to vector<128x1536xbf16>
    %cst_16 = arith.constant dense<0.000000e+00> : vector<16x1536xf32>
    %35 = tpu.matmul %32, %34, %cst_16 {dimension_numbers = #tpu.dot_dimension_numbers<[1], [0], [0], [1], [0, 0, 1, 1], [], []>} : vector<16x128xbf16>, vector<128x1536xbf16>, vector<16x1536xf32> -> vector<16x1536xf32>
    %c0_17 = arith.constant 0 : index
    %c0_18 = arith.constant 0 : index
    %c0_19 = arith.constant 0 : index
    %36 = vector.load %arg3[%c0_17, %c0_18, %c0_19] : memref<1x1x1536xf32, #tpu.memory_space<vmem>>, vector<1x1x1536xf32>
    %37 = vector.shape_cast %36 : vector<1x1x1536xf32> to vector<1x1536xf32>
    %38 = vector.broadcast %37 : vector<1x1536xf32> to vector<16x1536xf32>
    %39 = arith.addf %35, %38 : vector<16x1536xf32>
    %40 = vector.extract_strided_slice %39 {offsets = [0, 0], sizes = [16, 512], strides = [1, 1]} : vector<16x1536xf32> to vector<16x512xf32>
    %41 = vector.extract_strided_slice %39 {offsets = [0, 512], sizes = [16, 512], strides = [1, 1]} : vector<16x1536xf32> to vector<16x512xf32>
    %42 = vector.extract_strided_slice %39 {offsets = [0, 1024], sizes = [16, 512], strides = [1, 1]} : vector<16x1536xf32> to vector<16x512xf32>
    %43 = vector.extract_strided_slice %40 {offsets = [0, 0], sizes = [8, 128], strides = [1, 1]} : vector<16x512xf32> to vector<8x128xf32>
    %44 = arith.truncf %43 : vector<8x128xf32> to vector<8x128xbf16>
    %45 = vector.extract_strided_slice %41 {offsets = [0, 0], sizes = [8, 128], strides = [1, 1]} : vector<16x512xf32> to vector<8x128xf32>
    %46 = arith.truncf %45 : vector<8x128xf32> to vector<8x128xbf16>
    %47 = vector.extract_strided_slice %42 {offsets = [0, 0], sizes = [8, 128], strides = [1, 1]} : vector<16x512xf32> to vector<8x128xf32>
    %48 = arith.truncf %47 : vector<8x128xf32> to vector<8x128xbf16>
    %cst_20 = arith.constant dense<0.000000e+00> : vector<8x8xf32>
    %49 = tpu.matmul %44, %46, %cst_20 {dimension_numbers = #tpu.dot_dimension_numbers<[1], [1], [0], [0], [0, 0, 1, 0], [], []>} : vector<8x128xbf16>, vector<8x128xbf16>, vector<8x8xf32> -> vector<8x8xf32>
    %cst_21 = arith.constant dense<0xFF800000> : vector<8xf32>
    %50 = vector.multi_reduction <maximumf>, %49, %cst_21 [1] : vector<8x8xf32> to vector<8xf32>
    %51 = vector.shape_cast %50 : vector<8xf32> to vector<8x1xf32>
    %52 = vector.broadcast %51 : vector<8x1xf32> to vector<8x8xf32>
    %53 = arith.subf %49, %52 : vector<8x8xf32>
    %54 = math.exp %53 : vector<8x8xf32>
    %cst_22 = arith.constant dense<0.000000e+00> : vector<8xf32>
    %55 = vector.multi_reduction <add>, %54, %cst_22 [1] : vector<8x8xf32> to vector<8xf32>
    %56 = vector.shape_cast %55 : vector<8xf32> to vector<8x1xf32>
    %57 = tpu.reciprocal %56 {approx = true} : vector<8x1xf32> -> vector<8x1xf32>
    %58 = vector.broadcast %57 : vector<8x1xf32> to vector<8x8xf32>
    %59 = arith.mulf %54, %58 : vector<8x8xf32>
    %60 = arith.truncf %59 : vector<8x8xf32> to vector<8x8xbf16>
    %cst_23 = arith.constant dense<0.000000e+00> : vector<8x128xf32>
    %61 = tpu.matmul %60, %48, %cst_23 {dimension_numbers = #tpu.dot_dimension_numbers<[1], [0], [0], [1], [0, 0, 1, 1], [], []>} : vector<8x8xbf16>, vector<8x128xbf16>, vector<8x128xf32> -> vector<8x128xf32>
    %c0_24 = arith.constant 0 : index
    %c0_25 = arith.constant 0 : index
    %62 = vector.load %arg18[%c0_24, %c0_25] : memref<16x512xf32, #tpu.memory_space<vmem>>, vector<8x128xf32>
    tpu.vector_store %arg18[%c0_24, %c0_25], %61 {strides = array<i32>} : memref<16x512xf32, #tpu.memory_space<vmem>>, vector<8x128xf32>,
    %63 = vector.extract_strided_slice %40 {offsets = [0, 128], sizes = [8, 128], strides = [1, 1]} : vector<16x512xf32> to vector<8x128xf32>
    %64 = arith.truncf %63 : vector<8x128xf32> to vector<8x128xbf16>
    %65 = vector.extract_strided_slice %41 {offsets = [0, 128], sizes = [8, 128], strides = [1, 1]} : vector<16x512xf32> to vector<8x128xf32>
    %66 = arith.truncf %65 : vector<8x128xf32> to vector<8x128xbf16>
    %67 = vector.extract_strided_slice %42 {offsets = [0, 128], sizes = [8, 128], strides = [1, 1]} : vector<16x512xf32> to vector<8x128xf32>
    %68 = arith.truncf %67 : vector<8x128xf32> to vector<8x128xbf16>
    %cst_26 = arith.constant dense<0.000000e+00> : vector<8x8xf32>
    %69 = tpu.matmul %64, %66, %cst_26 {dimension_numbers = #tpu.dot_dimension_numbers<[1], [1], [0], [0], [0, 0, 1, 0], [], []>} : vector<8x128xbf16>, vector<8x128xbf16>, vector<8x8xf32> -> vector<8x8xf32>
    %cst_27 = arith.constant dense<0xFF800000> : vector<8xf32>
    %70 = vector.multi_reduction <maximumf>, %69, %cst_27 [1] : vector<8x8xf32> to vector<8xf32>
    %71 = vector.shape_cast %70 : vector<8xf32> to vector<8x1xf32>
    %72 = vector.broadcast %71 : vector<8x1xf32> to vector<8x8xf32>
    %73 = arith.subf %69, %72 : vector<8x8xf32>
    %74 = math.exp %73 : vector<8x8xf32>
    %cst_28 = arith.constant dense<0.000000e+00> : vector<8xf32>
    %75 = vector.multi_reduction <add>, %74, %cst_28 [1] : vector<8x8xf32> to vector<8xf32>
    %76 = vector.shape_cast %75 : vector<8xf32> to vector<8x1xf32>
    %77 = tpu.reciprocal %76 {approx = true} : vector<8x1xf32> -> vector<8x1xf32>
    %78 = vector.broadcast %77 : vector<8x1xf32> to vector<8x8xf32>
    %79 = arith.mulf %74, %78 : vector<8x8xf32>
    %80 = arith.truncf %79 : vector<8x8xf32> to vector<8x8xbf16>
    %cst_29 = arith.constant dense<0.000000e+00> : vector<8x128xf32>
    %81 = tpu.matmul %80, %68, %cst_29 {dimension_numbers = #tpu.dot_dimension_numbers<[1], [0], [0], [1], [0, 0, 1, 1], [], []>} : vector<8x8xbf16>, vector<8x128xbf16>, vector<8x128xf32> -> vector<8x128xf32>
    %c0_30 = arith.constant 0 : index
    %c128 = arith.constant 128 : index
    %82 = vector.load %arg18[%c0_30, %c128] : memref<16x512xf32, #tpu.memory_space<vmem>>, vector<8x128xf32>
    tpu.vector_store %arg18[%c0_30, %c128], %81 {strides = array<i32>} : memref<16x512xf32, #tpu.memory_space<vmem>>, vector<8x128xf32>,
    %83 = vector.extract_strided_slice %40 {offsets = [0, 256], sizes = [8, 128], strides = [1, 1]} : vector<16x512xf32> to vector<8x128xf32>
    %84 = arith.truncf %83 : vector<8x128xf32> to vector<8x128xbf16>
    %85 = vector.extract_strided_slice %41 {offsets = [0, 256], sizes = [8, 128], strides = [1, 1]} : vector<16x512xf32> to vector<8x128xf32>
    %86 = arith.truncf %85 : vector<8x128xf32> to vector<8x128xbf16>
    %87 = vector.extract_strided_slice %42 {offsets = [0, 256], sizes = [8, 128], strides = [1, 1]} : vector<16x512xf32> to vector<8x128xf32>
    %88 = arith.truncf %87 : vector<8x128xf32> to vector<8x128xbf16>
    %cst_31 = arith.constant dense<0.000000e+00> : vector<8x8xf32>
    %89 = tpu.matmul %84, %86, %cst_31 {dimension_numbers = #tpu.dot_dimension_numbers<[1], [1], [0], [0], [0, 0, 1, 0], [], []>} : vector<8x128xbf16>, vector<8x128xbf16>, vector<8x8xf32> -> vector<8x8xf32>
    %cst_32 = arith.constant dense<0xFF800000> : vector<8xf32>
    %90 = vector.multi_reduction <maximumf>, %89, %cst_32 [1] : vector<8x8xf32> to vector<8xf32>
    %91 = vector.shape_cast %90 : vector<8xf32> to vector<8x1xf32>
    %92 = vector.broadcast %91 : vector<8x1xf32> to vector<8x8xf32>
    %93 = arith.subf %89, %92 : vector<8x8xf32>
    %94 = math.exp %93 : vector<8x8xf32>
    %cst_33 = arith.constant dense<0.000000e+00> : vector<8xf32>
    %95 = vector.multi_reduction <add>, %94, %cst_33 [1] : vector<8x8xf32> to vector<8xf32>
    %96 = vector.shape_cast %95 : vector<8xf32> to vector<8x1xf32>
    %97 = tpu.reciprocal %96 {approx = true} : vector<8x1xf32> -> vector<8x1xf32>
    %98 = vector.broadcast %97 : vector<8x1xf32> to vector<8x8xf32>
    %99 = arith.mulf %94, %98 : vector<8x8xf32>
    %100 = arith.truncf %99 : vector<8x8xf32> to vector<8x8xbf16>
    %cst_34 = arith.constant dense<0.000000e+00> : vector<8x128xf32>
    %101 = tpu.matmul %100, %88, %cst_34 {dimension_numbers = #tpu.dot_dimension_numbers<[1], [0], [0], [1], [0, 0, 1, 1], [], []>} : vector<8x8xbf16>, vector<8x128xbf16>, vector<8x128xf32> -> vector<8x128xf32>
    %c0_35 = arith.constant 0 : index
    %c256 = arith.constant 256 : index
    %102 = vector.load %arg18[%c0_35, %c256] : memref<16x512xf32, #tpu.memory_space<vmem>>, vector<8x128xf32>
    tpu.vector_store %arg18[%c0_35, %c256], %101 {strides = array<i32>} : memref<16x512xf32, #tpu.memory_space<vmem>>, vector<8x128xf32>,
    %103 = vector.extract_strided_slice %40 {offsets = [0, 384], sizes = [8, 128], strides = [1, 1]} : vector<16x512xf32> to vector<8x128xf32>
    %104 = arith.truncf %103 : vector<8x128xf32> to vector<8x128xbf16>
    %105 = vector.extract_strided_slice %41 {offsets = [0, 384], sizes = [8, 128], strides = [1, 1]} : vector<16x512xf32> to vector<8x128xf32>
    %106 = arith.truncf %105 : vector<8x128xf32> to vector<8x128xbf16>
    %107 = vector.extract_strided_slice %42 {offsets = [0, 384], sizes = [8, 128], strides = [1, 1]} : vector<16x512xf32> to vector<8x128xf32>
    %108 = arith.truncf %107 : vector<8x128xf32> to vector<8x128xbf16>
    %cst_36 = arith.constant dense<0.000000e+00> : vector<8x8xf32>
    %109 = tpu.matmul %104, %106, %cst_36 {dimension_numbers = #tpu.dot_dimension_numbers<[1], [1], [0], [0], [0, 0, 1, 0], [], []>} : vector<8x128xbf16>, vector<8x128xbf16>, vector<8x8xf32> -> vector<8x8xf32>
    %cst_37 = arith.constant dense<0xFF800000> : vector<8xf32>
    %110 = vector.multi_reduction <maximumf>, %109, %cst_37 [1] : vector<8x8xf32> to vector<8xf32>
    %111 = vector.shape_cast %110 : vector<8xf32> to vector<8x1xf32>
    %112 = vector.broadcast %111 : vector<8x1xf32> to vector<8x8xf32>
    %113 = arith.subf %109, %112 : vector<8x8xf32>
    %114 = math.exp %113 : vector<8x8xf32>
    %cst_38 = arith.constant dense<0.000000e+00> : vector<8xf32>
    %115 = vector.multi_reduction <add>, %114, %cst_38 [1] : vector<8x8xf32> to vector<8xf32>
    %116 = vector.shape_cast %115 : vector<8xf32> to vector<8x1xf32>
    %117 = tpu.reciprocal %116 {approx = true} : vector<8x1xf32> -> vector<8x1xf32>
    %118 = vector.broadcast %117 : vector<8x1xf32> to vector<8x8xf32>
    %119 = arith.mulf %114, %118 : vector<8x8xf32>
    %120 = arith.truncf %119 : vector<8x8xf32> to vector<8x8xbf16>
    %cst_39 = arith.constant dense<0.000000e+00> : vector<8x128xf32>
    %121 = tpu.matmul %120, %108, %cst_39 {dimension_numbers = #tpu.dot_dimension_numbers<[1], [0], [0], [1], [0, 0, 1, 1], [], []>} : vector<8x8xbf16>, vector<8x128xbf16>, vector<8x128xf32> -> vector<8x128xf32>
    %c0_40 = arith.constant 0 : index
    %c384 = arith.constant 384 : index
    %122 = vector.load %arg18[%c0_40, %c384] : memref<16x512xf32, #tpu.memory_space<vmem>>, vector<8x128xf32>
    tpu.vector_store %arg18[%c0_40, %c384], %121 {strides = array<i32>} : memref<16x512xf32, #tpu.memory_space<vmem>>, vector<8x128xf32>,
    %123 = vector.extract_strided_slice %40 {offsets = [8, 0], sizes = [8, 128], strides = [1, 1]} : vector<16x512xf32> to vector<8x128xf32>
    %124 = arith.truncf %123 : vector<8x128xf32> to vector<8x128xbf16>
    %125 = vector.extract_strided_slice %41 {offsets = [8, 0], sizes = [8, 128], strides = [1, 1]} : vector<16x512xf32> to vector<8x128xf32>
    %126 = arith.truncf %125 : vector<8x128xf32> to vector<8x128xbf16>
    %127 = vector.extract_strided_slice %42 {offsets = [8, 0], sizes = [8, 128], strides = [1, 1]} : vector<16x512xf32> to vector<8x128xf32>
    %128 = arith.truncf %127 : vector<8x128xf32> to vector<8x128xbf16>
    %cst_41 = arith.constant dense<0.000000e+00> : vector<8x8xf32>
    %129 = tpu.matmul %124, %126, %cst_41 {dimension_numbers = #tpu.dot_dimension_numbers<[1], [1], [0], [0], [0, 0, 1, 0], [], []>} : vector<8x128xbf16>, vector<8x128xbf16>, vector<8x8xf32> -> vector<8x8xf32>
    %cst_42 = arith.constant dense<0xFF800000> : vector<8xf32>
    %130 = vector.multi_reduction <maximumf>, %129, %cst_42 [1] : vector<8x8xf32> to vector<8xf32>
    %131 = vector.shape_cast %130 : vector<8xf32> to vector<8x1xf32>
    %132 = vector.broadcast %131 : vector<8x1xf32> to vector<8x8xf32>
    %133 = arith.subf %129, %132 : vector<8x8xf32>
    %134 = math.exp %133 : vector<8x8xf32>
    %cst_43 = arith.constant dense<0.000000e+00> : vector<8xf32>
    %135 = vector.multi_reduction <add>, %134, %cst_43 [1] : vector<8x8xf32> to vector<8xf32>
    %136 = vector.shape_cast %135 : vector<8xf32> to vector<8x1xf32>
    %137 = tpu.reciprocal %136 {approx = true} : vector<8x1xf32> -> vector<8x1xf32>
    %138 = vector.broadcast %137 : vector<8x1xf32> to vector<8x8xf32>
    %139 = arith.mulf %134, %138 : vector<8x8xf32>
    %140 = arith.truncf %139 : vector<8x8xf32> to vector<8x8xbf16>
    %cst_44 = arith.constant dense<0.000000e+00> : vector<8x128xf32>
    %141 = tpu.matmul %140, %128, %cst_44 {dimension_numbers = #tpu.dot_dimension_numbers<[1], [0], [0], [1], [0, 0, 1, 1], [], []>} : vector<8x8xbf16>, vector<8x128xbf16>, vector<8x128xf32> -> vector<8x128xf32>
    %c8 = arith.constant 8 : index
    %c0_45 = arith.constant 0 : index
    %142 = vector.load %arg18[%c8, %c0_45] : memref<16x512xf32, #tpu.memory_space<vmem>>, vector<8x128xf32>
    tpu.vector_store %arg18[%c8, %c0_45], %141 {strides = array<i32>} : memref<16x512xf32, #tpu.memory_space<vmem>>, vector<8x128xf32>,
    %143 = vector.extract_strided_slice %40 {offsets = [8, 128], sizes = [8, 128], strides = [1, 1]} : vector<16x512xf32> to vector<8x128xf32>
    %144 = arith.truncf %143 : vector<8x128xf32> to vector<8x128xbf16>
    %145 = vector.extract_strided_slice %41 {offsets = [8, 128], sizes = [8, 128], strides = [1, 1]} : vector<16x512xf32> to vector<8x128xf32>
    %146 = arith.truncf %145 : vector<8x128xf32> to vector<8x128xbf16>
    %147 = vector.extract_strided_slice %42 {offsets = [8, 128], sizes = [8, 128], strides = [1, 1]} : vector<16x512xf32> to vector<8x128xf32>
    %148 = arith.truncf %147 : vector<8x128xf32> to vector<8x128xbf16>
    %cst_46 = arith.constant dense<0.000000e+00> : vector<8x8xf32>
    %149 = tpu.matmul %144, %146, %cst_46 {dimension_numbers = #tpu.dot_dimension_numbers<[1], [1], [0], [0], [0, 0, 1, 0], [], []>} : vector<8x128xbf16>, vector<8x128xbf16>, vector<8x8xf32> -> vector<8x8xf32>
    %cst_47 = arith.constant dense<0xFF800000> : vector<8xf32>
    %150 = vector.multi_reduction <maximumf>, %149, %cst_47 [1] : vector<8x8xf32> to vector<8xf32>
    %151 = vector.shape_cast %150 : vector<8xf32> to vector<8x1xf32>
    %152 = vector.broadcast %151 : vector<8x1xf32> to vector<8x8xf32>
    %153 = arith.subf %149, %152 : vector<8x8xf32>
    %154 = math.exp %153 : vector<8x8xf32>
    %cst_48 = arith.constant dense<0.000000e+00> : vector<8xf32>
    %155 = vector.multi_reduction <add>, %154, %cst_48 [1] : vector<8x8xf32> to vector<8xf32>
    %156 = vector.shape_cast %155 : vector<8xf32> to vector<8x1xf32>
    %157 = tpu.reciprocal %156 {approx = true} : vector<8x1xf32> -> vector<8x1xf32>
    %158 = vector.broadcast %157 : vector<8x1xf32> to vector<8x8xf32>
    %159 = arith.mulf %154, %158 : vector<8x8xf32>
    %160 = arith.truncf %159 : vector<8x8xf32> to vector<8x8xbf16>
    %cst_49 = arith.constant dense<0.000000e+00> : vector<8x128xf32>
    %161 = tpu.matmul %160, %148, %cst_49 {dimension_numbers = #tpu.dot_dimension_numbers<[1], [0], [0], [1], [0, 0, 1, 1], [], []>} : vector<8x8xbf16>, vector<8x128xbf16>, vector<8x128xf32> -> vector<8x128xf32>
    %c8_50 = arith.constant 8 : index
    %c128_51 = arith.constant 128 : index
    %162 = vector.load %arg18[%c8_50, %c128_51] : memref<16x512xf32, #tpu.memory_space<vmem>>, vector<8x128xf32>
    tpu.vector_store %arg18[%c8_50, %c128_51], %161 {strides = array<i32>} : memref<16x512xf32, #tpu.memory_space<vmem>>, vector<8x128xf32>,
    %163 = vector.extract_strided_slice %40 {offsets = [8, 256], sizes = [8, 128], strides = [1, 1]} : vector<16x512xf32> to vector<8x128xf32>
    %164 = arith.truncf %163 : vector<8x128xf32> to vector<8x128xbf16>
    %165 = vector.extract_strided_slice %41 {offsets = [8, 256], sizes = [8, 128], strides = [1, 1]} : vector<16x512xf32> to vector<8x128xf32>
    %166 = arith.truncf %165 : vector<8x128xf32> to vector<8x128xbf16>
    %167 = vector.extract_strided_slice %42 {offsets = [8, 256], sizes = [8, 128], strides = [1, 1]} : vector<16x512xf32> to vector<8x128xf32>
    %168 = arith.truncf %167 : vector<8x128xf32> to vector<8x128xbf16>
    %cst_52 = arith.constant dense<0.000000e+00> : vector<8x8xf32>
    %169 = tpu.matmul %164, %166, %cst_52 {dimension_numbers = #tpu.dot_dimension_numbers<[1], [1], [0], [0], [0, 0, 1, 0], [], []>} : vector<8x128xbf16>, vector<8x128xbf16>, vector<8x8xf32> -> vector<8x8xf32>
    %cst_53 = arith.constant dense<0xFF800000> : vector<8xf32>
    %170 = vector.multi_reduction <maximumf>, %169, %cst_53 [1] : vector<8x8xf32> to vector<8xf32>
    %171 = vector.shape_cast %170 : vector<8xf32> to vector<8x1xf32>
    %172 = vector.broadcast %171 : vector<8x1xf32> to vector<8x8xf32>
    %173 = arith.subf %169, %172 : vector<8x8xf32>
    %174 = math.exp %173 : vector<8x8xf32>
    %cst_54 = arith.constant dense<0.000000e+00> : vector<8xf32>
    %175 = vector.multi_reduction <add>, %174, %cst_54 [1] : vector<8x8xf32> to vector<8xf32>
    %176 = vector.shape_cast %175 : vector<8xf32> to vector<8x1xf32>
    %177 = tpu.reciprocal %176 {approx = true} : vector<8x1xf32> -> vector<8x1xf32>
    %178 = vector.broadcast %177 : vector<8x1xf32> to vector<8x8xf32>
    %179 = arith.mulf %174, %178 : vector<8x8xf32>
    %180 = arith.truncf %179 : vector<8x8xf32> to vector<8x8xbf16>
    %cst_55 = arith.constant dense<0.000000e+00> : vector<8x128xf32>
    %181 = tpu.matmul %180, %168, %cst_55 {dimension_numbers = #tpu.dot_dimension_numbers<[1], [0], [0], [1], [0, 0, 1, 1], [], []>} : vector<8x8xbf16>, vector<8x128xbf16>, vector<8x128xf32> -> vector<8x128xf32>
    %c8_56 = arith.constant 8 : index
    %c256_57 = arith.constant 256 : index
    %182 = vector.load %arg18[%c8_56, %c256_57] : memref<16x512xf32, #tpu.memory_space<vmem>>, vector<8x128xf32>
    tpu.vector_store %arg18[%c8_56, %c256_57], %181 {strides = array<i32>} : memref<16x512xf32, #tpu.memory_space<vmem>>, vector<8x128xf32>,
    %183 = vector.extract_strided_slice %40 {offsets = [8, 384], sizes = [8, 128], strides = [1, 1]} : vector<16x512xf32> to vector<8x128xf32>
    %184 = arith.truncf %183 : vector<8x128xf32> to vector<8x128xbf16>
    %185 = vector.extract_strided_slice %41 {offsets = [8, 384], sizes = [8, 128], strides = [1, 1]} : vector<16x512xf32> to vector<8x128xf32>
    %186 = arith.truncf %185 : vector<8x128xf32> to vector<8x128xbf16>
    %187 = vector.extract_strided_slice %42 {offsets = [8, 384], sizes = [8, 128], strides = [1, 1]} : vector<16x512xf32> to vector<8x128xf32>
    %188 = arith.truncf %187 : vector<8x128xf32> to vector<8x128xbf16>
    %cst_58 = arith.constant dense<0.000000e+00> : vector<8x8xf32>
    %189 = tpu.matmul %184, %186, %cst_58 {dimension_numbers = #tpu.dot_dimension_numbers<[1], [1], [0], [0], [0, 0, 1, 0], [], []>} : vector<8x128xbf16>, vector<8x128xbf16>, vector<8x8xf32> -> vector<8x8xf32>
    %cst_59 = arith.constant dense<0xFF800000> : vector<8xf32>
    %190 = vector.multi_reduction <maximumf>, %189, %cst_59 [1] : vector<8x8xf32> to vector<8xf32>
    %191 = vector.shape_cast %190 : vector<8xf32> to vector<8x1xf32>
    %192 = vector.broadcast %191 : vector<8x1xf32> to vector<8x8xf32>
    %193 = arith.subf %189, %192 : vector<8x8xf32>
    %194 = math.exp %193 : vector<8x8xf32>
    %cst_60 = arith.constant dense<0.000000e+00> : vector<8xf32>
    %195 = vector.multi_reduction <add>, %194, %cst_60 [1] : vector<8x8xf32> to vector<8xf32>
    %196 = vector.shape_cast %195 : vector<8xf32> to vector<8x1xf32>
    %197 = tpu.reciprocal %196 {approx = true} : vector<8x1xf32> -> vector<8x1xf32>
    %198 = vector.broadcast %197 : vector<8x1xf32> to vector<8x8xf32>
    %199 = arith.mulf %194, %198 : vector<8x8xf32>
    %200 = arith.truncf %199 : vector<8x8xf32> to vector<8x8xbf16>
    %cst_61 = arith.constant dense<0.000000e+00> : vector<8x128xf32>
    %201 = tpu.matmul %200, %188, %cst_61 {dimension_numbers = #tpu.dot_dimension_numbers<[1], [0], [0], [1], [0, 0, 1, 1], [], []>} : vector<8x8xbf16>, vector<8x128xbf16>, vector<8x128xf32> -> vector<8x128xf32>
    %c8_62 = arith.constant 8 : index
    %c384_63 = arith.constant 384 : index
    %202 = vector.load %arg18[%c8_62, %c384_63] : memref<16x512xf32, #tpu.memory_space<vmem>>, vector<8x128xf32>
    tpu.vector_store %arg18[%c8_62, %c384_63], %201 {strides = array<i32>} : memref<16x512xf32, #tpu.memory_space<vmem>>, vector<8x128xf32>,
    %c0_64 = arith.constant 0 : index
    %c0_65 = arith.constant 0 : index
    %203 = vector.load %arg18[%c0_64, %c0_65] : memref<16x512xf32, #tpu.memory_space<vmem>>, vector<16x512xf32>
    %204 = arith.truncf %203 : vector<16x512xf32> to vector<16x512xbf16>
    %c0_66 = arith.constant 0 : index
    %c0_67 = arith.constant 0 : index
    %c0_68 = arith.constant 0 : index
    %205 = vector.load %arg4[%c0_66, %c0_67, %c0_68] : memref<1x512x128xbf16, #tpu.memory_space<vmem>>, vector<1x512x128xbf16>
    %206 = vector.shape_cast %205 : vector<1x512x128xbf16> to vector<512x128xbf16>
    %cst_69 = arith.constant dense<0.000000e+00> : vector<16x128xf32>
    %207 = tpu.matmul %204, %206, %cst_69 {dimension_numbers = #tpu.dot_dimension_numbers<[1], [0], [0], [1], [0, 0, 1, 1], [], []>} : vector<16x512xbf16>, vector<512x128xbf16>, vector<16x128xf32> -> vector<16x128xf32>
    %c0_70 = arith.constant 0 : index
    %c0_71 = arith.constant 0 : index
    %c0_72 = arith.constant 0 : index
    %208 = vector.load %arg5[%c0_70, %c0_71, %c0_72] : memref<1x1x128xf32, #tpu.memory_space<vmem>>, vector<1x1x128xf32>
    %209 = vector.shape_cast %208 : vector<1x1x128xf32> to vector<1x128xf32>
    %210 = vector.broadcast %209 : vector<1x128xf32> to vector<16x128xf32>
    %211 = arith.addf %207, %210 : vector<16x128xf32>
    %212 = arith.addf %3, %211 : vector<16x128xf32>
    %c0_73 = arith.constant 0 : index
    %c0_74 = arith.constant 0 : index
    %c0_75 = arith.constant 0 : index
    %213 = vector.load %arg12[%c0_73, %c0_74, %c0_75] : memref<1x1x128xf32, #tpu.memory_space<vmem>>, vector<1x1x128xf32>
    %214 = vector.shape_cast %213 : vector<1x1x128xf32> to vector<1x128xf32>
    %c0_76 = arith.constant 0 : index
    %c0_77 = arith.constant 0 : index
    %c0_78 = arith.constant 0 : index
    %215 = vector.load %arg13[%c0_76, %c0_77, %c0_78] : memref<1x1x128xf32, #tpu.memory_space<vmem>>, vector<1x1x128xf32>
    %216 = vector.shape_cast %215 : vector<1x1x128xf32> to vector<1x128xf32>
    %cst_79 = arith.constant dense<0.000000e+00> : vector<16xf32>
    %217 = vector.multi_reduction <add>, %212, %cst_79 [1] : vector<16x128xf32> to vector<16xf32>
    %218 = vector.shape_cast %217 : vector<16xf32> to vector<16x1xf32>
    %cst_80 = arith.constant 3.200000e+01 : f32
    %219 = vector.broadcast %cst_80 : f32 to vector<16x1xf32>
    %220 = arith.divf %218, %219 : vector<16x1xf32>
    %221 = vector.broadcast %220 : vector<16x1xf32> to vector<16x128xf32>
    %222 = arith.subf %212, %221 : vector<16x128xf32>
    %223 = arith.mulf %222, %222 : vector<16x128xf32>
    %cst_81 = arith.constant dense<0.000000e+00> : vector<16xf32>
    %224 = vector.multi_reduction <add>, %223, %cst_81 [1] : vector<16x128xf32> to vector<16xf32>
    %225 = vector.shape_cast %224 : vector<16xf32> to vector<16x1xf32>
    %226 = arith.mulf %220, %220 : vector<16x1xf32>
    %cst_82 = arith.constant 9.600000e+01 : f32
    %227 = vector.broadcast %cst_82 : f32 to vector<16x1xf32>
    %228 = arith.mulf %227, %226 : vector<16x1xf32>
    %229 = arith.subf %225, %228 : vector<16x1xf32>
    %cst_83 = arith.constant 3.200000e+01 : f32
    %230 = vector.broadcast %cst_83 : f32 to vector<16x1xf32>
    %231 = arith.divf %229, %230 : vector<16x1xf32>
    %cst_84 = arith.constant 9.99999974E-6 : f32
    %232 = vector.broadcast %cst_84 : f32 to vector<16x1xf32>
    %233 = arith.addf %231, %232 : vector<16x1xf32>
    %234 = math.rsqrt %233 : vector<16x1xf32>
    %235 = vector.broadcast %234 : vector<16x1xf32> to vector<16x128xf32>
    %236 = arith.mulf %222, %235 : vector<16x128xf32>
    %237 = vector.broadcast %214 : vector<1x128xf32> to vector<16x128xf32>
    %238 = arith.mulf %236, %237 : vector<16x128xf32>
    %239 = vector.broadcast %216 : vector<1x128xf32> to vector<16x128xf32>
    %240 = arith.addf %238, %239 : vector<16x128xf32>
    %241 = arith.truncf %240 : vector<16x128xf32> to vector<16x128xbf16>
    %c0_85 = arith.constant 0 : index
    %c0_86 = arith.constant 0 : index
    %c0_87 = arith.constant 0 : index
    %242 = vector.load %arg6[%c0_85, %c0_86, %c0_87] : memref<1x128x128xbf16, #tpu.memory_space<vmem>>, vector<1x128x128xbf16>
    %243 = vector.shape_cast %242 : vector<1x128x128xbf16> to vector<128x128xbf16>
    %cst_88 = arith.constant dense<0.000000e+00> : vector<16x128xf32>
    %244 = tpu.matmul %241, %243, %cst_88 {dimension_numbers = #tpu.dot_dimension_numbers<[1], [0], [0], [1], [0, 0, 1, 1], [], []>} : vector<16x128xbf16>, vector<128x128xbf16>, vector<16x128xf32> -> vector<16x128xf32>
    %c0_89 = arith.constant 0 : index
    %c0_90 = arith.constant 0 : index
    %c0_91 = arith.constant 0 : index
    %245 = vector.load %arg7[%c0_89, %c0_90, %c0_91] : memref<1x1x128xf32, #tpu.memory_space<vmem>>, vector<1x1x128xf32>
    %246 = vector.shape_cast %245 : vector<1x1x128xf32> to vector<1x128xf32>
    %247 = vector.broadcast %246 : vector<1x128xf32> to vector<16x128xf32>
    %248 = arith.addf %244, %247 : vector<16x128xf32>
    %cst_92 = arith.constant 0.000000e+00 : f32
    %249 = vector.broadcast %cst_92 : f32 to vector<16x128xf32>
    %250 = arith.maximumf %248, %249 : vector<16x128xf32>
    %251 = arith.truncf %250 : vector<16x128xf32> to vector<16x128xbf16>
    %c0_93 = arith.constant 0 : index
    %c0_94 = arith.constant 0 : index
    %c0_95 = arith.constant 0 : index
    %252 = vector.load %arg8[%c0_93, %c0_94, %c0_95] : memref<1x128x128xbf16, #tpu.memory_space<vmem>>, vector<1x128x128xbf16>
    %253 = vector.shape_cast %252 : vector<1x128x128xbf16> to vector<128x128xbf16>
    %cst_96 = arith.constant dense<0.000000e+00> : vector<16x128xf32>
    %254 = tpu.matmul %251, %253, %cst_96 {dimension_numbers = #tpu.dot_dimension_numbers<[1], [0], [0], [1], [0, 0, 1, 1], [], []>} : vector<16x128xbf16>, vector<128x128xbf16>, vector<16x128xf32> -> vector<16x128xf32>
    %c0_97 = arith.constant 0 : index
    %c0_98 = arith.constant 0 : index
    %c0_99 = arith.constant 0 : index
    %255 = vector.load %arg9[%c0_97, %c0_98, %c0_99] : memref<1x1x128xf32, #tpu.memory_space<vmem>>, vector<1x1x128xf32>
    %256 = vector.shape_cast %255 : vector<1x1x128xf32> to vector<1x128xf32>
    %257 = vector.broadcast %256 : vector<1x128xf32> to vector<16x128xf32>
    %258 = arith.addf %254, %257 : vector<16x128xf32>
    %259 = arith.addf %212, %258 : vector<16x128xf32>
    %c0_100 = arith.constant 0 : index
    %c0_101 = arith.constant 0 : index
    %260 = vector.load %arg17[%c0_100, %c0_101] : memref<16x128xf32, #tpu.memory_space<vmem>>, vector<16x128xf32>
    tpu.vector_store %arg17[%c0_100, %c0_101], %259 {strides = array<i32>} : memref<16x128xf32, #tpu.memory_space<vmem>>, vector<16x128xf32>,
    %c1_i32 = arith.constant 1 : i32
    %261 = arith.cmpi eq, %arg0, %c1_i32 : i32
    %262 = arith.extui %261 : i1 to i32
    %c0_i32_102 = arith.constant 0 : i32
    %263 = arith.cmpi ne, %262, %c0_i32_102 : i32
    scf.if %263 {
      %c0_103 = arith.constant 0 : index
      %c0_104 = arith.constant 0 : index
      %264 = vector.load %arg14[%c0_103, %c0_104] : memref<1x128xf32, #tpu.memory_space<vmem>>, vector<1x128xf32>
      %c0_105 = arith.constant 0 : index
      %c0_106 = arith.constant 0 : index
      %265 = vector.load %arg15[%c0_105, %c0_106] : memref<1x128xf32, #tpu.memory_space<vmem>>, vector<1x128xf32>
      %cst_107 = arith.constant dense<0.000000e+00> : vector<16xf32>
      %266 = vector.multi_reduction <add>, %259, %cst_107 [1] : vector<16x128xf32> to vector<16xf32>
      %267 = vector.shape_cast %266 : vector<16xf32> to vector<16x1xf32>
      %cst_108 = arith.constant 3.200000e+01 : f32
      %268 = vector.broadcast %cst_108 : f32 to vector<16x1xf32>
      %269 = arith.divf %267, %268 : vector<16x1xf32>
      %270 = vector.broadcast %269 : vector<16x1xf32> to vector<16x128xf32>
      %271 = arith.subf %259, %270 : vector<16x128xf32>
      %272 = arith.mulf %271, %271 : vector<16x128xf32>
      %cst_109 = arith.constant dense<0.000000e+00> : vector<16xf32>
      %273 = vector.multi_reduction <add>, %272, %cst_109 [1] : vector<16x128xf32> to vector<16xf32>
      %274 = vector.shape_cast %273 : vector<16xf32> to vector<16x1xf32>
      %275 = arith.mulf %269, %269 : vector<16x1xf32>
      %cst_110 = arith.constant 9.600000e+01 : f32
      %276 = vector.broadcast %cst_110 : f32 to vector<16x1xf32>
      %277 = arith.mulf %276, %275 : vector<16x1xf32>
      %278 = arith.subf %274, %277 : vector<16x1xf32>
      %cst_111 = arith.constant 3.200000e+01 : f32
      %279 = vector.broadcast %cst_111 : f32 to vector<16x1xf32>
      %280 = arith.divf %278, %279 : vector<16x1xf32>
      %cst_112 = arith.constant 9.99999974E-6 : f32
      %281 = vector.broadcast %cst_112 : f32 to vector<16x1xf32>
      %282 = arith.addf %280, %281 : vector<16x1xf32>
      %283 = math.rsqrt %282 : vector<16x1xf32>
      %284 = vector.broadcast %283 : vector<16x1xf32> to vector<16x128xf32>
      %285 = arith.mulf %271, %284 : vector<16x128xf32>
      %286 = vector.broadcast %264 : vector<1x128xf32> to vector<16x128xf32>
      %287 = arith.mulf %285, %286 : vector<16x128xf32>
      %288 = vector.broadcast %265 : vector<1x128xf32> to vector<16x128xf32>
      %289 = arith.addf %287, %288 : vector<16x128xf32>
      %c0_113 = arith.constant 0 : index
      %c0_114 = arith.constant 0 : index
      %290 = vector.load %arg16[%c0_113, %c0_114] : memref<16x128xf32, #tpu.memory_space<vmem>>, vector<16x128xf32>
      tpu.vector_store %arg16[%c0_113, %c0_114], %289 {strides = array<i32>} : memref<16x128xf32, #tpu.memory_space<vmem>>, vector<16x128xf32>,
    } else {
    }
    return
  }
  func.func @transform_0(%arg0: i32) -> (i32, i32) {
    %c0_i32 = arith.constant 0 : i32
    %c0_i32_0 = arith.constant 0 : i32
    %c0_i32_1 = arith.constant 0 : i32
    return %c0_i32, %c0_i32_0 : i32, i32
  }
  func.func @transform_1(%arg0: i32) -> (i32, i32, i32) {
    %c0_i32 = arith.constant 0 : i32
    %c0_i32_0 = arith.constant 0 : i32
    %c0_i32_1 = arith.constant 0 : i32
    return %arg0, %c0_i32, %c0_i32_0 : i32, i32, i32
  }
  func.func @transform_2(%arg0: i32) -> (i32, i32, i32) {
    %c0_i32 = arith.constant 0 : i32
    %c0_i32_0 = arith.constant 0 : i32
    %c0_i32_1 = arith.constant 0 : i32
    return %arg0, %c0_i32, %c0_i32_0 : i32, i32, i32
  }
  func.func @transform_3(%arg0: i32) -> (i32, i32, i32) {
    %c0_i32 = arith.constant 0 : i32
    %c0_i32_0 = arith.constant 0 : i32
    %c0_i32_1 = arith.constant 0 : i32
    return %arg0, %c0_i32, %c0_i32_0 : i32, i32, i32
  }
  func.func @transform_4(%arg0: i32) -> (i32, i32, i32) {
    %c0_i32 = arith.constant 0 : i32
    %c0_i32_0 = arith.constant 0 : i32
    %c0_i32_1 = arith.constant 0 : i32
    return %arg0, %c0_i32, %c0_i32_0 : i32, i32, i32
  }
  func.func @transform_5(%arg0: i32) -> (i32, i32, i32) {
    %c0_i32 = arith.constant 0 : i32
    %c0_i32_0 = arith.constant 0 : i32
    %c0_i32_1 = arith.constant 0 : i32
    return %arg0, %c0_i32, %c0_i32_0 : i32, i32, i32
  }
  func.func @transform_6(%arg0: i32) -> (i32, i32, i32) {
    %c0_i32 = arith.constant 0 : i32
    %c0_i32_0 = arith.constant 0 : i32
    %c0_i32_1 = arith.constant 0 : i32
    return %arg0, %c0_i32, %c0_i32_0 : i32, i32, i32
  }
  func.func @transform_7(%arg0: i32) -> (i32, i32, i32) {
    %c0_i32 = arith.constant 0 : i32
    %c0_i32_0 = arith.constant 0 : i32
    %c0_i32_1 = arith.constant 0 : i32
    return %arg0, %c0_i32, %c0_i32_0 : i32, i32, i32
  }
  func.func @transform_8(%arg0: i32) -> (i32, i32, i32) {
    %c0_i32 = arith.constant 0 : i32
    %c0_i32_0 = arith.constant 0 : i32
    %c0_i32_1 = arith.constant 0 : i32
    return %arg0, %c0_i32, %c0_i32_0 : i32, i32, i32
  }
  func.func @transform_9(%arg0: i32) -> (i32, i32, i32) {
    %c0_i32 = arith.constant 0 : i32
    %c0_i32_0 = arith.constant 0 : i32
    %c0_i32_1 = arith.constant 0 : i32
    return %arg0, %c0_i32, %c0_i32_0 : i32, i32, i32
  }
  func.func @transform_10(%arg0: i32) -> (i32, i32, i32) {
    %c0_i32 = arith.constant 0 : i32
    %c0_i32_0 = arith.constant 0 : i32
    %c0_i32_1 = arith.constant 0 : i32
    return %arg0, %c0_i32, %c0_i32_0 : i32, i32, i32
  }
  func.func @transform_11(%arg0: i32) -> (i32, i32, i32) {
    %c0_i32 = arith.constant 0 : i32
    %c0_i32_0 = arith.constant 0 : i32
    %c0_i32_1 = arith.constant 0 : i32
    return %arg0, %c0_i32, %c0_i32_0 : i32, i32, i32
  }
  func.func @transform_12(%arg0: i32) -> (i32, i32, i32) {
    %c0_i32 = arith.constant 0 : i32
    %c0_i32_0 = arith.constant 0 : i32
    %c0_i32_1 = arith.constant 0 : i32
    return %arg0, %c0_i32, %c0_i32_0 : i32, i32, i32
  }
  func.func @transform_13(%arg0: i32) -> (i32, i32) {
    %c0_i32 = arith.constant 0 : i32
    %c0_i32_0 = arith.constant 0 : i32
    %c0_i32_1 = arith.constant 0 : i32
    return %c0_i32, %c0_i32_0 : i32, i32
  }
  func.func @transform_14(%arg0: i32) -> (i32, i32) {
    %c0_i32 = arith.constant 0 : i32
    %c0_i32_0 = arith.constant 0 : i32
    %c0_i32_1 = arith.constant 0 : i32
    return %c0_i32, %c0_i32_0 : i32, i32
  }
  func.func @transform_15(%arg0: i32) -> (i32, i32) {
    %c0_i32 = arith.constant 0 : i32
    %c0_i32_0 = arith.constant 0 : i32
    %c0_i32_1 = arith.constant 0 : i32
    return %c0_i32, %c0_i32_0 : i32, i32
  }
}

module attributes {stable_mosaic.version = 11 : i64} {
  func.func @_decoder_stack_kernel(%arg0: i32, %arg1: memref<16x128xf32, #tpu.memory_space<vmem>>, %arg2: memref<16x128xf32, #tpu.memory_space<vmem>>, %arg3: memref<1x128x1536xbf16, #tpu.memory_space<vmem>>, %arg4: memref<1x1x1536xf32, #tpu.memory_space<vmem>>, %arg5: memref<1x512x128xbf16, #tpu.memory_space<vmem>>, %arg6: memref<1x1x128xf32, #tpu.memory_space<vmem>>, %arg7: memref<1x128x512xbf16, #tpu.memory_space<vmem>>, %arg8: memref<1x1x512xf32, #tpu.memory_space<vmem>>, %arg9: memref<1x128x1024xbf16, #tpu.memory_space<vmem>>, %arg10: memref<1x1x1024xf32, #tpu.memory_space<vmem>>, %arg11: memref<1x512x128xbf16, #tpu.memory_space<vmem>>, %arg12: memref<1x1x128xf32, #tpu.memory_space<vmem>>, %arg13: memref<1x128x128xbf16, #tpu.memory_space<vmem>>, %arg14: memref<1x1x128xf32, #tpu.memory_space<vmem>>, %arg15: memref<1x128x128xbf16, #tpu.memory_space<vmem>>, %arg16: memref<1x1x128xf32, #tpu.memory_space<vmem>>, %arg17: memref<1x1x128xf32, #tpu.memory_space<vmem>>, %arg18: memref<1x1x128xf32, #tpu.memory_space<vmem>>, %arg19: memref<1x1x128xf32, #tpu.memory_space<vmem>>, %arg20: memref<1x1x128xf32, #tpu.memory_space<vmem>>, %arg21: memref<1x1x128xf32, #tpu.memory_space<vmem>>, %arg22: memref<1x1x128xf32, #tpu.memory_space<vmem>>, %arg23: memref<1x128xf32, #tpu.memory_space<vmem>>, %arg24: memref<1x128xf32, #tpu.memory_space<vmem>>, %arg25: memref<128x128xbf16, #tpu.memory_space<vmem>>, %arg26: memref<1x128xf32, #tpu.memory_space<vmem>>, %arg27: memref<16x128xf32, #tpu.memory_space<vmem>>, %arg28: memref<16x128xf32, #tpu.memory_space<vmem>>, %arg29: memref<16x512xf32, #tpu.memory_space<vmem>>) attributes {dimension_semantics = [#tpu.dimension_semantics<arbitrary>], iteration_bounds = array<i64: 1>, scalar_prefetch = 0 : i64, scratch_operands = 2 : i64, tpu.core_type = #tpu.core_type<tc>, window_params = [{pipeline_mode = #tpu.pipeline_mode<synchronous>, transform_indices = @transform_0, window_bounds = array<i64: 16, 128>}, {pipeline_mode = #tpu.pipeline_mode<synchronous>, transform_indices = @transform_1, window_bounds = array<i64: 16, 128>}, {transform_indices = @transform_2, window_bounds = array<i64: 1, 128, 1536>}, {transform_indices = @transform_3, window_bounds = array<i64: 1, 1, 1536>}, {transform_indices = @transform_4, window_bounds = array<i64: 1, 512, 128>}, {transform_indices = @transform_5, window_bounds = array<i64: 1, 1, 128>}, {transform_indices = @transform_6, window_bounds = array<i64: 1, 128, 512>}, {transform_indices = @transform_7, window_bounds = array<i64: 1, 1, 512>}, {transform_indices = @transform_8, window_bounds = array<i64: 1, 128, 1024>}, {transform_indices = @transform_9, window_bounds = array<i64: 1, 1, 1024>}, {transform_indices = @transform_10, window_bounds = array<i64: 1, 512, 128>}, {transform_indices = @transform_11, window_bounds = array<i64: 1, 1, 128>}, {transform_indices = @transform_12, window_bounds = array<i64: 1, 128, 128>}, {transform_indices = @transform_13, window_bounds = array<i64: 1, 1, 128>}, {transform_indices = @transform_14, window_bounds = array<i64: 1, 128, 128>}, {transform_indices = @transform_15, window_bounds = array<i64: 1, 1, 128>}, {transform_indices = @transform_16, window_bounds = array<i64: 1, 1, 128>}, {transform_indices = @transform_17, window_bounds = array<i64: 1, 1, 128>}, {transform_indices = @transform_18, window_bounds = array<i64: 1, 1, 128>}, {transform_indices = @transform_19, window_bounds = array<i64: 1, 1, 128>}, {transform_indices = @transform_20, window_bounds = array<i64: 1, 1, 128>}, {transform_indices = @transform_21, window_bounds = array<i64: 1, 1, 128>}, {pipeline_mode = #tpu.pipeline_mode<synchronous>, transform_indices = @transform_22, window_bounds = array<i64: 1, 128>}, {pipeline_mode = #tpu.pipeline_mode<synchronous>, transform_indices = @transform_23, window_bounds = array<i64: 1, 128>}, {pipeline_mode = #tpu.pipeline_mode<synchronous>, transform_indices = @transform_24, window_bounds = array<i64: 128, 128>}, {pipeline_mode = #tpu.pipeline_mode<synchronous>, transform_indices = @transform_25, window_bounds = array<i64: 1, 128>}, {pipeline_mode = #tpu.pipeline_mode<synchronous>, transform_indices = @transform_26, window_bounds = array<i64: 16, 128>}]} {
    %c0_i32 = arith.constant 0 : i32
    %0 = arith.cmpi eq, %arg0, %c0_i32 : i32
    %1 = arith.extui %0 : i1 to i32
    %c0_i32_0 = arith.constant 0 : i32
    %2 = arith.cmpi ne, %1, %c0_i32_0 : i32
    scf.if %2 {
      %c0_197 = arith.constant 0 : index
      %c0_198 = arith.constant 0 : index
      %500 = vector.load %arg1[%c0_197, %c0_198] : memref<16x128xf32, #tpu.memory_space<vmem>>, vector<16x128xf32>
      %c0_199 = arith.constant 0 : index
      %c0_200 = arith.constant 0 : index
      %501 = vector.load %arg28[%c0_199, %c0_200] : memref<16x128xf32, #tpu.memory_space<vmem>>, vector<16x128xf32>
      tpu.vector_store %arg28[%c0_199, %c0_200], %500 {strides = array<i32>} : memref<16x128xf32, #tpu.memory_space<vmem>>, vector<16x128xf32>,
    } else {
    }
    %c0 = arith.constant 0 : index
    %c0_1 = arith.constant 0 : index
    %3 = vector.load %arg28[%c0, %c0_1] : memref<16x128xf32, #tpu.memory_space<vmem>>, vector<16x128xf32>
    %c0_2 = arith.constant 0 : index
    %c0_3 = arith.constant 0 : index
    %4 = vector.load %arg2[%c0_2, %c0_3] : memref<16x128xf32, #tpu.memory_space<vmem>>, vector<16x128xf32>
    %c0_4 = arith.constant 0 : index
    %c0_5 = arith.constant 0 : index
    %c0_6 = arith.constant 0 : index
    %5 = vector.load %arg17[%c0_4, %c0_5, %c0_6] : memref<1x1x128xf32, #tpu.memory_space<vmem>>, vector<1x1x128xf32>
    %6 = vector.shape_cast %5 : vector<1x1x128xf32> to vector<1x128xf32>
    %c0_7 = arith.constant 0 : index
    %c0_8 = arith.constant 0 : index
    %c0_9 = arith.constant 0 : index
    %7 = vector.load %arg18[%c0_7, %c0_8, %c0_9] : memref<1x1x128xf32, #tpu.memory_space<vmem>>, vector<1x1x128xf32>
    %8 = vector.shape_cast %7 : vector<1x1x128xf32> to vector<1x128xf32>
    %cst = arith.constant dense<0.000000e+00> : vector<16xf32>
    %9 = vector.multi_reduction <add>, %3, %cst [1] : vector<16x128xf32> to vector<16xf32>
    %10 = vector.shape_cast %9 : vector<16xf32> to vector<16x1xf32>
    %cst_10 = arith.constant 3.200000e+01 : f32
    %11 = vector.broadcast %cst_10 : f32 to vector<16x1xf32>
    %12 = arith.divf %10, %11 : vector<16x1xf32>
    %13 = vector.broadcast %12 : vector<16x1xf32> to vector<16x128xf32>
    %14 = arith.subf %3, %13 : vector<16x128xf32>
    %15 = arith.mulf %14, %14 : vector<16x128xf32>
    %cst_11 = arith.constant dense<0.000000e+00> : vector<16xf32>
    %16 = vector.multi_reduction <add>, %15, %cst_11 [1] : vector<16x128xf32> to vector<16xf32>
    %17 = vector.shape_cast %16 : vector<16xf32> to vector<16x1xf32>
    %18 = arith.mulf %12, %12 : vector<16x1xf32>
    %cst_12 = arith.constant 9.600000e+01 : f32
    %19 = vector.broadcast %cst_12 : f32 to vector<16x1xf32>
    %20 = arith.mulf %19, %18 : vector<16x1xf32>
    %21 = arith.subf %17, %20 : vector<16x1xf32>
    %cst_13 = arith.constant 3.200000e+01 : f32
    %22 = vector.broadcast %cst_13 : f32 to vector<16x1xf32>
    %23 = arith.divf %21, %22 : vector<16x1xf32>
    %cst_14 = arith.constant 9.99999974E-6 : f32
    %24 = vector.broadcast %cst_14 : f32 to vector<16x1xf32>
    %25 = arith.addf %23, %24 : vector<16x1xf32>
    %26 = math.rsqrt %25 : vector<16x1xf32>
    %27 = vector.broadcast %26 : vector<16x1xf32> to vector<16x128xf32>
    %28 = arith.mulf %14, %27 : vector<16x128xf32>
    %29 = vector.broadcast %6 : vector<1x128xf32> to vector<16x128xf32>
    %30 = arith.mulf %28, %29 : vector<16x128xf32>
    %31 = vector.broadcast %8 : vector<1x128xf32> to vector<16x128xf32>
    %32 = arith.addf %30, %31 : vector<16x128xf32>
    %33 = arith.truncf %32 : vector<16x128xf32> to vector<16x128xbf16>
    %c0_15 = arith.constant 0 : index
    %c0_16 = arith.constant 0 : index
    %c0_17 = arith.constant 0 : index
    %34 = vector.load %arg3[%c0_15, %c0_16, %c0_17] : memref<1x128x1536xbf16, #tpu.memory_space<vmem>>, vector<1x128x1536xbf16>
    %35 = vector.shape_cast %34 : vector<1x128x1536xbf16> to vector<128x1536xbf16>
    %cst_18 = arith.constant dense<0.000000e+00> : vector<16x1536xf32>
    %36 = tpu.matmul %33, %35, %cst_18 {dimension_numbers = #tpu.dot_dimension_numbers<[1], [0], [0], [1], [0, 0, 1, 1], [], []>} : vector<16x128xbf16>, vector<128x1536xbf16>, vector<16x1536xf32> -> vector<16x1536xf32>
    %c0_19 = arith.constant 0 : index
    %c0_20 = arith.constant 0 : index
    %c0_21 = arith.constant 0 : index
    %37 = vector.load %arg4[%c0_19, %c0_20, %c0_21] : memref<1x1x1536xf32, #tpu.memory_space<vmem>>, vector<1x1x1536xf32>
    %38 = vector.shape_cast %37 : vector<1x1x1536xf32> to vector<1x1536xf32>
    %39 = vector.broadcast %38 : vector<1x1536xf32> to vector<16x1536xf32>
    %40 = arith.addf %36, %39 : vector<16x1536xf32>
    %41 = vector.extract_strided_slice %40 {offsets = [0, 0], sizes = [16, 512], strides = [1, 1]} : vector<16x1536xf32> to vector<16x512xf32>
    %42 = vector.extract_strided_slice %40 {offsets = [0, 512], sizes = [16, 512], strides = [1, 1]} : vector<16x1536xf32> to vector<16x512xf32>
    %43 = vector.extract_strided_slice %40 {offsets = [0, 1024], sizes = [16, 512], strides = [1, 1]} : vector<16x1536xf32> to vector<16x512xf32>
    %44 = tpu.iota {dimensions = array<i32: 0>} : vector<8x8xi32>
    %45 = tpu.iota {dimensions = array<i32: 1>} : vector<8x8xi32>
    %46 = arith.cmpi sle, %45, %44 : vector<8x8xi32>
    %47 = vector.extract_strided_slice %41 {offsets = [0, 0], sizes = [8, 128], strides = [1, 1]} : vector<16x512xf32> to vector<8x128xf32>
    %48 = arith.truncf %47 : vector<8x128xf32> to vector<8x128xbf16>
    %49 = vector.extract_strided_slice %42 {offsets = [0, 0], sizes = [8, 128], strides = [1, 1]} : vector<16x512xf32> to vector<8x128xf32>
    %50 = arith.truncf %49 : vector<8x128xf32> to vector<8x128xbf16>
    %51 = vector.extract_strided_slice %43 {offsets = [0, 0], sizes = [8, 128], strides = [1, 1]} : vector<16x512xf32> to vector<8x128xf32>
    %52 = arith.truncf %51 : vector<8x128xf32> to vector<8x128xbf16>
    %cst_22 = arith.constant dense<0.000000e+00> : vector<8x8xf32>
    %53 = tpu.matmul %48, %50, %cst_22 {dimension_numbers = #tpu.dot_dimension_numbers<[1], [1], [0], [0], [0, 0, 1, 0], [], []>} : vector<8x128xbf16>, vector<8x128xbf16>, vector<8x8xf32> -> vector<8x8xf32>
    %cst_23 = arith.constant -1.000000e+30 : f32
    %54 = vector.broadcast %cst_23 : f32 to vector<8x8xf32>
    %55 = arith.select %46, %53, %54 : vector<8x8xi1>, vector<8x8xf32>
    %cst_24 = arith.constant dense<0xFF800000> : vector<8xf32>
    %56 = vector.multi_reduction <maximumf>, %55, %cst_24 [1] : vector<8x8xf32> to vector<8xf32>
    %57 = vector.shape_cast %56 : vector<8xf32> to vector<8x1xf32>
    %58 = vector.broadcast %57 : vector<8x1xf32> to vector<8x8xf32>
    %59 = arith.subf %55, %58 : vector<8x8xf32>
    %60 = math.exp %59 : vector<8x8xf32>
    %cst_25 = arith.constant dense<0.000000e+00> : vector<8xf32>
    %61 = vector.multi_reduction <add>, %60, %cst_25 [1] : vector<8x8xf32> to vector<8xf32>
    %62 = vector.shape_cast %61 : vector<8xf32> to vector<8x1xf32>
    %63 = tpu.reciprocal %62 {approx = true} : vector<8x1xf32> -> vector<8x1xf32>
    %64 = vector.broadcast %63 : vector<8x1xf32> to vector<8x8xf32>
    %65 = arith.mulf %60, %64 : vector<8x8xf32>
    %66 = arith.truncf %65 : vector<8x8xf32> to vector<8x8xbf16>
    %cst_26 = arith.constant dense<0.000000e+00> : vector<8x128xf32>
    %67 = tpu.matmul %66, %52, %cst_26 {dimension_numbers = #tpu.dot_dimension_numbers<[1], [0], [0], [1], [0, 0, 1, 1], [], []>} : vector<8x8xbf16>, vector<8x128xbf16>, vector<8x128xf32> -> vector<8x128xf32>
    %c0_27 = arith.constant 0 : index
    %c0_28 = arith.constant 0 : index
    %68 = vector.load %arg29[%c0_27, %c0_28] : memref<16x512xf32, #tpu.memory_space<vmem>>, vector<8x128xf32>
    tpu.vector_store %arg29[%c0_27, %c0_28], %67 {strides = array<i32>} : memref<16x512xf32, #tpu.memory_space<vmem>>, vector<8x128xf32>,
    %69 = vector.extract_strided_slice %41 {offsets = [0, 128], sizes = [8, 128], strides = [1, 1]} : vector<16x512xf32> to vector<8x128xf32>
    %70 = arith.truncf %69 : vector<8x128xf32> to vector<8x128xbf16>
    %71 = vector.extract_strided_slice %42 {offsets = [0, 128], sizes = [8, 128], strides = [1, 1]} : vector<16x512xf32> to vector<8x128xf32>
    %72 = arith.truncf %71 : vector<8x128xf32> to vector<8x128xbf16>
    %73 = vector.extract_strided_slice %43 {offsets = [0, 128], sizes = [8, 128], strides = [1, 1]} : vector<16x512xf32> to vector<8x128xf32>
    %74 = arith.truncf %73 : vector<8x128xf32> to vector<8x128xbf16>
    %cst_29 = arith.constant dense<0.000000e+00> : vector<8x8xf32>
    %75 = tpu.matmul %70, %72, %cst_29 {dimension_numbers = #tpu.dot_dimension_numbers<[1], [1], [0], [0], [0, 0, 1, 0], [], []>} : vector<8x128xbf16>, vector<8x128xbf16>, vector<8x8xf32> -> vector<8x8xf32>
    %cst_30 = arith.constant -1.000000e+30 : f32
    %76 = vector.broadcast %cst_30 : f32 to vector<8x8xf32>
    %77 = arith.select %46, %75, %76 : vector<8x8xi1>, vector<8x8xf32>
    %cst_31 = arith.constant dense<0xFF800000> : vector<8xf32>
    %78 = vector.multi_reduction <maximumf>, %77, %cst_31 [1] : vector<8x8xf32> to vector<8xf32>
    %79 = vector.shape_cast %78 : vector<8xf32> to vector<8x1xf32>
    %80 = vector.broadcast %79 : vector<8x1xf32> to vector<8x8xf32>
    %81 = arith.subf %77, %80 : vector<8x8xf32>
    %82 = math.exp %81 : vector<8x8xf32>
    %cst_32 = arith.constant dense<0.000000e+00> : vector<8xf32>
    %83 = vector.multi_reduction <add>, %82, %cst_32 [1] : vector<8x8xf32> to vector<8xf32>
    %84 = vector.shape_cast %83 : vector<8xf32> to vector<8x1xf32>
    %85 = tpu.reciprocal %84 {approx = true} : vector<8x1xf32> -> vector<8x1xf32>
    %86 = vector.broadcast %85 : vector<8x1xf32> to vector<8x8xf32>
    %87 = arith.mulf %82, %86 : vector<8x8xf32>
    %88 = arith.truncf %87 : vector<8x8xf32> to vector<8x8xbf16>
    %cst_33 = arith.constant dense<0.000000e+00> : vector<8x128xf32>
    %89 = tpu.matmul %88, %74, %cst_33 {dimension_numbers = #tpu.dot_dimension_numbers<[1], [0], [0], [1], [0, 0, 1, 1], [], []>} : vector<8x8xbf16>, vector<8x128xbf16>, vector<8x128xf32> -> vector<8x128xf32>
    %c0_34 = arith.constant 0 : index
    %c128 = arith.constant 128 : index
    %90 = vector.load %arg29[%c0_34, %c128] : memref<16x512xf32, #tpu.memory_space<vmem>>, vector<8x128xf32>
    tpu.vector_store %arg29[%c0_34, %c128], %89 {strides = array<i32>} : memref<16x512xf32, #tpu.memory_space<vmem>>, vector<8x128xf32>,
    %91 = vector.extract_strided_slice %41 {offsets = [0, 256], sizes = [8, 128], strides = [1, 1]} : vector<16x512xf32> to vector<8x128xf32>
    %92 = arith.truncf %91 : vector<8x128xf32> to vector<8x128xbf16>
    %93 = vector.extract_strided_slice %42 {offsets = [0, 256], sizes = [8, 128], strides = [1, 1]} : vector<16x512xf32> to vector<8x128xf32>
    %94 = arith.truncf %93 : vector<8x128xf32> to vector<8x128xbf16>
    %95 = vector.extract_strided_slice %43 {offsets = [0, 256], sizes = [8, 128], strides = [1, 1]} : vector<16x512xf32> to vector<8x128xf32>
    %96 = arith.truncf %95 : vector<8x128xf32> to vector<8x128xbf16>
    %cst_35 = arith.constant dense<0.000000e+00> : vector<8x8xf32>
    %97 = tpu.matmul %92, %94, %cst_35 {dimension_numbers = #tpu.dot_dimension_numbers<[1], [1], [0], [0], [0, 0, 1, 0], [], []>} : vector<8x128xbf16>, vector<8x128xbf16>, vector<8x8xf32> -> vector<8x8xf32>
    %cst_36 = arith.constant -1.000000e+30 : f32
    %98 = vector.broadcast %cst_36 : f32 to vector<8x8xf32>
    %99 = arith.select %46, %97, %98 : vector<8x8xi1>, vector<8x8xf32>
    %cst_37 = arith.constant dense<0xFF800000> : vector<8xf32>
    %100 = vector.multi_reduction <maximumf>, %99, %cst_37 [1] : vector<8x8xf32> to vector<8xf32>
    %101 = vector.shape_cast %100 : vector<8xf32> to vector<8x1xf32>
    %102 = vector.broadcast %101 : vector<8x1xf32> to vector<8x8xf32>
    %103 = arith.subf %99, %102 : vector<8x8xf32>
    %104 = math.exp %103 : vector<8x8xf32>
    %cst_38 = arith.constant dense<0.000000e+00> : vector<8xf32>
    %105 = vector.multi_reduction <add>, %104, %cst_38 [1] : vector<8x8xf32> to vector<8xf32>
    %106 = vector.shape_cast %105 : vector<8xf32> to vector<8x1xf32>
    %107 = tpu.reciprocal %106 {approx = true} : vector<8x1xf32> -> vector<8x1xf32>
    %108 = vector.broadcast %107 : vector<8x1xf32> to vector<8x8xf32>
    %109 = arith.mulf %104, %108 : vector<8x8xf32>
    %110 = arith.truncf %109 : vector<8x8xf32> to vector<8x8xbf16>
    %cst_39 = arith.constant dense<0.000000e+00> : vector<8x128xf32>
    %111 = tpu.matmul %110, %96, %cst_39 {dimension_numbers = #tpu.dot_dimension_numbers<[1], [0], [0], [1], [0, 0, 1, 1], [], []>} : vector<8x8xbf16>, vector<8x128xbf16>, vector<8x128xf32> -> vector<8x128xf32>
    %c0_40 = arith.constant 0 : index
    %c256 = arith.constant 256 : index
    %112 = vector.load %arg29[%c0_40, %c256] : memref<16x512xf32, #tpu.memory_space<vmem>>, vector<8x128xf32>
    tpu.vector_store %arg29[%c0_40, %c256], %111 {strides = array<i32>} : memref<16x512xf32, #tpu.memory_space<vmem>>, vector<8x128xf32>,
    %113 = vector.extract_strided_slice %41 {offsets = [0, 384], sizes = [8, 128], strides = [1, 1]} : vector<16x512xf32> to vector<8x128xf32>
    %114 = arith.truncf %113 : vector<8x128xf32> to vector<8x128xbf16>
    %115 = vector.extract_strided_slice %42 {offsets = [0, 384], sizes = [8, 128], strides = [1, 1]} : vector<16x512xf32> to vector<8x128xf32>
    %116 = arith.truncf %115 : vector<8x128xf32> to vector<8x128xbf16>
    %117 = vector.extract_strided_slice %43 {offsets = [0, 384], sizes = [8, 128], strides = [1, 1]} : vector<16x512xf32> to vector<8x128xf32>
    %118 = arith.truncf %117 : vector<8x128xf32> to vector<8x128xbf16>
    %cst_41 = arith.constant dense<0.000000e+00> : vector<8x8xf32>
    %119 = tpu.matmul %114, %116, %cst_41 {dimension_numbers = #tpu.dot_dimension_numbers<[1], [1], [0], [0], [0, 0, 1, 0], [], []>} : vector<8x128xbf16>, vector<8x128xbf16>, vector<8x8xf32> -> vector<8x8xf32>
    %cst_42 = arith.constant -1.000000e+30 : f32
    %120 = vector.broadcast %cst_42 : f32 to vector<8x8xf32>
    %121 = arith.select %46, %119, %120 : vector<8x8xi1>, vector<8x8xf32>
    %cst_43 = arith.constant dense<0xFF800000> : vector<8xf32>
    %122 = vector.multi_reduction <maximumf>, %121, %cst_43 [1] : vector<8x8xf32> to vector<8xf32>
    %123 = vector.shape_cast %122 : vector<8xf32> to vector<8x1xf32>
    %124 = vector.broadcast %123 : vector<8x1xf32> to vector<8x8xf32>
    %125 = arith.subf %121, %124 : vector<8x8xf32>
    %126 = math.exp %125 : vector<8x8xf32>
    %cst_44 = arith.constant dense<0.000000e+00> : vector<8xf32>
    %127 = vector.multi_reduction <add>, %126, %cst_44 [1] : vector<8x8xf32> to vector<8xf32>
    %128 = vector.shape_cast %127 : vector<8xf32> to vector<8x1xf32>
    %129 = tpu.reciprocal %128 {approx = true} : vector<8x1xf32> -> vector<8x1xf32>
    %130 = vector.broadcast %129 : vector<8x1xf32> to vector<8x8xf32>
    %131 = arith.mulf %126, %130 : vector<8x8xf32>
    %132 = arith.truncf %131 : vector<8x8xf32> to vector<8x8xbf16>
    %cst_45 = arith.constant dense<0.000000e+00> : vector<8x128xf32>
    %133 = tpu.matmul %132, %118, %cst_45 {dimension_numbers = #tpu.dot_dimension_numbers<[1], [0], [0], [1], [0, 0, 1, 1], [], []>} : vector<8x8xbf16>, vector<8x128xbf16>, vector<8x128xf32> -> vector<8x128xf32>
    %c0_46 = arith.constant 0 : index
    %c384 = arith.constant 384 : index
    %134 = vector.load %arg29[%c0_46, %c384] : memref<16x512xf32, #tpu.memory_space<vmem>>, vector<8x128xf32>
    tpu.vector_store %arg29[%c0_46, %c384], %133 {strides = array<i32>} : memref<16x512xf32, #tpu.memory_space<vmem>>, vector<8x128xf32>,
    %135 = vector.extract_strided_slice %41 {offsets = [8, 0], sizes = [8, 128], strides = [1, 1]} : vector<16x512xf32> to vector<8x128xf32>
    %136 = arith.truncf %135 : vector<8x128xf32> to vector<8x128xbf16>
    %137 = vector.extract_strided_slice %42 {offsets = [8, 0], sizes = [8, 128], strides = [1, 1]} : vector<16x512xf32> to vector<8x128xf32>
    %138 = arith.truncf %137 : vector<8x128xf32> to vector<8x128xbf16>
    %139 = vector.extract_strided_slice %43 {offsets = [8, 0], sizes = [8, 128], strides = [1, 1]} : vector<16x512xf32> to vector<8x128xf32>
    %140 = arith.truncf %139 : vector<8x128xf32> to vector<8x128xbf16>
    %cst_47 = arith.constant dense<0.000000e+00> : vector<8x8xf32>
    %141 = tpu.matmul %136, %138, %cst_47 {dimension_numbers = #tpu.dot_dimension_numbers<[1], [1], [0], [0], [0, 0, 1, 0], [], []>} : vector<8x128xbf16>, vector<8x128xbf16>, vector<8x8xf32> -> vector<8x8xf32>
    %cst_48 = arith.constant -1.000000e+30 : f32
    %142 = vector.broadcast %cst_48 : f32 to vector<8x8xf32>
    %143 = arith.select %46, %141, %142 : vector<8x8xi1>, vector<8x8xf32>
    %cst_49 = arith.constant dense<0xFF800000> : vector<8xf32>
    %144 = vector.multi_reduction <maximumf>, %143, %cst_49 [1] : vector<8x8xf32> to vector<8xf32>
    %145 = vector.shape_cast %144 : vector<8xf32> to vector<8x1xf32>
    %146 = vector.broadcast %145 : vector<8x1xf32> to vector<8x8xf32>
    %147 = arith.subf %143, %146 : vector<8x8xf32>
    %148 = math.exp %147 : vector<8x8xf32>
    %cst_50 = arith.constant dense<0.000000e+00> : vector<8xf32>
    %149 = vector.multi_reduction <add>, %148, %cst_50 [1] : vector<8x8xf32> to vector<8xf32>
    %150 = vector.shape_cast %149 : vector<8xf32> to vector<8x1xf32>
    %151 = tpu.reciprocal %150 {approx = true} : vector<8x1xf32> -> vector<8x1xf32>
    %152 = vector.broadcast %151 : vector<8x1xf32> to vector<8x8xf32>
    %153 = arith.mulf %148, %152 : vector<8x8xf32>
    %154 = arith.truncf %153 : vector<8x8xf32> to vector<8x8xbf16>
    %cst_51 = arith.constant dense<0.000000e+00> : vector<8x128xf32>
    %155 = tpu.matmul %154, %140, %cst_51 {dimension_numbers = #tpu.dot_dimension_numbers<[1], [0], [0], [1], [0, 0, 1, 1], [], []>} : vector<8x8xbf16>, vector<8x128xbf16>, vector<8x128xf32> -> vector<8x128xf32>
    %c8 = arith.constant 8 : index
    %c0_52 = arith.constant 0 : index
    %156 = vector.load %arg29[%c8, %c0_52] : memref<16x512xf32, #tpu.memory_space<vmem>>, vector<8x128xf32>
    tpu.vector_store %arg29[%c8, %c0_52], %155 {strides = array<i32>} : memref<16x512xf32, #tpu.memory_space<vmem>>, vector<8x128xf32>,
    %157 = vector.extract_strided_slice %41 {offsets = [8, 128], sizes = [8, 128], strides = [1, 1]} : vector<16x512xf32> to vector<8x128xf32>
    %158 = arith.truncf %157 : vector<8x128xf32> to vector<8x128xbf16>
    %159 = vector.extract_strided_slice %42 {offsets = [8, 128], sizes = [8, 128], strides = [1, 1]} : vector<16x512xf32> to vector<8x128xf32>
    %160 = arith.truncf %159 : vector<8x128xf32> to vector<8x128xbf16>
    %161 = vector.extract_strided_slice %43 {offsets = [8, 128], sizes = [8, 128], strides = [1, 1]} : vector<16x512xf32> to vector<8x128xf32>
    %162 = arith.truncf %161 : vector<8x128xf32> to vector<8x128xbf16>
    %cst_53 = arith.constant dense<0.000000e+00> : vector<8x8xf32>
    %163 = tpu.matmul %158, %160, %cst_53 {dimension_numbers = #tpu.dot_dimension_numbers<[1], [1], [0], [0], [0, 0, 1, 0], [], []>} : vector<8x128xbf16>, vector<8x128xbf16>, vector<8x8xf32> -> vector<8x8xf32>
    %cst_54 = arith.constant -1.000000e+30 : f32
    %164 = vector.broadcast %cst_54 : f32 to vector<8x8xf32>
    %165 = arith.select %46, %163, %164 : vector<8x8xi1>, vector<8x8xf32>
    %cst_55 = arith.constant dense<0xFF800000> : vector<8xf32>
    %166 = vector.multi_reduction <maximumf>, %165, %cst_55 [1] : vector<8x8xf32> to vector<8xf32>
    %167 = vector.shape_cast %166 : vector<8xf32> to vector<8x1xf32>
    %168 = vector.broadcast %167 : vector<8x1xf32> to vector<8x8xf32>
    %169 = arith.subf %165, %168 : vector<8x8xf32>
    %170 = math.exp %169 : vector<8x8xf32>
    %cst_56 = arith.constant dense<0.000000e+00> : vector<8xf32>
    %171 = vector.multi_reduction <add>, %170, %cst_56 [1] : vector<8x8xf32> to vector<8xf32>
    %172 = vector.shape_cast %171 : vector<8xf32> to vector<8x1xf32>
    %173 = tpu.reciprocal %172 {approx = true} : vector<8x1xf32> -> vector<8x1xf32>
    %174 = vector.broadcast %173 : vector<8x1xf32> to vector<8x8xf32>
    %175 = arith.mulf %170, %174 : vector<8x8xf32>
    %176 = arith.truncf %175 : vector<8x8xf32> to vector<8x8xbf16>
    %cst_57 = arith.constant dense<0.000000e+00> : vector<8x128xf32>
    %177 = tpu.matmul %176, %162, %cst_57 {dimension_numbers = #tpu.dot_dimension_numbers<[1], [0], [0], [1], [0, 0, 1, 1], [], []>} : vector<8x8xbf16>, vector<8x128xbf16>, vector<8x128xf32> -> vector<8x128xf32>
    %c8_58 = arith.constant 8 : index
    %c128_59 = arith.constant 128 : index
    %178 = vector.load %arg29[%c8_58, %c128_59] : memref<16x512xf32, #tpu.memory_space<vmem>>, vector<8x128xf32>
    tpu.vector_store %arg29[%c8_58, %c128_59], %177 {strides = array<i32>} : memref<16x512xf32, #tpu.memory_space<vmem>>, vector<8x128xf32>,
    %179 = vector.extract_strided_slice %41 {offsets = [8, 256], sizes = [8, 128], strides = [1, 1]} : vector<16x512xf32> to vector<8x128xf32>
    %180 = arith.truncf %179 : vector<8x128xf32> to vector<8x128xbf16>
    %181 = vector.extract_strided_slice %42 {offsets = [8, 256], sizes = [8, 128], strides = [1, 1]} : vector<16x512xf32> to vector<8x128xf32>
    %182 = arith.truncf %181 : vector<8x128xf32> to vector<8x128xbf16>
    %183 = vector.extract_strided_slice %43 {offsets = [8, 256], sizes = [8, 128], strides = [1, 1]} : vector<16x512xf32> to vector<8x128xf32>
    %184 = arith.truncf %183 : vector<8x128xf32> to vector<8x128xbf16>
    %cst_60 = arith.constant dense<0.000000e+00> : vector<8x8xf32>
    %185 = tpu.matmul %180, %182, %cst_60 {dimension_numbers = #tpu.dot_dimension_numbers<[1], [1], [0], [0], [0, 0, 1, 0], [], []>} : vector<8x128xbf16>, vector<8x128xbf16>, vector<8x8xf32> -> vector<8x8xf32>
    %cst_61 = arith.constant -1.000000e+30 : f32
    %186 = vector.broadcast %cst_61 : f32 to vector<8x8xf32>
    %187 = arith.select %46, %185, %186 : vector<8x8xi1>, vector<8x8xf32>
    %cst_62 = arith.constant dense<0xFF800000> : vector<8xf32>
    %188 = vector.multi_reduction <maximumf>, %187, %cst_62 [1] : vector<8x8xf32> to vector<8xf32>
    %189 = vector.shape_cast %188 : vector<8xf32> to vector<8x1xf32>
    %190 = vector.broadcast %189 : vector<8x1xf32> to vector<8x8xf32>
    %191 = arith.subf %187, %190 : vector<8x8xf32>
    %192 = math.exp %191 : vector<8x8xf32>
    %cst_63 = arith.constant dense<0.000000e+00> : vector<8xf32>
    %193 = vector.multi_reduction <add>, %192, %cst_63 [1] : vector<8x8xf32> to vector<8xf32>
    %194 = vector.shape_cast %193 : vector<8xf32> to vector<8x1xf32>
    %195 = tpu.reciprocal %194 {approx = true} : vector<8x1xf32> -> vector<8x1xf32>
    %196 = vector.broadcast %195 : vector<8x1xf32> to vector<8x8xf32>
    %197 = arith.mulf %192, %196 : vector<8x8xf32>
    %198 = arith.truncf %197 : vector<8x8xf32> to vector<8x8xbf16>
    %cst_64 = arith.constant dense<0.000000e+00> : vector<8x128xf32>
    %199 = tpu.matmul %198, %184, %cst_64 {dimension_numbers = #tpu.dot_dimension_numbers<[1], [0], [0], [1], [0, 0, 1, 1], [], []>} : vector<8x8xbf16>, vector<8x128xbf16>, vector<8x128xf32> -> vector<8x128xf32>
    %c8_65 = arith.constant 8 : index
    %c256_66 = arith.constant 256 : index
    %200 = vector.load %arg29[%c8_65, %c256_66] : memref<16x512xf32, #tpu.memory_space<vmem>>, vector<8x128xf32>
    tpu.vector_store %arg29[%c8_65, %c256_66], %199 {strides = array<i32>} : memref<16x512xf32, #tpu.memory_space<vmem>>, vector<8x128xf32>,
    %201 = vector.extract_strided_slice %41 {offsets = [8, 384], sizes = [8, 128], strides = [1, 1]} : vector<16x512xf32> to vector<8x128xf32>
    %202 = arith.truncf %201 : vector<8x128xf32> to vector<8x128xbf16>
    %203 = vector.extract_strided_slice %42 {offsets = [8, 384], sizes = [8, 128], strides = [1, 1]} : vector<16x512xf32> to vector<8x128xf32>
    %204 = arith.truncf %203 : vector<8x128xf32> to vector<8x128xbf16>
    %205 = vector.extract_strided_slice %43 {offsets = [8, 384], sizes = [8, 128], strides = [1, 1]} : vector<16x512xf32> to vector<8x128xf32>
    %206 = arith.truncf %205 : vector<8x128xf32> to vector<8x128xbf16>
    %cst_67 = arith.constant dense<0.000000e+00> : vector<8x8xf32>
    %207 = tpu.matmul %202, %204, %cst_67 {dimension_numbers = #tpu.dot_dimension_numbers<[1], [1], [0], [0], [0, 0, 1, 0], [], []>} : vector<8x128xbf16>, vector<8x128xbf16>, vector<8x8xf32> -> vector<8x8xf32>
    %cst_68 = arith.constant -1.000000e+30 : f32
    %208 = vector.broadcast %cst_68 : f32 to vector<8x8xf32>
    %209 = arith.select %46, %207, %208 : vector<8x8xi1>, vector<8x8xf32>
    %cst_69 = arith.constant dense<0xFF800000> : vector<8xf32>
    %210 = vector.multi_reduction <maximumf>, %209, %cst_69 [1] : vector<8x8xf32> to vector<8xf32>
    %211 = vector.shape_cast %210 : vector<8xf32> to vector<8x1xf32>
    %212 = vector.broadcast %211 : vector<8x1xf32> to vector<8x8xf32>
    %213 = arith.subf %209, %212 : vector<8x8xf32>
    %214 = math.exp %213 : vector<8x8xf32>
    %cst_70 = arith.constant dense<0.000000e+00> : vector<8xf32>
    %215 = vector.multi_reduction <add>, %214, %cst_70 [1] : vector<8x8xf32> to vector<8xf32>
    %216 = vector.shape_cast %215 : vector<8xf32> to vector<8x1xf32>
    %217 = tpu.reciprocal %216 {approx = true} : vector<8x1xf32> -> vector<8x1xf32>
    %218 = vector.broadcast %217 : vector<8x1xf32> to vector<8x8xf32>
    %219 = arith.mulf %214, %218 : vector<8x8xf32>
    %220 = arith.truncf %219 : vector<8x8xf32> to vector<8x8xbf16>
    %cst_71 = arith.constant dense<0.000000e+00> : vector<8x128xf32>
    %221 = tpu.matmul %220, %206, %cst_71 {dimension_numbers = #tpu.dot_dimension_numbers<[1], [0], [0], [1], [0, 0, 1, 1], [], []>} : vector<8x8xbf16>, vector<8x128xbf16>, vector<8x128xf32> -> vector<8x128xf32>
    %c8_72 = arith.constant 8 : index
    %c384_73 = arith.constant 384 : index
    %222 = vector.load %arg29[%c8_72, %c384_73] : memref<16x512xf32, #tpu.memory_space<vmem>>, vector<8x128xf32>
    tpu.vector_store %arg29[%c8_72, %c384_73], %221 {strides = array<i32>} : memref<16x512xf32, #tpu.memory_space<vmem>>, vector<8x128xf32>,
    %c0_74 = arith.constant 0 : index
    %c0_75 = arith.constant 0 : index
    %223 = vector.load %arg29[%c0_74, %c0_75] : memref<16x512xf32, #tpu.memory_space<vmem>>, vector<16x512xf32>
    %224 = arith.truncf %223 : vector<16x512xf32> to vector<16x512xbf16>
    %c0_76 = arith.constant 0 : index
    %c0_77 = arith.constant 0 : index
    %c0_78 = arith.constant 0 : index
    %225 = vector.load %arg5[%c0_76, %c0_77, %c0_78] : memref<1x512x128xbf16, #tpu.memory_space<vmem>>, vector<1x512x128xbf16>
    %226 = vector.shape_cast %225 : vector<1x512x128xbf16> to vector<512x128xbf16>
    %cst_79 = arith.constant dense<0.000000e+00> : vector<16x128xf32>
    %227 = tpu.matmul %224, %226, %cst_79 {dimension_numbers = #tpu.dot_dimension_numbers<[1], [0], [0], [1], [0, 0, 1, 1], [], []>} : vector<16x512xbf16>, vector<512x128xbf16>, vector<16x128xf32> -> vector<16x128xf32>
    %c0_80 = arith.constant 0 : index
    %c0_81 = arith.constant 0 : index
    %c0_82 = arith.constant 0 : index
    %228 = vector.load %arg6[%c0_80, %c0_81, %c0_82] : memref<1x1x128xf32, #tpu.memory_space<vmem>>, vector<1x1x128xf32>
    %229 = vector.shape_cast %228 : vector<1x1x128xf32> to vector<1x128xf32>
    %230 = vector.broadcast %229 : vector<1x128xf32> to vector<16x128xf32>
    %231 = arith.addf %227, %230 : vector<16x128xf32>
    %232 = arith.addf %3, %231 : vector<16x128xf32>
    %c0_83 = arith.constant 0 : index
    %c0_84 = arith.constant 0 : index
    %c0_85 = arith.constant 0 : index
    %233 = vector.load %arg19[%c0_83, %c0_84, %c0_85] : memref<1x1x128xf32, #tpu.memory_space<vmem>>, vector<1x1x128xf32>
    %234 = vector.shape_cast %233 : vector<1x1x128xf32> to vector<1x128xf32>
    %c0_86 = arith.constant 0 : index
    %c0_87 = arith.constant 0 : index
    %c0_88 = arith.constant 0 : index
    %235 = vector.load %arg20[%c0_86, %c0_87, %c0_88] : memref<1x1x128xf32, #tpu.memory_space<vmem>>, vector<1x1x128xf32>
    %236 = vector.shape_cast %235 : vector<1x1x128xf32> to vector<1x128xf32>
    %cst_89 = arith.constant dense<0.000000e+00> : vector<16xf32>
    %237 = vector.multi_reduction <add>, %232, %cst_89 [1] : vector<16x128xf32> to vector<16xf32>
    %238 = vector.shape_cast %237 : vector<16xf32> to vector<16x1xf32>
    %cst_90 = arith.constant 3.200000e+01 : f32
    %239 = vector.broadcast %cst_90 : f32 to vector<16x1xf32>
    %240 = arith.divf %238, %239 : vector<16x1xf32>
    %241 = vector.broadcast %240 : vector<16x1xf32> to vector<16x128xf32>
    %242 = arith.subf %232, %241 : vector<16x128xf32>
    %243 = arith.mulf %242, %242 : vector<16x128xf32>
    %cst_91 = arith.constant dense<0.000000e+00> : vector<16xf32>
    %244 = vector.multi_reduction <add>, %243, %cst_91 [1] : vector<16x128xf32> to vector<16xf32>
    %245 = vector.shape_cast %244 : vector<16xf32> to vector<16x1xf32>
    %246 = arith.mulf %240, %240 : vector<16x1xf32>
    %cst_92 = arith.constant 9.600000e+01 : f32
    %247 = vector.broadcast %cst_92 : f32 to vector<16x1xf32>
    %248 = arith.mulf %247, %246 : vector<16x1xf32>
    %249 = arith.subf %245, %248 : vector<16x1xf32>
    %cst_93 = arith.constant 3.200000e+01 : f32
    %250 = vector.broadcast %cst_93 : f32 to vector<16x1xf32>
    %251 = arith.divf %249, %250 : vector<16x1xf32>
    %cst_94 = arith.constant 9.99999974E-6 : f32
    %252 = vector.broadcast %cst_94 : f32 to vector<16x1xf32>
    %253 = arith.addf %251, %252 : vector<16x1xf32>
    %254 = math.rsqrt %253 : vector<16x1xf32>
    %255 = vector.broadcast %254 : vector<16x1xf32> to vector<16x128xf32>
    %256 = arith.mulf %242, %255 : vector<16x128xf32>
    %257 = vector.broadcast %234 : vector<1x128xf32> to vector<16x128xf32>
    %258 = arith.mulf %256, %257 : vector<16x128xf32>
    %259 = vector.broadcast %236 : vector<1x128xf32> to vector<16x128xf32>
    %260 = arith.addf %258, %259 : vector<16x128xf32>
    %261 = arith.truncf %260 : vector<16x128xf32> to vector<16x128xbf16>
    %c0_95 = arith.constant 0 : index
    %c0_96 = arith.constant 0 : index
    %c0_97 = arith.constant 0 : index
    %262 = vector.load %arg7[%c0_95, %c0_96, %c0_97] : memref<1x128x512xbf16, #tpu.memory_space<vmem>>, vector<1x128x512xbf16>
    %263 = vector.shape_cast %262 : vector<1x128x512xbf16> to vector<128x512xbf16>
    %cst_98 = arith.constant dense<0.000000e+00> : vector<16x512xf32>
    %264 = tpu.matmul %261, %263, %cst_98 {dimension_numbers = #tpu.dot_dimension_numbers<[1], [0], [0], [1], [0, 0, 1, 1], [], []>} : vector<16x128xbf16>, vector<128x512xbf16>, vector<16x512xf32> -> vector<16x512xf32>
    %c0_99 = arith.constant 0 : index
    %c0_100 = arith.constant 0 : index
    %c0_101 = arith.constant 0 : index
    %265 = vector.load %arg8[%c0_99, %c0_100, %c0_101] : memref<1x1x512xf32, #tpu.memory_space<vmem>>, vector<1x1x512xf32>
    %266 = vector.shape_cast %265 : vector<1x1x512xf32> to vector<1x512xf32>
    %267 = vector.broadcast %266 : vector<1x512xf32> to vector<16x512xf32>
    %268 = arith.addf %264, %267 : vector<16x512xf32>
    %269 = arith.truncf %4 : vector<16x128xf32> to vector<16x128xbf16>
    %c0_102 = arith.constant 0 : index
    %c0_103 = arith.constant 0 : index
    %c0_104 = arith.constant 0 : index
    %270 = vector.load %arg9[%c0_102, %c0_103, %c0_104] : memref<1x128x1024xbf16, #tpu.memory_space<vmem>>, vector<1x128x1024xbf16>
    %271 = vector.shape_cast %270 : vector<1x128x1024xbf16> to vector<128x1024xbf16>
    %cst_105 = arith.constant dense<0.000000e+00> : vector<16x1024xf32>
    %272 = tpu.matmul %269, %271, %cst_105 {dimension_numbers = #tpu.dot_dimension_numbers<[1], [0], [0], [1], [0, 0, 1, 1], [], []>} : vector<16x128xbf16>, vector<128x1024xbf16>, vector<16x1024xf32> -> vector<16x1024xf32>
    %c0_106 = arith.constant 0 : index
    %c0_107 = arith.constant 0 : index
    %c0_108 = arith.constant 0 : index
    %273 = vector.load %arg10[%c0_106, %c0_107, %c0_108] : memref<1x1x1024xf32, #tpu.memory_space<vmem>>, vector<1x1x1024xf32>
    %274 = vector.shape_cast %273 : vector<1x1x1024xf32> to vector<1x1024xf32>
    %275 = vector.broadcast %274 : vector<1x1024xf32> to vector<16x1024xf32>
    %276 = arith.addf %272, %275 : vector<16x1024xf32>
    %277 = vector.extract_strided_slice %276 {offsets = [0, 0], sizes = [16, 512], strides = [1, 1]} : vector<16x1024xf32> to vector<16x512xf32>
    %278 = vector.extract_strided_slice %276 {offsets = [0, 512], sizes = [16, 512], strides = [1, 1]} : vector<16x1024xf32> to vector<16x512xf32>
    %279 = vector.extract_strided_slice %268 {offsets = [0, 0], sizes = [8, 128], strides = [1, 1]} : vector<16x512xf32> to vector<8x128xf32>
    %280 = arith.truncf %279 : vector<8x128xf32> to vector<8x128xbf16>
    %281 = vector.extract_strided_slice %277 {offsets = [0, 0], sizes = [8, 128], strides = [1, 1]} : vector<16x512xf32> to vector<8x128xf32>
    %282 = arith.truncf %281 : vector<8x128xf32> to vector<8x128xbf16>
    %283 = vector.extract_strided_slice %278 {offsets = [0, 0], sizes = [8, 128], strides = [1, 1]} : vector<16x512xf32> to vector<8x128xf32>
    %284 = arith.truncf %283 : vector<8x128xf32> to vector<8x128xbf16>
    %cst_109 = arith.constant dense<0.000000e+00> : vector<8x8xf32>
    %285 = tpu.matmul %280, %282, %cst_109 {dimension_numbers = #tpu.dot_dimension_numbers<[1], [1], [0], [0], [0, 0, 1, 0], [], []>} : vector<8x128xbf16>, vector<8x128xbf16>, vector<8x8xf32> -> vector<8x8xf32>
    %cst_110 = arith.constant dense<0xFF800000> : vector<8xf32>
    %286 = vector.multi_reduction <maximumf>, %285, %cst_110 [1] : vector<8x8xf32> to vector<8xf32>
    %287 = vector.shape_cast %286 : vector<8xf32> to vector<8x1xf32>
    %288 = vector.broadcast %287 : vector<8x1xf32> to vector<8x8xf32>
    %289 = arith.subf %285, %288 : vector<8x8xf32>
    %290 = math.exp %289 : vector<8x8xf32>
    %cst_111 = arith.constant dense<0.000000e+00> : vector<8xf32>
    %291 = vector.multi_reduction <add>, %290, %cst_111 [1] : vector<8x8xf32> to vector<8xf32>
    %292 = vector.shape_cast %291 : vector<8xf32> to vector<8x1xf32>
    %293 = tpu.reciprocal %292 {approx = true} : vector<8x1xf32> -> vector<8x1xf32>
    %294 = vector.broadcast %293 : vector<8x1xf32> to vector<8x8xf32>
    %295 = arith.mulf %290, %294 : vector<8x8xf32>
    %296 = arith.truncf %295 : vector<8x8xf32> to vector<8x8xbf16>
    %cst_112 = arith.constant dense<0.000000e+00> : vector<8x128xf32>
    %297 = tpu.matmul %296, %284, %cst_112 {dimension_numbers = #tpu.dot_dimension_numbers<[1], [0], [0], [1], [0, 0, 1, 1], [], []>} : vector<8x8xbf16>, vector<8x128xbf16>, vector<8x128xf32> -> vector<8x128xf32>
    %c0_113 = arith.constant 0 : index
    %c0_114 = arith.constant 0 : index
    %298 = vector.load %arg29[%c0_113, %c0_114] : memref<16x512xf32, #tpu.memory_space<vmem>>, vector<8x128xf32>
    tpu.vector_store %arg29[%c0_113, %c0_114], %297 {strides = array<i32>} : memref<16x512xf32, #tpu.memory_space<vmem>>, vector<8x128xf32>,
    %299 = vector.extract_strided_slice %268 {offsets = [0, 128], sizes = [8, 128], strides = [1, 1]} : vector<16x512xf32> to vector<8x128xf32>
    %300 = arith.truncf %299 : vector<8x128xf32> to vector<8x128xbf16>
    %301 = vector.extract_strided_slice %277 {offsets = [0, 128], sizes = [8, 128], strides = [1, 1]} : vector<16x512xf32> to vector<8x128xf32>
    %302 = arith.truncf %301 : vector<8x128xf32> to vector<8x128xbf16>
    %303 = vector.extract_strided_slice %278 {offsets = [0, 128], sizes = [8, 128], strides = [1, 1]} : vector<16x512xf32> to vector<8x128xf32>
    %304 = arith.truncf %303 : vector<8x128xf32> to vector<8x128xbf16>
    %cst_115 = arith.constant dense<0.000000e+00> : vector<8x8xf32>
    %305 = tpu.matmul %300, %302, %cst_115 {dimension_numbers = #tpu.dot_dimension_numbers<[1], [1], [0], [0], [0, 0, 1, 0], [], []>} : vector<8x128xbf16>, vector<8x128xbf16>, vector<8x8xf32> -> vector<8x8xf32>
    %cst_116 = arith.constant dense<0xFF800000> : vector<8xf32>
    %306 = vector.multi_reduction <maximumf>, %305, %cst_116 [1] : vector<8x8xf32> to vector<8xf32>
    %307 = vector.shape_cast %306 : vector<8xf32> to vector<8x1xf32>
    %308 = vector.broadcast %307 : vector<8x1xf32> to vector<8x8xf32>
    %309 = arith.subf %305, %308 : vector<8x8xf32>
    %310 = math.exp %309 : vector<8x8xf32>
    %cst_117 = arith.constant dense<0.000000e+00> : vector<8xf32>
    %311 = vector.multi_reduction <add>, %310, %cst_117 [1] : vector<8x8xf32> to vector<8xf32>
    %312 = vector.shape_cast %311 : vector<8xf32> to vector<8x1xf32>
    %313 = tpu.reciprocal %312 {approx = true} : vector<8x1xf32> -> vector<8x1xf32>
    %314 = vector.broadcast %313 : vector<8x1xf32> to vector<8x8xf32>
    %315 = arith.mulf %310, %314 : vector<8x8xf32>
    %316 = arith.truncf %315 : vector<8x8xf32> to vector<8x8xbf16>
    %cst_118 = arith.constant dense<0.000000e+00> : vector<8x128xf32>
    %317 = tpu.matmul %316, %304, %cst_118 {dimension_numbers = #tpu.dot_dimension_numbers<[1], [0], [0], [1], [0, 0, 1, 1], [], []>} : vector<8x8xbf16>, vector<8x128xbf16>, vector<8x128xf32> -> vector<8x128xf32>
    %c0_119 = arith.constant 0 : index
    %c128_120 = arith.constant 128 : index
    %318 = vector.load %arg29[%c0_119, %c128_120] : memref<16x512xf32, #tpu.memory_space<vmem>>, vector<8x128xf32>
    tpu.vector_store %arg29[%c0_119, %c128_120], %317 {strides = array<i32>} : memref<16x512xf32, #tpu.memory_space<vmem>>, vector<8x128xf32>,
    %319 = vector.extract_strided_slice %268 {offsets = [0, 256], sizes = [8, 128], strides = [1, 1]} : vector<16x512xf32> to vector<8x128xf32>
    %320 = arith.truncf %319 : vector<8x128xf32> to vector<8x128xbf16>
    %321 = vector.extract_strided_slice %277 {offsets = [0, 256], sizes = [8, 128], strides = [1, 1]} : vector<16x512xf32> to vector<8x128xf32>
    %322 = arith.truncf %321 : vector<8x128xf32> to vector<8x128xbf16>
    %323 = vector.extract_strided_slice %278 {offsets = [0, 256], sizes = [8, 128], strides = [1, 1]} : vector<16x512xf32> to vector<8x128xf32>
    %324 = arith.truncf %323 : vector<8x128xf32> to vector<8x128xbf16>
    %cst_121 = arith.constant dense<0.000000e+00> : vector<8x8xf32>
    %325 = tpu.matmul %320, %322, %cst_121 {dimension_numbers = #tpu.dot_dimension_numbers<[1], [1], [0], [0], [0, 0, 1, 0], [], []>} : vector<8x128xbf16>, vector<8x128xbf16>, vector<8x8xf32> -> vector<8x8xf32>
    %cst_122 = arith.constant dense<0xFF800000> : vector<8xf32>
    %326 = vector.multi_reduction <maximumf>, %325, %cst_122 [1] : vector<8x8xf32> to vector<8xf32>
    %327 = vector.shape_cast %326 : vector<8xf32> to vector<8x1xf32>
    %328 = vector.broadcast %327 : vector<8x1xf32> to vector<8x8xf32>
    %329 = arith.subf %325, %328 : vector<8x8xf32>
    %330 = math.exp %329 : vector<8x8xf32>
    %cst_123 = arith.constant dense<0.000000e+00> : vector<8xf32>
    %331 = vector.multi_reduction <add>, %330, %cst_123 [1] : vector<8x8xf32> to vector<8xf32>
    %332 = vector.shape_cast %331 : vector<8xf32> to vector<8x1xf32>
    %333 = tpu.reciprocal %332 {approx = true} : vector<8x1xf32> -> vector<8x1xf32>
    %334 = vector.broadcast %333 : vector<8x1xf32> to vector<8x8xf32>
    %335 = arith.mulf %330, %334 : vector<8x8xf32>
    %336 = arith.truncf %335 : vector<8x8xf32> to vector<8x8xbf16>
    %cst_124 = arith.constant dense<0.000000e+00> : vector<8x128xf32>
    %337 = tpu.matmul %336, %324, %cst_124 {dimension_numbers = #tpu.dot_dimension_numbers<[1], [0], [0], [1], [0, 0, 1, 1], [], []>} : vector<8x8xbf16>, vector<8x128xbf16>, vector<8x128xf32> -> vector<8x128xf32>
    %c0_125 = arith.constant 0 : index
    %c256_126 = arith.constant 256 : index
    %338 = vector.load %arg29[%c0_125, %c256_126] : memref<16x512xf32, #tpu.memory_space<vmem>>, vector<8x128xf32>
    tpu.vector_store %arg29[%c0_125, %c256_126], %337 {strides = array<i32>} : memref<16x512xf32, #tpu.memory_space<vmem>>, vector<8x128xf32>,
    %339 = vector.extract_strided_slice %268 {offsets = [0, 384], sizes = [8, 128], strides = [1, 1]} : vector<16x512xf32> to vector<8x128xf32>
    %340 = arith.truncf %339 : vector<8x128xf32> to vector<8x128xbf16>
    %341 = vector.extract_strided_slice %277 {offsets = [0, 384], sizes = [8, 128], strides = [1, 1]} : vector<16x512xf32> to vector<8x128xf32>
    %342 = arith.truncf %341 : vector<8x128xf32> to vector<8x128xbf16>
    %343 = vector.extract_strided_slice %278 {offsets = [0, 384], sizes = [8, 128], strides = [1, 1]} : vector<16x512xf32> to vector<8x128xf32>
    %344 = arith.truncf %343 : vector<8x128xf32> to vector<8x128xbf16>
    %cst_127 = arith.constant dense<0.000000e+00> : vector<8x8xf32>
    %345 = tpu.matmul %340, %342, %cst_127 {dimension_numbers = #tpu.dot_dimension_numbers<[1], [1], [0], [0], [0, 0, 1, 0], [], []>} : vector<8x128xbf16>, vector<8x128xbf16>, vector<8x8xf32> -> vector<8x8xf32>
    %cst_128 = arith.constant dense<0xFF800000> : vector<8xf32>
    %346 = vector.multi_reduction <maximumf>, %345, %cst_128 [1] : vector<8x8xf32> to vector<8xf32>
    %347 = vector.shape_cast %346 : vector<8xf32> to vector<8x1xf32>
    %348 = vector.broadcast %347 : vector<8x1xf32> to vector<8x8xf32>
    %349 = arith.subf %345, %348 : vector<8x8xf32>
    %350 = math.exp %349 : vector<8x8xf32>
    %cst_129 = arith.constant dense<0.000000e+00> : vector<8xf32>
    %351 = vector.multi_reduction <add>, %350, %cst_129 [1] : vector<8x8xf32> to vector<8xf32>
    %352 = vector.shape_cast %351 : vector<8xf32> to vector<8x1xf32>
    %353 = tpu.reciprocal %352 {approx = true} : vector<8x1xf32> -> vector<8x1xf32>
    %354 = vector.broadcast %353 : vector<8x1xf32> to vector<8x8xf32>
    %355 = arith.mulf %350, %354 : vector<8x8xf32>
    %356 = arith.truncf %355 : vector<8x8xf32> to vector<8x8xbf16>
    %cst_130 = arith.constant dense<0.000000e+00> : vector<8x128xf32>
    %357 = tpu.matmul %356, %344, %cst_130 {dimension_numbers = #tpu.dot_dimension_numbers<[1], [0], [0], [1], [0, 0, 1, 1], [], []>} : vector<8x8xbf16>, vector<8x128xbf16>, vector<8x128xf32> -> vector<8x128xf32>
    %c0_131 = arith.constant 0 : index
    %c384_132 = arith.constant 384 : index
    %358 = vector.load %arg29[%c0_131, %c384_132] : memref<16x512xf32, #tpu.memory_space<vmem>>, vector<8x128xf32>
    tpu.vector_store %arg29[%c0_131, %c384_132], %357 {strides = array<i32>} : memref<16x512xf32, #tpu.memory_space<vmem>>, vector<8x128xf32>,
    %359 = vector.extract_strided_slice %268 {offsets = [8, 0], sizes = [8, 128], strides = [1, 1]} : vector<16x512xf32> to vector<8x128xf32>
    %360 = arith.truncf %359 : vector<8x128xf32> to vector<8x128xbf16>
    %361 = vector.extract_strided_slice %277 {offsets = [8, 0], sizes = [8, 128], strides = [1, 1]} : vector<16x512xf32> to vector<8x128xf32>
    %362 = arith.truncf %361 : vector<8x128xf32> to vector<8x128xbf16>
    %363 = vector.extract_strided_slice %278 {offsets = [8, 0], sizes = [8, 128], strides = [1, 1]} : vector<16x512xf32> to vector<8x128xf32>
    %364 = arith.truncf %363 : vector<8x128xf32> to vector<8x128xbf16>
    %cst_133 = arith.constant dense<0.000000e+00> : vector<8x8xf32>
    %365 = tpu.matmul %360, %362, %cst_133 {dimension_numbers = #tpu.dot_dimension_numbers<[1], [1], [0], [0], [0, 0, 1, 0], [], []>} : vector<8x128xbf16>, vector<8x128xbf16>, vector<8x8xf32> -> vector<8x8xf32>
    %cst_134 = arith.constant dense<0xFF800000> : vector<8xf32>
    %366 = vector.multi_reduction <maximumf>, %365, %cst_134 [1] : vector<8x8xf32> to vector<8xf32>
    %367 = vector.shape_cast %366 : vector<8xf32> to vector<8x1xf32>
    %368 = vector.broadcast %367 : vector<8x1xf32> to vector<8x8xf32>
    %369 = arith.subf %365, %368 : vector<8x8xf32>
    %370 = math.exp %369 : vector<8x8xf32>
    %cst_135 = arith.constant dense<0.000000e+00> : vector<8xf32>
    %371 = vector.multi_reduction <add>, %370, %cst_135 [1] : vector<8x8xf32> to vector<8xf32>
    %372 = vector.shape_cast %371 : vector<8xf32> to vector<8x1xf32>
    %373 = tpu.reciprocal %372 {approx = true} : vector<8x1xf32> -> vector<8x1xf32>
    %374 = vector.broadcast %373 : vector<8x1xf32> to vector<8x8xf32>
    %375 = arith.mulf %370, %374 : vector<8x8xf32>
    %376 = arith.truncf %375 : vector<8x8xf32> to vector<8x8xbf16>
    %cst_136 = arith.constant dense<0.000000e+00> : vector<8x128xf32>
    %377 = tpu.matmul %376, %364, %cst_136 {dimension_numbers = #tpu.dot_dimension_numbers<[1], [0], [0], [1], [0, 0, 1, 1], [], []>} : vector<8x8xbf16>, vector<8x128xbf16>, vector<8x128xf32> -> vector<8x128xf32>
    %c8_137 = arith.constant 8 : index
    %c0_138 = arith.constant 0 : index
    %378 = vector.load %arg29[%c8_137, %c0_138] : memref<16x512xf32, #tpu.memory_space<vmem>>, vector<8x128xf32>
    tpu.vector_store %arg29[%c8_137, %c0_138], %377 {strides = array<i32>} : memref<16x512xf32, #tpu.memory_space<vmem>>, vector<8x128xf32>,
    %379 = vector.extract_strided_slice %268 {offsets = [8, 128], sizes = [8, 128], strides = [1, 1]} : vector<16x512xf32> to vector<8x128xf32>
    %380 = arith.truncf %379 : vector<8x128xf32> to vector<8x128xbf16>
    %381 = vector.extract_strided_slice %277 {offsets = [8, 128], sizes = [8, 128], strides = [1, 1]} : vector<16x512xf32> to vector<8x128xf32>
    %382 = arith.truncf %381 : vector<8x128xf32> to vector<8x128xbf16>
    %383 = vector.extract_strided_slice %278 {offsets = [8, 128], sizes = [8, 128], strides = [1, 1]} : vector<16x512xf32> to vector<8x128xf32>
    %384 = arith.truncf %383 : vector<8x128xf32> to vector<8x128xbf16>
    %cst_139 = arith.constant dense<0.000000e+00> : vector<8x8xf32>
    %385 = tpu.matmul %380, %382, %cst_139 {dimension_numbers = #tpu.dot_dimension_numbers<[1], [1], [0], [0], [0, 0, 1, 0], [], []>} : vector<8x128xbf16>, vector<8x128xbf16>, vector<8x8xf32> -> vector<8x8xf32>
    %cst_140 = arith.constant dense<0xFF800000> : vector<8xf32>
    %386 = vector.multi_reduction <maximumf>, %385, %cst_140 [1] : vector<8x8xf32> to vector<8xf32>
    %387 = vector.shape_cast %386 : vector<8xf32> to vector<8x1xf32>
    %388 = vector.broadcast %387 : vector<8x1xf32> to vector<8x8xf32>
    %389 = arith.subf %385, %388 : vector<8x8xf32>
    %390 = math.exp %389 : vector<8x8xf32>
    %cst_141 = arith.constant dense<0.000000e+00> : vector<8xf32>
    %391 = vector.multi_reduction <add>, %390, %cst_141 [1] : vector<8x8xf32> to vector<8xf32>
    %392 = vector.shape_cast %391 : vector<8xf32> to vector<8x1xf32>
    %393 = tpu.reciprocal %392 {approx = true} : vector<8x1xf32> -> vector<8x1xf32>
    %394 = vector.broadcast %393 : vector<8x1xf32> to vector<8x8xf32>
    %395 = arith.mulf %390, %394 : vector<8x8xf32>
    %396 = arith.truncf %395 : vector<8x8xf32> to vector<8x8xbf16>
    %cst_142 = arith.constant dense<0.000000e+00> : vector<8x128xf32>
    %397 = tpu.matmul %396, %384, %cst_142 {dimension_numbers = #tpu.dot_dimension_numbers<[1], [0], [0], [1], [0, 0, 1, 1], [], []>} : vector<8x8xbf16>, vector<8x128xbf16>, vector<8x128xf32> -> vector<8x128xf32>
    %c8_143 = arith.constant 8 : index
    %c128_144 = arith.constant 128 : index
    %398 = vector.load %arg29[%c8_143, %c128_144] : memref<16x512xf32, #tpu.memory_space<vmem>>, vector<8x128xf32>
    tpu.vector_store %arg29[%c8_143, %c128_144], %397 {strides = array<i32>} : memref<16x512xf32, #tpu.memory_space<vmem>>, vector<8x128xf32>,
    %399 = vector.extract_strided_slice %268 {offsets = [8, 256], sizes = [8, 128], strides = [1, 1]} : vector<16x512xf32> to vector<8x128xf32>
    %400 = arith.truncf %399 : vector<8x128xf32> to vector<8x128xbf16>
    %401 = vector.extract_strided_slice %277 {offsets = [8, 256], sizes = [8, 128], strides = [1, 1]} : vector<16x512xf32> to vector<8x128xf32>
    %402 = arith.truncf %401 : vector<8x128xf32> to vector<8x128xbf16>
    %403 = vector.extract_strided_slice %278 {offsets = [8, 256], sizes = [8, 128], strides = [1, 1]} : vector<16x512xf32> to vector<8x128xf32>
    %404 = arith.truncf %403 : vector<8x128xf32> to vector<8x128xbf16>
    %cst_145 = arith.constant dense<0.000000e+00> : vector<8x8xf32>
    %405 = tpu.matmul %400, %402, %cst_145 {dimension_numbers = #tpu.dot_dimension_numbers<[1], [1], [0], [0], [0, 0, 1, 0], [], []>} : vector<8x128xbf16>, vector<8x128xbf16>, vector<8x8xf32> -> vector<8x8xf32>
    %cst_146 = arith.constant dense<0xFF800000> : vector<8xf32>
    %406 = vector.multi_reduction <maximumf>, %405, %cst_146 [1] : vector<8x8xf32> to vector<8xf32>
    %407 = vector.shape_cast %406 : vector<8xf32> to vector<8x1xf32>
    %408 = vector.broadcast %407 : vector<8x1xf32> to vector<8x8xf32>
    %409 = arith.subf %405, %408 : vector<8x8xf32>
    %410 = math.exp %409 : vector<8x8xf32>
    %cst_147 = arith.constant dense<0.000000e+00> : vector<8xf32>
    %411 = vector.multi_reduction <add>, %410, %cst_147 [1] : vector<8x8xf32> to vector<8xf32>
    %412 = vector.shape_cast %411 : vector<8xf32> to vector<8x1xf32>
    %413 = tpu.reciprocal %412 {approx = true} : vector<8x1xf32> -> vector<8x1xf32>
    %414 = vector.broadcast %413 : vector<8x1xf32> to vector<8x8xf32>
    %415 = arith.mulf %410, %414 : vector<8x8xf32>
    %416 = arith.truncf %415 : vector<8x8xf32> to vector<8x8xbf16>
    %cst_148 = arith.constant dense<0.000000e+00> : vector<8x128xf32>
    %417 = tpu.matmul %416, %404, %cst_148 {dimension_numbers = #tpu.dot_dimension_numbers<[1], [0], [0], [1], [0, 0, 1, 1], [], []>} : vector<8x8xbf16>, vector<8x128xbf16>, vector<8x128xf32> -> vector<8x128xf32>
    %c8_149 = arith.constant 8 : index
    %c256_150 = arith.constant 256 : index
    %418 = vector.load %arg29[%c8_149, %c256_150] : memref<16x512xf32, #tpu.memory_space<vmem>>, vector<8x128xf32>
    tpu.vector_store %arg29[%c8_149, %c256_150], %417 {strides = array<i32>} : memref<16x512xf32, #tpu.memory_space<vmem>>, vector<8x128xf32>,
    %419 = vector.extract_strided_slice %268 {offsets = [8, 384], sizes = [8, 128], strides = [1, 1]} : vector<16x512xf32> to vector<8x128xf32>
    %420 = arith.truncf %419 : vector<8x128xf32> to vector<8x128xbf16>
    %421 = vector.extract_strided_slice %277 {offsets = [8, 384], sizes = [8, 128], strides = [1, 1]} : vector<16x512xf32> to vector<8x128xf32>
    %422 = arith.truncf %421 : vector<8x128xf32> to vector<8x128xbf16>
    %423 = vector.extract_strided_slice %278 {offsets = [8, 384], sizes = [8, 128], strides = [1, 1]} : vector<16x512xf32> to vector<8x128xf32>
    %424 = arith.truncf %423 : vector<8x128xf32> to vector<8x128xbf16>
    %cst_151 = arith.constant dense<0.000000e+00> : vector<8x8xf32>
    %425 = tpu.matmul %420, %422, %cst_151 {dimension_numbers = #tpu.dot_dimension_numbers<[1], [1], [0], [0], [0, 0, 1, 0], [], []>} : vector<8x128xbf16>, vector<8x128xbf16>, vector<8x8xf32> -> vector<8x8xf32>
    %cst_152 = arith.constant dense<0xFF800000> : vector<8xf32>
    %426 = vector.multi_reduction <maximumf>, %425, %cst_152 [1] : vector<8x8xf32> to vector<8xf32>
    %427 = vector.shape_cast %426 : vector<8xf32> to vector<8x1xf32>
    %428 = vector.broadcast %427 : vector<8x1xf32> to vector<8x8xf32>
    %429 = arith.subf %425, %428 : vector<8x8xf32>
    %430 = math.exp %429 : vector<8x8xf32>
    %cst_153 = arith.constant dense<0.000000e+00> : vector<8xf32>
    %431 = vector.multi_reduction <add>, %430, %cst_153 [1] : vector<8x8xf32> to vector<8xf32>
    %432 = vector.shape_cast %431 : vector<8xf32> to vector<8x1xf32>
    %433 = tpu.reciprocal %432 {approx = true} : vector<8x1xf32> -> vector<8x1xf32>
    %434 = vector.broadcast %433 : vector<8x1xf32> to vector<8x8xf32>
    %435 = arith.mulf %430, %434 : vector<8x8xf32>
    %436 = arith.truncf %435 : vector<8x8xf32> to vector<8x8xbf16>
    %cst_154 = arith.constant dense<0.000000e+00> : vector<8x128xf32>
    %437 = tpu.matmul %436, %424, %cst_154 {dimension_numbers = #tpu.dot_dimension_numbers<[1], [0], [0], [1], [0, 0, 1, 1], [], []>} : vector<8x8xbf16>, vector<8x128xbf16>, vector<8x128xf32> -> vector<8x128xf32>
    %c8_155 = arith.constant 8 : index
    %c384_156 = arith.constant 384 : index
    %438 = vector.load %arg29[%c8_155, %c384_156] : memref<16x512xf32, #tpu.memory_space<vmem>>, vector<8x128xf32>
    tpu.vector_store %arg29[%c8_155, %c384_156], %437 {strides = array<i32>} : memref<16x512xf32, #tpu.memory_space<vmem>>, vector<8x128xf32>,
    %c0_157 = arith.constant 0 : index
    %c0_158 = arith.constant 0 : index
    %439 = vector.load %arg29[%c0_157, %c0_158] : memref<16x512xf32, #tpu.memory_space<vmem>>, vector<16x512xf32>
    %440 = arith.truncf %439 : vector<16x512xf32> to vector<16x512xbf16>
    %c0_159 = arith.constant 0 : index
    %c0_160 = arith.constant 0 : index
    %c0_161 = arith.constant 0 : index
    %441 = vector.load %arg11[%c0_159, %c0_160, %c0_161] : memref<1x512x128xbf16, #tpu.memory_space<vmem>>, vector<1x512x128xbf16>
    %442 = vector.shape_cast %441 : vector<1x512x128xbf16> to vector<512x128xbf16>
    %cst_162 = arith.constant dense<0.000000e+00> : vector<16x128xf32>
    %443 = tpu.matmul %440, %442, %cst_162 {dimension_numbers = #tpu.dot_dimension_numbers<[1], [0], [0], [1], [0, 0, 1, 1], [], []>} : vector<16x512xbf16>, vector<512x128xbf16>, vector<16x128xf32> -> vector<16x128xf32>
    %c0_163 = arith.constant 0 : index
    %c0_164 = arith.constant 0 : index
    %c0_165 = arith.constant 0 : index
    %444 = vector.load %arg12[%c0_163, %c0_164, %c0_165] : memref<1x1x128xf32, #tpu.memory_space<vmem>>, vector<1x1x128xf32>
    %445 = vector.shape_cast %444 : vector<1x1x128xf32> to vector<1x128xf32>
    %446 = vector.broadcast %445 : vector<1x128xf32> to vector<16x128xf32>
    %447 = arith.addf %443, %446 : vector<16x128xf32>
    %448 = arith.addf %232, %447 : vector<16x128xf32>
    %c0_166 = arith.constant 0 : index
    %c0_167 = arith.constant 0 : index
    %c0_168 = arith.constant 0 : index
    %449 = vector.load %arg21[%c0_166, %c0_167, %c0_168] : memref<1x1x128xf32, #tpu.memory_space<vmem>>, vector<1x1x128xf32>
    %450 = vector.shape_cast %449 : vector<1x1x128xf32> to vector<1x128xf32>
    %c0_169 = arith.constant 0 : index
    %c0_170 = arith.constant 0 : index
    %c0_171 = arith.constant 0 : index
    %451 = vector.load %arg22[%c0_169, %c0_170, %c0_171] : memref<1x1x128xf32, #tpu.memory_space<vmem>>, vector<1x1x128xf32>
    %452 = vector.shape_cast %451 : vector<1x1x128xf32> to vector<1x128xf32>
    %cst_172 = arith.constant dense<0.000000e+00> : vector<16xf32>
    %453 = vector.multi_reduction <add>, %448, %cst_172 [1] : vector<16x128xf32> to vector<16xf32>
    %454 = vector.shape_cast %453 : vector<16xf32> to vector<16x1xf32>
    %cst_173 = arith.constant 3.200000e+01 : f32
    %455 = vector.broadcast %cst_173 : f32 to vector<16x1xf32>
    %456 = arith.divf %454, %455 : vector<16x1xf32>
    %457 = vector.broadcast %456 : vector<16x1xf32> to vector<16x128xf32>
    %458 = arith.subf %448, %457 : vector<16x128xf32>
    %459 = arith.mulf %458, %458 : vector<16x128xf32>
    %cst_174 = arith.constant dense<0.000000e+00> : vector<16xf32>
    %460 = vector.multi_reduction <add>, %459, %cst_174 [1] : vector<16x128xf32> to vector<16xf32>
    %461 = vector.shape_cast %460 : vector<16xf32> to vector<16x1xf32>
    %462 = arith.mulf %456, %456 : vector<16x1xf32>
    %cst_175 = arith.constant 9.600000e+01 : f32
    %463 = vector.broadcast %cst_175 : f32 to vector<16x1xf32>
    %464 = arith.mulf %463, %462 : vector<16x1xf32>
    %465 = arith.subf %461, %464 : vector<16x1xf32>
    %cst_176 = arith.constant 3.200000e+01 : f32
    %466 = vector.broadcast %cst_176 : f32 to vector<16x1xf32>
    %467 = arith.divf %465, %466 : vector<16x1xf32>
    %cst_177 = arith.constant 9.99999974E-6 : f32
    %468 = vector.broadcast %cst_177 : f32 to vector<16x1xf32>
    %469 = arith.addf %467, %468 : vector<16x1xf32>
    %470 = math.rsqrt %469 : vector<16x1xf32>
    %471 = vector.broadcast %470 : vector<16x1xf32> to vector<16x128xf32>
    %472 = arith.mulf %458, %471 : vector<16x128xf32>
    %473 = vector.broadcast %450 : vector<1x128xf32> to vector<16x128xf32>
    %474 = arith.mulf %472, %473 : vector<16x128xf32>
    %475 = vector.broadcast %452 : vector<1x128xf32> to vector<16x128xf32>
    %476 = arith.addf %474, %475 : vector<16x128xf32>
    %477 = arith.truncf %476 : vector<16x128xf32> to vector<16x128xbf16>
    %c0_178 = arith.constant 0 : index
    %c0_179 = arith.constant 0 : index
    %c0_180 = arith.constant 0 : index
    %478 = vector.load %arg13[%c0_178, %c0_179, %c0_180] : memref<1x128x128xbf16, #tpu.memory_space<vmem>>, vector<1x128x128xbf16>
    %479 = vector.shape_cast %478 : vector<1x128x128xbf16> to vector<128x128xbf16>
    %cst_181 = arith.constant dense<0.000000e+00> : vector<16x128xf32>
    %480 = tpu.matmul %477, %479, %cst_181 {dimension_numbers = #tpu.dot_dimension_numbers<[1], [0], [0], [1], [0, 0, 1, 1], [], []>} : vector<16x128xbf16>, vector<128x128xbf16>, vector<16x128xf32> -> vector<16x128xf32>
    %c0_182 = arith.constant 0 : index
    %c0_183 = arith.constant 0 : index
    %c0_184 = arith.constant 0 : index
    %481 = vector.load %arg14[%c0_182, %c0_183, %c0_184] : memref<1x1x128xf32, #tpu.memory_space<vmem>>, vector<1x1x128xf32>
    %482 = vector.shape_cast %481 : vector<1x1x128xf32> to vector<1x128xf32>
    %483 = vector.broadcast %482 : vector<1x128xf32> to vector<16x128xf32>
    %484 = arith.addf %480, %483 : vector<16x128xf32>
    %cst_185 = arith.constant 0.000000e+00 : f32
    %485 = vector.broadcast %cst_185 : f32 to vector<16x128xf32>
    %486 = arith.maximumf %484, %485 : vector<16x128xf32>
    %487 = arith.truncf %486 : vector<16x128xf32> to vector<16x128xbf16>
    %c0_186 = arith.constant 0 : index
    %c0_187 = arith.constant 0 : index
    %c0_188 = arith.constant 0 : index
    %488 = vector.load %arg15[%c0_186, %c0_187, %c0_188] : memref<1x128x128xbf16, #tpu.memory_space<vmem>>, vector<1x128x128xbf16>
    %489 = vector.shape_cast %488 : vector<1x128x128xbf16> to vector<128x128xbf16>
    %cst_189 = arith.constant dense<0.000000e+00> : vector<16x128xf32>
    %490 = tpu.matmul %487, %489, %cst_189 {dimension_numbers = #tpu.dot_dimension_numbers<[1], [0], [0], [1], [0, 0, 1, 1], [], []>} : vector<16x128xbf16>, vector<128x128xbf16>, vector<16x128xf32> -> vector<16x128xf32>
    %c0_190 = arith.constant 0 : index
    %c0_191 = arith.constant 0 : index
    %c0_192 = arith.constant 0 : index
    %491 = vector.load %arg16[%c0_190, %c0_191, %c0_192] : memref<1x1x128xf32, #tpu.memory_space<vmem>>, vector<1x1x128xf32>
    %492 = vector.shape_cast %491 : vector<1x1x128xf32> to vector<1x128xf32>
    %493 = vector.broadcast %492 : vector<1x128xf32> to vector<16x128xf32>
    %494 = arith.addf %490, %493 : vector<16x128xf32>
    %495 = arith.addf %448, %494 : vector<16x128xf32>
    %c0_193 = arith.constant 0 : index
    %c0_194 = arith.constant 0 : index
    %496 = vector.load %arg28[%c0_193, %c0_194] : memref<16x128xf32, #tpu.memory_space<vmem>>, vector<16x128xf32>
    tpu.vector_store %arg28[%c0_193, %c0_194], %495 {strides = array<i32>} : memref<16x128xf32, #tpu.memory_space<vmem>>, vector<16x128xf32>,
    %c0_i32_195 = arith.constant 0 : i32
    %497 = arith.cmpi eq, %arg0, %c0_i32_195 : i32
    %498 = arith.extui %497 : i1 to i32
    %c0_i32_196 = arith.constant 0 : i32
    %499 = arith.cmpi ne, %498, %c0_i32_196 : i32
    scf.if %499 {
      %c0_197 = arith.constant 0 : index
      %c0_198 = arith.constant 0 : index
      %500 = vector.load %arg23[%c0_197, %c0_198] : memref<1x128xf32, #tpu.memory_space<vmem>>, vector<1x128xf32>
      %c0_199 = arith.constant 0 : index
      %c0_200 = arith.constant 0 : index
      %501 = vector.load %arg24[%c0_199, %c0_200] : memref<1x128xf32, #tpu.memory_space<vmem>>, vector<1x128xf32>
      %cst_201 = arith.constant dense<0.000000e+00> : vector<16xf32>
      %502 = vector.multi_reduction <add>, %495, %cst_201 [1] : vector<16x128xf32> to vector<16xf32>
      %503 = vector.shape_cast %502 : vector<16xf32> to vector<16x1xf32>
      %cst_202 = arith.constant 3.200000e+01 : f32
      %504 = vector.broadcast %cst_202 : f32 to vector<16x1xf32>
      %505 = arith.divf %503, %504 : vector<16x1xf32>
      %506 = vector.broadcast %505 : vector<16x1xf32> to vector<16x128xf32>
      %507 = arith.subf %495, %506 : vector<16x128xf32>
      %508 = arith.mulf %507, %507 : vector<16x128xf32>
      %cst_203 = arith.constant dense<0.000000e+00> : vector<16xf32>
      %509 = vector.multi_reduction <add>, %508, %cst_203 [1] : vector<16x128xf32> to vector<16xf32>
      %510 = vector.shape_cast %509 : vector<16xf32> to vector<16x1xf32>
      %511 = arith.mulf %505, %505 : vector<16x1xf32>
      %cst_204 = arith.constant 9.600000e+01 : f32
      %512 = vector.broadcast %cst_204 : f32 to vector<16x1xf32>
      %513 = arith.mulf %512, %511 : vector<16x1xf32>
      %514 = arith.subf %510, %513 : vector<16x1xf32>
      %cst_205 = arith.constant 3.200000e+01 : f32
      %515 = vector.broadcast %cst_205 : f32 to vector<16x1xf32>
      %516 = arith.divf %514, %515 : vector<16x1xf32>
      %cst_206 = arith.constant 9.99999974E-6 : f32
      %517 = vector.broadcast %cst_206 : f32 to vector<16x1xf32>
      %518 = arith.addf %516, %517 : vector<16x1xf32>
      %519 = math.rsqrt %518 : vector<16x1xf32>
      %520 = vector.broadcast %519 : vector<16x1xf32> to vector<16x128xf32>
      %521 = arith.mulf %507, %520 : vector<16x128xf32>
      %522 = vector.broadcast %500 : vector<1x128xf32> to vector<16x128xf32>
      %523 = arith.mulf %521, %522 : vector<16x128xf32>
      %524 = vector.broadcast %501 : vector<1x128xf32> to vector<16x128xf32>
      %525 = arith.addf %523, %524 : vector<16x128xf32>
      %526 = arith.truncf %525 : vector<16x128xf32> to vector<16x128xbf16>
      %c0_207 = arith.constant 0 : index
      %c0_208 = arith.constant 0 : index
      %527 = vector.load %arg25[%c0_207, %c0_208] : memref<128x128xbf16, #tpu.memory_space<vmem>>, vector<128x128xbf16>
      %cst_209 = arith.constant dense<0.000000e+00> : vector<16x128xf32>
      %528 = tpu.matmul %526, %527, %cst_209 {dimension_numbers = #tpu.dot_dimension_numbers<[1], [0], [0], [1], [0, 0, 1, 1], [], []>} : vector<16x128xbf16>, vector<128x128xbf16>, vector<16x128xf32> -> vector<16x128xf32>
      %c0_210 = arith.constant 0 : index
      %c0_211 = arith.constant 0 : index
      %529 = vector.load %arg26[%c0_210, %c0_211] : memref<1x128xf32, #tpu.memory_space<vmem>>, vector<1x128xf32>
      %530 = vector.broadcast %529 : vector<1x128xf32> to vector<16x128xf32>
      %531 = arith.addf %528, %530 : vector<16x128xf32>
      %c0_212 = arith.constant 0 : index
      %c0_213 = arith.constant 0 : index
      %532 = vector.load %arg27[%c0_212, %c0_213] : memref<16x128xf32, #tpu.memory_space<vmem>>, vector<16x128xf32>
      tpu.vector_store %arg27[%c0_212, %c0_213], %531 {strides = array<i32>} : memref<16x128xf32, #tpu.memory_space<vmem>>, vector<16x128xf32>,
    } else {
    }
    return
  }
  func.func @transform_0(%arg0: i32) -> (i32, i32) {
    %c0_i32 = arith.constant 0 : i32
    %c0_i32_0 = arith.constant 0 : i32
    %c0_i32_1 = arith.constant 0 : i32
    return %c0_i32, %c0_i32_0 : i32, i32
  }
  func.func @transform_1(%arg0: i32) -> (i32, i32) {
    %c0_i32 = arith.constant 0 : i32
    %c0_i32_0 = arith.constant 0 : i32
    %c0_i32_1 = arith.constant 0 : i32
    return %c0_i32, %c0_i32_0 : i32, i32
  }
  func.func @transform_2(%arg0: i32) -> (i32, i32, i32) {
    %c0_i32 = arith.constant 0 : i32
    %c0_i32_0 = arith.constant 0 : i32
    %c0_i32_1 = arith.constant 0 : i32
    return %arg0, %c0_i32, %c0_i32_0 : i32, i32, i32
  }
  func.func @transform_3(%arg0: i32) -> (i32, i32, i32) {
    %c0_i32 = arith.constant 0 : i32
    %c0_i32_0 = arith.constant 0 : i32
    %c0_i32_1 = arith.constant 0 : i32
    return %arg0, %c0_i32, %c0_i32_0 : i32, i32, i32
  }
  func.func @transform_4(%arg0: i32) -> (i32, i32, i32) {
    %c0_i32 = arith.constant 0 : i32
    %c0_i32_0 = arith.constant 0 : i32
    %c0_i32_1 = arith.constant 0 : i32
    return %arg0, %c0_i32, %c0_i32_0 : i32, i32, i32
  }
  func.func @transform_5(%arg0: i32) -> (i32, i32, i32) {
    %c0_i32 = arith.constant 0 : i32
    %c0_i32_0 = arith.constant 0 : i32
    %c0_i32_1 = arith.constant 0 : i32
    return %arg0, %c0_i32, %c0_i32_0 : i32, i32, i32
  }
  func.func @transform_6(%arg0: i32) -> (i32, i32, i32) {
    %c0_i32 = arith.constant 0 : i32
    %c0_i32_0 = arith.constant 0 : i32
    %c0_i32_1 = arith.constant 0 : i32
    return %arg0, %c0_i32, %c0_i32_0 : i32, i32, i32
  }
  func.func @transform_7(%arg0: i32) -> (i32, i32, i32) {
    %c0_i32 = arith.constant 0 : i32
    %c0_i32_0 = arith.constant 0 : i32
    %c0_i32_1 = arith.constant 0 : i32
    return %arg0, %c0_i32, %c0_i32_0 : i32, i32, i32
  }
  func.func @transform_8(%arg0: i32) -> (i32, i32, i32) {
    %c0_i32 = arith.constant 0 : i32
    %c0_i32_0 = arith.constant 0 : i32
    %c0_i32_1 = arith.constant 0 : i32
    return %arg0, %c0_i32, %c0_i32_0 : i32, i32, i32
  }
  func.func @transform_9(%arg0: i32) -> (i32, i32, i32) {
    %c0_i32 = arith.constant 0 : i32
    %c0_i32_0 = arith.constant 0 : i32
    %c0_i32_1 = arith.constant 0 : i32
    return %arg0, %c0_i32, %c0_i32_0 : i32, i32, i32
  }
  func.func @transform_10(%arg0: i32) -> (i32, i32, i32) {
    %c0_i32 = arith.constant 0 : i32
    %c0_i32_0 = arith.constant 0 : i32
    %c0_i32_1 = arith.constant 0 : i32
    return %arg0, %c0_i32, %c0_i32_0 : i32, i32, i32
  }
  func.func @transform_11(%arg0: i32) -> (i32, i32, i32) {
    %c0_i32 = arith.constant 0 : i32
    %c0_i32_0 = arith.constant 0 : i32
    %c0_i32_1 = arith.constant 0 : i32
    return %arg0, %c0_i32, %c0_i32_0 : i32, i32, i32
  }
  func.func @transform_12(%arg0: i32) -> (i32, i32, i32) {
    %c0_i32 = arith.constant 0 : i32
    %c0_i32_0 = arith.constant 0 : i32
    %c0_i32_1 = arith.constant 0 : i32
    return %arg0, %c0_i32, %c0_i32_0 : i32, i32, i32
  }
  func.func @transform_13(%arg0: i32) -> (i32, i32, i32) {
    %c0_i32 = arith.constant 0 : i32
    %c0_i32_0 = arith.constant 0 : i32
    %c0_i32_1 = arith.constant 0 : i32
    return %arg0, %c0_i32, %c0_i32_0 : i32, i32, i32
  }
  func.func @transform_14(%arg0: i32) -> (i32, i32, i32) {
    %c0_i32 = arith.constant 0 : i32
    %c0_i32_0 = arith.constant 0 : i32
    %c0_i32_1 = arith.constant 0 : i32
    return %arg0, %c0_i32, %c0_i32_0 : i32, i32, i32
  }
  func.func @transform_15(%arg0: i32) -> (i32, i32, i32) {
    %c0_i32 = arith.constant 0 : i32
    %c0_i32_0 = arith.constant 0 : i32
    %c0_i32_1 = arith.constant 0 : i32
    return %arg0, %c0_i32, %c0_i32_0 : i32, i32, i32
  }
  func.func @transform_16(%arg0: i32) -> (i32, i32, i32) {
    %c0_i32 = arith.constant 0 : i32
    %c0_i32_0 = arith.constant 0 : i32
    %c0_i32_1 = arith.constant 0 : i32
    return %arg0, %c0_i32, %c0_i32_0 : i32, i32, i32
  }
  func.func @transform_17(%arg0: i32) -> (i32, i32, i32) {
    %c0_i32 = arith.constant 0 : i32
    %c0_i32_0 = arith.constant 0 : i32
    %c0_i32_1 = arith.constant 0 : i32
    return %arg0, %c0_i32, %c0_i32_0 : i32, i32, i32
  }
  func.func @transform_18(%arg0: i32) -> (i32, i32, i32) {
    %c0_i32 = arith.constant 0 : i32
    %c0_i32_0 = arith.constant 0 : i32
    %c0_i32_1 = arith.constant 0 : i32
    return %arg0, %c0_i32, %c0_i32_0 : i32, i32, i32
  }
  func.func @transform_19(%arg0: i32) -> (i32, i32, i32) {
    %c0_i32 = arith.constant 0 : i32
    %c0_i32_0 = arith.constant 0 : i32
    %c0_i32_1 = arith.constant 0 : i32
    return %arg0, %c0_i32, %c0_i32_0 : i32, i32, i32
  }
  func.func @transform_20(%arg0: i32) -> (i32, i32, i32) {
    %c0_i32 = arith.constant 0 : i32
    %c0_i32_0 = arith.constant 0 : i32
    %c0_i32_1 = arith.constant 0 : i32
    return %arg0, %c0_i32, %c0_i32_0 : i32, i32, i32
  }
  func.func @transform_21(%arg0: i32) -> (i32, i32, i32) {
    %c0_i32 = arith.constant 0 : i32
    %c0_i32_0 = arith.constant 0 : i32
    %c0_i32_1 = arith.constant 0 : i32
    return %arg0, %c0_i32, %c0_i32_0 : i32, i32, i32
  }
  func.func @transform_22(%arg0: i32) -> (i32, i32) {
    %c0_i32 = arith.constant 0 : i32
    %c0_i32_0 = arith.constant 0 : i32
    %c0_i32_1 = arith.constant 0 : i32
    return %c0_i32, %c0_i32_0 : i32, i32
  }
  func.func @transform_23(%arg0: i32) -> (i32, i32) {
    %c0_i32 = arith.constant 0 : i32
    %c0_i32_0 = arith.constant 0 : i32
    %c0_i32_1 = arith.constant 0 : i32
    return %c0_i32, %c0_i32_0 : i32, i32
  }
  func.func @transform_24(%arg0: i32) -> (i32, i32) {
    %c0_i32 = arith.constant 0 : i32
    %c0_i32_0 = arith.constant 0 : i32
    %c0_i32_1 = arith.constant 0 : i32
    return %c0_i32, %c0_i32_0 : i32, i32
  }
  func.func @transform_25(%arg0: i32) -> (i32, i32) {
    %c0_i32 = arith.constant 0 : i32
    %c0_i32_0 = arith.constant 0 : i32
    %c0_i32_1 = arith.constant 0 : i32
    return %c0_i32, %c0_i32_0 : i32, i32
  }
  func.func @transform_26(%arg0: i32) -> (i32, i32) {
    %c0_i32 = arith.constant 0 : i32
    %c0_i32_0 = arith.constant 0 : i32
    %c0_i32_1 = arith.constant 0 : i32
    return %c0_i32, %c0_i32_0 : i32, i32
  }
}

</mosaic_0001>

<bundles_post_ra>
// kernel: transformer_forward.4
= control target key start
LH: loop header
LB: loop body
LE: loop exit
PB: predicated region body
PF: predicated region fallthrough
CT: control target
= control target key end

     0   :  { %s4009_s18 = smov 0   ;;  %s4525_s0 = inlined_call_operand.vmem [shape: f32[16,128], index: 0, kind: input, shape index: {}]   ;;  %s4526_s1 = inlined_call_operand.vmem [shape: bf16[2,128,1536], index: 1, kind: input, shape index: {}]   ;;  %s4527_s2 = inlined_call_operand.vmem [shape: f32[2,1,1536], index: 2, kind: input, shape index: {}]   ;;  %s4528_s3 = inlined_call_operand.vmem [shape: bf16[2,512,128], index: 3, kind: input, shape index: {}]   ;;  %s4529_s4 = inlined_call_operand.vmem [shape: f32[2,1,128], index: 4, kind: input, shape index: {}]   ;;  %s4530_s5 = inlined_call_operand.vmem [shape: bf16[2,128,128], index: 5, kind: input, shape index: {}]   ;;  %s4531_s6 = inlined_call_operand.vmem [shape: f32[2,1,128], index: 6, kind: input, shape index: {}]   ;;  %s4532_s7 = inlined_call_operand.vmem [shape: bf16[2,128,128], index: 7, kind: input, shape index: {}]   ;;  %s4533_s8 = inlined_call_operand.vmem [shape: f32[2,1,128], index: 8, kind: input, shape index: {}]   ;;  %s4534_s9 = inlined_call_operand.vmem [shape: f32[2,1,128], index: 9, kind: input, shape index: {}]   ;;  %s4535_s10 = inlined_call_operand.vmem [shape: f32[2,1,128], index: 10, kind: input, shape index: {}]   ;;  %s4536_s11 = inlined_call_operand.vmem [shape: f32[2,1,128], index: 11, kind: input, shape index: {}]   ;;  %s4537_s12 = inlined_call_operand.vmem [shape: f32[2,1,128], index: 12, kind: input, shape index: {}]   ;;  %s4538_s13 = inlined_call_operand.vmem [shape: f32[1,128], index: 13, kind: input, shape index: {}]   ;;  %s4539_s14 = inlined_call_operand.vmem [shape: f32[1,128], index: 14, kind: input, shape index: {}]   ;;  %s4540_s15 = inlined_call_operand.vmem [shape: f32[16,128], index: 15, kind: output, shape index: {}]  }
   0x1   :  { %4545 = sst [smem:[#allocation6_spill]] %s4525_s0 }
   0x2   :  { %4546 = sst [smem:[#allocation7_spill]] %s4526_s1 }
   0x3   :  { %4547 = sst [smem:[#allocation8_spill]] %s4527_s2 }
   0x4   :  { %4548 = sst [smem:[#allocation9_spill]] %s4528_s3 }
   0x5   :  { %4549 = sst [smem:[#allocation10_spill]] %s4538_s13 }
   0x6   :  { %4550 = sst [smem:[#allocation11_spill]] %s4539_s14 }
   0x7   :  { %4551 = sst [smem:[#allocation12_spill]] %s4540_s15 }
   0x8 LB: > { %4552 = sst [smem:[#allocation4_spill]] %s3924_s18  ;;  %s4015_s19 = sadd.s32 4294967295, %s3924_s18   ;;  %s3924_s18 = sphi %s4009_s18, %s25_s18  }
   0x9   : > { %4553 = sst [smem:[#allocation5_spill]] %s4015_s19  ;;  %p3261_p0 = scmp.ge.s32.totalorder %s3924_s18, 1 }
   0xa   : > { %p527_p1 = scmp.lt.s32.totalorder %s3924_s18, 3 }
   0xc   : > { %p528_p2 = pnand %p3261_p0, %p527_p1 }
   0xd   : > { %p610_p3 = scmp.lt.s32.totalorder (!%p528_p2), %s4015_s19, 1  ;;  %s4554_s3 = sld [smem:[#allocation9_spill]] (!%p528_p2) }
   0xe   : > { %531 = sbr.rel (%p528_p2) target bundleno = 2708 (0xa94), region = 80  ;;  %s4555_s1 = sld [smem:[#allocation7_spill]] (!%p528_p2) }
   0xf   : > { %s4556_s2 = sld [smem:[#allocation8_spill]] (!%p528_p2)  ;;  %s4557_s28 = sld [smem:[#allocation5_spill]] (!%p528_p2) }
  0x15   : > { %s4021_s20 = scalar_select %p610_p3, %s4015_s19, 1 }
  0x16   : > { %p3269_p4 = scmp.ne.s32.totalorder %s4557_s28, 0 }
  0x17   : > { %s3667_s21 = smul.u32 768, %s4021_s20  ;;  %s3434_s22 = sshll.u32 %s4021_s20, 8 }
  0x18   : > { %s3668_s23 = smul.u32 12, %s4021_s20  ;;  %s4029_s26 = scalar_lea.vmem %s4554_s3, %s3434_s22 }
  0x19   : > { %s4034_s29 = scalar_lea.vmem %s4555_s1, %s3667_s21  ;;  %s3435_s13 = sshll.u32 %s4021_s20, 6 }
  0x1a   : > { %s4043_s14 = scalar_lea.vmem %s4556_s2, %s3668_s23  ;;  %s4049_s22 = scalar_lea.vmem %s4530_s5, %s3435_s13 }
  0x1b   : > { %s4058_s30 = scalar_lea.vmem %s4532_s7, %s3435_s13  ;;  %s645_s1 = scalar_lea.vmem %s4534_s9, %s4021_s20 }
  0x1c   : > { %s648_s2 = scalar_lea.vmem %s4535_s10, %s4021_s20  ;;  %s651_s25 = scalar_lea.vmem %s4536_s11, %s4021_s20 }
  0x1d   : > { %s654_s13 = scalar_lea.vmem %s4537_s12, %s4021_s20  ;;  %659 = sbr.rel (%p3269_p4) target bundleno = 38 (0x26), region = 84 }
  0x1e   : > { %s4558_s15 = sld [smem:[#allocation6_spill]] (!%p3269_p4) }
  0x24   : > { %v660_v0 = vld [vmem:[%s4558_s15] sm:$0xff]  ;;  %v661_v1 = vld [vmem:[%s4558_s15 + $0x8] sm:$0xff] }
  0x25   : > { %662 = vst [vmem:[#allocation2] sm:$0xff] %v660_v0  ;;  %663 = vst [vmem:[#allocation2 + $0x8] sm:$0xff] %v661_v1 }
  0x26 PF: > { %v3680_v4 = vld [vmem:[%s4034_s29 + $0x4] ss:$48 sps:$4 sm:$0xff]   ;;  %v3682_v5 = vld [vmem:[%s4034_s29 + $0xc] ss:$48 sps:$4 sm:$0xff]   ;;  %v3684_v6 = vld [vmem:[%s4034_s29] ss:$48 sps:$4 sm:$0xff]   ;;  %s4560_s28 = scalar_lea.vmem %s4531_s6, %s4021_s20 }
  0x27   : > { %v3685_v7 = vld [vmem:[%s4034_s29 + $0x8] ss:$48 sps:$4 sm:$0xff]   ;;  %1354 = vmatprep.subr.bf16.mxu0 %v3680_v4  ;;  %1397 = vmatprep.subr.bf16.mxu1 %v3682_v5  ;;  %v3686_v16 = vld [vmem:[%s4034_s29 + $0x64] ss:$48 sps:$4 sm:$0xff]   ;;  %v3688_v17 = vld [vmem:[%s4034_s29 + $0x6c] ss:$48 sps:$4 sm:$0xff]  }
  0x28   : > { %1355 = vmatpush1.bf16.msra.mxu0 %v3684_v6  ;;  %1398 = vmatpush1.bf16.msra.mxu1 %v3685_v7  ;;  %v3690_v18 = vld [vmem:[%s4034_s29 + $0x60] ss:$48 sps:$4 sm:$0xff]   ;;  %v3691_v19 = vld [vmem:[%s4034_s29 + $0x68] ss:$48 sps:$4 sm:$0xff]   ;;  %v3692_v20 = vld [vmem:[%s4034_s29 + $0xc4] ss:$48 sps:$4 sm:$0xff]  }
  0x29   : > { %1356 = vmatprep.subr.bf16.mxu0 %v3686_v16  ;;  %1399 = vmatprep.subr.bf16.mxu1 %v3688_v17  ;;  %v3694_v21 = vld [vmem:[%s4034_s29 + $0xcc] ss:$48 sps:$4 sm:$0xff]   ;;  %v3696_v22 = vld [vmem:[%s4034_s29 + $0xc0] ss:$48 sps:$4 sm:$0xff]   ;;  %v3697_v23 = vld [vmem:[%s4034_s29 + $0xc8] ss:$48 sps:$4 sm:$0xff]  }
  0x2a   : > { %v3698_v24 = vld [vmem:[%s4034_s29 + $0x124] ss:$48 sps:$4 sm:$0xff]   ;;  %v3700_v25 = vld [vmem:[%s4034_s29 + $0x12c] ss:$48 sps:$4 sm:$0xff]   ;;  %v3702_v26 = vld [vmem:[%s4034_s29 + $0x120] ss:$48 sps:$4 sm:$0xff]  }
  0x2b   : > { %v3703_v27 = vld [vmem:[%s4034_s29 + $0x128] ss:$48 sps:$4 sm:$0xff]   ;;  %v3704_v28 = vld [vmem:[%s4034_s29 + $0x184] ss:$48 sps:$4 sm:$0xff]   ;;  %v3706_v29 = vld [vmem:[%s4034_s29 + $0x18c] ss:$48 sps:$4 sm:$0xff]  }
  0x2c   : > { %v664_v2 = vld [vmem:[#allocation2] sm:$0xff]  ;;  %v665_v3 = vld [vmem:[#allocation2 + $0x8] sm:$0xff]  ;;  %1357 = vmatpush1.bf16.msra.mxu0 %v3690_v18  ;;  %1400 = vmatpush1.bf16.msra.mxu1 %v3691_v19  ;;  %v3926_v45 = vmov 0   ;;  %vm3928_vm0 = vmmov 0   ;;  %vm1671_vm1 = vcmask 1043456   ;;  %vm1655_vm2 = vcmask 64512  }
  0x2d   : > { %668 = vadd.xlane.f32.xlu0 %v664_v2  ;;  %1358 = vmatprep.subr.bf16.mxu0 %v3692_v20  ;;  %v3708_v30 = vld [vmem:[%s4034_s29 + $0x180] ss:$48 sps:$4 sm:$0xff]   ;;  %v3709_v31 = vld [vmem:[%s4034_s29 + $0x188] ss:$48 sps:$4 sm:$0xff]   ;;  %v3710_v32 = vld [vmem:[%s4034_s29 + $0x1e4] ss:$48 sps:$4 sm:$0xff]  }
  0x2e   : > { %1401 = vmatprep.subr.bf16.mxu1 %v3694_v21  ;;  %v3712_v33 = vld [vmem:[%s4034_s29 + $0x1ec] ss:$48 sps:$4 sm:$0xff]   ;;  %v3714_v34 = vld [vmem:[%s4034_s29 + $0x1e0] ss:$48 sps:$4 sm:$0xff]   ;;  %v3715_v35 = vld [vmem:[%s4034_s29 + $0x1e8] ss:$48 sps:$4 sm:$0xff]   ;;  %1386 = vmatprep.mubr.bf16.mxu0 %v3926_v45 }
  0x2f   : > { %v3716_v36 = vld [vmem:[%s4034_s29 + $0x244] ss:$48 sps:$4 sm:$0xff]   ;;  %v3718_v37 = vld [vmem:[%s4034_s29 + $0x24c] ss:$48 sps:$4 sm:$0xff]   ;;  %v3720_v38 = vld [vmem:[%s4034_s29 + $0x240] ss:$48 sps:$4 sm:$0xff]   ;;  %1429 = vmatprep.mubr.bf16.mxu1 %v3926_v45 }
  0x30   : > { %1359 = vmatpush1.bf16.msra.mxu0 %v3696_v22  ;;  %1402 = vmatpush1.bf16.msra.mxu1 %v3697_v23  ;;  %v3721_v39 = vld [vmem:[%s4034_s29 + $0x248] ss:$48 sps:$4 sm:$0xff]   ;;  %v3722_v40 = vld [vmem:[%s4034_s29 + $0x2a4] ss:$48 sps:$4 sm:$0xff]   ;;  %v3724_v41 = vld [vmem:[%s4034_s29 + $0x2ac] ss:$48 sps:$4 sm:$0xff]  }
  0x31   : > { %670 = vadd.xlane.f32.xlu0 %v665_v3  ;;  %1360 = vmatprep.subr.bf16.mxu0 %v3698_v24  ;;  %v3726_v42 = vld [vmem:[%s4034_s29 + $0x2a0] ss:$48 sps:$4 sm:$0xff]   ;;  %v3727_v43 = vld [vmem:[%s4034_s29 + $0x2a8] ss:$48 sps:$4 sm:$0xff]   ;;  %v3730_v44 = vld [vmem:[%s4034_s29 + $0x14] ss:$48 sps:$4 sm:$0xff]  }
  0x32   : > { %1403 = vmatprep.subr.bf16.mxu1 %v3700_v25  ;;  %v3733_v46 = vld [vmem:[%s4034_s29 + $0x1c] ss:$48 sps:$4 sm:$0xff]   ;;  %v3270_v61 = vld [vmem:[%s645_s1] ss:$0 sm:$0xff]  ;;  %v3731_v6 = vld [vmem:[%s4034_s29 + $0x18] ss:$48 sps:$4 sm:$0xff]  }
  0x33   : > { %v3271_v1 = vld [vmem:[%s648_s2] ss:$0 sm:$0xff]  ;;  %v3748_v16 = vld [vmem:[%s4034_s29 + $0x134] ss:$48 sps:$4 sm:$0xff]   ;;  %v3751_v17 = vld [vmem:[%s4034_s29 + $0x13c] ss:$48 sps:$4 sm:$0xff]  }
  0x34   : > { %1361 = vmatpush1.bf16.msra.mxu0 %v3702_v26  ;;  %1404 = vmatpush1.bf16.msra.mxu1 %v3703_v27  ;;  %v3728_v5 = vld [vmem:[%s4034_s29 + $0x10] ss:$48 sps:$4 sm:$0xff]   ;;  %v3749_v19 = vld [vmem:[%s4034_s29 + $0x138] ss:$48 sps:$4 sm:$0xff]   ;;  %v3754_v20 = vld [vmem:[%s4034_s29 + $0x194] ss:$48 sps:$4 sm:$0xff]  }
  0x35   : > { %1362 = vmatprep.subr.bf16.mxu0 %v3704_v28  ;;  %1405 = vmatprep.subr.bf16.mxu1 %v3706_v29  ;;  %v3746_v18 = vld [vmem:[%s4034_s29 + $0x130] ss:$48 sps:$4 sm:$0xff]   ;;  %v3757_v21 = vld [vmem:[%s4034_s29 + $0x19c] ss:$48 sps:$4 sm:$0xff]   ;;  %v3755_v23 = vld [vmem:[%s4034_s29 + $0x198] ss:$48 sps:$4 sm:$0xff]  }
  0x36   : > { %v3752_v22 = vld [vmem:[%s4034_s29 + $0x190] ss:$48 sps:$4 sm:$0xff]   ;;  %v3760_v24 = vld [vmem:[%s4034_s29 + $0x1f4] ss:$48 sps:$4 sm:$0xff]   ;;  %v3763_v25 = vld [vmem:[%s4034_s29 + $0x1fc] ss:$48 sps:$4 sm:$0xff]  }
  0x37   : > { %v3758_v26 = vld [vmem:[%s4034_s29 + $0x1f0] ss:$48 sps:$4 sm:$0xff]   ;;  %v3761_v27 = vld [vmem:[%s4034_s29 + $0x1f8] ss:$48 sps:$4 sm:$0xff]   ;;  %v3766_v28 = vld [vmem:[%s4034_s29 + $0x254] ss:$48 sps:$4 sm:$0xff]  }
  0x38   : > { %1363 = vmatpush1.bf16.msra.mxu0 %v3708_v30  ;;  %1406 = vmatpush1.bf16.msra.mxu1 %v3709_v31  ;;  %v3769_v29 = vld [vmem:[%s4034_s29 + $0x25c] ss:$48 sps:$4 sm:$0xff]   ;;  %v3764_v30 = vld [vmem:[%s4034_s29 + $0x250] ss:$48 sps:$4 sm:$0xff]   ;;  %v3767_v31 = vld [vmem:[%s4034_s29 + $0x258] ss:$48 sps:$4 sm:$0xff]  }
  0x39   : > { %1364 = vmatprep.subr.bf16.mxu0 %v3710_v32  ;;  %1407 = vmatprep.subr.bf16.mxu1 %v3712_v33  ;;  %v3772_v32 = vld [vmem:[%s4034_s29 + $0x2b4] ss:$48 sps:$4 sm:$0xff]   ;;  %v3775_v33 = vld [vmem:[%s4034_s29 + $0x2bc] ss:$48 sps:$4 sm:$0xff]   ;;  %s4562_s16 = sld [smem:[#allocation5_spill]] }
  0x3c   : > { %1365 = vmatpush1.bf16.msra.mxu0 %v3714_v34  ;;  %1408 = vmatpush1.bf16.msra.mxu1 %v3715_v35  ;;  %v3770_v34 = vld [vmem:[%s4034_s29 + $0x2b0] ss:$48 sps:$4 sm:$0xff]   ;;  %v3773_v35 = vld [vmem:[%s4034_s29 + $0x2b8] ss:$48 sps:$4 sm:$0xff]  }
  0x3d   : > { %1366 = vmatprep.subr.bf16.mxu0 %v3716_v36  ;;  %1409 = vmatprep.subr.bf16.mxu1 %v3718_v37  ;;  %v3778_v36 = vld [vmem:[%s4034_s29 + $0x24] ss:$48 sps:$4 sm:$0xff]   ;;  %v3781_v37 = vld [vmem:[%s4034_s29 + $0x2c] ss:$48 sps:$4 sm:$0xff]  }
  0x3f   : > { %p3429_p5 = scmp.ne.s32.totalorder %s4562_s16, 1 }
  0x40   : > { %1367 = vmatpush1.bf16.msra.mxu0 %v3720_v38  ;;  %1410 = vmatpush1.bf16.msra.mxu1 %v3721_v39  ;;  %v3776_v38 = vld [vmem:[%s4034_s29 + $0x20] ss:$48 sps:$4 sm:$0xff]   ;;  %v3779_v39 = vld [vmem:[%s4034_s29 + $0x28] ss:$48 sps:$4 sm:$0xff]   ;;  %s4563_s23 = sld [smem:[#allocation10_spill]] (!%p3429_p5)  ;;  %s4564_s0 = sld [smem:[#allocation11_spill]] (!%p3429_p5) }
  0x41   : > { %1368 = vmatprep.subr.bf16.mxu0 %v3722_v40  ;;  %1411 = vmatprep.subr.bf16.mxu1 %v3724_v41  ;;  %v3784_v40 = vld [vmem:[%s4034_s29 + $0x84] ss:$48 sps:$4 sm:$0xff]   ;;  %v3787_v41 = vld [vmem:[%s4034_s29 + $0x8c] ss:$48 sps:$4 sm:$0xff]   ;;  %s4565_s2 = sld [smem:[#allocation12_spill]] (!%p3429_p5) }
  0x44   : > { %1369 = vmatpush1.bf16.msra.mxu0 %v3726_v42  ;;  %1412 = vmatpush1.bf16.msra.mxu1 %v3727_v43  ;;  %v3782_v42 = vld [vmem:[%s4034_s29 + $0x80] ss:$48 sps:$4 sm:$0xff]   ;;  %v3785_v43 = vld [vmem:[%s4034_s29 + $0x88] ss:$48 sps:$4 sm:$0xff]  }
  0x45   : > { %1440 = vmatprep.subr.bf16.mxu0 %v3730_v44  ;;  %1483 = vmatprep.subr.bf16.mxu1 %v3733_v46  ;;  %v3790_v44 = vld [vmem:[%s4034_s29 + $0xe4] ss:$48 sps:$4 sm:$0xff]   ;;  %v3793_v46 = vld [vmem:[%s4034_s29 + $0xec] ss:$48 sps:$4 sm:$0xff]  }
  0xba   : > { %v669_v8 = vpop.xlane.xlu0 %668 }
  0xbb   : > { %v4091_v9 = vmul.f32 0.03125, %v669_v8  ;;  %v3736_v8 = vld [vmem:[%s4034_s29 + $0x74] ss:$48 sps:$4 sm:$0xff]  }
  0xbd   : > { %v4094_v10 = vsub.f32 %v664_v2, %v4091_v9  ;;  %v683_v47 = vmul.f32 %v4091_v9, %v4091_v9  ;;  %v3739_v9 = vld [vmem:[%s4034_s29 + $0x7c] ss:$48 sps:$4 sm:$0xff]  }
  0xbe   : > { %v671_v11 = vpop.xlane.xlu0 %670 }
  0xbf   : > { %v4096_v12 = vmul.f32 0.03125, %v671_v11  ;;  %v677_v13 = vmul.f32 %v4094_v10, %v4094_v10  ;;  %v685_v49 = vmul.f32 96.0, %v683_v47  ;;  %v3737_v11 = vld [vmem:[%s4034_s29 + $0x78] ss:$48 sps:$4 sm:$0xff]   ;;  %v3788_v47 = vld [vmem:[%s4034_s29 + $0xe0] ss:$48 sps:$4 sm:$0xff]  }
  0xc1   : > { %v4101_v14 = vsub.f32 %v665_v3, %v4096_v12  ;;  %679 = vadd.xlane.f32.xlu1 %v677_v13  ;;  %v684_v48 = vmul.f32 %v4096_v12, %v4096_v12  ;;  %v3742_v12 = vld [vmem:[%s4034_s29 + $0xd4] ss:$48 sps:$4 sm:$0xff]   ;;  %v3745_v13 = vld [vmem:[%s4034_s29 + $0xdc] ss:$48 sps:$4 sm:$0xff]  }
  0xc3   : > { %v678_v15 = vmul.f32 %v4101_v14, %v4101_v14  ;;  %v686_v53 = vmul.f32 96.0, %v684_v48  ;;  %v3791_v48 = vld [vmem:[%s4034_s29 + $0xe8] ss:$48 sps:$4 sm:$0xff]  }
  0xc5   : > { %681 = vadd.xlane.f32.xlu1 %v678_v15  ;;  %v3743_v15 = vld [vmem:[%s4034_s29 + $0xd8] ss:$48 sps:$4 sm:$0xff]  }
 0x14e   : > { %v680_v50 = vpop.xlane.xlu1 %679 }
 0x14f   : > { %v687_v51 = vsub.f32 %v680_v50, %v685_v49  ;;  %v3796_v49 = vld [vmem:[%s4034_s29 + $0x144] ss:$48 sps:$4 sm:$0xff]   ;;  %v3799_v50 = vld [vmem:[%s4034_s29 + $0x14c] ss:$48 sps:$4 sm:$0xff]  }
 0x151   : > { %v689_v52 = vmul.f32 0.03125, %v687_v51  ;;  %v3794_v51 = vld [vmem:[%s4034_s29 + $0x140] ss:$48 sps:$4 sm:$0xff]  }
 0x152   : > { %v682_v54 = vpop.xlane.xlu1 %681 }
 0x153   : > { %v691_v55 = vadd.f32 1e-05, %v689_v52  ;;  %v688_v56 = vsub.f32 %v682_v54, %v686_v53  ;;  %v3797_v52 = vld [vmem:[%s4034_s29 + $0x148] ss:$48 sps:$4 sm:$0xff]   ;;  %v3805_v53 = vld [vmem:[%s4034_s29 + $0x1ac] ss:$48 sps:$4 sm:$0xff]  }
 0x154   : > { %v3800_v54 = vld [vmem:[%s4034_s29 + $0x1a0] ss:$48 sps:$4 sm:$0xff]  }
 0x155   : > { %3872 = vrsqrt.f32 %v691_v55  ;;  %v690_v57 = vmul.f32 0.03125, %v688_v56  ;;  %v3803_v55 = vld [vmem:[%s4034_s29 + $0x1a8] ss:$48 sps:$4 sm:$0xff]   ;;  %v3808_v56 = vld [vmem:[%s4034_s29 + $0x204] ss:$48 sps:$4 sm:$0xff]  }
 0x157   : > { %v692_v58 = vadd.f32 1e-05, %v690_v57  ;;  %v3811_v57 = vld [vmem:[%s4034_s29 + $0x20c] ss:$48 sps:$4 sm:$0xff]  }
 0x159   : > { %3874 = vrsqrt.f32 %v692_v58  ;;  %v3806_v58 = vld [vmem:[%s4034_s29 + $0x200] ss:$48 sps:$4 sm:$0xff]  }
 0x15f   : > { %v3873_v59 = vpop.eup %3872 }
 0x160   : > { %v695_v60 = vmul.f32 %v3873_v59, %v4094_v10  ;;  %v3734_v10 = vld [vmem:[%s4034_s29 + $0x70] ss:$48 sps:$4 sm:$0xff]   ;;  %v3809_v59 = vld [vmem:[%s4034_s29 + $0x208] ss:$48 sps:$4 sm:$0xff]  }
 0x162   : > { %v703_v63 = vmul.f32 %v3270_v61, %v695_v60  ;;  %v3814_v60 = vld [vmem:[%s4034_s29 + $0x264] ss:$48 sps:$4 sm:$0xff]  }
 0x163   : > { %v3875_v62 = vpop.eup %3874 }
 0x164   : > { %v696_v0 = vmul.f32 %v3875_v62, %v4101_v14  ;;  %v711_v3 = vadd.f32 %v3271_v1, %v703_v63  ;;  %v3740_v14 = vld [vmem:[%s4034_s29 + $0xd0] ss:$48 sps:$4 sm:$0xff]   ;;  %v3815_v63 = vld [vmem:[%s4034_s29 + $0x268] ss:$48 sps:$4 sm:$0xff]  }
 0x165   : > { %v3812_v62 = vld [vmem:[%s4034_s29 + $0x260] ss:$48 sps:$4 sm:$0xff]  }
 0x166   : > { %v704_v2 = vmul.f32 %v3270_v61, %v696_v0  ;;  %v3817_v61 = vld [vmem:[%s4034_s29 + $0x26c] ss:$48 sps:$4 sm:$0xff]   ;;  %v3820_v0 = vld [vmem:[%s4034_s29 + $0x2c4] ss:$48 sps:$4 sm:$0xff]  }
 0x168   : > { %v712_v4 = vadd.f32 %v3271_v1, %v704_v2  ;;  %v3823_v1 = vld [vmem:[%s4034_s29 + $0x2cc] ss:$48 sps:$4 sm:$0xff]   ;;  %v3818_v2 = vld [vmem:[%s4034_s29 + $0x2c0] ss:$48 sps:$4 sm:$0xff]  }
 0x16a   : > { %v4155_v7 = vpack.c.bf16 %v712_v4, %v711_v3  ;;  %v3821_v3 = vld [vmem:[%s4034_s29 + $0x2c8] ss:$48 sps:$4 sm:$0xff]   ;;  %v3927_v4 = vmov 0.0  }
 0x16c   : > { %1387 = vmatmul.mubr.bf16.vlgmr.msra.gmra.mrb[0].mxu0 %v4155_v7  ;;  %1430 = vmatmul.mubr.bf16.vlgmr.msra.gmra.mrb[0].mxu1 %v4155_v7 }
 0x16d   : > { %1441 = vmatpush1.bf16.msra.mxu0 %v3728_v5  ;;  %1484 = vmatpush1.bf16.msra.mxu1 %v3731_v6  ;;  %v814_v5 = vlaneseq }
 0x16e   : > { %1442 = vmatprep.subr.bf16.mxu0 %v3736_v8  ;;  %1485 = vmatprep.subr.bf16.mxu1 %v3739_v9  ;;  %v811_v9 = vld [vmem:[%s4043_s14 + $0x8] sm:$0xf] }
 0x16f   : > { %1472 = vmatprep.mubr.bf16.mxu0 %v3926_v45  ;;  %1515 = vmatprep.mubr.bf16.mxu1 %v3926_v45  ;;  %v4233_v6 = vshrl.u32 %v814_v5, 7 }
 0x171   : > { %1443 = vmatpush1.bf16.msra.mxu0 %v3734_v10  ;;  %1486 = vmatpush1.bf16.msra.mxu1 %v3737_v11  ;;  %v824_v8 = vsub.s32 2, %v4233_v6  ;;  %v828_v10 = vsub.s32 3, %v4233_v6 }
 0x172   : > { %1444 = vmatprep.subr.bf16.mxu0 %v3742_v12  ;;  %1487 = vmatprep.subr.bf16.mxu1 %v3745_v13 }
 0x173   : > { %v4239_v11 = vrot.slane %v811_v9, %v824_v8  ;;  %v4243_v13 = vrot.slane %v811_v9, %v828_v10 }
 0x175   : > { %1445 = vmatpush1.bf16.msra.mxu0 %v3740_v14  ;;  %1488 = vmatpush1.bf16.msra.mxu1 %v3743_v15 }
 0x176   : > { %1446 = vmatprep.subr.bf16.mxu0 %v3748_v16  ;;  %1489 = vmatprep.subr.bf16.mxu1 %v3751_v17 }
 0x179   : > { %1447 = vmatpush1.bf16.msra.mxu0 %v3746_v18  ;;  %1490 = vmatpush1.bf16.msra.mxu1 %v3749_v19 }
 0x17a   : > { %1448 = vmatprep.subr.bf16.mxu0 %v3754_v20  ;;  %1491 = vmatprep.subr.bf16.mxu1 %v3757_v21 }
 0x17d   : > { %1449 = vmatpush1.bf16.msra.mxu0 %v3752_v22  ;;  %1492 = vmatpush1.bf16.msra.mxu1 %v3755_v23  ;;  %v832_v22 = vsub.s32 4, %v4233_v6  ;;  %v810_v23 = vld [vmem:[%s4043_s14] sm:$0xff]  ;;  %s4559_s14 = scalar_lea.vmem %s4529_s4, %s4021_s20 }
 0x17e   : > { %1450 = vmatprep.subr.bf16.mxu0 %v3760_v24  ;;  %1493 = vmatprep.subr.bf16.mxu1 %v3763_v25  ;;  %v816_v25 = vsub.s32 0, %v4233_v6 }
 0x17f   : > { %v833_v24 = vrot.slane %v810_v23, %v832_v22 }
 0x181   : > { %1451 = vmatpush1.bf16.msra.mxu0 %v3758_v26  ;;  %1494 = vmatpush1.bf16.msra.mxu1 %v3761_v27  ;;  %v836_v26 = vsub.s32 5, %v4233_v6 }
 0x182   : > { %1452 = vmatprep.subr.bf16.mxu0 %v3766_v28  ;;  %1495 = vmatprep.subr.bf16.mxu1 %v3769_v29 }
 0x185   : > { %1453 = vmatpush1.bf16.msra.mxu0 %v3764_v30  ;;  %1496 = vmatpush1.bf16.msra.mxu1 %v3767_v31 }
 0x186   : > { %1454 = vmatprep.subr.bf16.mxu0 %v3772_v32  ;;  %1497 = vmatprep.subr.bf16.mxu1 %v3775_v33  ;;  %v817_v32 = vrot.slane %v810_v23, %v816_v25 }
 0x189   : > { %1455 = vmatpush1.bf16.msra.mxu0 %v3770_v34  ;;  %1498 = vmatpush1.bf16.msra.mxu1 %v3773_v35 }
 0x18a   : > { %1526 = vmatprep.subr.bf16.mxu0 %v3778_v36  ;;  %1569 = vmatprep.subr.bf16.mxu1 %v3781_v37  ;;  %v4257_v36 = vrot.slane %v810_v23, %v836_v26 }
 0x18c   : > { %1473 = vmatmul.mubr.bf16.vlgmr.msra.gmra.mrb[4].mxu0 %v4155_v7  ;;  %1516 = vmatmul.mubr.bf16.vlgmr.msra.gmra.mrb[4].mxu1 %v4155_v7 }
 0x18d   : > { %1527 = vmatpush1.bf16.msra.mxu0 %v3776_v38  ;;  %1570 = vmatpush1.bf16.msra.mxu1 %v3779_v39 }
 0x18e   : > { %1528 = vmatprep.subr.bf16.mxu0 %v3784_v40  ;;  %1571 = vmatprep.subr.bf16.mxu1 %v3787_v41  ;;  %v840_v40 = vsub.s32 6, %v4233_v6 }
 0x18f   : > { %1558 = vmatprep.mubr.bf16.mxu0 %v3926_v45  ;;  %1601 = vmatprep.mubr.bf16.mxu1 %v3926_v45  ;;  %v3802_v45 = vld [vmem:[%s4034_s29 + $0x1a4] ss:$48 sps:$4 sm:$0xff]  }
 0x191   : > { %1529 = vmatpush1.bf16.msra.mxu0 %v3782_v42  ;;  %1572 = vmatpush1.bf16.msra.mxu1 %v3785_v43 }
 0x192   : > { %1530 = vmatprep.subr.bf16.mxu0 %v3790_v44  ;;  %1573 = vmatprep.subr.bf16.mxu1 %v3793_v46  ;;  %v4268_v44 = vrot.slane %v810_v23, %v840_v40 }
 0x195   : > { %1531 = vmatpush1.bf16.msra.mxu0 %v3788_v47  ;;  %1574 = vmatpush1.bf16.msra.mxu1 %v3791_v48 }
 0x196   : > { %1532 = vmatprep.subr.bf16.mxu0 %v3796_v49  ;;  %1575 = vmatprep.subr.bf16.mxu1 %v3799_v50  ;;  %v844_v49 = vsub.s32 7, %v4233_v6  ;;  %v4276_v50 = vrot.slane %v810_v23, %v824_v8 }
 0x199   : > { %1533 = vmatpush1.bf16.msra.mxu0 %v3794_v51  ;;  %1576 = vmatpush1.bf16.msra.mxu1 %v3797_v52 }
 0x19a   : > { %1534 = vmatprep.subr.bf16.mxu0 %v3802_v45  ;;  %1577 = vmatprep.subr.bf16.mxu1 %v3805_v53  ;;  %v4278_v45 = vrot.slane %v810_v23, %v844_v49 }
 0x19d   : > { %1535 = vmatpush1.bf16.msra.mxu0 %v3800_v54  ;;  %1578 = vmatpush1.bf16.msra.mxu1 %v3803_v55 }
 0x19e   : > { %1536 = vmatprep.subr.bf16.mxu0 %v3808_v56  ;;  %1579 = vmatprep.subr.bf16.mxu1 %v3811_v57  ;;  %v4285_v56 = vrot.slane %v810_v23, %v828_v10 }
 0x1a1   : > { %1537 = vmatpush1.bf16.msra.mxu0 %v3806_v58  ;;  %1580 = vmatpush1.bf16.msra.mxu1 %v3809_v59  ;;  %v849_v58 = vrot.slane %v811_v9, %v816_v25 }
 0x1a2   : > { %1538 = vmatprep.subr.bf16.mxu0 %v3814_v60  ;;  %1581 = vmatprep.subr.bf16.mxu1 %v3817_v61 }
 0x1a5   : > { %1539 = vmatpush1.bf16.msra.mxu0 %v3812_v62  ;;  %1582 = vmatpush1.bf16.msra.mxu1 %v3815_v63 }
 0x1a6   : > { %1540 = vmatprep.subr.bf16.mxu0 %v3820_v0  ;;  %1583 = vmatprep.subr.bf16.mxu1 %v3823_v1 }
 0x1a9   : > { %1541 = vmatpush1.bf16.msra.mxu0 %v3818_v2  ;;  %1584 = vmatpush1.bf16.msra.mxu1 %v3821_v3 }
 0x1aa   : > { %3531 = vmatprep.subr.bf16.mxu0 %v3927_v4  ;;  %3537 = vmatprep.subr.bf16.mxu1 %v3927_v4 }
 0x1ac   : > { %1559 = vmatmul.mubr.bf16.vlgmr.msra.gmra.mrb[8].mxu0 %v4155_v7  ;;  %1602 = vmatmul.mubr.bf16.vlgmr.msra.gmra.mrb[8].mxu1 %v4155_v7  ;;  %v820_v7 = vsub.s32 1, %v4233_v6 }
 0x1ad   : > { %3533 = vmatprep.mubr.msk.bf16.mxu0 %vm3928_vm0, %v3927_v4  ;;  %3539 = vmatprep.mubr.msk.bf16.mxu1 %vm3928_vm0, %v3927_v4 }
 0x1ae   : > { %v4241_v12 = vrot.slane %v811_v9, %v820_v7  ;;  %v4266_v43 = vrot.slane %v810_v23, %v820_v7 }
 0x23f   : > { %v1388_v14 = vpop.f32.mrb[0].mxu0  ;;  %v1431_v15 = vpop.f32.mrb[0].mxu1 }
 0x240   : > { %v1390_v16 = vpop.f32.mrb[1].mxu0  ;;  %v1433_v17 = vpop.f32.mrb[1].mxu1  ;;  %v1389_v39 = vadd.f32 %v1388_v14, %v817_v32  ;;  %v1432_v53 = vadd.f32 %v1431_v15, %v4276_v50 }
 0x241   : > { %v1392_v18 = vpop.f32.mrb[2].mxu0  ;;  %v4245_v19 = vpop.f32.mrb[2].mxu1  ;;  %v1391_v47 = vadd.f32 %v1390_v16, %v4266_v43  ;;  %v1434_v59 = vadd.f32 %v1433_v17, %v4285_v56 }
 0x242   : > { %v4247_v20 = vpop.f32.mrb[3].mxu0  ;;  %v4249_v21 = vpop.f32.mrb[3].mxu1  ;;  %v1612_v42 = vpack.c.bf16 %v1389_v39, %v1389_v39  ;;  %v1818_v55 = vpack.c.bf16 %v1432_v53, %v1432_v53  ;;  %v1393_v63 = vadd.f32 %v1392_v18, %v817_v32 }
 0x243   : > { %v1716_v51 = vpack.c.bf16 %v1391_v47, %v1391_v47  ;;  %v1920_v5 = vpack.c.bf16 %v1434_v59, %v1434_v59 }
 0x25f   : > { %v1474_v27 = vpop.f32.mrb[4].mxu0  ;;  %v1517_v28 = vpop.f32.mrb[4].mxu1 }
 0x260   : > { %v1475_v29 = vadd.f32 %v1474_v27, %v833_v24  ;;  %v1476_v30 = vpop.f32.mrb[5].mxu0  ;;  %v1519_v31 = vpop.f32.mrb[5].mxu1  ;;  %v1518_v48 = vadd.f32 %v1517_v28, %v4268_v44 }
 0x261   : > { %v1478_v33 = vpop.f32.mrb[6].mxu0  ;;  %v4255_v34 = vpop.f32.mrb[6].mxu1  ;;  %v1477_v41 = vadd.f32 %v1476_v30, %v4257_v36  ;;  %v1520_v54 = vadd.f32 %v1519_v31, %v4278_v45 }
 0x262   : > { %v1613_v35 = vpack.c.bf16 %v1475_v29, %v1475_v29  ;;  %v4259_v37 = vpop.f32.mrb[7].mxu0  ;;  %v4261_v38 = vpop.f32.mrb[7].mxu1  ;;  %v1819_v52 = vpack.c.bf16 %v1518_v48, %v1518_v48  ;;  %v1479_v60 = vadd.f32 %v1478_v33, %v833_v24  ;;  %v1436_v48 = vadd.f32 %v4245_v19, %v4276_v50 }
 0x263   : > { %v1717_v46 = vpack.c.bf16 %v1477_v41, %v1477_v41  ;;  %v1921_v57 = vpack.c.bf16 %v1520_v54, %v1520_v54  ;;  %v1481_v32 = vadd.f32 %v4259_v37, %v4257_v36  ;;  %v2022_v41 = vpack.c.bf16 %v1393_v63, %v1393_v63 }
 0x264   : > { %3532 = vmatpush3.bf16.xpose.msra.mxu0 %v1613_v35  ;;  %v2023_v6 = vpack.c.bf16 %v1479_v60, %v1479_v60  ;;  %v1395_v36 = vadd.f32 %v4247_v20, %v4266_v43  ;;  %v1522_v37 = vadd.f32 %v4255_v34, %v4268_v44  ;;  %v1524_v20 = vadd.f32 %v4261_v38, %v4278_v45 }
 0x265   : > { %3543 = vmatprep.subr.bf16.mxu0 %v3927_v4  ;;  %v2226_v43 = vpack.c.bf16 %v1436_v48, %v1436_v48  ;;  %v1438_v34 = vadd.f32 %v4249_v21, %v4285_v56 }
 0x266   : > { %v2227_v47 = vpack.c.bf16 %v1522_v37, %v1522_v37  ;;  %v2329_v49 = vpack.c.bf16 %v1524_v20, %v1524_v20 }
 0x267   : > { %v2328_v44 = vpack.c.bf16 %v1438_v34, %v1438_v34 }
 0x26b   : > { %3534 = vmatmul.mubr.bf16.vlgmr.msra.gmra.mrb[12].mxu0 %v1612_v42  ;;  %v2125_v42 = vpack.c.bf16 %v1481_v32, %v1481_v32 }
 0x26c   : > { %3544 = vmatpush3.bf16.xpose.msra.mxu0 %v1717_v46  ;;  %3545 = vmatprep.mubr.msk.bf16.mxu0 %vm3928_vm0, %v3927_v4  ;;  %v2124_v46 = vpack.c.bf16 %v1395_v36, %v1395_v36 }
 0x26d   : > { %3555 = vmatprep.subr.bf16.mxu0 %v3927_v4 }
 0x273   : > { %3546 = vmatmul.mubr.bf16.vlgmr.msra.gmra.mrb[16].mxu0 %v1716_v51 }
 0x274   : > { %3556 = vmatpush3.bf16.xpose.msra.mxu0 %v1819_v52  ;;  %3557 = vmatprep.mubr.msk.bf16.mxu0 %vm3928_vm0, %v3927_v4 }
 0x275   : > { %3567 = vmatprep.subr.bf16.mxu0 %v3927_v4 }
 0x27b   : > { %3558 = vmatmul.mubr.bf16.vlgmr.msra.gmra.mrb[20].mxu0 %v1818_v55 }
 0x27c   : > { %3568 = vmatpush3.bf16.xpose.msra.mxu0 %v1921_v57  ;;  %3569 = vmatprep.mubr.msk.bf16.mxu0 %vm3928_vm0, %v3927_v4 }
 0x27d   : > { %3579 = vmatprep.subr.bf16.mxu0 %v3927_v4 }
 0x27f   : > { %v1560_v61 = vpop.f32.mrb[8].mxu0  ;;  %v1603_v62 = vpop.f32.mrb[8].mxu1 }
 0x280   : > { %v1561_v0 = vadd.f32 %v1560_v61, %v849_v58  ;;  %v1604_v1 = vadd.f32 %v1603_v62, %v4239_v11  ;;  %v1562_v2 = vpop.f32.mrb[9].mxu0  ;;  %v1605_v3 = vpop.f32.mrb[9].mxu1 }
 0x281   : > { %v1563_v8 = vadd.f32 %v1562_v2, %v4241_v12  ;;  %v1606_v9 = vadd.f32 %v1605_v3, %v4243_v13  ;;  %v1564_v7 = vpop.f32.mrb[10].mxu0  ;;  %v1607_v10 = vpop.f32.mrb[10].mxu1 }
 0x282   : > { %v1614_v14 = vpack.c.bf16 %v1561_v0, %v1561_v0  ;;  %v1820_v15 = vpack.c.bf16 %v1604_v1, %v1604_v1  ;;  %v1565_v16 = vadd.f32 %v1564_v7, %v849_v58  ;;  %v1608_v17 = vadd.f32 %v1607_v10, %v4239_v11  ;;  %v1566_v18 = vpop.f32.mrb[11].mxu0  ;;  %v1609_v22 = vpop.f32.mrb[11].mxu1 }
 0x283   : > { %v1718_v23 = vpack.c.bf16 %v1563_v8, %v1563_v8  ;;  %v1922_v24 = vpack.c.bf16 %v1606_v9, %v1606_v9  ;;  %v1567_v25 = vadd.f32 %v1566_v18, %v4241_v12  ;;  %v1610_v26 = vadd.f32 %v1609_v22, %v4243_v13  ;;  %3570 = vmatmul.mubr.bf16.vlgmr.msra.gmra.mrb[24].mxu0 %v1920_v5 }
 0x284   : > { %v1673_v27 = vsel %vm1671_vm1, %v1614_v14, 0  ;;  %v4299_v28 = vsel %vm1671_vm1, %v1820_v15, 0  ;;  %v2024_v29 = vpack.c.bf16 %v1565_v16, %v1565_v16  ;;  %v2228_v30 = vpack.c.bf16 %v1608_v17, %v1608_v17  ;;  %3580 = vmatpush3.bf16.xpose.msra.mxu0 %v2023_v6  ;;  %3581 = vmatprep.mubr.msk.bf16.mxu0 %vm3928_vm0, %v3927_v4 }
 0x285   : > { %v4304_v11 = vsel %vm1671_vm1, %v1718_v23, 0  ;;  %v4307_v31 = vsel %vm1671_vm1, %v1922_v24, 0  ;;  %v2126_v12 = vpack.c.bf16 %v1567_v25, %v1567_v25  ;;  %v2330_v13 = vpack.c.bf16 %v1610_v26, %v1610_v26  ;;  %3538 = vmatpush3.bf16.msra.mxu1 %v1673_v27  ;;  %3591 = vmatprep.subr.bf16.mxu0 %v3927_v4 }
 0x286   : > { %v4313_v33 = vsel %vm1671_vm1, %v2024_v29, 0  ;;  %v4316_v35 = vsel %vm1671_vm1, %v2228_v30, 0  ;;  %3549 = vmatprep.subr.bf16.mxu1 %v3927_v4 }
 0x287   : > { %v4320_v39 = vsel %vm1671_vm1, %v2126_v12, 0  ;;  %v4323_v40 = vsel %vm1671_vm1, %v2330_v13, 0 }
 0x28b   : > { %3582 = vmatmul.mubr.bf16.vlgmr.msra.gmra.mrb[28].mxu0 %v2022_v41 }
 0x28c   : > { %3592 = vmatpush3.bf16.xpose.msra.mxu0 %v2125_v42  ;;  %3593 = vmatprep.mubr.msk.bf16.mxu0 %vm3928_vm0, %v3927_v4 }
 0x28d   : > { %3603 = vmatprep.subr.bf16.mxu0 %v3927_v4 }
 0x293   : > { %3594 = vmatmul.mubr.bf16.vlgmr.msra.gmra.mrb[32].mxu0 %v2124_v46 }
 0x294   : > { %3604 = vmatpush3.bf16.xpose.msra.mxu0 %v2227_v47  ;;  %3605 = vmatprep.mubr.msk.bf16.mxu0 %vm3928_vm0, %v3927_v4 }
 0x295   : > { %3615 = vmatprep.subr.bf16.mxu0 %v3927_v4 }
 0x29b   : > { %3606 = vmatmul.mubr.bf16.vlgmr.msra.gmra.mrb[36].mxu0 %v2226_v43 }
 0x29c   : > { %3616 = vmatpush3.bf16.xpose.msra.mxu0 %v2329_v49  ;;  %3617 = vmatprep.mubr.msk.bf16.mxu0 %vm3928_vm0, %v3927_v4 }
 0x2a3   : > { %3618 = vmatmul.mubr.bf16.vlgmr.msra.gmra.mrb[40].mxu0 %v2328_v44 }
 0x33e   : > { %v1649_v51 = vpop.f32.mrb[12].mxu0 }
 0x33f   : > { %v3535_v19 = vpop.f32.mrb[13].mxu0  ;;  %v1656_v50 = vsel %vm1655_vm2, %v1649_v51, -inf }
 0x340   : > { %1657 = vmax.xlane.f32.xlu0 %v1656_v50  ;;  %v1652_v52 = vpop.f32.mrb[14].mxu0 }
 0x341   : > { %v3536_v38 = vpop.f32.mrb[15].mxu0 }
 0x346   : > { %v1753_v45 = vpop.f32.mrb[16].mxu0 }
 0x347   : > { %v3547_v53 = vpop.f32.mrb[17].mxu0  ;;  %v1759_v54 = vsel %vm1655_vm2, %v1753_v45, -inf }
 0x348   : > { %1760 = vmax.xlane.f32.xlu1 %v1759_v54  ;;  %v1756_v55 = vpop.f32.mrb[18].mxu0 }
 0x349   : > { %v3548_v57 = vpop.f32.mrb[19].mxu0 }
 0x34e   : > { %v1855_v58 = vpop.f32.mrb[20].mxu0 }
 0x34f   : > { %v3559_v59 = vpop.f32.mrb[21].mxu0  ;;  %v1861_v21 = vsel %vm1655_vm2, %v1855_v58, -inf }
 0x350   : > { %1862 = vmax.xlane.f32.xlu0 %v1861_v21  ;;  %v1858_v56 = vpop.f32.mrb[22].mxu0 }
 0x351   : > { %v3560_v60 = vpop.f32.mrb[23].mxu0 }
 0x356   : > { %v1957_v61 = vpop.f32.mrb[24].mxu0 }
 0x357   : > { %v3571_v62 = vpop.f32.mrb[25].mxu0  ;;  %v1963_v63 = vsel %vm1655_vm2, %v1957_v61, -inf }
 0x358   : > { %1964 = vmax.xlane.f32.xlu1 %v1963_v63  ;;  %v1960_v0 = vpop.f32.mrb[26].mxu0 }
 0x359   : > { %v3572_v1 = vpop.f32.mrb[27].mxu0 }
 0x35e   : > { %v2059_v2 = vpop.f32.mrb[28].mxu0 }
 0x35f   : > { %v3583_v3 = vpop.f32.mrb[29].mxu0  ;;  %v2065_v5 = vsel %vm1655_vm2, %v2059_v2, -inf }
 0x360   : > { %2066 = vmax.xlane.f32.xlu0 %v2065_v5  ;;  %v2062_v6 = vpop.f32.mrb[30].mxu0 }
 0x361   : > { %v3584_v8 = vpop.f32.mrb[31].mxu0 }
 0x366   : > { %v2161_v9 = vpop.f32.mrb[32].mxu0 }
 0x367   : > { %v3595_v7 = vpop.f32.mrb[33].mxu0  ;;  %v2167_v10 = vsel %vm1655_vm2, %v2161_v9, -inf }
 0x368   : > { %2168 = vmax.xlane.f32.xlu1 %v2167_v10  ;;  %v2164_v14 = vpop.f32.mrb[34].mxu0 }
 0x369   : > { %v3596_v15 = vpop.f32.mrb[35].mxu0 }
 0x36e   : > { %v2263_v16 = vpop.f32.mrb[36].mxu0 }
 0x36f   : > { %v3607_v17 = vpop.f32.mrb[37].mxu0  ;;  %v2269_v18 = vsel %vm1655_vm2, %v2263_v16, -inf }
 0x370   : > { %2270 = vmax.xlane.f32.xlu0 %v2269_v18  ;;  %v2266_v22 = vpop.f32.mrb[38].mxu0 }
 0x371   : > { %v3608_v23 = vpop.f32.mrb[39].mxu0 }
 0x376   : > { %v2365_v24 = vpop.f32.mrb[40].mxu0 }
 0x377   : > { %v3619_v25 = vpop.f32.mrb[41].mxu0  ;;  %v2371_v26 = vsel %vm1655_vm2, %v2365_v24, -inf }
 0x378   : > { %2372 = vmax.xlane.f32.xlu1 %v2371_v26  ;;  %v2368_v27 = vpop.f32.mrb[42].mxu0 }
 0x379   : > { %v3620_v29 = vpop.f32.mrb[43].mxu0 }
 0x3cd   : > { %v1658_v30 = vpop.xlane.xlu0 %1657 }
 0x3ce   : > { %v1659_v12 = vsub.f32 %v1649_v51, %v1658_v30 }
 0x3d0   : > { %v1660_v13 = vmul.f32 1.442695, %v1659_v12 }
 0x3d2   : > { %3876 = vpow2.f32 %v1660_v13 }
 0x3d5   : > { %v1761_v32 = vpop.xlane.xlu1 %1760 }
 0x3d6   : > { %v1762_v41 = vsub.f32 %v1753_v45, %v1761_v32 }
 0x3d8   : > { %v1763_v42 = vmul.f32 1.442695, %v1762_v41 }
 0x3da   : > { %3878 = vpow2.f32 %v1763_v42 }
 0x3dc   : > { %v3877_v36 = vpop.eup %3876 }
 0x3dd   : > { %v1863_v37 = vpop.xlane.xlu0 %1862  ;;  %v1662_v46 = vsel %vm1655_vm2, %v3877_v36, 0.0 }
 0x3de   : > { %v1864_v47 = vsub.f32 %v1855_v58, %v1863_v37  ;;  %1663 = vadd.xlane.f32.xlu0 %v1662_v46 }
 0x3e0   : > { %v1865_v48 = vmul.f32 1.442695, %v1864_v47 }
 0x3e2   : > { %3880 = vpow2.f32 %v1865_v48  ;;  %v3824_v48 = vld [vmem:[%s4029_s26 + $0x40] sm:$0xff]  }
 0x3e3   : > { %3469 = vmatprep.subr.bf16.mxu0 %v3824_v48 }
 0x3e4   : > { %v3879_v20 = vpop.eup %3878 }
 0x3e5   : > { %v1965_v43 = vpop.xlane.xlu1 %1964  ;;  %v1765_v49 = vsel %vm1655_vm2, %v3879_v20, 0.0 }
 0x3e6   : > { %v1966_v34 = vsub.f32 %v1957_v61, %v1965_v43  ;;  %1766 = vadd.xlane.f32.xlu1 %v1765_v49  ;;  %v3827_v43 = vld [vmem:[%s4029_s26 + $0x8] sm:$0xff]   ;;  %v3828_v49 = vld [vmem:[%s4029_s26 + $0x50] sm:$0xff]  }
 0x3e8   : > { %v1967_v44 = vmul.f32 1.442695, %v1966_v34  ;;  %v3829_v34 = vld [vmem:[%s4029_s26 + $0x10] sm:$0xff]  }
 0x3ea   : > { %3882 = vpow2.f32 %v1967_v44  ;;  %v3830_v44 = vld [vmem:[%s4029_s26 + $0x58] sm:$0xff]  }
 0x3ec   : > { %v3881_v51 = vpop.eup %3880 }
 0x3ed   : > { %v2067_v19 = vpop.xlane.xlu0 %2066  ;;  %v1867_v50 = vsel %vm1655_vm2, %v3881_v51, 0.0 }
 0x3ee   : > { %v2068_v52 = vsub.f32 %v2059_v2, %v2067_v19  ;;  %1868 = vadd.xlane.f32.xlu0 %v1867_v50  ;;  %v3832_v19 = vld [vmem:[%s4029_s26 + $0x60] sm:$0xff]  }
 0x3ef   : > { %v3833_v50 = vld [vmem:[%s4029_s26 + $0xc0] sm:$0xff]  }
 0x3f0   : > { %v2069_v38 = vmul.f32 1.442695, %v2068_v52  ;;  %v3834_v52 = vld [vmem:[%s4029_s26 + $0x20] sm:$0xff]  }
 0x3f2   : > { %3884 = vpow2.f32 %v2069_v38  ;;  %v3835_v38 = vld [vmem:[%s4029_s26 + $0x80] sm:$0xff]  }
 0x3f4   : > { %v3883_v45 = vpop.eup %3882 }
 0x3f5   : > { %v2169_v53 = vpop.xlane.xlu1 %2168  ;;  %v1969_v54 = vsel %vm1655_vm2, %v3883_v45, 0.0 }
 0x3f6   : > { %v2170_v55 = vsub.f32 %v2161_v9, %v2169_v53  ;;  %1970 = vadd.xlane.f32.xlu1 %v1969_v54  ;;  %v3837_v53 = vld [vmem:[%s4029_s26 + $0xc8] sm:$0xff]  }
 0x3f7   : > { %v3838_v54 = vld [vmem:[%s4029_s26 + $0x28] sm:$0xff]  }
 0x3f8   : > { %v2171_v57 = vmul.f32 1.442695, %v2170_v55  ;;  %v3839_v55 = vld [vmem:[%s4029_s26 + $0x88] sm:$0xff]  }
 0x3fa   : > { %3886 = vpow2.f32 %v2171_v57  ;;  %v3840_v57 = vld [vmem:[%s4029_s26 + $0x70] sm:$0xff]  }
 0x3fc   : > { %v3885_v58 = vpop.eup %3884 }
 0x3fd   : > { %v2271_v59 = vpop.xlane.xlu0 %2270  ;;  %v2071_v21 = vsel %vm1655_vm2, %v3885_v58, 0.0 }
 0x3fe   : > { %v2272_v56 = vsub.f32 %v2263_v16, %v2271_v59  ;;  %2072 = vadd.xlane.f32.xlu0 %v2071_v21  ;;  %v3842_v59 = vld [vmem:[%s4029_s26 + $0x30] sm:$0xff]  }
 0x3ff   : > { %v3843_v21 = vld [vmem:[%s4029_s26 + $0x90] sm:$0xff]  }
 0x400   : > { %v2273_v60 = vmul.f32 1.442695, %v2272_v56  ;;  %v3844_v56 = vld [vmem:[%s4029_s26 + $0x78] sm:$0xff]  }
 0x402   : > { %3888 = vpow2.f32 %v2273_v60  ;;  %v3845_v60 = vld [vmem:[%s4029_s26 + $0xd8] sm:$0xff]  }
 0x404   : > { %v4356_v61 = vpop.eup %3886 }
 0x405   : > { %v2373_v62 = vpop.xlane.xlu1 %2372  ;;  %v2173_v63 = vsel %vm1655_vm2, %v4356_v61, 0.0 }
 0x406   : > { %v2374_v0 = vsub.f32 %v2365_v24, %v2373_v62  ;;  %2174 = vadd.xlane.f32.xlu1 %v2173_v63  ;;  %v3847_v62 = vld [vmem:[%s4029_s26 + $0x98] sm:$0xff]   ;;  %v3848_v63 = vld [vmem:[%s4029_s26 + $0xe0] sm:$0xff]  }
 0x408   : > { %v2375_v1 = vmul.f32 1.442695, %v2374_v0  ;;  %v3849_v0 = vld [vmem:[%s4029_s26 + $0xa0] sm:$0xff]  }
 0x40a   : > { %3890 = vpow2.f32 %v2375_v1  ;;  %v3850_v1 = vld [vmem:[%s4029_s26 + $0xe8] sm:$0xff]  }
 0x40c   : > { %v4360_v2 = vpop.eup %3888 }
 0x40d   : > { %v2275_v3 = vsel %vm1655_vm2, %v4360_v2, 0.0 }
 0x40e   : > { %2276 = vadd.xlane.f32.xlu0 %v2275_v3  ;;  %v3852_v3 = vld [vmem:[%s4029_s26 + $0xf0] sm:$0xff]  }
 0x414   : > { %v4364_v5 = vpop.eup %3890 }
 0x415   : > { %v2377_v6 = vsel %vm1655_vm2, %v4364_v5, 0.0 }
 0x416   : > { %2378 = vadd.xlane.f32.xlu1 %v2377_v6  ;;  %v3854_v6 = vld [vmem:[%s4029_s26 + $0xf8] sm:$0xff]  }
 0x46b   : > { %v1664_v8 = vpop.xlane.xlu0 %1663 }
 0x46c   : > { %3892 = vrcp.f32 %v1664_v8  ;;  %v3855_v8 = vld [vmem:[%s4029_s26 + $0xb8] sm:$0xff]  }
 0x473   : > { %v1767_v9 = vpop.xlane.xlu1 %1766 }
 0x474   : > { %3894 = vrcp.f32 %v1767_v9 }
 0x476   : > { %v3893_v7 = vpop.eup %3892 }
 0x477   : > { %v1666_v10 = vmul.f32 %v3893_v7, %v3877_v36 }
 0x479   : > { %v1667_v14 = vpack.c.bf16 %v1666_v10, %v1666_v10 }
 0x47b   : > { %3540 = vmatmul.mubr.msk.bf16.vlgmr.msra.gmra.mrb[12].mxu1 %vm1655_vm2, %v1667_v14  ;;  %v1869_v15 = vpop.xlane.xlu0 %1868 }
 0x47c   : > { %3550 = vmatpush3.bf16.msra.mxu1 %v4304_v11  ;;  %3896 = vrcp.f32 %v1869_v15  ;;  %3551 = vmatprep.mubr.msk.bf16.mxu1 %vm3928_vm0, %v3927_v4 }
 0x47d   : > { %3561 = vmatprep.subr.bf16.mxu1 %v3927_v4 }
 0x47e   : > { %v3895_v16 = vpop.eup %3894 }
 0x47f   : > { %v1769_v17 = vmul.f32 %v3895_v16, %v3879_v20  ;;  %v3825_v20 = vld [vmem:[%s4029_s26] sm:$0xff]  }
 0x480   : > { %3470 = vmatpush3.bf16.msra.mxu0 %v3825_v20 }
 0x481   : > { %v1770_v18 = vpack.c.bf16 %v1769_v17, %v1769_v17 }
 0x483   : > { %3552 = vmatmul.mubr.msk.bf16.vlgmr.msra.gmra.mrb[16].mxu1 %vm1655_vm2, %v1770_v18  ;;  %v1971_v22 = vpop.xlane.xlu1 %1970 }
 0x484   : > { %3562 = vmatpush3.bf16.msra.mxu1 %v4299_v28  ;;  %3898 = vrcp.f32 %v1971_v22  ;;  %3563 = vmatprep.mubr.msk.bf16.mxu1 %vm3928_vm0, %v3927_v4 }
 0x485   : > { %3573 = vmatprep.subr.bf16.mxu1 %v3927_v4 }
 0x486   : > { %v3897_v11 = vpop.eup %3896 }
 0x487   : > { %v1871_v23 = vmul.f32 %v3897_v11, %v3881_v51  ;;  %v3831_v51 = vld [vmem:[%s4029_s26 + $0x18] sm:$0xff]  }
 0x489   : > { %v1872_v24 = vpack.c.bf16 %v1871_v23, %v1871_v23 }
 0x48b   : > { %v2073_v25 = vpop.xlane.xlu0 %2072  ;;  %3564 = vmatmul.mubr.msk.bf16.vlgmr.msra.gmra.mrb[20].mxu1 %vm1655_vm2, %v1872_v24 }
 0x48c   : > { %3900 = vrcp.f32 %v2073_v25  ;;  %3574 = vmatpush3.bf16.msra.mxu1 %v4307_v31  ;;  %3575 = vmatprep.mubr.msk.bf16.mxu1 %vm3928_vm0, %v3927_v4 }
 0x48d   : > { %3585 = vmatprep.subr.bf16.mxu1 %v3927_v4 }
 0x48e   : > { %v3899_v28 = vpop.eup %3898 }
 0x48f   : > { %v1973_v26 = vmul.f32 %v3899_v28, %v3883_v45  ;;  %v3836_v45 = vld [vmem:[%s4029_s26 + $0x68] sm:$0xff]  }
 0x491   : > { %v1974_v27 = vpack.c.bf16 %v1973_v26, %v1973_v26 }
 0x493   : > { %3576 = vmatmul.mubr.msk.bf16.vlgmr.msra.gmra.mrb[24].mxu1 %vm1655_vm2, %v1974_v27  ;;  %v2175_v29 = vpop.xlane.xlu1 %2174 }
 0x494   : > { %3586 = vmatpush3.bf16.msra.mxu1 %v4313_v33  ;;  %3902 = vrcp.f32 %v2175_v29  ;;  %3587 = vmatprep.mubr.msk.bf16.mxu1 %vm3928_vm0, %v3927_v4 }
 0x495   : > { %3597 = vmatprep.subr.bf16.mxu1 %v3927_v4 }
 0x496   : > { %v3901_v31 = vpop.eup %3900 }
 0x497   : > { %v2075_v30 = vmul.f32 %v3901_v31, %v3885_v58  ;;  %v3841_v58 = vld [vmem:[%s4029_s26 + $0xd0] sm:$0xff]  }
 0x499   : > { %v2076_v12 = vpack.c.bf16 %v2075_v30, %v2075_v30 }
 0x49b   : > { %v2277_v13 = vpop.xlane.xlu0 %2276  ;;  %3588 = vmatmul.mubr.msk.bf16.vlgmr.msra.gmra.mrb[28].mxu1 %vm1655_vm2, %v2076_v12 }
 0x49c   : > { %3904 = vrcp.f32 %v2277_v13  ;;  %3598 = vmatpush3.bf16.msra.mxu1 %v4320_v39  ;;  %3599 = vmatprep.mubr.msk.bf16.mxu1 %vm3928_vm0, %v3927_v4 }
 0x49d   : > { %3609 = vmatprep.subr.bf16.mxu1 %v3927_v4 }
 0x49e   : > { %v3903_v33 = vpop.eup %3902 }
 0x49f   : > { %v2177_v32 = vmul.f32 %v3903_v33, %v4356_v61  ;;  %v3846_v61 = vld [vmem:[%s4029_s26 + $0x38] sm:$0xff]  }
 0x4a1   : > { %v2178_v41 = vpack.c.bf16 %v2177_v32, %v2177_v32 }
 0x4a3   : > { %3600 = vmatmul.mubr.msk.bf16.vlgmr.msra.gmra.mrb[32].mxu1 %vm1655_vm2, %v2178_v41  ;;  %v2379_v42 = vpop.xlane.xlu1 %2378 }
 0x4a4   : > { %3610 = vmatpush3.bf16.msra.mxu1 %v4316_v35  ;;  %3906 = vrcp.f32 %v2379_v42  ;;  %3611 = vmatprep.mubr.msk.bf16.mxu1 %vm3928_vm0, %v3927_v4 }
 0x4a5   : > { %3621 = vmatprep.subr.bf16.mxu1 %v3927_v4 }
 0x4a6   : > { %v3905_v39 = vpop.eup %3904 }
 0x4a7   : > { %v2279_v36 = vmul.f32 %v3905_v39, %v4360_v2  ;;  %v3851_v2 = vld [vmem:[%s4029_s26 + $0xa8] sm:$0xff]  }
 0x4a9   : > { %v2280_v37 = vpack.c.bf16 %v2279_v36, %v2279_v36 }
 0x4ab   : > { %3612 = vmatmul.mubr.msk.bf16.vlgmr.msra.gmra.mrb[36].mxu1 %vm1655_vm2, %v2280_v37 }
 0x4ac   : > { %3622 = vmatpush3.bf16.msra.mxu1 %v4323_v40  ;;  %3623 = vmatprep.mubr.msk.bf16.mxu1 %vm3928_vm0, %v3927_v4  ;;  %v3826_v40 = vld [vmem:[%s4029_s26 + $0x48] sm:$0xff]  }
 0x4ad   : > { %3471 = vmatprep.subr.bf16.mxu0 %v3826_v40  ;;  %3491 = vmatprep.subr.bf16.mxu1 %v3833_v50 }
 0x4ae   : > { %v3907_v35 = vpop.eup %3906  ;;  %3472 = vmatpush3.bf16.msra.mxu0 %v3827_v43 }
 0x4af   : > { %v2381_v46 = vmul.f32 %v3907_v35, %v4364_v5  ;;  %3473 = vmatprep.subr.bf16.mxu0 %v3828_v49  ;;  %v3853_v5 = vld [vmem:[%s4029_s26 + $0xb0] sm:$0xff]  }
 0x4b1   : > { %v2382_v47 = vpack.c.bf16 %v2381_v46, %v2381_v46 }
 0x4b2   : > { %3474 = vmatpush3.bf16.msra.mxu0 %v3829_v34 }
 0x4b3   : > { %3624 = vmatmul.mubr.msk.bf16.vlgmr.msra.gmra.mrb[40].mxu1 %vm1655_vm2, %v2382_v47  ;;  %3475 = vmatprep.subr.bf16.mxu0 %v3830_v44 }
 0x4b4   : > { %3492 = vmatpush3.bf16.msra.mxu1 %v3835_v38  ;;  %v3376_v38 = vld [vmem:[%s4559_s14] ss:$0 sm:$0xff] }
 0x4b5   : > { %3493 = vmatprep.subr.bf16.mxu1 %v3837_v53 }
 0x4b6   : > { %3476 = vmatpush3.bf16.msra.mxu0 %v3831_v51 }
 0x4b7   : > { %3477 = vmatprep.subr.bf16.mxu0 %v3832_v19 }
 0x4b8   : > { %3494 = vmatpush3.bf16.msra.mxu1 %v3839_v55 }
 0x4b9   : > { %3495 = vmatprep.subr.bf16.mxu1 %v3841_v58 }
 0x4ba   : > { %3478 = vmatpush3.bf16.msra.mxu0 %v3834_v52 }
 0x4bb   : > { %3479 = vmatprep.subr.bf16.mxu0 %v3836_v45 }
 0x4bc   : > { %3496 = vmatpush3.bf16.msra.mxu1 %v3843_v21 }
 0x4bd   : > { %3497 = vmatprep.subr.bf16.mxu1 %v3845_v60 }
 0x4be   : > { %3480 = vmatpush3.bf16.msra.mxu0 %v3838_v54 }
 0x4bf   : > { %3481 = vmatprep.subr.bf16.mxu0 %v3840_v57 }
 0x4c0   : > { %3498 = vmatpush3.bf16.msra.mxu1 %v3847_v62 }
 0x4c1   : > { %3499 = vmatprep.subr.bf16.mxu1 %v3848_v63  ;;  %v3913_v63 = vld [vmem:[#allocation2 + $0x8] sm:$0xff] }
 0x4c2   : > { %3482 = vmatpush3.bf16.msra.mxu0 %v3842_v59 }
 0x4c3   : > { %3483 = vmatprep.subr.bf16.mxu0 %v3844_v56 }
 0x4c4   : > { %3500 = vmatpush3.bf16.msra.mxu1 %v3849_v0 }
 0x4c5   : > { %3501 = vmatprep.subr.bf16.mxu1 %v3850_v1  ;;  %v3856_v1 = vld [vmem:[%s4049_s22] sm:$0xff]  }
 0x4c6   : > { %3484 = vmatpush3.bf16.msra.mxu0 %v3846_v61  ;;  %v3912_v61 = vld [vmem:[#allocation2] sm:$0xff] }
 0x4c7   : > { %3627 = vmatprep.subr.bf16.mxu0 %v3927_v4 }
 0x4c8   : > { %3502 = vmatpush3.bf16.msra.mxu1 %v3851_v2 }
 0x4c9   : > { %3503 = vmatprep.subr.bf16.mxu1 %v3852_v3 }
 0x4cc   : > { %3504 = vmatpush3.bf16.msra.mxu1 %v3853_v5 }
 0x4cd   : > { %3505 = vmatprep.subr.bf16.mxu1 %v3854_v6 }
 0x4d0   : > { %3506 = vmatpush3.bf16.msra.mxu1 %v3855_v8 }
 0x4d1   : > { %3647 = vmatprep.subr.bf16.mxu1 %v3927_v4 }
 0x54e   : > { %v1709_v9 = vpop.f32.mrb[12].mxu1 }
 0x54f   : > { %v3541_v7 = vpop.f32.mrb[13].mxu1 }
 0x550   : > { %v1712_v10 = vpop.f32.mrb[14].mxu1 }
 0x551   : > { %v3542_v14 = vpop.f32.mrb[15].mxu1 }
 0x552   : > { %v3857_v14 = vld [vmem:[%s4049_s22 + $0x8] sm:$0xff]  }
 0x556   : > { %v1811_v15 = vpop.f32.mrb[16].mxu1 }
 0x557   : > { %v3553_v16 = vpop.f32.mrb[17].mxu1 }
 0x558   : > { %v1814_v17 = vpop.f32.mrb[18].mxu1  ;;  %v3859_v16 = vld [vmem:[%s4049_s22 + $0x18] sm:$0xff]  }
 0x559   : > { %v3554_v18 = vpop.f32.mrb[19].mxu1  ;;  %v3860_v17 = vld [vmem:[%s4049_s22 + $0x20] sm:$0xff]  }
 0x55a   : > { %v3861_v18 = vld [vmem:[%s4049_s22 + $0x28] sm:$0xff]  }
 0x55e   : > { %v1913_v22 = vpop.f32.mrb[20].mxu1 }
 0x55f   : > { %v3565_v11 = vpop.f32.mrb[21].mxu1 }
 0x560   : > { %v1916_v23 = vpop.f32.mrb[22].mxu1  ;;  %v3863_v11 = vld [vmem:[%s4049_s22 + $0x38] sm:$0xff]  }
 0x561   : > { %v3566_v24 = vpop.f32.mrb[23].mxu1  ;;  %v3864_v23 = vld [vmem:[%s4058_s30] sm:$0xff]  }
 0x562   : > { %v3865_v24 = vld [vmem:[%s4058_s30 + $0x8] sm:$0xff]  }
 0x566   : > { %v2015_v25 = vpop.f32.mrb[24].mxu1 }
 0x567   : > { %v3577_v28 = vpop.f32.mrb[25].mxu1 }
 0x568   : > { %v2018_v26 = vpop.f32.mrb[26].mxu1  ;;  %v3867_v28 = vld [vmem:[%s4058_s30 + $0x18] sm:$0xff]  }
 0x569   : > { %v3578_v27 = vpop.f32.mrb[27].mxu1  ;;  %v3868_v26 = vld [vmem:[%s4058_s30 + $0x20] sm:$0xff]  }
 0x56a   : > { %v3869_v27 = vld [vmem:[%s4058_s30 + $0x28] sm:$0xff]  }
 0x56e   : > { %v2117_v29 = vpop.f32.mrb[28].mxu1 }
 0x56f   : > { %v2438_v31 = vpack.c.bf16 %v2117_v29, %v1709_v9  ;;  %v3589_v30 = vpop.f32.mrb[29].mxu1 }
 0x570   : > { %v2120_v12 = vpop.f32.mrb[30].mxu1 }
 0x571   : > { %v3590_v13 = vpop.f32.mrb[31].mxu1 }
 0x576   : > { %v2219_v33 = vpop.f32.mrb[32].mxu1 }
 0x577   : > { %v2439_v32 = vpack.c.bf16 %v2219_v33, %v1811_v15  ;;  %v3601_v41 = vpop.f32.mrb[33].mxu1  ;;  %v3858_v15 = vld [vmem:[%s4049_s22 + $0x10] sm:$0xff]  }
 0x578   : > { %v2222_v42 = vpop.f32.mrb[34].mxu1 }
 0x579   : > { %v3602_v39 = vpop.f32.mrb[35].mxu1  ;;  %2737 = vmatprep.mubr.bf16.mxu0 %v2439_v32 }
 0x57a   : > { %2738 = vmatmul.mubr.bf16.vlgmr.msra.gmra.mrb[44].mxu0 %v2438_v31 }
 0x57b   : > { %3643 = vmatprep.mubr.msk.bf16.mxu0 %vm3928_vm0, %v3927_v4  ;;  %3628 = vmatpush3.bf16.msra.mxu0 %v3856_v1 }
 0x57c   : > { %3629 = vmatprep.subr.bf16.mxu0 %v3927_v4 }
 0x57e   : > { %v2321_v36 = vpop.f32.mrb[36].mxu1 }
 0x57f   : > { %v2440_v37 = vpack.c.bf16 %v2321_v36, %v1913_v22  ;;  %v3613_v35 = vpop.f32.mrb[37].mxu1  ;;  %3630 = vmatpush3.bf16.msra.mxu0 %v3857_v14  ;;  %v3862_v22 = vld [vmem:[%s4049_s22 + $0x30] sm:$0xff]  }
 0x580   : > { %v2324_v46 = vpop.f32.mrb[38].mxu1  ;;  %3631 = vmatprep.subr.bf16.mxu0 %v3927_v4 }
 0x581   : > { %v3614_v47 = vpop.f32.mrb[39].mxu1  ;;  %v3409_v46 = vld [vmem:[%s651_s25] ss:$0 sm:$0xff] }
 0x583   : > { %3632 = vmatpush3.bf16.msra.mxu0 %v3858_v15 }
 0x584   : > { %3633 = vmatprep.subr.bf16.mxu0 %v3927_v4 }
 0x586   : > { %v2423_v48 = vpop.f32.mrb[40].mxu1 }
 0x587   : > { %v2441_v20 = vpack.c.bf16 %v2423_v48, %v2015_v25  ;;  %v3625_v40 = vpop.f32.mrb[41].mxu1  ;;  %3634 = vmatpush3.bf16.msra.mxu0 %v3859_v16  ;;  %v3866_v25 = vld [vmem:[%s4058_s30 + $0x10] sm:$0xff]  }
 0x588   : > { %v2426_v43 = vpop.f32.mrb[42].mxu1  ;;  %3635 = vmatprep.subr.bf16.mxu0 %v3927_v4 }
 0x589   : > { %v3626_v49 = vpop.f32.mrb[43].mxu1  ;;  %2778 = vmatprep.mubr.bf16.mxu1 %v2441_v20  ;;  %v3410_v43 = vld [vmem:[%s654_s13] ss:$0 sm:$0xff] }
 0x58a   : > { %2779 = vmatmul.mubr.bf16.vlgmr.msra.gmra.mrb[44].mxu1 %v2440_v37 }
 0x58b   : > { %3663 = vmatprep.mubr.msk.bf16.mxu1 %vm3928_vm0, %v3927_v4  ;;  %3636 = vmatpush3.bf16.msra.mxu0 %v3860_v17 }
 0x58c   : > { %3637 = vmatprep.subr.bf16.mxu0 %v3927_v4  ;;  %3648 = vmatpush3.bf16.msra.mxu1 %v3864_v23 }
 0x58d   : > { %3649 = vmatprep.subr.bf16.mxu1 %v3927_v4 }
 0x58f   : > { %3638 = vmatpush3.bf16.msra.mxu0 %v3861_v18 }
 0x590   : > { %3639 = vmatprep.subr.bf16.mxu0 %v3927_v4  ;;  %3650 = vmatpush3.bf16.msra.mxu1 %v3865_v24 }
 0x591   : > { %3651 = vmatprep.subr.bf16.mxu1 %v3927_v4 }
 0x593   : > { %3640 = vmatpush3.bf16.msra.mxu0 %v3862_v22 }
 0x594   : > { %3641 = vmatprep.subr.bf16.mxu0 %v3927_v4  ;;  %3652 = vmatpush3.bf16.msra.mxu1 %v3866_v25 }
 0x595   : > { %3653 = vmatprep.subr.bf16.mxu1 %v3927_v4 }
 0x597   : > { %3642 = vmatpush3.bf16.msra.mxu0 %v3863_v11 }
 0x598   : > { %3654 = vmatpush3.bf16.msra.mxu1 %v3867_v28 }
 0x599   : > { %3655 = vmatprep.subr.bf16.mxu1 %v3927_v4 }
 0x59c   : > { %3656 = vmatpush3.bf16.msra.mxu1 %v3868_v26 }
 0x59d   : > { %3657 = vmatprep.subr.bf16.mxu1 %v3927_v4 }
 0x5a0   : > { %3658 = vmatpush3.bf16.msra.mxu1 %v3869_v27 }
 0x5a1   : > { %3659 = vmatprep.subr.bf16.mxu1 %v3927_v4 }
 0x64d   : > { %v3485_v34 = vpop.f32.mrb[44].mxu0 }
 0x64e   : > { %v3486_v44 = vpop.f32.mrb[45].mxu0 }
 0x64f   : > { %v3487_v51 = vadd.f32 %v3486_v44, %v3485_v34  ;;  %v3488_v19 = vpop.f32.mrb[46].mxu0 }
 0x650   : > { %v3489_v50 = vpop.f32.mrb[47].mxu0 }
 0x651   : > { %v3490_v52 = vadd.f32 %v3489_v50, %v3488_v19  ;;  %v2740_v54 = vadd.f32 %v3487_v51, %v3376_v38  ;;  %v3870_v19 = vld [vmem:[%s4058_s30 + $0x30] sm:$0xff]   ;;  %v3871_v50 = vld [vmem:[%s4058_s30 + $0x38] sm:$0xff]   ;;  %s4561_s30 = scalar_lea.vmem %s4533_s8, %s4021_s20 }
 0x652   : > { %3660 = vmatpush3.bf16.msra.mxu1 %v3870_v19 }
 0x653   : > { %v2743_v59 = vadd.f32 %v3490_v52, %v3376_v38  ;;  %3661 = vmatprep.subr.bf16.mxu1 %v3927_v4  ;;  %v3411_v52 = vld [vmem:[%s4560_s28] ss:$0 sm:$0xff] }
 0x654   : > { %v3420_v4 = vld [vmem:[%s4561_s30] ss:$0 sm:$0xff] }
 0x656   : > { %3662 = vmatpush3.bf16.msra.mxu1 %v3871_v50 }
 0x65d   : > { %v3507_v45 = vpop.f32.mrb[44].mxu1 }
 0x65e   : > { %v3508_v53 = vpop.f32.mrb[45].mxu1 }
 0x65f   : > { %v3509_v55 = vadd.f32 %v3508_v53, %v3507_v45  ;;  %v3510_v57 = vpop.f32.mrb[46].mxu1 }
 0x660   : > { %v3511_v58 = vpop.f32.mrb[47].mxu1 }
 0x661   : > { %v2781_v21 = vadd.f32 %v3509_v55, %v2740_v54  ;;  %v3512_v56 = vadd.f32 %v3511_v58, %v3510_v57 }
 0x663   : > { %v2784_v60 = vadd.f32 %v3512_v56, %v2743_v59  ;;  %v4449_v62 = vadd.f32 %v3912_v61, %v2781_v21 }
 0x665   : > { %2791 = vadd.xlane.f32.xlu0 %v4449_v62  ;;  %v4452_v0 = vadd.f32 %v3913_v63, %v2784_v60 }
 0x667   : > { %2793 = vadd.xlane.f32.xlu1 %v4452_v0 }
 0x6f2   : > { %v2792_v2 = vpop.xlane.xlu0 %2791 }
 0x6f3   : > { %v2795_v3 = vmul.f32 0.03125, %v2792_v2 }
 0x6f4   : > { %v2794_v5 = vpop.xlane.xlu1 %2793 }
 0x6f5   : > { %v2797_v6 = vsub.f32 %v4449_v62, %v2795_v3  ;;  %v2796_v8 = vmul.f32 0.03125, %v2794_v5  ;;  %v2805_v29 = vmul.f32 %v2795_v3, %v2795_v3 }
 0x6f7   : > { %v2798_v9 = vsub.f32 %v4452_v0, %v2796_v8  ;;  %v2799_v7 = vmul.f32 %v2797_v6, %v2797_v6  ;;  %v2806_v31 = vmul.f32 %v2796_v8, %v2796_v8  ;;  %v2807_v30 = vmul.f32 96.0, %v2805_v29 }
 0x6f9   : > { %2801 = vadd.xlane.f32.xlu0 %v2799_v7  ;;  %v2800_v10 = vmul.f32 %v2798_v9, %v2798_v9  ;;  %v2808_v33 = vmul.f32 96.0, %v2806_v31  ;;  %v3430_v31 = vld [vmem:[%s4563_s23] ss:$0 sm:$0xff] (!%p3429_p5) }
 0x6fb   : > { %2803 = vadd.xlane.f32.xlu1 %v2800_v10 }
 0x786   : > { %v2802_v12 = vpop.xlane.xlu0 %2801 }
 0x787   : > { %v2809_v13 = vsub.f32 %v2802_v12, %v2807_v30  ;;  %v3431_v12 = vld [vmem:[%s4564_s0] ss:$0 sm:$0xff] (!%p3429_p5) }
 0x788   : > { %v2804_v32 = vpop.xlane.xlu1 %2803 }
 0x789   : > { %v2811_v41 = vmul.f32 0.03125, %v2809_v13  ;;  %v2810_v42 = vsub.f32 %v2804_v32, %v2808_v33 }
 0x78b   : > { %v2813_v39 = vadd.f32 1e-05, %v2811_v41  ;;  %v2812_v36 = vmul.f32 0.03125, %v2810_v42 }
 0x78d   : > { %3908 = vrsqrt.f32 %v2813_v39  ;;  %v2814_v37 = vadd.f32 1e-05, %v2812_v36 }
 0x78f   : > { %3910 = vrsqrt.f32 %v2814_v37 }
 0x797   : > { %v3909_v35 = vpop.eup %3908 }
 0x798   : > { %v2817_v47 = vmul.f32 %v3909_v35, %v2797_v6 }
 0x799   : > { %v3911_v48 = vpop.eup %3910 }
 0x79a   : > { %v2818_v20 = vmul.f32 %v3911_v48, %v2798_v9  ;;  %v2825_v40 = vmul.f32 %v3409_v46, %v2817_v47 }
 0x79c   : > { %v2826_v49 = vmul.f32 %v3409_v46, %v2818_v20  ;;  %v2833_v34 = vadd.f32 %v3410_v43, %v2825_v40 }
 0x79e   : > { %v2834_v44 = vadd.f32 %v3410_v43, %v2826_v49 }
 0x7a0   : > { %v2835_v51 = vpack.c.bf16 %v2834_v44, %v2833_v34 }
 0x7a2   : > { %3644 = vmatmul.mubr.bf16.vlgmr.msra.gmra.mrb[48].mxu0 %v2835_v51 }
 0x875   : > { %v2941_v38 = vpop.f32.mrb[48].mxu0 }
 0x876   : > { %v2942_v45 = vadd.f32 %v3411_v52, %v2941_v38  ;;  %v3645_v53 = vpop.f32.mrb[49].mxu0 }
 0x877   : > { %v2944_v54 = vpop.f32.mrb[50].mxu0 }
 0x878   : > { %v2945_v55 = vadd.f32 %v3411_v52, %v2944_v54  ;;  %v3646_v57 = vpop.f32.mrb[51].mxu0  ;;  %v2948_v58 = vmax.f32 %v2942_v45, 0.0 }
 0x87a   : > { %v2949_v59 = vmax.f32 %v2945_v55, 0.0 }
 0x87c   : > { %v2950_v21 = vpack.c.bf16 %v2949_v59, %v2948_v58 }
 0x87e   : > { %3664 = vmatmul.mubr.bf16.vlgmr.msra.gmra.mrb[48].mxu1 %v2950_v21 }
 0x951   : > { %v3056_v56 = vpop.f32.mrb[48].mxu1 }
 0x952   : > { %v3057_v60 = vadd.f32 %v3420_v4, %v3056_v56  ;;  %v3665_v61 = vpop.f32.mrb[49].mxu1  ;;  %3070 = sbr.rel (%p3429_p5) target bundleno = 2708 (0xa94), region = 88 }
 0x953   : > { %v3059_v63 = vpop.f32.mrb[50].mxu1 }
 0x954   : > { %v3063_v1 = vadd.f32 %v3057_v60, %v4449_v62  ;;  %v3060_v2 = vadd.f32 %v3420_v4, %v3059_v63  ;;  %v3666_v3 = vpop.f32.mrb[51].mxu1 }
 0x956   : > { %3065 = vst [vmem:[#allocation2] sm:$0xff] %v3063_v1  ;;  %v3064_v5 = vadd.f32 %v3060_v2, %v4452_v0  ;;  %3073 = vadd.xlane.f32.xlu0 (!%p3429_p5), %v3063_v1 }
 0x958   : > { %3066 = vst [vmem:[#allocation2 + $0x8] sm:$0xff] %v3064_v5 }
 0x95a   : > { %3075 = vadd.xlane.f32.xlu0 %v3064_v5 }
 0x9e3   : > { %v3074_v6 = vpop.xlane.xlu0 %3073 }
 0x9e4   : > { %v3077_v8 = vmul.f32 0.03125, %v3074_v6 }
 0x9e6   : > { %v3079_v9 = vsub.f32 %v3063_v1, %v3077_v8  ;;  %v3087_v16 = vmul.f32 %v3077_v8, %v3077_v8 }
 0x9e7   : > { %v3076_v7 = vpop.xlane.xlu0 %3075 }
 0x9e8   : > { %v3078_v10 = vmul.f32 0.03125, %v3076_v7  ;;  %v3081_v14 = vmul.f32 %v3079_v9, %v3079_v9  ;;  %v3089_v18 = vmul.f32 96.0, %v3087_v16 }
 0x9ea   : > { %v3080_v15 = vsub.f32 %v3064_v5, %v3078_v10  ;;  %3083 = vadd.xlane.f32.xlu1 %v3081_v14  ;;  %v3088_v17 = vmul.f32 %v3078_v10, %v3078_v10 }
 0x9ec   : > { %v3082_v62 = vmul.f32 %v3080_v15, %v3080_v15  ;;  %v3090_v11 = vmul.f32 96.0, %v3088_v17 }
 0x9ee   : > { %3085 = vadd.xlane.f32.xlu1 %v3082_v62 }
 0xa77   : > { %v3084_v0 = vpop.xlane.xlu1 %3083 }
 0xa78   : > { %v3091_v22 = vsub.f32 %v3084_v0, %v3089_v18 }
 0xa7a   : > { %v3093_v23 = vmul.f32 0.03125, %v3091_v22 }
 0xa7b   : > { %v3086_v24 = vpop.xlane.xlu1 %3085 }
 0xa7c   : > { %v3095_v25 = vadd.f32 1e-05, %v3093_v23  ;;  %v3092_v28 = vsub.f32 %v3086_v24, %v3090_v11 }
 0xa7e   : > { %3914 = vrsqrt.f32 %v3095_v25  ;;  %v3094_v26 = vmul.f32 0.03125, %v3092_v28 }
 0xa80   : > { %v3096_v27 = vadd.f32 1e-05, %v3094_v26 }
 0xa82   : > { %3916 = vrsqrt.f32 %v3096_v27 }
 0xa88   : > { %v3915_v29 = vpop.eup %3914 }
 0xa89   : > { %v3099_v30 = vmul.f32 %v3915_v29, %v3079_v9 }
 0xa8b   : > { %v3107_v13 = vmul.f32 %v3430_v31, %v3099_v30 }
 0xa8c   : > { %v3917_v33 = vpop.eup %3916 }
 0xa8d   : > { %v3115_v32 = vadd.f32 %v3431_v12, %v3107_v13  ;;  %v3100_v41 = vmul.f32 %v3917_v33, %v3080_v15 }
 0xa8f   : > { %3117 = vst [vmem:[%s4565_s2] sm:$0xff] %v3115_v32  ;;  %v3108_v42 = vmul.f32 %v3430_v31, %v3100_v41 }
 0xa91   : > { %v3116_v39 = vadd.f32 %v3431_v12, %v3108_v42 }
 0xa93   : > { %3118 = vst [vmem:[%s4565_s2 + $0x8] sm:$0xff] %v3116_v39 }
 0xa94 PF: > { %s4566_s29 = sld [smem:[#allocation4_spill]] }
 0xa9a   : > { %s25_s18 = sadd.s32 1, %s4566_s29  }
 0xa9b   : > { %p22_p6 = scmp.ge.s32.totalorder %s25_s18, 4  }
 0xa9d   :  { %24 = sbr.rel (!%p22_p6) target bundleno = 8 (0x8), region = 147 }

// kernel: transformer_forward.5
= control target key start
LH: loop header
LB: loop body
LE: loop exit
PB: predicated region body
PF: predicated region fallthrough
CT: control target
= control target key end

     0   :  { %s7554_s0 = inlined_call_operand.vmem [shape: f32[16,128], index: 0, kind: input, shape index: {}]   ;;  %s7555_s1 = inlined_call_operand.vmem [shape: f32[16,128], index: 1, kind: input, shape index: {}]   ;;  %s7556_s2 = inlined_call_operand.vmem [shape: bf16[1,128,1536], index: 2, kind: input, shape index: {}]   ;;  %s7557_s3 = inlined_call_operand.vmem [shape: f32[1,1,1536], index: 3, kind: input, shape index: {}]   ;;  %s7558_s4 = inlined_call_operand.vmem [shape: bf16[1,512,128], index: 4, kind: input, shape index: {}]   ;;  %s7559_s5 = inlined_call_operand.vmem [shape: f32[1,1,128], index: 5, kind: input, shape index: {}]   ;;  %s7560_s6 = inlined_call_operand.vmem [shape: bf16[1,128,512], index: 6, kind: input, shape index: {}]   ;;  %s7561_s7 = inlined_call_operand.vmem [shape: f32[1,1,512], index: 7, kind: input, shape index: {}]   ;;  %s7562_s8 = inlined_call_operand.vmem [shape: bf16[1,128,1024], index: 8, kind: input, shape index: {}]   ;;  %s7563_s9 = inlined_call_operand.vmem [shape: f32[1,1,1024], index: 9, kind: input, shape index: {}]   ;;  %s7564_s10 = inlined_call_operand.vmem [shape: bf16[1,512,128], index: 10, kind: input, shape index: {}]   ;;  %s7565_s11 = inlined_call_operand.vmem [shape: f32[1,1,128], index: 11, kind: input, shape index: {}]   ;;  %s7566_s12 = inlined_call_operand.vmem [shape: bf16[1,128,128], index: 12, kind: input, shape index: {}]   ;;  %s7567_s13 = inlined_call_operand.vmem [shape: f32[1,1,128], index: 13, kind: input, shape index: {}]   ;;  %s7568_s14 = inlined_call_operand.vmem [shape: bf16[1,128,128], index: 14, kind: input, shape index: {}]   ;;  %s7569_s15 = inlined_call_operand.vmem [shape: f32[1,1,128], index: 15, kind: input, shape index: {}]   ;;  %s7570_s16 = inlined_call_operand.vmem [shape: f32[1,1,128], index: 16, kind: input, shape index: {}]   ;;  %s7571_s17 = inlined_call_operand.vmem [shape: f32[1,1,128], index: 17, kind: input, shape index: {}]   ;;  %s7572_s18 = inlined_call_operand.vmem [shape: f32[1,1,128], index: 18, kind: input, shape index: {}]   ;;  %s7573_s19 = inlined_call_operand.vmem [shape: f32[1,1,128], index: 19, kind: input, shape index: {}]   ;;  %s7574_s20 = inlined_call_operand.vmem [shape: f32[1,1,128], index: 20, kind: input, shape index: {}]   ;;  %s7575_s21 = inlined_call_operand.vmem [shape: f32[1,1,128], index: 21, kind: input, shape index: {}]   ;;  %s7576_s22 = inlined_call_operand.vmem [shape: f32[1,128], index: 22, kind: input, shape index: {}]   ;;  %s7577_s23 = inlined_call_operand.vmem [shape: f32[1,128], index: 23, kind: input, shape index: {}]   ;;  %s7578_s24 = inlined_call_operand.vmem [shape: bf16[128,128], index: 24, kind: input, shape index: {}]   ;;  %s7579_s25 = inlined_call_operand.hbm [shape: f32[1,128], index: 25, kind: input, shape index: {}]   ;;  %s7580_s26 = inlined_call_operand.hbm [shape: f32[16,128], index: 26, kind: output, shape index: {}]  }
   0x1   :  { %7589 = sst [smem:[#allocation10_spill]] %s7554_s0 }
   0x2   :  { %7590 = sst [smem:[#allocation11_spill]] %s7555_s1 }
   0x3   :  { %7591 = sst [smem:[#allocation12_spill]] %s7556_s2 }
   0x4   :  { %7592 = sst [smem:[#allocation13_spill]] %s7557_s3 }
   0x5   :  { %7593 = sst [smem:[#allocation14_spill]] %s7558_s4 }
   0x6   :  { %7594 = sst [smem:[#allocation15_spill]] %s7559_s5 }
   0x7   :  { %7595 = sst [smem:[#allocation16_spill]] %s7560_s6 }
   0x8   :  { %7596 = sst [smem:[#allocation17_spill]] %s7561_s7 }
   0x9   :  { %7597 = sst [smem:[#allocation18_spill]] %s7562_s8 }
   0xa   :  { %7598 = sst [smem:[#allocation19_spill]] %s7563_s9 }
   0xb   :  { %7599 = sst [smem:[#allocation20_spill]] %s7564_s10 }
   0xc   :  { %31 = vsyncpa [#allocation5], 0 }
   0xd   :  { %32 = vsyncpa [#allocation6], 0  ;;  %s5982_s27 = smov [#allocation4]   ;;  %s5934_s8 = scalar_lea.hbm %s7579_s25, 16 }
   0xe   :  { %s89_s3 = sshll.u32 %s5982_s27, 4  ;;  %p5935_p0 = scmp.ne.s32.totalorder %s7579_s25, %s5934_s8  ;;  %s90_s3 = int_to_ptr.vmem [resolvable:$true] %s89_s3 }
   0xf   :  { %p5938_p1 = scmp.lt.u32.totalorder %s5934_s8, %s7579_s25 }
  0x11   :  { %p5940_p2 = pnand %p5938_p1, %p5935_p0 }
  0x13   :  { %5943 = shalt.err (!%p5940_p2)
}
  0x14   :  { %s5944_s30 = scalar_lea.vmem %s90_s3, 16  ;;  %s5948_s2 = scalar_lea.vmem %s90_s3, 32 }
  0x15   :  { %p5945_p3 = scmp.ne.s32.totalorder %s90_s3, %s5944_s30  ;;  %p5949_p4 = scmp.lt.s32.totalorder %s90_s3, %s90_s3 }
  0x16   :  { %p5950_p5 = scmp.lt.s32.totalorder %s5948_s2, %s5944_s30 }
  0x18   :  { %p5951_p6 = por %p5950_p5, %p5949_p4 }
  0x1a   :  { %p5952_p7 = pnand %p5951_p6, %p5945_p3 }
  0x1c   :  { %5955 = shalt.err (!%p5952_p7)
}
  0x1d   :  { %92 = dma.hbm_to_vmem [thread:$0]  %s7579_s25, 16, %s90_s3, [#allocation5]  }
  0x1e   :  { %5978 = dma.done.wait [#allocation5], 16  }
  0x1f   :  { %5979 = vsyncadd [#allocation5], 4294967280  ;;  %s7600_s27 = sld [smem:[#allocation10_spill]]  ;;  %s7601_s29 = sld [smem:[#allocation12_spill]]  ;;  %v5983_v43 = vmov 0   ;;  %vm5985_vm0 = vmmov 0  }
  0x20   :  { %829 = vmatprep.mubr.bf16.mxu0 %v5983_v43  ;;  %872 = vmatprep.mubr.bf16.mxu1 %v5983_v43  ;;  %v4825_v59 = vld [vmem:[%s7570_s16] ss:$0 sm:$0xff]  ;;  %s7602_s28 = sld [smem:[#allocation13_spill]]  ;;  %vm1120_vm1 = vcmask 1043456   ;;  %vm1104_vm3 = vcmask 64512   ;;  %s7605_s25 = sld [smem:[#allocation14_spill]] }
  0x21   :  { %v4826_v63 = vld [vmem:[%s7571_s17] ss:$0 sm:$0xff]  ;;  %s7606_s9 = sld [smem:[#allocation15_spill]]  ;;  %s7607_s10 = sld [smem:[#allocation16_spill]] }
  0x22   :  { %s7608_s3 = sld [smem:[#allocation18_spill]]  ;;  %s7610_s6 = sld [smem:[#allocation19_spill]] }
  0x23   :  { %s7612_s8 = sld [smem:[#allocation20_spill]] }
  0x25   :  { %v101_v0 = vld [vmem:[%s7600_s27] sm:$0xff]  ;;  %v102_v1 = vld [vmem:[%s7600_s27 + $0x8] sm:$0xff] }
  0x26   :  { %111 = vadd.xlane.f32.xlu0 %v101_v0  ;;  %v5572_v2 = vld [vmem:[%s7601_s29 + $0x4] ss:$48 sps:$4 sm:$0xff]   ;;  %v5574_v3 = vld [vmem:[%s7601_s29 + $0xc] ss:$48 sps:$4 sm:$0xff]   ;;  %v5576_v4 = vld [vmem:[%s7601_s29] ss:$48 sps:$4 sm:$0xff]  }
  0x27   :  { %v5577_v5 = vld [vmem:[%s7601_s29 + $0x8] ss:$48 sps:$4 sm:$0xff]   ;;  %797 = vmatprep.subr.bf16.mxu0 %v5572_v2  ;;  %840 = vmatprep.subr.bf16.mxu1 %v5574_v3  ;;  %v5578_v14 = vld [vmem:[%s7601_s29 + $0x64] ss:$48 sps:$4 sm:$0xff]   ;;  %v5580_v15 = vld [vmem:[%s7601_s29 + $0x6c] ss:$48 sps:$4 sm:$0xff]  }
  0x28   :  { %798 = vmatpush1.bf16.msra.mxu0 %v5576_v4  ;;  %841 = vmatpush1.bf16.msra.mxu1 %v5577_v5  ;;  %v5582_v16 = vld [vmem:[%s7601_s29 + $0x60] ss:$48 sps:$4 sm:$0xff]   ;;  %v5583_v17 = vld [vmem:[%s7601_s29 + $0x68] ss:$48 sps:$4 sm:$0xff]   ;;  %v5584_v18 = vld [vmem:[%s7601_s29 + $0xc4] ss:$48 sps:$4 sm:$0xff]  }
  0x29   :  { %799 = vmatprep.subr.bf16.mxu0 %v5578_v14  ;;  %842 = vmatprep.subr.bf16.mxu1 %v5580_v15  ;;  %v5586_v19 = vld [vmem:[%s7601_s29 + $0xcc] ss:$48 sps:$4 sm:$0xff]   ;;  %v5588_v20 = vld [vmem:[%s7601_s29 + $0xc0] ss:$48 sps:$4 sm:$0xff]   ;;  %v5589_v21 = vld [vmem:[%s7601_s29 + $0xc8] ss:$48 sps:$4 sm:$0xff]  }
  0x2a   :  { %113 = vadd.xlane.f32.xlu0 %v102_v1  ;;  %v5590_v22 = vld [vmem:[%s7601_s29 + $0x124] ss:$48 sps:$4 sm:$0xff]   ;;  %v5592_v23 = vld [vmem:[%s7601_s29 + $0x12c] ss:$48 sps:$4 sm:$0xff]   ;;  %v5594_v24 = vld [vmem:[%s7601_s29 + $0x120] ss:$48 sps:$4 sm:$0xff]  }
  0x2b   :  { %v5595_v25 = vld [vmem:[%s7601_s29 + $0x128] ss:$48 sps:$4 sm:$0xff]   ;;  %v5596_v26 = vld [vmem:[%s7601_s29 + $0x184] ss:$48 sps:$4 sm:$0xff]   ;;  %v5598_v27 = vld [vmem:[%s7601_s29 + $0x18c] ss:$48 sps:$4 sm:$0xff]  }
  0x2c   :  { %800 = vmatpush1.bf16.msra.mxu0 %v5582_v16  ;;  %843 = vmatpush1.bf16.msra.mxu1 %v5583_v17  ;;  %v5600_v28 = vld [vmem:[%s7601_s29 + $0x180] ss:$48 sps:$4 sm:$0xff]   ;;  %v5601_v29 = vld [vmem:[%s7601_s29 + $0x188] ss:$48 sps:$4 sm:$0xff]   ;;  %v5602_v30 = vld [vmem:[%s7601_s29 + $0x1e4] ss:$48 sps:$4 sm:$0xff]  }
  0x2d   :  { %801 = vmatprep.subr.bf16.mxu0 %v5584_v18  ;;  %844 = vmatprep.subr.bf16.mxu1 %v5586_v19  ;;  %v5604_v31 = vld [vmem:[%s7601_s29 + $0x1ec] ss:$48 sps:$4 sm:$0xff]   ;;  %v5606_v32 = vld [vmem:[%s7601_s29 + $0x1e0] ss:$48 sps:$4 sm:$0xff]   ;;  %v5607_v33 = vld [vmem:[%s7601_s29 + $0x1e8] ss:$48 sps:$4 sm:$0xff]  }
  0x2e   :  { %v5608_v34 = vld [vmem:[%s7601_s29 + $0x244] ss:$48 sps:$4 sm:$0xff]   ;;  %v5610_v35 = vld [vmem:[%s7601_s29 + $0x24c] ss:$48 sps:$4 sm:$0xff]   ;;  %v5612_v36 = vld [vmem:[%s7601_s29 + $0x240] ss:$48 sps:$4 sm:$0xff]  }
  0x2f   :  { %v5613_v37 = vld [vmem:[%s7601_s29 + $0x248] ss:$48 sps:$4 sm:$0xff]   ;;  %v5614_v38 = vld [vmem:[%s7601_s29 + $0x2a4] ss:$48 sps:$4 sm:$0xff]   ;;  %v5616_v39 = vld [vmem:[%s7601_s29 + $0x2ac] ss:$48 sps:$4 sm:$0xff]  }
  0x30   :  { %802 = vmatpush1.bf16.msra.mxu0 %v5588_v20  ;;  %845 = vmatpush1.bf16.msra.mxu1 %v5589_v21  ;;  %v5618_v40 = vld [vmem:[%s7601_s29 + $0x2a0] ss:$48 sps:$4 sm:$0xff]   ;;  %v5619_v41 = vld [vmem:[%s7601_s29 + $0x2a8] ss:$48 sps:$4 sm:$0xff]   ;;  %v5622_v42 = vld [vmem:[%s7601_s29 + $0x14] ss:$48 sps:$4 sm:$0xff]  }
  0x31   :  { %803 = vmatprep.subr.bf16.mxu0 %v5590_v22  ;;  %846 = vmatprep.subr.bf16.mxu1 %v5592_v23  ;;  %v5625_v44 = vld [vmem:[%s7601_s29 + $0x1c] ss:$48 sps:$4 sm:$0xff]   ;;  %v5620_v3 = vld [vmem:[%s7601_s29 + $0x10] ss:$48 sps:$4 sm:$0xff]   ;;  %v5623_v4 = vld [vmem:[%s7601_s29 + $0x18] ss:$48 sps:$4 sm:$0xff]  }
  0x32   :  { %v5640_v14 = vld [vmem:[%s7601_s29 + $0x134] ss:$48 sps:$4 sm:$0xff]   ;;  %v5643_v15 = vld [vmem:[%s7601_s29 + $0x13c] ss:$48 sps:$4 sm:$0xff]   ;;  %v5638_v16 = vld [vmem:[%s7601_s29 + $0x130] ss:$48 sps:$4 sm:$0xff]  }
  0x33   :  { %v5641_v17 = vld [vmem:[%s7601_s29 + $0x138] ss:$48 sps:$4 sm:$0xff]   ;;  %v5646_v18 = vld [vmem:[%s7601_s29 + $0x194] ss:$48 sps:$4 sm:$0xff]   ;;  %v5649_v19 = vld [vmem:[%s7601_s29 + $0x19c] ss:$48 sps:$4 sm:$0xff]  }
  0x34   :  { %804 = vmatpush1.bf16.msra.mxu0 %v5594_v24  ;;  %847 = vmatpush1.bf16.msra.mxu1 %v5595_v25  ;;  %v5644_v20 = vld [vmem:[%s7601_s29 + $0x190] ss:$48 sps:$4 sm:$0xff]   ;;  %v5647_v21 = vld [vmem:[%s7601_s29 + $0x198] ss:$48 sps:$4 sm:$0xff]   ;;  %v5652_v22 = vld [vmem:[%s7601_s29 + $0x1f4] ss:$48 sps:$4 sm:$0xff]  }
  0x35   :  { %805 = vmatprep.subr.bf16.mxu0 %v5596_v26  ;;  %848 = vmatprep.subr.bf16.mxu1 %v5598_v27  ;;  %v5655_v23 = vld [vmem:[%s7601_s29 + $0x1fc] ss:$48 sps:$4 sm:$0xff]   ;;  %v5650_v24 = vld [vmem:[%s7601_s29 + $0x1f0] ss:$48 sps:$4 sm:$0xff]   ;;  %v5653_v25 = vld [vmem:[%s7601_s29 + $0x1f8] ss:$48 sps:$4 sm:$0xff]  }
  0x36   :  { %v5658_v26 = vld [vmem:[%s7601_s29 + $0x254] ss:$48 sps:$4 sm:$0xff]   ;;  %v5661_v27 = vld [vmem:[%s7601_s29 + $0x25c] ss:$48 sps:$4 sm:$0xff]  }
  0x38   :  { %806 = vmatpush1.bf16.msra.mxu0 %v5600_v28  ;;  %849 = vmatpush1.bf16.msra.mxu1 %v5601_v29  ;;  %v5656_v28 = vld [vmem:[%s7601_s29 + $0x250] ss:$48 sps:$4 sm:$0xff]   ;;  %v5659_v29 = vld [vmem:[%s7601_s29 + $0x258] ss:$48 sps:$4 sm:$0xff]  }
  0x39   :  { %807 = vmatprep.subr.bf16.mxu0 %v5602_v30  ;;  %850 = vmatprep.subr.bf16.mxu1 %v5604_v31  ;;  %v5664_v30 = vld [vmem:[%s7601_s29 + $0x2b4] ss:$48 sps:$4 sm:$0xff]   ;;  %v5667_v31 = vld [vmem:[%s7601_s29 + $0x2bc] ss:$48 sps:$4 sm:$0xff]  }
  0x3c   :  { %808 = vmatpush1.bf16.msra.mxu0 %v5606_v32  ;;  %851 = vmatpush1.bf16.msra.mxu1 %v5607_v33  ;;  %v5662_v32 = vld [vmem:[%s7601_s29 + $0x2b0] ss:$48 sps:$4 sm:$0xff]   ;;  %v5665_v33 = vld [vmem:[%s7601_s29 + $0x2b8] ss:$48 sps:$4 sm:$0xff]  }
  0x3d   :  { %809 = vmatprep.subr.bf16.mxu0 %v5608_v34  ;;  %852 = vmatprep.subr.bf16.mxu1 %v5610_v35  ;;  %v5670_v34 = vld [vmem:[%s7601_s29 + $0x24] ss:$48 sps:$4 sm:$0xff]   ;;  %v5673_v35 = vld [vmem:[%s7601_s29 + $0x2c] ss:$48 sps:$4 sm:$0xff]  }
  0x40   :  { %810 = vmatpush1.bf16.msra.mxu0 %v5612_v36  ;;  %853 = vmatpush1.bf16.msra.mxu1 %v5613_v37  ;;  %v5668_v36 = vld [vmem:[%s7601_s29 + $0x20] ss:$48 sps:$4 sm:$0xff]   ;;  %v5671_v37 = vld [vmem:[%s7601_s29 + $0x28] ss:$48 sps:$4 sm:$0xff]  }
  0x41   :  { %811 = vmatprep.subr.bf16.mxu0 %v5614_v38  ;;  %854 = vmatprep.subr.bf16.mxu1 %v5616_v39  ;;  %v5676_v38 = vld [vmem:[%s7601_s29 + $0x84] ss:$48 sps:$4 sm:$0xff]   ;;  %v5679_v39 = vld [vmem:[%s7601_s29 + $0x8c] ss:$48 sps:$4 sm:$0xff]  }
  0x44   :  { %812 = vmatpush1.bf16.msra.mxu0 %v5618_v40  ;;  %855 = vmatpush1.bf16.msra.mxu1 %v5619_v41  ;;  %v5674_v40 = vld [vmem:[%s7601_s29 + $0x80] ss:$48 sps:$4 sm:$0xff]   ;;  %v5677_v41 = vld [vmem:[%s7601_s29 + $0x88] ss:$48 sps:$4 sm:$0xff]  }
  0x45   :  { %883 = vmatprep.subr.bf16.mxu0 %v5622_v42  ;;  %926 = vmatprep.subr.bf16.mxu1 %v5625_v44  ;;  %v5682_v42 = vld [vmem:[%s7601_s29 + $0xe4] ss:$48 sps:$4 sm:$0xff]   ;;  %v5685_v44 = vld [vmem:[%s7601_s29 + $0xec] ss:$48 sps:$4 sm:$0xff]  }
  0xb3   :  { %v112_v6 = vpop.xlane.xlu0 %111 }
  0xb4   :  { %v6154_v7 = vmul.f32 0.03125, %v112_v6  ;;  %v5628_v6 = vld [vmem:[%s7601_s29 + $0x74] ss:$48 sps:$4 sm:$0xff]  }
  0xb6   :  { %v6157_v8 = vsub.f32 %v101_v0, %v6154_v7  ;;  %v126_v45 = vmul.f32 %v6154_v7, %v6154_v7  ;;  %v5631_v7 = vld [vmem:[%s7601_s29 + $0x7c] ss:$48 sps:$4 sm:$0xff]  }
  0xb7   :  { %v114_v9 = vpop.xlane.xlu0 %113 }
  0xb8   :  { %v6159_v10 = vmul.f32 0.03125, %v114_v9  ;;  %v120_v11 = vmul.f32 %v6157_v8, %v6157_v8  ;;  %v128_v47 = vmul.f32 96.0, %v126_v45  ;;  %v5629_v9 = vld [vmem:[%s7601_s29 + $0x78] ss:$48 sps:$4 sm:$0xff]   ;;  %v5680_v45 = vld [vmem:[%s7601_s29 + $0xe0] ss:$48 sps:$4 sm:$0xff]  }
  0xba   :  { %v6164_v12 = vsub.f32 %v102_v1, %v6159_v10  ;;  %122 = vadd.xlane.f32.xlu1 %v120_v11  ;;  %v127_v46 = vmul.f32 %v6159_v10, %v6159_v10  ;;  %v5634_v10 = vld [vmem:[%s7601_s29 + $0xd4] ss:$48 sps:$4 sm:$0xff]   ;;  %v5637_v11 = vld [vmem:[%s7601_s29 + $0xdc] ss:$48 sps:$4 sm:$0xff]  }
  0xbc   :  { %v121_v13 = vmul.f32 %v6164_v12, %v6164_v12  ;;  %v129_v51 = vmul.f32 96.0, %v127_v46  ;;  %v5683_v46 = vld [vmem:[%s7601_s29 + $0xe8] ss:$48 sps:$4 sm:$0xff]  }
  0xbe   :  { %124 = vadd.xlane.f32.xlu1 %v121_v13  ;;  %v5635_v13 = vld [vmem:[%s7601_s29 + $0xd8] ss:$48 sps:$4 sm:$0xff]  }
 0x147   :  { %v123_v48 = vpop.xlane.xlu1 %122 }
 0x148   :  { %v130_v49 = vsub.f32 %v123_v48, %v128_v47  ;;  %v5688_v47 = vld [vmem:[%s7601_s29 + $0x144] ss:$48 sps:$4 sm:$0xff]   ;;  %v5691_v48 = vld [vmem:[%s7601_s29 + $0x14c] ss:$48 sps:$4 sm:$0xff]  }
 0x14a   :  { %v132_v50 = vmul.f32 0.03125, %v130_v49  ;;  %v5686_v49 = vld [vmem:[%s7601_s29 + $0x140] ss:$48 sps:$4 sm:$0xff]  }
 0x14b   :  { %v125_v52 = vpop.xlane.xlu1 %124 }
 0x14c   :  { %v134_v53 = vadd.f32 1e-05, %v132_v50  ;;  %v131_v54 = vsub.f32 %v125_v52, %v129_v51  ;;  %v5689_v50 = vld [vmem:[%s7601_s29 + $0x148] ss:$48 sps:$4 sm:$0xff]   ;;  %v5694_v51 = vld [vmem:[%s7601_s29 + $0x1a4] ss:$48 sps:$4 sm:$0xff]  }
 0x14d   :  { %v5697_v52 = vld [vmem:[%s7601_s29 + $0x1ac] ss:$48 sps:$4 sm:$0xff]  }
 0x14e   :  { %5852 = vrsqrt.f32 %v134_v53  ;;  %v133_v55 = vmul.f32 0.03125, %v131_v54  ;;  %v5692_v53 = vld [vmem:[%s7601_s29 + $0x1a0] ss:$48 sps:$4 sm:$0xff]   ;;  %v5695_v54 = vld [vmem:[%s7601_s29 + $0x1a8] ss:$48 sps:$4 sm:$0xff]  }
 0x150   :  { %v135_v56 = vadd.f32 1e-05, %v133_v55  ;;  %v5700_v55 = vld [vmem:[%s7601_s29 + $0x204] ss:$48 sps:$4 sm:$0xff]  }
 0x152   :  { %5854 = vrsqrt.f32 %v135_v56  ;;  %v5703_v56 = vld [vmem:[%s7601_s29 + $0x20c] ss:$48 sps:$4 sm:$0xff]  }
 0x158   :  { %v5853_v57 = vpop.eup %5852 }
 0x159   :  { %v138_v58 = vmul.f32 %v5853_v57, %v6157_v8  ;;  %v5626_v8 = vld [vmem:[%s7601_s29 + $0x70] ss:$48 sps:$4 sm:$0xff]  }
 0x15a   :  { %v5698_v57 = vld [vmem:[%s7601_s29 + $0x200] ss:$48 sps:$4 sm:$0xff]  }
 0x15b   :  { %v146_v61 = vmul.f32 %v4825_v59, %v138_v58  ;;  %v5701_v58 = vld [vmem:[%s7601_s29 + $0x208] ss:$48 sps:$4 sm:$0xff]  }
 0x15c   :  { %v5855_v60 = vpop.eup %5854 }
 0x15d   :  { %v139_v62 = vmul.f32 %v5855_v60, %v6164_v12  ;;  %v154_v1 = vadd.f32 %v4826_v63, %v146_v61  ;;  %v5632_v12 = vld [vmem:[%s7601_s29 + $0xd0] ss:$48 sps:$4 sm:$0xff]   ;;  %v5709_v60 = vld [vmem:[%s7601_s29 + $0x26c] ss:$48 sps:$4 sm:$0xff]  }
 0x15e   :  { %v5704_v61 = vld [vmem:[%s7601_s29 + $0x260] ss:$48 sps:$4 sm:$0xff]  }
 0x15f   :  { %v147_v0 = vmul.f32 %v4825_v59, %v139_v62  ;;  %v5706_v59 = vld [vmem:[%s7601_s29 + $0x264] ss:$48 sps:$4 sm:$0xff]   ;;  %v5707_v62 = vld [vmem:[%s7601_s29 + $0x268] ss:$48 sps:$4 sm:$0xff]  }
 0x161   :  { %v155_v2 = vadd.f32 %v4826_v63, %v147_v0  ;;  %v5712_v63 = vld [vmem:[%s7601_s29 + $0x2c4] ss:$48 sps:$4 sm:$0xff]   ;;  %v5715_v0 = vld [vmem:[%s7601_s29 + $0x2cc] ss:$48 sps:$4 sm:$0xff]  }
 0x163   :  { %v6278_v5 = vpack.c.bf16 %v155_v2, %v154_v1  ;;  %v5710_v1 = vld [vmem:[%s7601_s29 + $0x2c0] ss:$48 sps:$4 sm:$0xff]   ;;  %v5713_v2 = vld [vmem:[%s7601_s29 + $0x2c8] ss:$48 sps:$4 sm:$0xff]   ;;  %s5986_s29 = smov [#allocation7]  }
 0x165   :  { %830 = vmatmul.mubr.bf16.vlgmr.msra.gmra.mrb[0].mxu0 %v6278_v5  ;;  %873 = vmatmul.mubr.bf16.vlgmr.msra.gmra.mrb[0].mxu1 %v6278_v5 }
 0x166   :  { %884 = vmatpush1.bf16.msra.mxu0 %v5620_v3  ;;  %927 = vmatpush1.bf16.msra.mxu1 %v5623_v4  ;;  %v5984_v3 = vmov 0.0   ;;  %v257_v4 = vlaneseq }
 0x167   :  { %885 = vmatprep.subr.bf16.mxu0 %v5628_v6  ;;  %928 = vmatprep.subr.bf16.mxu1 %v5631_v7 }
 0x168   :  { %915 = vmatprep.mubr.bf16.mxu0 %v5983_v43  ;;  %958 = vmatprep.mubr.bf16.mxu1 %v5983_v43  ;;  %v6477_v6 = vshrl.u32 %v257_v4, 7 }
 0x16a   :  { %886 = vmatpush1.bf16.msra.mxu0 %v5626_v8  ;;  %929 = vmatpush1.bf16.msra.mxu1 %v5629_v9  ;;  %v6480_v7 = vsub.s32 1, %v6477_v6 }
 0x16b   :  { %887 = vmatprep.subr.bf16.mxu0 %v5634_v10  ;;  %930 = vmatprep.subr.bf16.mxu1 %v5637_v11 }
 0x16e   :  { %888 = vmatpush1.bf16.msra.mxu0 %v5632_v12  ;;  %931 = vmatpush1.bf16.msra.mxu1 %v5635_v13 }
 0x16f   :  { %889 = vmatprep.subr.bf16.mxu0 %v5640_v14  ;;  %932 = vmatprep.subr.bf16.mxu1 %v5643_v15 }
 0x172   :  { %890 = vmatpush1.bf16.msra.mxu0 %v5638_v16  ;;  %933 = vmatpush1.bf16.msra.mxu1 %v5641_v17 }
 0x173   :  { %891 = vmatprep.subr.bf16.mxu0 %v5646_v18  ;;  %934 = vmatprep.subr.bf16.mxu1 %v5649_v19  ;;  %v275_v18 = vsub.s32 4, %v6477_v6  ;;  %v283_v19 = vsub.s32 6, %v6477_v6 }
 0x176   :  { %892 = vmatpush1.bf16.msra.mxu0 %v5644_v20  ;;  %935 = vmatpush1.bf16.msra.mxu1 %v5647_v21  ;;  %v279_v20 = vsub.s32 5, %v6477_v6 }
 0x177   :  { %893 = vmatprep.subr.bf16.mxu0 %v5652_v22  ;;  %936 = vmatprep.subr.bf16.mxu1 %v5655_v23  ;;  %v6505_v23 = vsub.s32 0, %v6477_v6 }
 0x17a   :  { %894 = vmatpush1.bf16.msra.mxu0 %v5650_v24  ;;  %937 = vmatpush1.bf16.msra.mxu1 %v5653_v25  ;;  %v6508_v24 = vsub.s32 2, %v6477_v6 }
 0x17b   :  { %895 = vmatprep.subr.bf16.mxu0 %v5658_v26  ;;  %938 = vmatprep.subr.bf16.mxu1 %v5661_v27  ;;  %v287_v26 = vsub.s32 7, %v6477_v6 }
 0x17e   :  { %896 = vmatpush1.bf16.msra.mxu0 %v5656_v28  ;;  %939 = vmatpush1.bf16.msra.mxu1 %v5659_v29 }
 0x17f   :  { %897 = vmatprep.subr.bf16.mxu0 %v5664_v30  ;;  %940 = vmatprep.subr.bf16.mxu1 %v5667_v31 }
 0x182   :  { %898 = vmatpush1.bf16.msra.mxu0 %v5662_v32  ;;  %941 = vmatpush1.bf16.msra.mxu1 %v5665_v33 }
 0x183   :  { %969 = vmatprep.subr.bf16.mxu0 %v5670_v34  ;;  %1012 = vmatprep.subr.bf16.mxu1 %v5673_v35 }
 0x185   :  { %916 = vmatmul.mubr.bf16.vlgmr.msra.gmra.mrb[4].mxu0 %v6278_v5  ;;  %959 = vmatmul.mubr.bf16.vlgmr.msra.gmra.mrb[4].mxu1 %v6278_v5 }
 0x186   :  { %970 = vmatpush1.bf16.msra.mxu0 %v5668_v36  ;;  %1013 = vmatpush1.bf16.msra.mxu1 %v5671_v37 }
 0x187   :  { %971 = vmatprep.subr.bf16.mxu0 %v5676_v38  ;;  %1014 = vmatprep.subr.bf16.mxu1 %v5679_v39 }
 0x188   :  { %1001 = vmatprep.mubr.bf16.mxu0 %v5983_v43  ;;  %1044 = vmatprep.mubr.bf16.mxu1 %v5983_v43 }
 0x18a   :  { %972 = vmatpush1.bf16.msra.mxu0 %v5674_v40  ;;  %1015 = vmatpush1.bf16.msra.mxu1 %v5677_v41 }
 0x18b   :  { %973 = vmatprep.subr.bf16.mxu0 %v5682_v42  ;;  %1016 = vmatprep.subr.bf16.mxu1 %v5685_v44 }
 0x18e   :  { %974 = vmatpush1.bf16.msra.mxu0 %v5680_v45  ;;  %1017 = vmatpush1.bf16.msra.mxu1 %v5683_v46  ;;  %v6527_v46 = vsub.s32 3, %v6477_v6 }
 0x18f   :  { %975 = vmatprep.subr.bf16.mxu0 %v5688_v47  ;;  %1018 = vmatprep.subr.bf16.mxu1 %v5691_v48 }
 0x192   :  { %976 = vmatpush1.bf16.msra.mxu0 %v5686_v49  ;;  %1019 = vmatpush1.bf16.msra.mxu1 %v5689_v50 }
 0x193   :  { %977 = vmatprep.subr.bf16.mxu0 %v5694_v51  ;;  %1020 = vmatprep.subr.bf16.mxu1 %v5697_v52 }
 0x196   :  { %978 = vmatpush1.bf16.msra.mxu0 %v5692_v53  ;;  %1021 = vmatpush1.bf16.msra.mxu1 %v5695_v54 }
 0x197   :  { %979 = vmatprep.subr.bf16.mxu0 %v5700_v55  ;;  %1022 = vmatprep.subr.bf16.mxu1 %v5703_v56 }
 0x19a   :  { %980 = vmatpush1.bf16.msra.mxu0 %v5698_v57  ;;  %1023 = vmatpush1.bf16.msra.mxu1 %v5701_v58 }
 0x19b   :  { %981 = vmatprep.subr.bf16.mxu0 %v5706_v59  ;;  %1024 = vmatprep.subr.bf16.mxu1 %v5709_v60  ;;  %v254_v59 = vld [vmem:[%s7602_s28 + $0x8] sm:$0xf] }
 0x19e   :  { %982 = vmatpush1.bf16.msra.mxu0 %v5704_v61  ;;  %1025 = vmatpush1.bf16.msra.mxu1 %v5707_v62  ;;  %v292_v61 = vrot.slane %v254_v59, %v6505_v23  ;;  %v300_v62 = vrot.slane %v254_v59, %v6508_v24 }
 0x19f   :  { %983 = vmatprep.subr.bf16.mxu0 %v5712_v63  ;;  %1026 = vmatprep.subr.bf16.mxu1 %v5715_v0  ;;  %v296_v0 = vrot.slane %v254_v59, %v6480_v7 }
 0x1a2   :  { %984 = vmatpush1.bf16.msra.mxu0 %v5710_v1  ;;  %1027 = vmatpush1.bf16.msra.mxu1 %v5713_v2  ;;  %v304_v1 = vrot.slane %v254_v59, %v6527_v46 }
 0x1a3   :  { %5313 = vmatprep.subr.bf16.mxu1 %v5984_v3  ;;  %5337 = vmatprep.subr.bf16.mxu0 %v5984_v3 }
 0x1a5   :  { %1002 = vmatmul.mubr.bf16.vlgmr.msra.gmra.mrb[8].mxu0 %v6278_v5  ;;  %1045 = vmatmul.mubr.bf16.vlgmr.msra.gmra.mrb[8].mxu1 %v6278_v5  ;;  %v253_v5 = vld [vmem:[%s7602_s28] sm:$0xff] }
 0x1a6   :  { %5315 = vmatprep.mubr.msk.bf16.mxu1 %vm5985_vm0, %v5984_v3  ;;  %5339 = vmatprep.mubr.msk.bf16.mxu0 %vm5985_vm0, %v5984_v3  ;;  %v6486_v8 = vrot.slane %v253_v5, %v6480_v7  ;;  %v276_v21 = vrot.slane %v253_v5, %v275_v18  ;;  %v284_v22 = vrot.slane %v253_v5, %v283_v19 }
 0x1a7   :  { %v280_v25 = vrot.slane %v253_v5, %v279_v20  ;;  %v260_v33 = vrot.slane %v253_v5, %v6505_v23  ;;  %v6515_v34 = vrot.slane %v253_v5, %v6508_v24  ;;  %v6521_v40 = vrot.slane %v253_v5, %v287_v26 }
 0x1a8   :  { %v6533_v50 = vrot.slane %v253_v5, %v6527_v46 }
 0x238   :  { %v831_v9 = vpop.f32.mrb[0].mxu0  ;;  %v874_v10 = vpop.f32.mrb[0].mxu1 }
 0x239   :  { %v833_v11 = vpop.f32.mrb[1].mxu0  ;;  %v876_v12 = vpop.f32.mrb[1].mxu1  ;;  %v832_v44 = vadd.f32 %v831_v9, %v260_v33  ;;  %v875_v45 = vadd.f32 %v874_v10, %v6515_v34 }
 0x23a   :  { %v6489_v13 = vadd.f32 %v833_v11, %v6486_v8  ;;  %v835_v14 = vpop.f32.mrb[2].mxu0  ;;  %v6491_v15 = vpop.f32.mrb[2].mxu1  ;;  %v877_v52 = vadd.f32 %v876_v12, %v6533_v50 }
 0x23b   :  { %v6493_v16 = vpop.f32.mrb[3].mxu0  ;;  %v6495_v17 = vpop.f32.mrb[3].mxu1  ;;  %v1060_v48 = vpack.c.bf16 %v832_v44, %v832_v44  ;;  %v1268_v49 = vpack.c.bf16 %v875_v45, %v875_v45  ;;  %v836_v56 = vadd.f32 %v835_v14, %v260_v33 }
 0x23c   :  { %v1371_v54 = vpack.c.bf16 %v877_v52, %v877_v52  ;;  %v838_v63 = vadd.f32 %v6493_v16, %v6486_v8  ;;  %v881_v45 = vadd.f32 %v6495_v17, %v6533_v50 }
 0x23d   :  { %v1474_v58 = vpack.c.bf16 %v836_v56, %v836_v56 }
 0x258   :  { %v917_v27 = vpop.f32.mrb[4].mxu0  ;;  %v960_v28 = vpop.f32.mrb[4].mxu1 }
 0x259   :  { %v918_v29 = vadd.f32 %v917_v27, %v276_v21  ;;  %v961_v30 = vadd.f32 %v960_v28, %v284_v22  ;;  %v919_v31 = vpop.f32.mrb[5].mxu0  ;;  %v962_v32 = vpop.f32.mrb[5].mxu1 }
 0x25a   :  { %v6517_v35 = vadd.f32 %v919_v31, %v280_v25  ;;  %v921_v36 = vpop.f32.mrb[6].mxu0  ;;  %v964_v37 = vpop.f32.mrb[6].mxu1  ;;  %v963_v47 = vadd.f32 %v962_v32, %v6521_v40 }
 0x25b   :  { %v1061_v38 = vpack.c.bf16 %v918_v29, %v918_v29  ;;  %v1269_v39 = vpack.c.bf16 %v961_v30, %v961_v30  ;;  %v923_v41 = vpop.f32.mrb[7].mxu0  ;;  %v6523_v42 = vpop.f32.mrb[7].mxu1  ;;  %v922_v53 = vadd.f32 %v921_v36, %v276_v21  ;;  %v965_v2 = vadd.f32 %v964_v37, %v284_v22 }
 0x25c   :  { %v1372_v51 = vpack.c.bf16 %v963_v47, %v963_v47  ;;  %v924_v57 = vadd.f32 %v923_v41, %v280_v25  ;;  %v1577_v21 = vpack.c.bf16 %v838_v63, %v838_v63  ;;  %v1783_v47 = vpack.c.bf16 %v881_v45, %v881_v45 }
 0x25d   :  { %5314 = vmatpush3.bf16.xpose.msra.mxu1 %v1061_v38  ;;  %5338 = vmatpush3.bf16.xpose.msra.mxu0 %v1269_v39  ;;  %v1475_v55 = vpack.c.bf16 %v922_v53, %v922_v53  ;;  %v1681_v28 = vpack.c.bf16 %v965_v2, %v965_v2  ;;  %v879_v38 = vadd.f32 %v6491_v15, %v6515_v34  ;;  %v1058_v15 = vand.u32 127, %v257_v4 }
 0x25e   :  { %5349 = vmatprep.subr.bf16.mxu0 %v5984_v3  ;;  %5319 = vmatprep.subr.bf16.mxu1 %v5984_v3  ;;  %v1578_v60 = vpack.c.bf16 %v924_v57, %v924_v57  ;;  %v967_v39 = vadd.f32 %v6523_v42, %v6521_v40 }
 0x25f   :  { %v1680_v41 = vpack.c.bf16 %v879_v38, %v879_v38  ;;  %vm6585_vm2 = vcmp.le.s32.totalorder %v1058_v15, %v6477_v6 }
 0x260   :  { %v1784_v44 = vpack.c.bf16 %v967_v39, %v967_v39 }
 0x264   :  { %5316 = vmatmul.mubr.bf16.vlgmr.msra.gmra.mrb[12].mxu1 %v1060_v48  ;;  %5340 = vmatmul.mubr.bf16.vlgmr.msra.gmra.mrb[12].mxu0 %v1268_v49 }
 0x265   :  { %5350 = vmatpush3.bf16.xpose.msra.mxu0 %v1372_v51  ;;  %5351 = vmatprep.mubr.msk.bf16.mxu0 %vm5985_vm0, %v5984_v3 }
 0x266   :  { %5361 = vmatprep.subr.bf16.mxu0 %v5984_v3  ;;  %5321 = vmatprep.mubr.msk.bf16.mxu1 %vm5985_vm0, %v5984_v3 }
 0x26c   :  { %5352 = vmatmul.mubr.bf16.vlgmr.msra.gmra.mrb[16].mxu0 %v1371_v54 }
 0x26d   :  { %5362 = vmatpush3.bf16.xpose.msra.mxu0 %v1475_v55  ;;  %5363 = vmatprep.mubr.msk.bf16.mxu0 %vm5985_vm0, %v5984_v3 }
 0x26e   :  { %5373 = vmatprep.subr.bf16.mxu0 %v5984_v3 }
 0x274   :  { %5364 = vmatmul.mubr.bf16.vlgmr.msra.gmra.mrb[20].mxu0 %v1474_v58 }
 0x275   :  { %5374 = vmatpush3.bf16.xpose.msra.mxu0 %v1578_v60  ;;  %5375 = vmatprep.mubr.msk.bf16.mxu0 %vm5985_vm0, %v5984_v3 }
 0x276   :  { %5385 = vmatprep.subr.bf16.mxu0 %v5984_v3 }
 0x278   :  { %v1003_v5 = vpop.f32.mrb[8].mxu0  ;;  %v1046_v9 = vpop.f32.mrb[8].mxu1 }
 0x279   :  { %v1004_v10 = vadd.f32 %v1003_v5, %v292_v61  ;;  %v6556_v11 = vadd.f32 %v1046_v9, %v300_v62  ;;  %v1005_v12 = vpop.f32.mrb[9].mxu0  ;;  %v1048_v14 = vpop.f32.mrb[9].mxu1 }
 0x27a   :  { %v6558_v25 = vadd.f32 %v1005_v12, %v296_v0  ;;  %v6560_v27 = vadd.f32 %v1048_v14, %v304_v1  ;;  %v1007_v8 = vpop.f32.mrb[10].mxu0  ;;  %v1050_v16 = vpop.f32.mrb[10].mxu1 }
 0x27b   :  { %v1062_v29 = vpack.c.bf16 %v1004_v10, %v1004_v10  ;;  %v6562_v30 = vadd.f32 %v1007_v8, %v292_v61  ;;  %v6564_v22 = vadd.f32 %v1050_v16, %v300_v62  ;;  %v1009_v31 = vpop.f32.mrb[11].mxu0  ;;  %v1052_v32 = vpop.f32.mrb[11].mxu1 }
 0x27c   :  { %v6566_v33 = vadd.f32 %v1009_v31, %v296_v0  ;;  %v6568_v36 = vadd.f32 %v1052_v32, %v304_v1  ;;  %5376 = vmatmul.mubr.bf16.vlgmr.msra.gmra.mrb[24].mxu0 %v1577_v21 }
 0x27d   :  { %v1122_v37 = vsel %vm1120_vm1, %v1062_v29, 0  ;;  %5386 = vmatpush3.bf16.xpose.msra.mxu0 %v1681_v28  ;;  %5387 = vmatprep.mubr.msk.bf16.mxu0 %vm5985_vm0, %v5984_v3 }
 0x27e   :  { %5320 = vmatpush3.bf16.msra.mxu1 %v1122_v37  ;;  %5397 = vmatprep.subr.bf16.mxu0 %v5984_v3 }
 0x27f   :  { %5325 = vmatprep.subr.bf16.mxu1 %v5984_v3 }
 0x284   :  { %5388 = vmatmul.mubr.bf16.vlgmr.msra.gmra.mrb[28].mxu0 %v1680_v41 }
 0x285   :  { %5398 = vmatpush3.bf16.xpose.msra.mxu0 %v1784_v44  ;;  %5399 = vmatprep.mubr.msk.bf16.mxu0 %vm5985_vm0, %v5984_v3 }
 0x28c   :  { %5400 = vmatmul.mubr.bf16.vlgmr.msra.gmra.mrb[32].mxu0 %v1783_v47 }
 0x337   :  { %v1097_v40 = vpop.f32.mrb[12].mxu1  ;;  %v1305_v42 = vpop.f32.mrb[12].mxu0 }
 0x338   :  { %v1103_v48 = vsel %vm6585_vm2, %v1097_v40, -1e+30  ;;  %v5317_v49 = vpop.f32.mrb[13].mxu1  ;;  %v5341_v51 = vpop.f32.mrb[13].mxu0  ;;  %v1311_v37 = vsel %vm6585_vm2, %v1305_v42, -1e+30 }
 0x339   :  { %v1100_v52 = vpop.f32.mrb[14].mxu1  ;;  %v1308_v53 = vpop.f32.mrb[14].mxu0  ;;  %v1105_v17 = vsel %vm1104_vm3, %v1103_v48, -inf  ;;  %v1312_v38 = vsel %vm1104_vm3, %v1311_v37, -inf  ;;  %v1167_v49 = vpack.c.bf16 %v6558_v25, %v6558_v25  ;;  %v1165_v51 = vpack.c.bf16 %v6489_v13, %v6489_v13 }
 0x33a   :  { %v5342_v50 = vpop.f32.mrb[15].mxu0  ;;  %1106 = vmax.xlane.f32.xlu0 %v1105_v17  ;;  %v5318_v4 = vpop.f32.mrb[15].mxu1 }
 0x33b   :  { %v1225_v52 = vsel %vm1120_vm1, %v1167_v49, 0 }
 0x33f   :  { %v6592_v54 = vpop.f32.mrb[16].mxu0 }
 0x340   :  { %v5353_v55 = vpop.f32.mrb[17].mxu0 }
 0x341   :  { %v1411_v56 = vpop.f32.mrb[18].mxu0 }
 0x342   :  { %v5354_v57 = vpop.f32.mrb[19].mxu0 }
 0x347   :  { %v1511_v58 = vpop.f32.mrb[20].mxu0 }
 0x348   :  { %v5365_v59 = vpop.f32.mrb[21].mxu0  ;;  %v1517_v39 = vsel %vm6585_vm2, %v1511_v58, -1e+30 }
 0x349   :  { %v1514_v60 = vpop.f32.mrb[22].mxu0  ;;  %v1518_v41 = vsel %vm1104_vm3, %v1517_v39, -inf }
 0x34a   :  { %v5366_v61 = vpop.f32.mrb[23].mxu0 }
 0x34f   :  { %v6594_v62 = vpop.f32.mrb[24].mxu0 }
 0x350   :  { %v5377_v63 = vpop.f32.mrb[25].mxu0 }
 0x351   :  { %v1617_v0 = vpop.f32.mrb[26].mxu0 }
 0x352   :  { %v5378_v1 = vpop.f32.mrb[27].mxu0  ;;  %v1414_v0 = vsel %vm6585_vm2, %v6592_v54, -1e+30 }
 0x357   :  { %v1717_v2 = vpop.f32.mrb[28].mxu0 }
 0x358   :  { %v5389_v5 = vpop.f32.mrb[29].mxu0  ;;  %v1723_v44 = vsel %vm6585_vm2, %v1717_v2, -1e+30 }
 0x359   :  { %v1720_v9 = vpop.f32.mrb[30].mxu0  ;;  %v1724_v45 = vsel %vm1104_vm3, %v1723_v44, -inf }
 0x35a   :  { %v5390_v10 = vpop.f32.mrb[31].mxu0  ;;  %v1415_v9 = vsel %vm1104_vm3, %v1414_v0, -inf }
 0x35b   :  { %v1620_v10 = vsel %vm6585_vm2, %v6594_v62, -1e+30 }
 0x35f   :  { %v6596_v12 = vpop.f32.mrb[32].mxu0 }
 0x360   :  { %v5401_v14 = vpop.f32.mrb[33].mxu0  ;;  %v1826_v54 = vsel %vm6585_vm2, %v6596_v12, -1e+30 }
 0x361   :  { %v1823_v21 = vpop.f32.mrb[34].mxu0 }
 0x362   :  { %v5402_v8 = vpop.f32.mrb[35].mxu0  ;;  %v1621_v21 = vsel %vm1104_vm3, %v1620_v10, -inf }
 0x363   :  { %v1827_v8 = vsel %vm1104_vm3, %v1826_v54, -inf }
 0x3c7   :  { %v1107_v16 = vpop.xlane.xlu0 %1106 }
 0x3c8   :  { %v1108_v28 = vsub.f32 %v1103_v48, %v1107_v16  ;;  %v1166_v48 = vpack.c.bf16 %v6517_v35, %v6517_v35 }
 0x3ca   :  { %v1109_v29 = vmul.f32 1.442695, %v1108_v28 }
 0x3cc   :  { %5856 = vpow2.f32 %v1109_v29 }
 0x3d6   :  { %v5857_v31 = vpop.eup %5856 }
 0x3d7   :  { %v1111_v32 = vsel %vm1104_vm3, %v5857_v31, 0.0 }
 0x3d8   :  { %1112 = vadd.xlane.f32.xlu1 %v1111_v32 }
 0x3dc   :  { %1313 = vmax.xlane.f32.xlu1 %v1312_v38 }
 0x3e0   :  { %1519 = vmax.xlane.f32.xlu1 %v1518_v41 }
 0x3e4   :  { %1725 = vmax.xlane.f32.xlu1 %v1724_v45 }
 0x465   :  { %v1113_v47 = vpop.xlane.xlu1 %1112 }
 0x466   :  { %5858 = vrcp.f32 %v1113_v47 }
 0x469   :  { %v1314_v35 = vpop.xlane.xlu1 %1313 }
 0x46a   :  { %v1315_v25 = vsub.f32 %v1311_v37, %v1314_v35 }
 0x46c   :  { %v1316_v57 = vmul.f32 1.442695, %v1315_v25 }
 0x46d   :  { %v1520_v55 = vpop.xlane.xlu1 %1519 }
 0x46e   :  { %v1521_v13 = vsub.f32 %v1517_v39, %v1520_v55  ;;  %5860 = vpow2.f32 %v1316_v57 }
 0x470   :  { %v5859_v15 = vpop.eup %5858  ;;  %v1522_v2 = vmul.f32 1.442695, %v1521_v13  ;;  %v1270_v13 = vpack.c.bf16 %v6556_v11, %v6556_v11 }
 0x471   :  { %v1115_v40 = vmul.f32 %v5859_v15, %v5857_v31  ;;  %v1726_v60 = vpop.xlane.xlu1 %1725 }
 0x472   :  { %v1727_v5 = vsub.f32 %v1723_v44, %v1726_v60  ;;  %5862 = vpow2.f32 %v1522_v2 }
 0x473   :  { %v1116_v42 = vpack.c.bf16 %v1115_v40, %v1115_v40 }
 0x474   :  { %v1728_v14 = vmul.f32 1.442695, %v1727_v5 }
 0x475   :  { %5322 = vmatmul.mubr.msk.bf16.vlgmr.msra.gmra.mrb[16].mxu1 %vm1104_vm3, %v1116_v42 }
 0x476   :  { %5326 = vmatpush3.bf16.xpose.msra.mxu1 %v1166_v48  ;;  %5327 = vmatprep.mubr.msk.bf16.mxu1 %vm5985_vm0, %v5984_v3  ;;  %5864 = vpow2.f32 %v1728_v14  ;;  %v1476_v14 = vpack.c.bf16 %v6562_v30, %v6562_v30 }
 0x477   :  { %5331 = vmatprep.subr.bf16.mxu1 %v5984_v3 }
 0x478   :  { %v5861_v16 = vpop.eup %5860 }
 0x479   :  { %v1318_v28 = vsel %vm1104_vm3, %v5861_v16, 0.0 }
 0x47c   :  { %v6640_v29 = vpop.eup %5862 }
 0x47d   :  { %5328 = vmatmul.mubr.bf16.vlgmr.msra.gmra.mrb[20].mxu1 %v1165_v51  ;;  %v1524_v62 = vsel %vm1104_vm3, %v6640_v29, 0.0 }
 0x47e   :  { %5332 = vmatpush3.bf16.msra.mxu1 %v1225_v52  ;;  %5333 = vmatprep.mubr.msk.bf16.mxu1 %vm5985_vm0, %v5984_v3 }
 0x47f   :  { %5343 = vmatprep.subr.bf16.mxu1 %v5984_v3 }
 0x480   :  { %v6644_v31 = vpop.eup %5864 }
 0x481   :  { %v1730_v34 = vsel %vm1104_vm3, %v6644_v31, 0.0 }
 0x548   :  { %v6622_v53 = vpop.f32.mrb[16].mxu1 }
 0x549   :  { %v5323_v17 = vpop.f32.mrb[17].mxu1 }
 0x54a   :  { %v1161_v50 = vpop.f32.mrb[18].mxu1 }
 0x54b   :  { %v5324_v4 = vpop.f32.mrb[19].mxu1 }
 0x550   :  { %v1202_v56 = vpop.f32.mrb[20].mxu1 }
 0x551   :  { %v1208_v58 = vsel %vm6585_vm2, %v1202_v56, -1e+30  ;;  %v5329_v59 = vpop.f32.mrb[21].mxu1 }
 0x552   :  { %v1205_v61 = vpop.f32.mrb[22].mxu1  ;;  %v1209_v63 = vsel %vm1104_vm3, %v1208_v58, -inf }
 0x553   :  { %1210 = vmax.xlane.f32.xlu0 %v1209_v63  ;;  %v5330_v1 = vpop.f32.mrb[23].mxu1  ;;  %v1328_v61 = vsel %vm1120_vm1, %v1270_v13, 0  ;;  %v5732_v13 = vld [vmem:[%s7605_s25 + $0x70] sm:$0xff]  }
 0x554   :  { %v1373_v1 = vpack.c.bf16 %v6560_v27, %v6560_v27 }
 0x556   :  { %v1431_v5 = vsel %vm1120_vm1, %v1373_v1, 0  ;;  %v5739_v1 = vld [vmem:[%s7605_s25 + $0x98] sm:$0xff]  }
 0x557   :  { %1416 = vmax.xlane.f32.xlu0 %v1415_v9 }
 0x55b   :  { %1622 = vmax.xlane.f32.xlu0 %v1621_v21 }
 0x55f   :  { %1828 = vmax.xlane.f32.xlu0 %v1827_v8 }
 0x563   :  { %1319 = vadd.xlane.f32.xlu0 %v1318_v28  ;;  %v1579_v28 = vpack.c.bf16 %v6566_v33, %v6566_v33 }
 0x567   :  { %1525 = vadd.xlane.f32.xlu0 %v1524_v62 }
 0x56b   :  { %1731 = vadd.xlane.f32.xlu0 %v1730_v34  ;;  %v1637_v34 = vsel %vm1120_vm1, %v1579_v28, 0 }
 0x5e0   :  { %v1211_v12 = vpop.xlane.xlu0 %1210 }
 0x5e1   :  { %v1212_v32 = vsub.f32 %v1208_v58, %v1211_v12 }
 0x5e3   :  { %v1213_v37 = vmul.f32 1.442695, %v1212_v32 }
 0x5e4   :  { %v1417_v38 = vpop.xlane.xlu0 %1416 }
 0x5e5   :  { %5866 = vpow2.f32 %v1213_v37  ;;  %v1418_v39 = vsub.f32 %v1414_v0, %v1417_v38 }
 0x5e7   :  { %v1419_v41 = vmul.f32 1.442695, %v1418_v39 }
 0x5e8   :  { %v1623_v44 = vpop.xlane.xlu0 %1622 }
 0x5e9   :  { %5868 = vpow2.f32 %v1419_v41  ;;  %v1624_v45 = vsub.f32 %v1620_v10, %v1623_v44  ;;  %v1785_v41 = vpack.c.bf16 %v6568_v36, %v6568_v36  ;;  %v5717_v36 = vld [vmem:[%s7605_s25] sm:$0xff]  }
 0x5eb   :  { %v1625_v47 = vmul.f32 1.442695, %v1624_v45  ;;  %v1843_v45 = vsel %vm1120_vm1, %v1785_v41, 0 }
 0x5ec   :  { %v1829_v15 = vpop.xlane.xlu0 %1828 }
 0x5ed   :  { %5870 = vpow2.f32 %v1625_v47  ;;  %v1830_v40 = vsub.f32 %v1826_v54, %v1829_v15  ;;  %v1534_v54 = vsel %vm1120_vm1, %v1476_v14, 0  ;;  %v5745_v14 = vld [vmem:[%s7605_s25 + $0xb0] sm:$0xff]  }
 0x5ef   :  { %v5867_v42 = vpop.eup %5866  ;;  %v1831_v48 = vmul.f32 1.442695, %v1830_v40  ;;  %v5718_v40 = vld [vmem:[%s7605_s25 + $0x48] sm:$0xff]  }
 0x5f0   :  { %v1215_v49 = vsel %vm1104_vm3, %v5867_v42, 0.0  ;;  %v1320_v25 = vpop.xlane.xlu0 %1319 }
 0x5f1   :  { %5872 = vpow2.f32 %v1831_v48  ;;  %1216 = vadd.xlane.f32.xlu1 %v1215_v49  ;;  %v5720_v48 = vld [vmem:[%s7605_s25 + $0x50] sm:$0xff]  }
 0x5f2   :  { %v5721_v49 = vld [vmem:[%s7605_s25 + $0x10] sm:$0xff]  }
 0x5f3   :  { %v5869_v51 = vpop.eup %5868 }
 0x5f4   :  { %v1421_v52 = vsel %vm1104_vm3, %v5869_v51, 0.0  ;;  %v1526_v0 = vpop.xlane.xlu0 %1525 }
 0x5f5   :  { %1422 = vadd.xlane.f32.xlu1 %v1421_v52  ;;  %v5723_v52 = vld [vmem:[%s7605_s25 + $0x18] sm:$0xff]  }
 0x5f7   :  { %v5871_v35 = vpop.eup %5870 }
 0x5f8   :  { %v1627_v17 = vsel %vm1104_vm3, %v5871_v35, 0.0 }
 0x5f9   :  { %1628 = vadd.xlane.f32.xlu1 %v1627_v17  ;;  %v5725_v17 = vld [vmem:[%s7605_s25 + $0xc0] sm:$0xff]  }
 0x5fb   :  { %v6651_v50 = vpop.eup %5872 }
 0x5fc   :  { %v1833_v4 = vsel %vm1104_vm3, %v6651_v50, 0.0 }
 0x5fd   :  { %1834 = vadd.xlane.f32.xlu1 %v1833_v4  ;;  %v5727_v4 = vld [vmem:[%s7605_s25 + $0x80] sm:$0xff]  }
 0x67e   :  { %v1217_v55 = vpop.xlane.xlu1 %1216 }
 0x67f   :  { %5874 = vrcp.f32 %v1217_v55  ;;  %v5728_v55 = vld [vmem:[%s7605_s25 + $0x68] sm:$0xff]  }
 0x680   :  { %5876 = vrcp.f32 %v1320_v25  ;;  %v5729_v25 = vld [vmem:[%s7605_s25 + $0xc8] sm:$0xff]  }
 0x682   :  { %v1423_v56 = vpop.xlane.xlu1 %1422 }
 0x683   :  { %5878 = vrcp.f32 %v1423_v56  ;;  %v5730_v56 = vld [vmem:[%s7605_s25 + $0x28] sm:$0xff]  }
 0x684   :  { %5880 = vrcp.f32 %v1526_v0  ;;  %v5738_v0 = vld [vmem:[%s7605_s25 + $0x38] sm:$0xff]  }
 0x686   :  { %v1629_v10 = vpop.xlane.xlu1 %1628 }
 0x687   :  { %5882 = vrcp.f32 %v1629_v10  ;;  %v5744_v10 = vld [vmem:[%s7605_s25 + $0xf0] sm:$0xff]  }
 0x689   :  { %v5875_v57 = vpop.eup %5874 }
 0x68a   :  { %v1219_v58 = vmul.f32 %v5875_v57, %v5867_v42  ;;  %v5877_v60 = vpop.eup %5876  ;;  %v1835_v32 = vpop.xlane.xlu1 %1834  ;;  %v5719_v42 = vld [vmem:[%s7605_s25 + $0x8] sm:$0xff]  }
 0x68b   :  { %v1322_v63 = vmul.f32 %v5877_v60, %v5861_v16  ;;  %v1732_v16 = vpop.xlane.xlu0 %1731  ;;  %v5731_v57 = vld [vmem:[%s7605_s25 + $0x88] sm:$0xff]   ;;  %v5735_v60 = vld [vmem:[%s7605_s25 + $0x90] sm:$0xff]  }
 0x68c   :  { %v1220_v59 = vpack.c.bf16 %v1219_v58, %v1219_v58  ;;  %5884 = vrcp.f32 %v1732_v16  ;;  %v5733_v58 = vld [vmem:[%s7605_s25 + $0xd0] sm:$0xff]  }
 0x68d   :  { %v1323_v11 = vpack.c.bf16 %v1322_v63, %v1322_v63  ;;  %v5879_v2 = vpop.eup %5878  ;;  %5886 = vrcp.f32 %v1835_v32  ;;  %v5737_v63 = vld [vmem:[%s7605_s25 + $0xd8] sm:$0xff]  }
 0x68e   :  { %5334 = vmatmul.mubr.msk.bf16.vlgmr.msra.gmra.mrb[24].mxu1 %vm1104_vm3, %v1220_v59  ;;  %v1425_v9 = vmul.f32 %v5879_v2, %v5869_v51  ;;  %v5881_v21 = vpop.eup %5880  ;;  %v5722_v51 = vld [vmem:[%s7605_s25 + $0x58] sm:$0xff]   ;;  %v5734_v59 = vld [vmem:[%s7605_s25 + $0x30] sm:$0xff]   ;;  %v5741_v2 = vld [vmem:[%s7605_s25 + $0xa0] sm:$0xff]  }
 0x68f   :  { %5344 = vmatpush3.bf16.msra.mxu1 %v1328_v61  ;;  %5345 = vmatprep.mubr.msk.bf16.mxu1 %vm5985_vm0, %v5984_v3  ;;  %v1528_v8 = vmul.f32 %v5881_v21, %v6640_v29  ;;  %v1682_v29 = vpack.c.bf16 %v6564_v22, %v6564_v22  ;;  %v5736_v61 = vld [vmem:[%s7605_s25 + $0x78] sm:$0xff]  }
 0x690   :  { %5355 = vmatprep.subr.bf16.mxu1 %v5984_v3  ;;  %v1426_v27 = vpack.c.bf16 %v1425_v9, %v1425_v9  ;;  %v5743_v9 = vld [vmem:[%s7605_s25 + $0xa8] sm:$0xff]   ;;  %v5747_v21 = vld [vmem:[%s7605_s25 + $0xb8] sm:$0xff]  }
 0x691   :  { %v1529_v30 = vpack.c.bf16 %v1528_v8, %v1528_v8  ;;  %v5883_v62 = vpop.eup %5882  ;;  %v1740_v38 = vsel %vm1120_vm1, %v1682_v29, 0 }
 0x692   :  { %v1631_v12 = vmul.f32 %v5883_v62, %v5871_v35  ;;  %v5724_v35 = vld [vmem:[%s7605_s25 + $0x60] sm:$0xff]  }
 0x694   :  { %v1632_v33 = vpack.c.bf16 %v1631_v12, %v1631_v12 }
 0x696   :  { %5346 = vmatmul.mubr.msk.bf16.vlgmr.msra.gmra.mrb[28].mxu1 %vm1104_vm3, %v1323_v11  ;;  %v5885_v37 = vpop.eup %5884  ;;  %v5740_v11 = vld [vmem:[%s7605_s25 + $0xe0] sm:$0xff]  }
 0x697   :  { %5356 = vmatpush3.bf16.msra.mxu1 %v1431_v5  ;;  %5357 = vmatprep.mubr.msk.bf16.mxu1 %vm5985_vm0, %v5984_v3  ;;  %v1734_v39 = vmul.f32 %v5885_v37, %v6644_v31  ;;  %v5887_v22 = vpop.eup %5886  ;;  %v5716_v31 = vld [vmem:[%s7605_s25 + $0x40] sm:$0xff]   ;;  %v5742_v5 = vld [vmem:[%s7605_s25 + $0xe8] sm:$0xff]  }
 0x698   :  { %5367 = vmatprep.subr.bf16.mxu1 %v5984_v3  ;;  %v1837_v47 = vmul.f32 %v5887_v22, %v6651_v50  ;;  %5166 = vmatprep.subr.bf16.mxu0 %v5716_v31  ;;  %v5726_v50 = vld [vmem:[%s7605_s25 + $0x20] sm:$0xff]  }
 0x699   :  { %v1735_v44 = vpack.c.bf16 %v1734_v39, %v1734_v39  ;;  %5167 = vmatpush3.bf16.msra.mxu0 %v5717_v36 }
 0x69a   :  { %v1838_v15 = vpack.c.bf16 %v1837_v47, %v1837_v47  ;;  %5168 = vmatprep.subr.bf16.mxu0 %v5718_v40 }
 0x69d   :  { %5169 = vmatpush3.bf16.msra.mxu0 %v5719_v42 }
 0x69e   :  { %5358 = vmatmul.mubr.msk.bf16.vlgmr.msra.gmra.mrb[32].mxu1 %vm1104_vm3, %v1426_v27  ;;  %5170 = vmatprep.subr.bf16.mxu0 %v5720_v48  ;;  %v5746_v27 = vld [vmem:[%s7605_s25 + $0xf8] sm:$0xff]  }
 0x69f   :  { %5368 = vmatpush3.bf16.msra.mxu1 %v1534_v54  ;;  %5369 = vmatprep.mubr.msk.bf16.mxu1 %vm5985_vm0, %v5984_v3 }
 0x6a0   :  { %5379 = vmatprep.subr.bf16.mxu1 %v5984_v3 }
 0x6a1   :  { %5171 = vmatpush3.bf16.msra.mxu0 %v5721_v49 }
 0x6a2   :  { %5172 = vmatprep.subr.bf16.mxu0 %v5722_v51 }
 0x6a5   :  { %5173 = vmatpush3.bf16.msra.mxu0 %v5723_v52 }
 0x6a6   :  { %5370 = vmatmul.mubr.msk.bf16.vlgmr.msra.gmra.mrb[36].mxu1 %vm1104_vm3, %v1529_v30  ;;  %5174 = vmatprep.subr.bf16.mxu0 %v5724_v35 }
 0x6a7   :  { %5380 = vmatpush3.bf16.msra.mxu1 %v1637_v34  ;;  %5381 = vmatprep.mubr.msk.bf16.mxu1 %vm5985_vm0, %v5984_v3 }
 0x6a8   :  { %5391 = vmatprep.subr.bf16.mxu1 %v5984_v3 }
 0x6a9   :  { %5175 = vmatpush3.bf16.msra.mxu0 %v5726_v50 }
 0x6aa   :  { %5176 = vmatprep.subr.bf16.mxu0 %v5728_v55 }
 0x6ad   :  { %5177 = vmatpush3.bf16.msra.mxu0 %v5730_v56 }
 0x6ae   :  { %5382 = vmatmul.mubr.msk.bf16.vlgmr.msra.gmra.mrb[40].mxu1 %vm1104_vm3, %v1632_v33  ;;  %5178 = vmatprep.subr.bf16.mxu0 %v5732_v13 }
 0x6af   :  { %5392 = vmatpush3.bf16.msra.mxu1 %v1740_v38  ;;  %5393 = vmatprep.mubr.msk.bf16.mxu1 %vm5985_vm0, %v5984_v3 }
 0x6b0   :  { %5403 = vmatprep.subr.bf16.mxu1 %v5984_v3 }
 0x6b1   :  { %5179 = vmatpush3.bf16.msra.mxu0 %v5734_v59 }
 0x6b2   :  { %5180 = vmatprep.subr.bf16.mxu0 %v5736_v61 }
 0x6b5   :  { %5181 = vmatpush3.bf16.msra.mxu0 %v5738_v0 }
 0x6b6   :  { %5394 = vmatmul.mubr.msk.bf16.vlgmr.msra.gmra.mrb[44].mxu1 %vm1104_vm3, %v1735_v44 }
 0x6b7   :  { %5404 = vmatpush3.bf16.msra.mxu1 %v1843_v45  ;;  %5405 = vmatprep.mubr.msk.bf16.mxu1 %vm5985_vm0, %v5984_v3 }
 0x6b8   :  { %5188 = vmatprep.subr.bf16.mxu1 %v5725_v17 }
 0x6be   :  { %5406 = vmatmul.mubr.msk.bf16.vlgmr.msra.gmra.mrb[48].mxu1 %vm1104_vm3, %v1838_v15 }
 0x6bf   :  { %5189 = vmatpush3.bf16.msra.mxu1 %v5727_v4 }
 0x6c0   :  { %5190 = vmatprep.subr.bf16.mxu1 %v5729_v25 }
 0x6c3   :  { %5191 = vmatpush3.bf16.msra.mxu1 %v5731_v57 }
 0x6c4   :  { %5192 = vmatprep.subr.bf16.mxu1 %v5733_v58  ;;  %v4931_v58 = vld [vmem:[%s7606_s9] ss:$0 sm:$0xff]  ;;  %s7609_s9 = sld [smem:[#allocation11_spill]] }
 0x6c7   :  { %5193 = vmatpush3.bf16.msra.mxu1 %v5735_v60 }
 0x6c8   :  { %5194 = vmatprep.subr.bf16.mxu1 %v5737_v63 }
 0x6cb   :  { %5195 = vmatpush3.bf16.msra.mxu1 %v5739_v1 }
 0x6cc   :  { %5196 = vmatprep.subr.bf16.mxu1 %v5740_v11 }
 0x6cf   :  { %5197 = vmatpush3.bf16.msra.mxu1 %v5741_v2 }
 0x6d0   :  { %5198 = vmatprep.subr.bf16.mxu1 %v5742_v5 }
 0x6d3   :  { %5199 = vmatpush3.bf16.msra.mxu1 %v5743_v9 }
 0x6d4   :  { %5200 = vmatprep.subr.bf16.mxu1 %v5744_v10  ;;  %v5932_v10 = vld [vmem:[%s7600_s27] sm:$0xff] }
 0x6d7   :  { %5201 = vmatpush3.bf16.msra.mxu1 %v5745_v14 }
 0x6d8   :  { %5202 = vmatprep.subr.bf16.mxu1 %v5746_v27  ;;  %v5933_v27 = vld [vmem:[%s7600_s27 + $0x8] sm:$0xff] }
 0x6db   :  { %5203 = vmatpush3.bf16.msra.mxu1 %v5747_v21 }
 0x761   :  { %v1261_v54 = vpop.f32.mrb[24].mxu1 }
 0x762   :  { %v5335_v8 = vpop.f32.mrb[25].mxu1 }
 0x763   :  { %v1264_v16 = vpop.f32.mrb[26].mxu1  ;;  %v5750_v8 = vld [vmem:[%s7607_s10 + $0x4] ss:$16 sps:$4 sm:$0xff]  }
 0x764   :  { %v5336_v28 = vpop.f32.mrb[27].mxu1  ;;  %v5751_v16 = vld [vmem:[%s7607_s10 + $0x8] ss:$16 sps:$4 sm:$0xff]   ;;  %2506 = vmatprep.subr.bf16.mxu0 %v5750_v8 }
 0x765   :  { %v5753_v28 = vld [vmem:[%s7607_s10 + $0xc] ss:$16 sps:$4 sm:$0xff]  }
 0x766   :  { %2549 = vmatprep.subr.bf16.mxu1 %v5753_v28 }
 0x769   :  { %v1364_v30 = vpop.f32.mrb[28].mxu1 }
 0x76a   :  { %v5347_v62 = vpop.f32.mrb[29].mxu1 }
 0x76b   :  { %v1367_v34 = vpop.f32.mrb[30].mxu1  ;;  %v5759_v62 = vld [vmem:[%s7607_s10 + $0x2c] ss:$16 sps:$4 sm:$0xff]  }
 0x76c   :  { %v5348_v12 = vpop.f32.mrb[31].mxu1  ;;  %v5754_v34 = vld [vmem:[%s7607_s10 + $0x20] ss:$16 sps:$4 sm:$0xff]  }
 0x76d   :  { %v5757_v12 = vld [vmem:[%s7607_s10 + $0x28] ss:$16 sps:$4 sm:$0xff]  }
 0x771   :  { %v1467_v32 = vpop.f32.mrb[32].mxu1 }
 0x772   :  { %v5359_v29 = vpop.f32.mrb[33].mxu1 }
 0x773   :  { %v1470_v33 = vpop.f32.mrb[34].mxu1 }
 0x774   :  { %v5360_v37 = vpop.f32.mrb[35].mxu1 }
 0x779   :  { %v1570_v38 = vpop.f32.mrb[36].mxu1 }
 0x77a   :  { %v1894_v39 = vpack.c.bf16 %v1570_v38, %v6622_v53  ;;  %v5371_v41 = vpop.f32.mrb[37].mxu1 }
 0x77b   :  { %v1573_v44 = vpop.f32.mrb[38].mxu1 }
 0x77c   :  { %v5372_v22 = vpop.f32.mrb[39].mxu1 }
 0x77d   :  { %v5762_v22 = vld [vmem:[%s7607_s10 + $0x44] ss:$16 sps:$4 sm:$0xff]  }
 0x781   :  { %v1673_v45 = vpop.f32.mrb[40].mxu1 }
 0x782   :  { %v1895_v47 = vpack.c.bf16 %v1673_v45, %v1261_v54  ;;  %v5383_v15 = vpop.f32.mrb[41].mxu1  ;;  %v5748_v54 = vld [vmem:[%s7607_s10] ss:$16 sps:$4 sm:$0xff]  }
 0x783   :  { %v1676_v31 = vpop.f32.mrb[42].mxu1  ;;  %v5760_v45 = vld [vmem:[%s7607_s10 + $0x40] ss:$16 sps:$4 sm:$0xff]   ;;  %v5763_v15 = vld [vmem:[%s7607_s10 + $0x48] ss:$16 sps:$4 sm:$0xff]  }
 0x784   :  { %v5384_v36 = vpop.f32.mrb[43].mxu1  ;;  %2193 = vmatprep.mubr.bf16.mxu0 %v1895_v47  ;;  %v5765_v47 = vld [vmem:[%s7607_s10 + $0x4c] ss:$16 sps:$4 sm:$0xff]   ;;  %v5768_v31 = vld [vmem:[%s7607_s10 + $0x64] ss:$16 sps:$4 sm:$0xff]  }
 0x785   :  { %2194 = vmatmul.mubr.bf16.vlgmr.msra.gmra.mrb[36].mxu0 %v1894_v39  ;;  %v5766_v36 = vld [vmem:[%s7607_s10 + $0x60] ss:$16 sps:$4 sm:$0xff]  }
 0x786   :  { %2538 = vmatprep.mubr.bf16.mxu0 %v5983_v43  ;;  %2507 = vmatpush1.bf16.msra.mxu0 %v5748_v54 }
 0x789   :  { %v1776_v40 = vpop.f32.mrb[44].mxu1 }
 0x78a   :  { %v1896_v42 = vpack.c.bf16 %v1776_v40, %v1364_v30  ;;  %v5395_v48 = vpop.f32.mrb[45].mxu1  ;;  %v5756_v30 = vld [vmem:[%s7607_s10 + $0x24] ss:$16 sps:$4 sm:$0xff]   ;;  %v5771_v40 = vld [vmem:[%s7607_s10 + $0x6c] ss:$16 sps:$4 sm:$0xff]  }
 0x78b   :  { %v1779_v49 = vpop.f32.mrb[46].mxu1  ;;  %2508 = vmatprep.subr.bf16.mxu0 %v5756_v30  ;;  %v5774_v48 = vld [vmem:[%s7607_s10 + $0x84] ss:$16 sps:$4 sm:$0xff]  }
 0x78c   :  { %v5396_v51 = vpop.f32.mrb[47].mxu1  ;;  %2509 = vmatpush1.bf16.msra.mxu0 %v5754_v34  ;;  %v5772_v49 = vld [vmem:[%s7607_s10 + $0x80] ss:$16 sps:$4 sm:$0xff]  }
 0x78d   :  { %2510 = vmatprep.subr.bf16.mxu0 %v5762_v22  ;;  %v5777_v51 = vld [vmem:[%s7607_s10 + $0x8c] ss:$16 sps:$4 sm:$0xff]  }
 0x790   :  { %2511 = vmatpush1.bf16.msra.mxu0 %v5760_v45  ;;  %v4965_v45 = vld [vmem:[%s7573_s19] ss:$0 sm:$0xff] }
 0x791   :  { %v1879_v52 = vpop.f32.mrb[48].mxu1  ;;  %2512 = vmatprep.subr.bf16.mxu0 %v5768_v31  ;;  %v2605_v31 = vld [vmem:[%s7608_s3 + $0x60] sm:$0xff] }
 0x792   :  { %v1897_v35 = vpack.c.bf16 %v1879_v52, %v1467_v32  ;;  %v5407_v53 = vpop.f32.mrb[49].mxu1  ;;  %v5775_v52 = vld [vmem:[%s7607_s10 + $0x88] ss:$16 sps:$4 sm:$0xff]  }
 0x793   :  { %v1882_v17 = vpop.f32.mrb[50].mxu1  ;;  %v5778_v53 = vld [vmem:[%s7607_s10 + $0xa0] ss:$16 sps:$4 sm:$0xff]  }
 0x794   :  { %v5408_v50 = vpop.f32.mrb[51].mxu1  ;;  %2234 = vmatprep.mubr.bf16.mxu1 %v1897_v35  ;;  %2513 = vmatpush1.bf16.msra.mxu0 %v5766_v36  ;;  %v5780_v35 = vld [vmem:[%s7607_s10 + $0xa4] ss:$16 sps:$4 sm:$0xff]   ;;  %v5783_v17 = vld [vmem:[%s7607_s10 + $0xac] ss:$16 sps:$4 sm:$0xff]  }
 0x795   :  { %2235 = vmatmul.mubr.bf16.vlgmr.msra.gmra.mrb[52].mxu1 %v1896_v42  ;;  %v5769_v42 = vld [vmem:[%s7607_s10 + $0x68] ss:$16 sps:$4 sm:$0xff]   ;;  %2514 = vmatprep.subr.bf16.mxu0 %v5774_v48 }
 0x796   :  { %2581 = vmatprep.mubr.bf16.mxu1 %v5983_v43  ;;  %2550 = vmatpush1.bf16.msra.mxu1 %v5751_v16  ;;  %v5781_v50 = vld [vmem:[%s7607_s10 + $0xa8] ss:$16 sps:$4 sm:$0xff]  }
 0x797   :  { %2551 = vmatprep.subr.bf16.mxu1 %v5759_v62 }
 0x798   :  { %2515 = vmatpush1.bf16.msra.mxu0 %v5772_v49  ;;  %v2609_v49 = vld [vmem:[%s7608_s3 + $0x80] sm:$0xff] }
 0x799   :  { %2516 = vmatprep.subr.bf16.mxu0 %v5780_v35  ;;  %v2610_v35 = vld [vmem:[%s7608_s3 + $0x88] sm:$0xff] }
 0x79a   :  { %2552 = vmatpush1.bf16.msra.mxu1 %v5757_v12 }
 0x79b   :  { %2553 = vmatprep.subr.bf16.mxu1 %v5765_v47 }
 0x79c   :  { %2517 = vmatpush1.bf16.msra.mxu0 %v5778_v53  ;;  %v2614_v53 = vld [vmem:[%s7608_s3 + $0xa8] sm:$0xff] }
 0x79e   :  { %2554 = vmatpush1.bf16.msra.mxu1 %v5763_v15  ;;  %v2601_v15 = vld [vmem:[%s7608_s3 + $0x40] sm:$0xff] }
 0x79f   :  { %2555 = vmatprep.subr.bf16.mxu1 %v5771_v40  ;;  %v5007_v48 = vcombine.high %v2601_v15, %v2605_v31 }
 0x7a2   :  { %2556 = vmatpush1.bf16.msra.mxu1 %v5769_v42 }
 0x7a3   :  { %2557 = vmatprep.subr.bf16.mxu1 %v5777_v51 }
 0x7a6   :  { %2558 = vmatpush1.bf16.msra.mxu1 %v5775_v52  ;;  %v2613_v52 = vld [vmem:[%s7608_s3 + $0xa0] sm:$0xff] }
 0x7a7   :  { %2559 = vmatprep.subr.bf16.mxu1 %v5783_v17  ;;  %v5006_v17 = vcombine.low %v2601_v15, %v2605_v31  ;;  %v2650_v15 = vld [vmem:[%s7608_s3 + $0x1c8] sm:$0xff] }
 0x7a8   :  { %v2654_v31 = vld [vmem:[%s7608_s3 + $0x1e8] sm:$0xff] }
 0x7aa   :  { %2560 = vmatpush1.bf16.msra.mxu1 %v5781_v50 }
 0x858   :  { %v5182_v4 = vpop.f32.mrb[36].mxu0 }
 0x859   :  { %v5183_v55 = vpop.f32.mrb[37].mxu0 }
 0x85a   :  { %v5184_v25 = vadd.f32 %v5183_v55, %v5182_v4  ;;  %v5185_v56 = vpop.f32.mrb[38].mxu0  ;;  %v5786_v4 = vld [vmem:[%s7607_s10 + $0xc4] ss:$16 sps:$4 sm:$0xff]   ;;  %v5784_v55 = vld [vmem:[%s7607_s10 + $0xc0] ss:$16 sps:$4 sm:$0xff]  }
 0x85b   :  { %v5186_v57 = vpop.f32.mrb[39].mxu0  ;;  %2518 = vmatprep.subr.bf16.mxu0 %v5786_v4  ;;  %v5015_v4 = vcombine.high %v2609_v49, %v2613_v52 }
 0x85c   :  { %v5187_v13 = vadd.f32 %v5186_v57, %v5185_v56  ;;  %v2196_v61 = vadd.f32 %v5184_v25, %v4931_v58  ;;  %v5789_v25 = vld [vmem:[%s7607_s10 + $0xcc] ss:$16 sps:$4 sm:$0xff]   ;;  %v5787_v56 = vld [vmem:[%s7607_s10 + $0xc8] ss:$16 sps:$4 sm:$0xff]   ;;  %v5792_v57 = vld [vmem:[%s7607_s10 + $0xe4] ss:$16 sps:$4 sm:$0xff]   ;;  %2519 = vmatpush1.bf16.msra.mxu0 %v5784_v55 }
 0x85d   :  { %2561 = vmatprep.subr.bf16.mxu1 %v5789_v25  ;;  %2520 = vmatprep.subr.bf16.mxu0 %v5792_v57  ;;  %v2617_v55 = vld [vmem:[%s7608_s3 + $0xc0] sm:$0xff]  ;;  %v5017_v25 = vcombine.high %v2610_v35, %v2614_v53  ;;  %v2618_v57 = vld [vmem:[%s7608_s3 + $0xc8] sm:$0xff] }
 0x85e   :  { %v2199_v11 = vadd.f32 %v5187_v13, %v4931_v58  ;;  %v5790_v13 = vld [vmem:[%s7607_s10 + $0xe0] ss:$16 sps:$4 sm:$0xff]   ;;  %v5795_v58 = vld [vmem:[%s7607_s10 + $0xec] ss:$16 sps:$4 sm:$0xff]   ;;  %2562 = vmatpush1.bf16.msra.mxu1 %v5787_v56 }
 0x85f   :  { %2563 = vmatprep.subr.bf16.mxu1 %v5795_v58  ;;  %v2621_v56 = vld [vmem:[%s7608_s3 + $0xe0] sm:$0xff]  ;;  %v5014_v58 = vcombine.low %v2609_v49, %v2613_v52  ;;  %v108_v52 = vld [vmem:[%s7609_s9 + $0x8] sm:$0xff] }
 0x860   :  { %2521 = vmatpush1.bf16.msra.mxu0 %v5790_v13  ;;  %v2622_v13 = vld [vmem:[%s7608_s3 + $0xe8] sm:$0xff] }
 0x868   :  { %v5204_v59 = vpop.f32.mrb[52].mxu1 }
 0x869   :  { %v5205_v60 = vpop.f32.mrb[53].mxu1 }
 0x86a   :  { %v5206_v63 = vadd.f32 %v5205_v60, %v5204_v59  ;;  %v5207_v0 = vpop.f32.mrb[54].mxu1  ;;  %v2593_v59 = vld [vmem:[%s7608_s3] sm:$0xff]  ;;  %v5793_v60 = vld [vmem:[%s7607_s10 + $0xe8] ss:$16 sps:$4 sm:$0xff]   ;;  %s7611_s10 = sld [smem:[#allocation17_spill]] }
 0x86b   :  { %v5208_v1 = vpop.f32.mrb[55].mxu1  ;;  %2564 = vmatpush1.bf16.msra.mxu1 %v5793_v60  ;;  %v5023_v60 = vcombine.high %v2617_v55, %v2621_v56 }
 0x86c   :  { %v2237_v2 = vadd.f32 %v5206_v63, %v2196_v61  ;;  %v5209_v5 = vadd.f32 %v5208_v1, %v5207_v0  ;;  %v2597_v61 = vld [vmem:[%s7608_s3 + $0x20] sm:$0xff]  ;;  %v2594_v1 = vld [vmem:[%s7608_s3 + $0x8] sm:$0xff] }
 0x86d   :  { %v4998_v63 = vcombine.low %v2593_v59, %v2597_v61  ;;  %v4999_v0 = vcombine.high %v2593_v59, %v2597_v61  ;;  %v5016_v59 = vcombine.low %v2610_v35, %v2614_v53  ;;  %v2625_v61 = vld [vmem:[%s7608_s3 + $0x100] sm:$0xff]  ;;  %v5056_v35 = vcombine.low %v2650_v15, %v2654_v31 }
 0x86e   :  { %v2240_v9 = vadd.f32 %v5209_v5, %v2199_v11  ;;  %v6805_v14 = vadd.f32 %v5932_v10, %v2237_v2  ;;  %v2598_v11 = vld [vmem:[%s7608_s3 + $0x28] sm:$0xff] }
 0x86f   :  { %3019 = vmatprep.subr.bf16.mxu0 %v4999_v0  ;;  %v5001_v2 = vcombine.high %v2594_v1, %v2598_v11  ;;  %v5000_v5 = vcombine.low %v2594_v1, %v2598_v11  ;;  %v2629_v0 = vld [vmem:[%s7608_s3 + $0x120] sm:$0xff]  ;;  %v2626_v1 = vld [vmem:[%s7608_s3 + $0x108] sm:$0xff] }
 0x870   :  { %2247 = vadd.xlane.f32.xlu0 %v6805_v14  ;;  %v6811_v21 = vadd.f32 %v5933_v27, %v2240_v9  ;;  %v2630_v11 = vld [vmem:[%s7608_s3 + $0x128] sm:$0xff] }
 0x871   :  { %3062 = vmatprep.subr.bf16.mxu1 %v5001_v2  ;;  %v5022_v2 = vcombine.low %v2617_v55, %v2621_v56  ;;  %v2607_v55 = vld [vmem:[%s7608_s3 + $0x70] sm:$0xff] }
 0x872   :  { %2249 = vadd.xlane.f32.xlu1 %v6811_v21 }
 0x8fd   :  { %v2248_v32 = vpop.xlane.xlu0 %2247 }
 0x8fe   :  { %v6838_v29 = vmul.f32 0.03125, %v2248_v32 }
 0x8ff   :  { %v2250_v33 = vpop.xlane.xlu1 %2249 }
 0x900   :  { %v6842_v37 = vsub.f32 %v6805_v14, %v6838_v29  ;;  %v6844_v38 = vmul.f32 0.03125, %v2250_v33  ;;  %v2261_v9 = vmul.f32 %v6838_v29, %v6838_v29  ;;  %v4964_v29 = vld [vmem:[%s7572_s18] ss:$0 sm:$0xff] }
 0x902   :  { %v6848_v39 = vsub.f32 %v6811_v21, %v6844_v38  ;;  %v2255_v41 = vmul.f32 %v6842_v37, %v6842_v37  ;;  %v2262_v10 = vmul.f32 %v6844_v38, %v6844_v38  ;;  %v2263_v27 = vmul.f32 96.0, %v2261_v9 }
 0x903   :  { %v5031_v9 = vcombine.high %v2625_v61, %v2629_v0 }
 0x904   :  { %2257 = vadd.xlane.f32.xlu0 %v2255_v41  ;;  %v2256_v44 = vmul.f32 %v6848_v39, %v6848_v39  ;;  %v2264_v16 = vmul.f32 96.0, %v2262_v10  ;;  %v2633_v10 = vld [vmem:[%s7608_s3 + $0x140] sm:$0xff] }
 0x906   :  { %2259 = vadd.xlane.f32.xlu1 %v2256_v44 }
 0x991   :  { %v2258_v54 = vpop.xlane.xlu0 %2257 }
 0x992   :  { %v2265_v8 = vsub.f32 %v2258_v54, %v2263_v27  ;;  %v5033_v27 = vcombine.high %v2626_v1, %v2630_v11  ;;  %v2637_v54 = vld [vmem:[%s7608_s3 + $0x160] sm:$0xff] }
 0x993   :  { %v2260_v28 = vpop.xlane.xlu1 %2259 }
 0x994   :  { %v2267_v30 = vmul.f32 0.03125, %v2265_v8  ;;  %v2266_v62 = vsub.f32 %v2260_v28, %v2264_v16  ;;  %v2634_v8 = vld [vmem:[%s7608_s3 + $0x148] sm:$0xff]  ;;  %v5030_v28 = vcombine.low %v2625_v61, %v2629_v0  ;;  %v2627_v61 = vld [vmem:[%s7608_s3 + $0x110] sm:$0xff] }
 0x995   :  { %v2638_v16 = vld [vmem:[%s7608_s3 + $0x168] sm:$0xff]  ;;  %v2631_v0 = vld [vmem:[%s7608_s3 + $0x130] sm:$0xff] }
 0x996   :  { %v2269_v34 = vadd.f32 1e-05, %v2267_v30  ;;  %v2268_v12 = vmul.f32 0.03125, %v2266_v62  ;;  %v5032_v30 = vcombine.low %v2626_v1, %v2630_v11  ;;  %v5039_v62 = vcombine.high %v2633_v10, %v2637_v54 }
 0x997   :  { %v5035_v11 = vcombine.high %v2627_v61, %v2631_v0 }
 0x998   :  { %5888 = vrsqrt.f32 %v2269_v34  ;;  %v2270_v32 = vadd.f32 1e-05, %v2268_v12  ;;  %v2641_v34 = vld [vmem:[%s7608_s3 + $0x180] sm:$0xff]  ;;  %v5041_v12 = vcombine.high %v2634_v8, %v2638_v16 }
 0x99a   :  { %5890 = vrsqrt.f32 %v2270_v32  ;;  %v2645_v32 = vld [vmem:[%s7608_s3 + $0x1a0] sm:$0xff] }
 0x9a2   :  { %v5889_v33 = vpop.eup %5888 }
 0x9a3   :  { %v2273_v41 = vmul.f32 %v5889_v33, %v6842_v37  ;;  %v2602_v37 = vld [vmem:[%s7608_s3 + $0x48] sm:$0xff] }
 0x9a4   :  { %v5891_v38 = vpop.eup %5890  ;;  %v2642_v33 = vld [vmem:[%s7608_s3 + $0x188] sm:$0xff] }
 0x9a5   :  { %v2274_v44 = vmul.f32 %v5891_v38, %v6848_v39  ;;  %v2281_v22 = vmul.f32 %v4964_v29, %v2273_v41  ;;  %v2606_v39 = vld [vmem:[%s7608_s3 + $0x68] sm:$0xff]  ;;  %v5038_v41 = vcombine.low %v2633_v10, %v2637_v54  ;;  %v5040_v38 = vcombine.low %v2634_v8, %v2638_v16  ;;  %v2647_v54 = vld [vmem:[%s7608_s3 + $0x1b0] sm:$0xff] }
 0x9a6   :  { %v5009_v51 = vcombine.high %v2602_v37, %v2606_v39  ;;  %v5008_v50 = vcombine.low %v2602_v37, %v2606_v39  ;;  %v5046_v37 = vcombine.low %v2641_v34, %v2645_v32 }
 0x9a7   :  { %v2282_v47 = vmul.f32 %v4964_v29, %v2274_v44  ;;  %v2289_v36 = vadd.f32 %v4965_v45, %v2281_v22  ;;  %v2646_v29 = vld [vmem:[%s7608_s3 + $0x1a8] sm:$0xff]  ;;  %v5047_v44 = vcombine.high %v2641_v34, %v2645_v32  ;;  %v2649_v22 = vld [vmem:[%s7608_s3 + $0x1c0] sm:$0xff]  ;;  %v2596_v32 = vld [vmem:[%s7608_s3 + $0x18] sm:$0xff] }
 0x9a8   :  { %v5048_v39 = vcombine.low %v2642_v33, %v2646_v29 }
 0x9a9   :  { %v2290_v40 = vadd.f32 %v4965_v45, %v2282_v47  ;;  %v5049_v45 = vcombine.high %v2642_v33, %v2646_v29  ;;  %v2653_v47 = vld [vmem:[%s7608_s3 + $0x1e0] sm:$0xff]  ;;  %v2600_v33 = vld [vmem:[%s7608_s3 + $0x38] sm:$0xff] }
 0x9aa   :  { %v5054_v49 = vcombine.low %v2649_v22, %v2653_v47  ;;  %v2604_v29 = vld [vmem:[%s7608_s3 + $0x58] sm:$0xff] }
 0x9ab   :  { %v2291_v42 = vpack.c.bf16 %v2290_v40, %v2289_v36  ;;  %v5055_v36 = vcombine.high %v2649_v22, %v2653_v47  ;;  %v5057_v40 = vcombine.high %v2650_v15, %v2654_v31  ;;  %v2616_v47 = vld [vmem:[%s7608_s3 + $0xb8] sm:$0xff] }
 0x9ad   :  { %2539 = vmatmul.mubr.bf16.vlgmr.msra.gmra.mrb[40].mxu0 %v2291_v42  ;;  %2582 = vmatmul.mubr.bf16.vlgmr.msra.gmra.mrb[56].mxu1 %v2291_v42  ;;  %v2595_v42 = vld [vmem:[%s7608_s3 + $0x10] sm:$0xff] }
 0x9ae   :  { %3020 = vmatpush1.bf16.msra.mxu0 %v4998_v63  ;;  %3063 = vmatpush1.bf16.msra.mxu1 %v5000_v5  ;;  %v5025_v63 = vcombine.high %v2618_v57, %v2622_v13  ;;  %v5024_v5 = vcombine.low %v2618_v57, %v2622_v13  ;;  %v2611_v57 = vld [vmem:[%s7608_s3 + $0x90] sm:$0xff] }
 0x9af   :  { %3021 = vmatprep.subr.bf16.mxu0 %v5007_v48  ;;  %3064 = vmatprep.subr.bf16.mxu1 %v5009_v51  ;;  %v2599_v48 = vld [vmem:[%s7608_s3 + $0x30] sm:$0xff]  ;;  %v107_v51 = vld [vmem:[%s7609_s9] sm:$0xff] }
 0x9b0   :  { %3051 = vmatprep.mubr.bf16.mxu0 %v5983_v43  ;;  %3094 = vmatprep.mubr.bf16.mxu1 %v5983_v43  ;;  %v5003_v53 = vcombine.high %v2595_v42, %v2599_v48 }
 0x9b2   :  { %3022 = vmatpush1.bf16.msra.mxu0 %v5006_v17  ;;  %3065 = vmatpush1.bf16.msra.mxu1 %v5008_v50  ;;  %v7048_v17 = vpack.c.bf16 %v108_v52, %v107_v51  ;;  %v5002_v50 = vcombine.low %v2595_v42, %v2599_v48  ;;  %v2628_v42 = vld [vmem:[%s7608_s3 + $0x118] sm:$0xff] }
 0x9b3   :  { %3023 = vmatprep.subr.bf16.mxu0 %v5015_v4  ;;  %3066 = vmatprep.subr.bf16.mxu1 %v5017_v25  ;;  %v2603_v4 = vld [vmem:[%s7608_s3 + $0x50] sm:$0xff]  ;;  %v2632_v48 = vld [vmem:[%s7608_s3 + $0x138] sm:$0xff] }
 0x9b4   :  { %v5011_v25 = vcombine.high %v2603_v4, %v2607_v55  ;;  %v5010_v56 = vcombine.low %v2603_v4, %v2607_v55  ;;  %v5037_v51 = vcombine.high %v2628_v42, %v2632_v48  ;;  %v2636_v52 = vld [vmem:[%s7608_s3 + $0x158] sm:$0xff] }
 0x9b5   :  { %v2644_v4 = vld [vmem:[%s7608_s3 + $0x198] sm:$0xff] }
 0x9b6   :  { %3024 = vmatpush1.bf16.msra.mxu0 %v5014_v58  ;;  %3067 = vmatpush1.bf16.msra.mxu1 %v5016_v59  ;;  %v2619_v59 = vld [vmem:[%s7608_s3 + $0xd0] sm:$0xff]  ;;  %v2648_v55 = vld [vmem:[%s7608_s3 + $0x1b8] sm:$0xff] }
 0x9b7   :  { %3025 = vmatprep.subr.bf16.mxu0 %v5023_v60  ;;  %3068 = vmatprep.subr.bf16.mxu1 %v5025_v63  ;;  %v2623_v60 = vld [vmem:[%s7608_s3 + $0xf0] sm:$0xff] }
 0x9b8   :  { %v5027_v63 = vcombine.high %v2619_v59, %v2623_v60  ;;  %v5026_v1 = vcombine.low %v2619_v59, %v2623_v60 }
 0x9ba   :  { %3026 = vmatpush1.bf16.msra.mxu0 %v5022_v2  ;;  %3069 = vmatpush1.bf16.msra.mxu1 %v5024_v5  ;;  %v2635_v2 = vld [vmem:[%s7608_s3 + $0x150] sm:$0xff] }
 0x9bb   :  { %3027 = vmatprep.subr.bf16.mxu0 %v5031_v9  ;;  %3070 = vmatprep.subr.bf16.mxu1 %v5033_v27  ;;  %v2639_v5 = vld [vmem:[%s7608_s3 + $0x170] sm:$0xff]  ;;  %v5034_v9 = vcombine.low %v2627_v61, %v2631_v0 }
 0x9bc   :  { %v5043_v10 = vcombine.high %v2635_v2, %v2639_v5  ;;  %v2643_v27 = vld [vmem:[%s7608_s3 + $0x190] sm:$0xff]  ;;  %v5042_v8 = vcombine.low %v2635_v2, %v2639_v5 }
 0x9bd   :  { %v5051_v16 = vcombine.high %v2643_v27, %v2647_v54 }
 0x9be   :  { %3028 = vmatpush1.bf16.msra.mxu0 %v5030_v28  ;;  %3071 = vmatpush1.bf16.msra.mxu1 %v5032_v30  ;;  %v2651_v28 = vld [vmem:[%s7608_s3 + $0x1d0] sm:$0xff] }
 0x9bf   :  { %3029 = vmatprep.subr.bf16.mxu0 %v5039_v62  ;;  %3072 = vmatprep.subr.bf16.mxu1 %v5041_v12  ;;  %v2655_v30 = vld [vmem:[%s7608_s3 + $0x1f0] sm:$0xff]  ;;  %v5050_v62 = vcombine.low %v2643_v27, %v2647_v54  ;;  %v2324_v27 = vld [vmem:[%s7611_s10] sm:$0xf]  ;;  %s4813_s10 = sshll.u32 %s5986_s29, 4  ;;  %s4814_s10 = int_to_ptr.vmem [resolvable:$true] %s4813_s10 }
 0x9c0   :  { %v5059_v34 = vcombine.high %v2651_v28, %v2655_v30  ;;  %v5058_v12 = vcombine.low %v2651_v28, %v2655_v30  ;;  %v2329_v30 = vrot.slane %v2324_v27, %v6505_v23  ;;  %p5961_p9 = scmp.lt.s32.totalorder %s4814_s10, %s4814_s10 }
 0x9c2   :  { %3030 = vmatpush1.bf16.msra.mxu0 %v5038_v41  ;;  %3073 = vmatpush1.bf16.msra.mxu1 %v5040_v38  ;;  %v5004_v41 = vcombine.low %v2596_v32, %v2600_v33  ;;  %v5005_v38 = vcombine.high %v2596_v32, %v2600_v33 }
 0x9c3   :  { %3031 = vmatprep.subr.bf16.mxu0 %v5047_v44  ;;  %3074 = vmatprep.subr.bf16.mxu1 %v5049_v45  ;;  %v2608_v44 = vld [vmem:[%s7608_s3 + $0x78] sm:$0xff] }
 0x9c4   :  { %v5013_v22 = vcombine.high %v2604_v29, %v2608_v44  ;;  %v2612_v45 = vld [vmem:[%s7608_s3 + $0x98] sm:$0xff]  ;;  %v5012_v15 = vcombine.low %v2604_v29, %v2608_v44 }
 0x9c5   :  { %v5021_v31 = vcombine.high %v2612_v45, %v2616_v47 }
 0x9c6   :  { %3032 = vmatpush1.bf16.msra.mxu0 %v5046_v37  ;;  %3075 = vmatpush1.bf16.msra.mxu1 %v5048_v39  ;;  %v2620_v37 = vld [vmem:[%s7608_s3 + $0xd8] sm:$0xff] }
 0x9c7   :  { %3033 = vmatprep.subr.bf16.mxu0 %v5055_v36  ;;  %3076 = vmatprep.subr.bf16.mxu1 %v5057_v40  ;;  %v2624_v39 = vld [vmem:[%s7608_s3 + $0xf8] sm:$0xff]  ;;  %v5020_v36 = vcombine.low %v2612_v45, %v2616_v47  ;;  %v2333_v45 = vrot.slane %v2324_v27, %v6480_v7 }
 0x9c8   :  { %v5029_v40 = vcombine.high %v2620_v37, %v2624_v39 }
 0x9ca   :  { %3034 = vmatpush1.bf16.msra.mxu0 %v5054_v49  ;;  %3077 = vmatpush1.bf16.msra.mxu1 %v5056_v35  ;;  %v5028_v49 = vcombine.low %v2620_v37, %v2624_v39  ;;  %v2640_v35 = vld [vmem:[%s7608_s3 + $0x178] sm:$0xff]  ;;  %v2337_v37 = vrot.slane %v2324_v27, %v6508_v24 }
 0x9cb   :  { %3105 = vmatprep.subr.bf16.mxu0 %v5003_v53  ;;  %3148 = vmatprep.subr.bf16.mxu1 %v5005_v38  ;;  %v5036_v53 = vcombine.low %v2628_v42, %v2632_v48  ;;  %v2341_v48 = vrot.slane %v2324_v27, %v6527_v46 }
 0x9cd   :  { %3052 = vmatmul.mubr.bf16.vlgmr.msra.gmra.mrb[44].mxu0 %v7048_v17  ;;  %3095 = vmatmul.mubr.bf16.vlgmr.msra.gmra.mrb[60].mxu1 %v7048_v17 }
 0x9ce   :  { %3106 = vmatpush1.bf16.msra.mxu0 %v5002_v50  ;;  %3137 = vmatprep.mubr.bf16.mxu0 %v5983_v43  ;;  %v5045_v50 = vcombine.high %v2636_v52, %v2640_v35 }
 0x9cf   :  { %3180 = vmatprep.mubr.bf16.mxu1 %v5983_v43  ;;  %3107 = vmatprep.subr.bf16.mxu0 %v5011_v25  ;;  %v2615_v43 = vld [vmem:[%s7608_s3 + $0xb0] sm:$0xff]  ;;  %v5044_v25 = vcombine.low %v2636_v52, %v2640_v35 }
 0x9d0   :  { %v5019_v13 = vcombine.high %v2611_v57, %v2615_v43  ;;  %v5018_v58 = vcombine.low %v2611_v57, %v2615_v43  ;;  %3149 = vmatpush1.bf16.msra.mxu1 %v5004_v41  ;;  %v2652_v57 = vld [vmem:[%s7608_s3 + $0x1d8] sm:$0xff] }
 0x9d1   :  { %3150 = vmatprep.subr.bf16.mxu1 %v5013_v22  ;;  %v2656_v43 = vld [vmem:[%s7608_s3 + $0x1f8] sm:$0xff] }
 0x9d2   :  { %3108 = vmatpush1.bf16.msra.mxu0 %v5010_v56  ;;  %v5053_v56 = vcombine.high %v2644_v4, %v2648_v55  ;;  %v5060_v61 = vcombine.low %v2652_v57, %v2656_v43 }
 0x9d3   :  { %3109 = vmatprep.subr.bf16.mxu0 %v5019_v13  ;;  %v5052_v13 = vcombine.low %v2644_v4, %v2648_v55 }
 0x9d4   :  { %3151 = vmatpush1.bf16.msra.mxu1 %v5012_v15 }
 0x9d5   :  { %3152 = vmatprep.subr.bf16.mxu1 %v5021_v31 }
 0x9d6   :  { %3110 = vmatpush1.bf16.msra.mxu0 %v5018_v58  ;;  %v5061_v58 = vcombine.high %v2652_v57, %v2656_v43 }
 0x9d7   :  { %3111 = vmatprep.subr.bf16.mxu0 %v5027_v63 }
 0x9d8   :  { %3153 = vmatpush1.bf16.msra.mxu1 %v5020_v36 }
 0x9d9   :  { %3154 = vmatprep.subr.bf16.mxu1 %v5029_v40 }
 0x9da   :  { %3112 = vmatpush1.bf16.msra.mxu0 %v5026_v1 }
 0x9db   :  { %3113 = vmatprep.subr.bf16.mxu0 %v5035_v11 }
 0x9dc   :  { %3155 = vmatpush1.bf16.msra.mxu1 %v5028_v49 }
 0x9dd   :  { %3156 = vmatprep.subr.bf16.mxu1 %v5037_v51 }
 0x9de   :  { %3114 = vmatpush1.bf16.msra.mxu0 %v5034_v9  ;;  %v7161_v9 = vld [vmem:[%s7610_s6] sm:$0xff] }
 0x9df   :  { %3115 = vmatprep.subr.bf16.mxu0 %v5043_v10  ;;  %v2662_v10 = vrot.slane %v7161_v9, %v6505_v23  ;;  %v2666_v32 = vrot.slane %v7161_v9, %v6480_v7  ;;  %v2670_v44 = vrot.slane %v7161_v9, %v6508_v24  ;;  %v2674_v36 = vrot.slane %v7161_v9, %v6527_v46 }
 0x9e0   :  { %3157 = vmatpush1.bf16.msra.mxu1 %v5036_v53 }
 0x9e1   :  { %3158 = vmatprep.subr.bf16.mxu1 %v5045_v50 }
 0x9e2   :  { %3116 = vmatpush1.bf16.msra.mxu0 %v5042_v8 }
 0x9e3   :  { %3117 = vmatprep.subr.bf16.mxu0 %v5051_v16 }
 0x9e4   :  { %3159 = vmatpush1.bf16.msra.mxu1 %v5044_v25 }
 0x9e5   :  { %3160 = vmatprep.subr.bf16.mxu1 %v5053_v56 }
 0x9e6   :  { %3118 = vmatpush1.bf16.msra.mxu0 %v5050_v62 }
 0x9e7   :  { %3119 = vmatprep.subr.bf16.mxu0 %v5059_v34 }
 0x9e8   :  { %3161 = vmatpush1.bf16.msra.mxu1 %v5052_v13 }
 0x9e9   :  { %3162 = vmatprep.subr.bf16.mxu1 %v5061_v58 }
 0x9ea   :  { %3120 = vmatpush1.bf16.msra.mxu0 %v5058_v12 }
 0x9eb   :  { %5409 = vmatprep.subr.bf16.mxu0 %v5984_v3 }
 0x9ec   :  { %3163 = vmatpush1.bf16.msra.mxu1 %v5060_v61 }
 0x9ed   :  { %3138 = vmatmul.mubr.bf16.vlgmr.msra.gmra.mrb[48].mxu0 %v7048_v17  ;;  %5415 = vmatprep.subr.bf16.mxu1 %v5984_v3 }
 0x9ee   :  { %5411 = vmatprep.mubr.msk.bf16.mxu0 %vm5985_vm0, %v5984_v3 }
 0x9ef   :  { %3181 = vmatmul.mubr.bf16.vlgmr.msra.gmra.mrb[64].mxu1 %v7048_v17 }
 0x9f0   :  { %5417 = vmatprep.mubr.msk.bf16.mxu1 %vm5985_vm0, %v5984_v3 }
 0xa80   :  { %v2540_v59 = vpop.f32.mrb[40].mxu0  ;;  %v2583_v60 = vpop.f32.mrb[56].mxu1 }
 0xa81   :  { %v2542_v63 = vpop.f32.mrb[41].mxu0  ;;  %v2585_v0 = vpop.f32.mrb[57].mxu1  ;;  %v2541_v41 = vadd.f32 %v2540_v59, %v2329_v30  ;;  %v2584_v7 = vadd.f32 %v2583_v60, %v2337_v37 }
 0xa82   :  { %v2544_v1 = vpop.f32.mrb[42].mxu0  ;;  %v7148_v11 = vpop.f32.mrb[58].mxu1  ;;  %v2543_v15 = vadd.f32 %v2542_v63, %v2333_v45  ;;  %v2586_v24 = vadd.f32 %v2585_v0, %v2341_v48  ;;  %v2678_v63 = vrot.slane %v7161_v9, %v275_v18 }
 0xa83   :  { %v7150_v2 = vpop.f32.mrb[43].mxu0  ;;  %v7152_v5 = vpop.f32.mrb[59].mxu1  ;;  %v3191_v22 = vpack.c.bf16 %v2541_v41, %v2541_v41  ;;  %v3395_v42 = vpack.c.bf16 %v2584_v7, %v2584_v7  ;;  %v2545_v53 = vadd.f32 %v2544_v1, %v2329_v30  ;;  %v2588_v43 = vadd.f32 %v7148_v11, %v2337_v37 }
 0xa84   :  { %v3293_v39 = vpack.c.bf16 %v2543_v15, %v2543_v15  ;;  %v3497_v52 = vpack.c.bf16 %v2586_v24, %v2586_v24  ;;  %v2547_v55 = vadd.f32 %v7150_v2, %v2333_v45  ;;  %v2590_v60 = vadd.f32 %v7152_v5, %v2341_v48 }
 0xa85   :  { %v3599_v50 = vpack.c.bf16 %v2545_v53, %v2545_v53  ;;  %v3803_v58 = vpack.c.bf16 %v2588_v43, %v2588_v43 }
 0xa86   :  { %v3701_v56 = vpack.c.bf16 %v2547_v55, %v2547_v55  ;;  %v3905_v61 = vpack.c.bf16 %v2590_v60, %v2590_v60 }
 0xaa0   :  { %v3053_v54 = vpop.f32.mrb[44].mxu0  ;;  %v3096_v8 = vpop.f32.mrb[60].mxu1 }
 0xaa1   :  { %v3054_v16 = vadd.f32 %v3053_v54, %v2662_v10  ;;  %v3055_v28 = vpop.f32.mrb[45].mxu0  ;;  %v3098_v17 = vpop.f32.mrb[61].mxu1  ;;  %v3097_v47 = vadd.f32 %v3096_v8, %v2670_v44 }
 0xaa2   :  { %v3057_v62 = vpop.f32.mrb[46].mxu0  ;;  %v3100_v34 = vpop.f32.mrb[62].mxu1  ;;  %v3056_v38 = vadd.f32 %v3055_v28, %v2666_v32  ;;  %v3099_v40 = vadd.f32 %v3098_v17, %v2674_v36 }
 0xaa3   :  { %v3192_v12 = vpack.c.bf16 %v3054_v16, %v3054_v16  ;;  %v3059_v33 = vpop.f32.mrb[47].mxu0  ;;  %v3102_v29 = vpop.f32.mrb[63].mxu1  ;;  %v3396_v31 = vpack.c.bf16 %v3097_v47, %v3097_v47  ;;  %v3058_v51 = vadd.f32 %v3057_v62, %v2662_v10  ;;  %v3101_v25 = vadd.f32 %v3100_v34, %v2670_v44 }
 0xaa4   :  { %v3294_v23 = vpack.c.bf16 %v3056_v38, %v3056_v38  ;;  %v3498_v49 = vpack.c.bf16 %v3099_v40, %v3099_v40  ;;  %v3060_v46 = vadd.f32 %v3059_v33, %v2666_v32  ;;  %v3103_v13 = vadd.f32 %v3102_v29, %v2674_v36 }
 0xaa5   :  { %5410 = vmatpush3.bf16.xpose.msra.mxu0 %v3192_v12  ;;  %v3600_v35 = vpack.c.bf16 %v3058_v51, %v3058_v51  ;;  %v3804_v57 = vpack.c.bf16 %v3101_v25, %v3101_v25 }
 0xaa6   :  { %5421 = vmatprep.subr.bf16.mxu0 %v5984_v3  ;;  %v3702_v4 = vpack.c.bf16 %v3060_v46, %v3060_v46  ;;  %v3906_v59 = vpack.c.bf16 %v3103_v13, %v3103_v13 }
 0xaac   :  { %5412 = vmatmul.mubr.bf16.vlgmr.msra.gmra.mrb[52].mxu0 %v3191_v22 }
 0xaad   :  { %5422 = vmatpush3.bf16.xpose.msra.mxu0 %v3294_v23  ;;  %5423 = vmatprep.mubr.msk.bf16.mxu0 %vm5985_vm0, %v5984_v3 }
 0xaae   :  { %5433 = vmatprep.subr.bf16.mxu0 %v5984_v3 }
 0xab4   :  { %5424 = vmatmul.mubr.bf16.vlgmr.msra.gmra.mrb[56].mxu0 %v3293_v39 }
 0xab5   :  { %5434 = vmatpush3.bf16.xpose.msra.mxu0 %v3396_v31  ;;  %5435 = vmatprep.mubr.msk.bf16.mxu0 %vm5985_vm0, %v5984_v3 }
 0xab6   :  { %5445 = vmatprep.subr.bf16.mxu0 %v5984_v3 }
 0xabc   :  { %5436 = vmatmul.mubr.bf16.vlgmr.msra.gmra.mrb[60].mxu0 %v3395_v42 }
 0xabd   :  { %5446 = vmatpush3.bf16.xpose.msra.mxu0 %v3498_v49  ;;  %5447 = vmatprep.mubr.msk.bf16.mxu0 %vm5985_vm0, %v5984_v3 }
 0xabe   :  { %5457 = vmatprep.subr.bf16.mxu0 %v5984_v3 }
 0xac0   :  { %v3139_v0 = vpop.f32.mrb[48].mxu0 }
 0xac1   :  { %v3140_v1 = vadd.f32 %v3139_v0, %v2678_v63  ;;  %v7205_v11 = vpop.f32.mrb[49].mxu0 }
 0xac2   :  { %v3143_v2 = vpop.f32.mrb[50].mxu0 }
 0xac3   :  { %v3193_v10 = vpack.c.bf16 %v3140_v1, %v3140_v1  ;;  %v7207_v27 = vadd.f32 %v3143_v2, %v2678_v63  ;;  %v7209_v54 = vpop.f32.mrb[51].mxu0 }
 0xac4   :  { %5448 = vmatmul.mubr.bf16.vlgmr.msra.gmra.mrb[64].mxu0 %v3497_v52 }
 0xac5   :  { %5458 = vmatpush3.bf16.xpose.msra.mxu0 %v3600_v35  ;;  %5459 = vmatprep.mubr.msk.bf16.mxu0 %vm5985_vm0, %v5984_v3  ;;  %v3250_v8 = vsel %vm1120_vm1, %v3193_v10, 0 }
 0xac6   :  { %5469 = vmatprep.subr.bf16.mxu0 %v5984_v3  ;;  %5416 = vmatpush3.bf16.msra.mxu1 %v3250_v8 }
 0xac7   :  { %5427 = vmatprep.subr.bf16.mxu1 %v5984_v3 }
 0xacc   :  { %5460 = vmatmul.mubr.bf16.vlgmr.msra.gmra.mrb[68].mxu0 %v3599_v50 }
 0xacd   :  { %5470 = vmatpush3.bf16.xpose.msra.mxu0 %v3702_v4  ;;  %5471 = vmatprep.mubr.msk.bf16.mxu0 %vm5985_vm0, %v5984_v3 }
 0xace   :  { %5481 = vmatprep.subr.bf16.mxu0 %v5984_v3 }
 0xad4   :  { %5472 = vmatmul.mubr.bf16.vlgmr.msra.gmra.mrb[72].mxu0 %v3701_v56 }
 0xad5   :  { %5482 = vmatpush3.bf16.xpose.msra.mxu0 %v3804_v57  ;;  %5483 = vmatprep.mubr.msk.bf16.mxu0 %vm5985_vm0, %v5984_v3 }
 0xad6   :  { %5493 = vmatprep.subr.bf16.mxu0 %v5984_v3 }
 0xadc   :  { %5484 = vmatmul.mubr.bf16.vlgmr.msra.gmra.mrb[76].mxu0 %v3803_v58 }
 0xadd   :  { %5494 = vmatpush3.bf16.xpose.msra.mxu0 %v3906_v59  ;;  %5495 = vmatprep.mubr.msk.bf16.mxu0 %vm5985_vm0, %v5984_v3 }
 0xae4   :  { %5496 = vmatmul.mubr.bf16.vlgmr.msra.gmra.mrb[80].mxu0 %v3905_v61 }
 0xb7f   :  { %v3228_v5 = vpop.f32.mrb[52].mxu0 }
 0xb80   :  { %v5413_v16 = vpop.f32.mrb[53].mxu0  ;;  %v3234_v28 = vsel %vm1104_vm3, %v3228_v5, -inf }
 0xb81   :  { %3235 = vmax.xlane.f32.xlu0 %v3234_v28  ;;  %v3231_v18 = vpop.f32.mrb[54].mxu0 }
 0xb82   :  { %v5414_v17 = vpop.f32.mrb[55].mxu0 }
 0xb87   :  { %v3330_v30 = vpop.f32.mrb[56].mxu0 }
 0xb88   :  { %v5425_v62 = vpop.f32.mrb[57].mxu0  ;;  %v3336_v34 = vsel %vm1104_vm3, %v3330_v30, -inf }
 0xb89   :  { %3337 = vmax.xlane.f32.xlu1 %v3336_v34  ;;  %v3333_v12 = vpop.f32.mrb[58].mxu0 }
 0xb8a   :  { %v5426_v32 = vpop.f32.mrb[59].mxu0 }
 0xb8f   :  { %v3432_v33 = vpop.f32.mrb[60].mxu0 }
 0xb90   :  { %v5437_v29 = vpop.f32.mrb[61].mxu0  ;;  %v3438_v41 = vsel %vm1104_vm3, %v3432_v33, -inf }
 0xb91   :  { %3439 = vmax.xlane.f32.xlu0 %v3438_v41  ;;  %v3435_v38 = vpop.f32.mrb[62].mxu0 }
 0xb92   :  { %v5438_v44 = vpop.f32.mrb[63].mxu0 }
 0xb97   :  { %v3534_v22 = vpop.f32.mrb[64].mxu0 }
 0xb98   :  { %v5449_v45 = vpop.f32.mrb[65].mxu0  ;;  %v3540_v23 = vsel %vm1104_vm3, %v3534_v22, -inf }
 0xb99   :  { %3541 = vmax.xlane.f32.xlu1 %v3540_v23  ;;  %v3537_v47 = vpop.f32.mrb[66].mxu0  ;;  %v3182_v23 = vpop.f32.mrb[64].mxu1 }
 0xb9a   :  { %v5450_v15 = vpop.f32.mrb[67].mxu0 }
 0xb9b   :  { %v3184_v15 = vpop.f32.mrb[65].mxu1 }
 0xb9f   :  { %v3636_v31 = vpop.f32.mrb[68].mxu0 }
 0xba0   :  { %v5461_v37 = vpop.f32.mrb[69].mxu0  ;;  %v3642_v39 = vsel %vm1104_vm3, %v3636_v31, -inf }
 0xba1   :  { %3643 = vmax.xlane.f32.xlu0 %v3642_v39  ;;  %v3639_v36 = vpop.f32.mrb[70].mxu0 }
 0xba2   :  { %v5462_v7 = vpop.f32.mrb[71].mxu0 }
 0xba7   :  { %v3738_v40 = vpop.f32.mrb[72].mxu0 }
 0xba8   :  { %v5473_v42 = vpop.f32.mrb[73].mxu0  ;;  %v3744_v48 = vsel %vm1104_vm3, %v3738_v40, -inf }
 0xba9   :  { %3745 = vmax.xlane.f32.xlu1 %v3744_v48  ;;  %v3741_v49 = vpop.f32.mrb[74].mxu0 }
 0xbaa   :  { %v5474_v24 = vpop.f32.mrb[75].mxu0 }
 0xbaf   :  { %v3840_v51 = vpop.f32.mrb[76].mxu0 }
 0xbb0   :  { %v5485_v52 = vpop.f32.mrb[77].mxu0  ;;  %v3846_v35 = vsel %vm1104_vm3, %v3840_v51, -inf }
 0xbb1   :  { %3847 = vmax.xlane.f32.xlu0 %v3846_v35  ;;  %v3843_v53 = vpop.f32.mrb[78].mxu0  ;;  %v2682_v35 = vrot.slane %v7161_v9, %v279_v20 }
 0xbb2   :  { %v5486_v46 = vpop.f32.mrb[79].mxu0 }
 0xbb3   :  { %v3142_v53 = vadd.f32 %v7205_v11, %v2682_v35 }
 0xbb7   :  { %v3942_v50 = vpop.f32.mrb[80].mxu0 }
 0xbb8   :  { %v5497_v4 = vpop.f32.mrb[81].mxu0  ;;  %v3948_v55 = vsel %vm1104_vm3, %v3942_v50, -inf }
 0xbb9   :  { %3949 = vmax.xlane.f32.xlu1 %v3948_v55  ;;  %v3945_v25 = vpop.f32.mrb[82].mxu0  ;;  %v3295_v55 = vpack.c.bf16 %v3142_v53, %v3142_v53  ;;  %v5804_v53 = vld [vmem:[%s7612_s8 + $0x60] sm:$0xff]  }
 0xbba   :  { %v5498_v56 = vpop.f32.mrb[83].mxu0 }
 0xc0e   :  { %v3236_v57 = vpop.xlane.xlu0 %3235 }
 0xc0f   :  { %v3237_v43 = vsub.f32 %v3228_v5, %v3236_v57 }
 0xc11   :  { %v3238_v13 = vmul.f32 1.442695, %v3237_v43  ;;  %v3352_v43 = vsel %vm1120_vm1, %v3295_v55, 0  ;;  %v5808_v55 = vld [vmem:[%s7612_s8 + $0x68] sm:$0xff]  }
 0xc13   :  { %5892 = vpow2.f32 %v3238_v13 }
 0xc16   :  { %v3338_v58 = vpop.xlane.xlu1 %3337 }
 0xc17   :  { %v3339_v59 = vsub.f32 %v3330_v30, %v3338_v58  ;;  %v2690_v58 = vrot.slane %v7161_v9, %v287_v26 }
 0xc19   :  { %v3340_v60 = vmul.f32 1.442695, %v3339_v59 }
 0xc1b   :  { %5894 = vpow2.f32 %v3340_v60 }
 0xc1d   :  { %v5893_v61 = vpop.eup %5892 }
 0xc1e   :  { %v3440_v63 = vpop.xlane.xlu0 %3439  ;;  %v3240_v0 = vsel %vm1104_vm3, %v5893_v61, 0.0 }
 0xc1f   :  { %v3441_v1 = vsub.f32 %v3432_v33, %v3440_v63  ;;  %3241 = vadd.xlane.f32.xlu0 %v3240_v0 }
 0xc21   :  { %v3442_v2 = vmul.f32 1.442695, %v3441_v1 }
 0xc23   :  { %5896 = vpow2.f32 %v3442_v2 }
 0xc25   :  { %v7222_v10 = vpop.eup %5894 }
 0xc26   :  { %v3542_v8 = vpop.xlane.xlu1 %3541  ;;  %v3342_v5 = vsel %vm1104_vm3, %v7222_v10, 0.0 }
 0xc27   :  { %v3543_v16 = vsub.f32 %v3534_v22, %v3542_v8  ;;  %3343 = vadd.xlane.f32.xlu1 %v3342_v5  ;;  %v3601_v8 = vpack.c.bf16 %v7207_v27, %v7207_v27 }
 0xc29   :  { %v3544_v28 = vmul.f32 1.442695, %v3543_v16 }
 0xc2b   :  { %5898 = vpow2.f32 %v3544_v28  ;;  %v3658_v28 = vsel %vm1120_vm1, %v3601_v8, 0 }
 0xc2d   :  { %v7226_v18 = vpop.eup %5896 }
 0xc2e   :  { %v3644_v17 = vpop.xlane.xlu0 %3643  ;;  %v3444_v30 = vsel %vm1104_vm3, %v7226_v18, 0.0 }
 0xc2f   :  { %v3645_v62 = vsub.f32 %v3636_v31, %v3644_v17  ;;  %3445 = vadd.xlane.f32.xlu0 %v3444_v30  ;;  %v7238_v31 = vpop.f32.mrb[66].mxu1 }
 0xc30   :  { %v7240_v37 = vpop.f32.mrb[67].mxu1 }
 0xc31   :  { %v3646_v34 = vmul.f32 1.442695, %v3645_v62 }
 0xc33   :  { %5900 = vpow2.f32 %v3646_v34 }
 0xc35   :  { %v7230_v12 = vpop.eup %5898 }
 0xc36   :  { %v3746_v32 = vpop.xlane.xlu1 %3745  ;;  %v3546_v33 = vsel %vm1104_vm3, %v7230_v12, 0.0 }
 0xc37   :  { %v3747_v29 = vsub.f32 %v3738_v40, %v3746_v32  ;;  %3547 = vadd.xlane.f32.xlu1 %v3546_v33 }
 0xc39   :  { %v3748_v41 = vmul.f32 1.442695, %v3747_v29 }
 0xc3b   :  { %5902 = vpow2.f32 %v3748_v41 }
 0xc3d   :  { %v7234_v38 = vpop.eup %5900 }
 0xc3e   :  { %v3848_v44 = vpop.xlane.xlu0 %3847  ;;  %v3648_v22 = vsel %vm1104_vm3, %v7234_v38, 0.0 }
 0xc3f   :  { %v3849_v45 = vsub.f32 %v3840_v51, %v3848_v44  ;;  %3649 = vadd.xlane.f32.xlu0 %v3648_v22  ;;  %v3189_v22 = vadd.f32 %v7240_v37, %v2690_v58 }
 0xc41   :  { %v3850_v47 = vmul.f32 1.442695, %v3849_v45 }
 0xc43   :  { %5904 = vpow2.f32 %v3850_v47  ;;  %v3907_v47 = vpack.c.bf16 %v3189_v22, %v3189_v22 }
 0xc45   :  { %v7242_v39 = vpop.eup %5902 }
 0xc46   :  { %v3950_v36 = vpop.xlane.xlu1 %3949  ;;  %v3750_v7 = vsel %vm1104_vm3, %v7242_v39, 0.0 }
 0xc47   :  { %v3951_v40 = vsub.f32 %v3942_v50, %v3950_v36  ;;  %3751 = vadd.xlane.f32.xlu1 %v3750_v7  ;;  %v2686_v50 = vrot.slane %v7161_v9, %v283_v19 }
 0xc49   :  { %v3952_v42 = vmul.f32 1.442695, %v3951_v40  ;;  %v3183_v56 = vadd.f32 %v3182_v23, %v2686_v50  ;;  %v3187_v32 = vadd.f32 %v7238_v31, %v2686_v50  ;;  %v5796_v40 = vld [vmem:[%s7612_s8 + $0x40] sm:$0xff]  }
 0xc4a   :  { %5242 = vmatprep.subr.bf16.mxu0 %v5796_v40  ;;  %v5806_v50 = vld [vmem:[%s7612_s8 + $0x20] sm:$0xff]  }
 0xc4b   :  { %5906 = vpow2.f32 %v3952_v42  ;;  %v3397_v20 = vpack.c.bf16 %v3183_v56, %v3183_v56  ;;  %v3805_v29 = vpack.c.bf16 %v3187_v32, %v3187_v32  ;;  %v5797_v42 = vld [vmem:[%s7612_s8] sm:$0xff]   ;;  %v5810_v56 = vld [vmem:[%s7612_s8 + $0x28] sm:$0xff]  }
 0xc4c   :  { %5243 = vmatpush3.bf16.msra.mxu0 %v5797_v42 }
 0xc4d   :  { %v7246_v48 = vpop.eup %5904  ;;  %v3454_v59 = vsel %vm1120_vm1, %v3397_v20, 0  ;;  %v3862_v44 = vsel %vm1120_vm1, %v3805_v29, 0  ;;  %v5814_v20 = vld [vmem:[%s7612_s8 + $0x30] sm:$0xff]  }
 0xc4e   :  { %v3852_v49 = vsel %vm1104_vm3, %v7246_v48, 0.0 }
 0xc4f   :  { %3853 = vadd.xlane.f32.xlu0 %v3852_v49  ;;  %v5799_v49 = vld [vmem:[%s7612_s8 + $0x8] sm:$0xff]  }
 0xc55   :  { %v7250_v24 = vpop.eup %5906 }
 0xc56   :  { %v3954_v51 = vsel %vm1104_vm3, %v7250_v24, 0.0 }
 0xc57   :  { %3955 = vadd.xlane.f32.xlu1 %v3954_v51  ;;  %v5801_v51 = vld [vmem:[%s7612_s8 + $0x10] sm:$0xff]  }
 0xcac   :  { %v3242_v52 = vpop.xlane.xlu0 %3241 }
 0xcad   :  { %5908 = vrcp.f32 %v3242_v52  ;;  %v5802_v52 = vld [vmem:[%s7612_s8 + $0x58] sm:$0xff]  }
 0xcb4   :  { %v3344_v46 = vpop.xlane.xlu1 %3343 }
 0xcb5   :  { %5910 = vrcp.f32 %v3344_v46  ;;  %v5805_v46 = vld [vmem:[%s7612_s8 + $0xc0] sm:$0xff]  }
 0xcb7   :  { %v5909_v4 = vpop.eup %5908 }
 0xcb8   :  { %v3244_v25 = vmul.f32 %v5909_v4, %v5893_v61  ;;  %v3185_v61 = vadd.f32 %v3184_v15, %v2690_v58  ;;  %v5807_v4 = vld [vmem:[%s7612_s8 + $0x80] sm:$0xff]   ;;  %v5817_v58 = vld [vmem:[%s7612_s8 + $0xd8] sm:$0xff]  }
 0xcba   :  { %v3245_v57 = vpack.c.bf16 %v3244_v25, %v3244_v25  ;;  %v3499_v6 = vpack.c.bf16 %v3185_v61, %v3185_v61  ;;  %v5809_v25 = vld [vmem:[%s7612_s8 + $0xc8] sm:$0xff]   ;;  %v5820_v61 = vld [vmem:[%s7612_s8 + $0xe0] sm:$0xff]  }
 0xcbc   :  { %5418 = vmatmul.mubr.msk.bf16.vlgmr.msra.gmra.mrb[68].mxu1 %vm1104_vm3, %v3245_v57  ;;  %v3446_v13 = vpop.xlane.xlu0 %3445  ;;  %v3556_v26 = vsel %vm1120_vm1, %v3499_v6, 0  ;;  %v5811_v57 = vld [vmem:[%s7612_s8 + $0x88] sm:$0xff]   ;;  %v5824_v6 = vld [vmem:[%s7612_s8 + $0xf0] sm:$0xff]  }
 0xcbd   :  { %5428 = vmatpush3.bf16.msra.mxu1 %v3352_v43  ;;  %5912 = vrcp.f32 %v3446_v13  ;;  %5429 = vmatprep.mubr.msk.bf16.mxu1 %vm5985_vm0, %v5984_v3  ;;  %v5812_v43 = vld [vmem:[%s7612_s8 + $0x70] sm:$0xff]  }
 0xcbe   :  { %5439 = vmatprep.subr.bf16.mxu1 %v5984_v3  ;;  %v5813_v13 = vld [vmem:[%s7612_s8 + $0xd0] sm:$0xff]  }
 0xcbf   :  { %v5911_v11 = vpop.eup %5910 }
 0xcc0   :  { %v3346_v19 = vmul.f32 %v5911_v11, %v7222_v10  ;;  %v5815_v11 = vld [vmem:[%s7612_s8 + $0x90] sm:$0xff]  }
 0xcc2   :  { %v3347_v60 = vpack.c.bf16 %v3346_v19, %v3346_v19  ;;  %v5816_v19 = vld [vmem:[%s7612_s8 + $0x78] sm:$0xff]  }
 0xcc4   :  { %5430 = vmatmul.mubr.msk.bf16.vlgmr.msra.gmra.mrb[72].mxu1 %vm1104_vm3, %v3347_v60  ;;  %v3548_v63 = vpop.xlane.xlu1 %3547  ;;  %v5819_v60 = vld [vmem:[%s7612_s8 + $0x98] sm:$0xff]  }
 0xcc5   :  { %5914 = vrcp.f32 %v3548_v63  ;;  %5440 = vmatpush3.bf16.msra.mxu1 %v3454_v59  ;;  %5441 = vmatprep.mubr.msk.bf16.mxu1 %vm5985_vm0, %v5984_v3  ;;  %v5818_v59 = vld [vmem:[%s7612_s8 + $0x38] sm:$0xff]   ;;  %v5821_v63 = vld [vmem:[%s7612_s8 + $0xa0] sm:$0xff]  }
 0xcc6   :  { %5451 = vmatprep.subr.bf16.mxu1 %v5984_v3 }
 0xcc7   :  { %v5913_v0 = vpop.eup %5912 }
 0xcc8   :  { %v3448_v1 = vmul.f32 %v5913_v0, %v7226_v18  ;;  %v3146_v18 = vadd.f32 %v7209_v54, %v2682_v35  ;;  %v5803_v35 = vld [vmem:[%s7612_s8 + $0x18] sm:$0xff]   ;;  %v5822_v0 = vld [vmem:[%s7612_s8 + $0xe8] sm:$0xff]  }
 0xcca   :  { %v3449_v2 = vpack.c.bf16 %v3448_v1, %v3448_v1  ;;  %v3703_v62 = vpack.c.bf16 %v3146_v18, %v3146_v18  ;;  %v5823_v1 = vld [vmem:[%s7612_s8 + $0xa8] sm:$0xff]  }
 0xccc   :  { %v3650_v9 = vpop.xlane.xlu0 %3649  ;;  %5442 = vmatmul.mubr.msk.bf16.vlgmr.msra.gmra.mrb[76].mxu1 %vm1104_vm3, %v3449_v2  ;;  %v5825_v2 = vld [vmem:[%s7612_s8 + $0xb0] sm:$0xff]  }
 0xccd   :  { %5916 = vrcp.f32 %v3650_v9  ;;  %5452 = vmatpush3.bf16.msra.mxu1 %v3556_v26  ;;  %5453 = vmatprep.mubr.msk.bf16.mxu1 %vm5985_vm0, %v5984_v3  ;;  %v5826_v26 = vld [vmem:[%s7612_s8 + $0xf8] sm:$0xff]  }
 0xcce   :  { %5463 = vmatprep.subr.bf16.mxu1 %v5984_v3  ;;  %v5827_v9 = vld [vmem:[%s7612_s8 + $0xb8] sm:$0xff]  }
 0xccf   :  { %v5915_v10 = vpop.eup %5914 }
 0xcd0   :  { %v3550_v5 = vmul.f32 %v5915_v10, %v7230_v12  ;;  %v3760_v12 = vsel %vm1120_vm1, %v3703_v62, 0 }
 0xcd2   :  { %v3551_v16 = vpack.c.bf16 %v3550_v5, %v3550_v5 }
 0xcd4   :  { %5454 = vmatmul.mubr.msk.bf16.vlgmr.msra.gmra.mrb[80].mxu1 %vm1104_vm3, %v3551_v16  ;;  %v3752_v17 = vpop.xlane.xlu1 %3751 }
 0xcd5   :  { %5464 = vmatpush3.bf16.msra.mxu1 %v3658_v28  ;;  %5918 = vrcp.f32 %v3752_v17  ;;  %5465 = vmatprep.mubr.msk.bf16.mxu1 %vm5985_vm0, %v5984_v3 }
 0xcd6   :  { %5475 = vmatprep.subr.bf16.mxu1 %v5984_v3 }
 0xcd7   :  { %v5917_v30 = vpop.eup %5916 }
 0xcd8   :  { %v3652_v27 = vmul.f32 %v5917_v30, %v7234_v38 }
 0xcda   :  { %v3653_v34 = vpack.c.bf16 %v3652_v27, %v3652_v27 }
 0xcdc   :  { %v3854_v54 = vpop.xlane.xlu0 %3853  ;;  %5466 = vmatmul.mubr.msk.bf16.vlgmr.msra.gmra.mrb[84].mxu1 %vm1104_vm3, %v3653_v34 }
 0xcdd   :  { %5920 = vrcp.f32 %v3854_v54  ;;  %5476 = vmatpush3.bf16.msra.mxu1 %v3760_v12  ;;  %5477 = vmatprep.mubr.msk.bf16.mxu1 %vm5985_vm0, %v5984_v3 }
 0xcde   :  { %5487 = vmatprep.subr.bf16.mxu1 %v5984_v3 }
 0xcdf   :  { %v5919_v33 = vpop.eup %5918 }
 0xce0   :  { %v3754_v41 = vmul.f32 %v5919_v33, %v7242_v39  ;;  %v3964_v39 = vsel %vm1120_vm1, %v3907_v47, 0 }
 0xce2   :  { %v3755_v38 = vpack.c.bf16 %v3754_v41, %v3754_v41 }
 0xce4   :  { %5478 = vmatmul.mubr.msk.bf16.vlgmr.msra.gmra.mrb[88].mxu1 %vm1104_vm3, %v3755_v38  ;;  %v3956_v45 = vpop.xlane.xlu1 %3955 }
 0xce5   :  { %5488 = vmatpush3.bf16.msra.mxu1 %v3862_v44  ;;  %5922 = vrcp.f32 %v3956_v45  ;;  %5489 = vmatprep.mubr.msk.bf16.mxu1 %vm5985_vm0, %v5984_v3 }
 0xce6   :  { %5499 = vmatprep.subr.bf16.mxu1 %v5984_v3 }
 0xce7   :  { %v5921_v23 = vpop.eup %5920 }
 0xce8   :  { %v3856_v15 = vmul.f32 %v5921_v23, %v7246_v48  ;;  %v5798_v48 = vld [vmem:[%s7612_s8 + $0x48] sm:$0xff]  }
 0xce9   :  { %5244 = vmatprep.subr.bf16.mxu0 %v5798_v48 }
 0xcea   :  { %v3857_v31 = vpack.c.bf16 %v3856_v15, %v3856_v15  ;;  %5245 = vmatpush3.bf16.msra.mxu0 %v5799_v49 }
 0xcec   :  { %5490 = vmatmul.mubr.msk.bf16.vlgmr.msra.gmra.mrb[92].mxu1 %vm1104_vm3, %v3857_v31 }
 0xced   :  { %5500 = vmatpush3.bf16.msra.mxu1 %v3964_v39  ;;  %5501 = vmatprep.mubr.msk.bf16.mxu1 %vm5985_vm0, %v5984_v3 }
 0xcee   :  { %5264 = vmatprep.subr.bf16.mxu1 %v5805_v46 }
 0xcef   :  { %v5923_v37 = vpop.eup %5922 }
 0xcf0   :  { %v3958_v36 = vmul.f32 %v5923_v37, %v7250_v24  ;;  %v5800_v24 = vld [vmem:[%s7612_s8 + $0x50] sm:$0xff]  }
 0xcf1   :  { %5246 = vmatprep.subr.bf16.mxu0 %v5800_v24 }
 0xcf2   :  { %v3959_v7 = vpack.c.bf16 %v3958_v36, %v3958_v36  ;;  %5247 = vmatpush3.bf16.msra.mxu0 %v5801_v51 }
 0xcf3   :  { %5248 = vmatprep.subr.bf16.mxu0 %v5802_v52 }
 0xcf4   :  { %5502 = vmatmul.mubr.msk.bf16.vlgmr.msra.gmra.mrb[96].mxu1 %vm1104_vm3, %v3959_v7 }
 0xcf5   :  { %5265 = vmatpush3.bf16.msra.mxu1 %v5807_v4 }
 0xcf6   :  { %5249 = vmatpush3.bf16.msra.mxu0 %v5803_v35  ;;  %5266 = vmatprep.subr.bf16.mxu1 %v5809_v25  ;;  %v5070_v25 = vld [vmem:[%s7565_s11] ss:$0 sm:$0xff] }
 0xcf7   :  { %5250 = vmatprep.subr.bf16.mxu0 %v5804_v53 }
 0xcf9   :  { %5267 = vmatpush3.bf16.msra.mxu1 %v5811_v57 }
 0xcfa   :  { %5251 = vmatpush3.bf16.msra.mxu0 %v5806_v50  ;;  %5268 = vmatprep.subr.bf16.mxu1 %v5813_v13 }
 0xcfb   :  { %5252 = vmatprep.subr.bf16.mxu0 %v5808_v55 }
 0xcfd   :  { %5269 = vmatpush3.bf16.msra.mxu1 %v5815_v11 }
 0xcfe   :  { %5253 = vmatpush3.bf16.msra.mxu0 %v5810_v56  ;;  %5270 = vmatprep.subr.bf16.mxu1 %v5817_v58 }
 0xcff   :  { %5254 = vmatprep.subr.bf16.mxu0 %v5812_v43 }
 0xd01   :  { %5271 = vmatpush3.bf16.msra.mxu1 %v5819_v60 }
 0xd02   :  { %5255 = vmatpush3.bf16.msra.mxu0 %v5814_v20  ;;  %5272 = vmatprep.subr.bf16.mxu1 %v5820_v61 }
 0xd03   :  { %5256 = vmatprep.subr.bf16.mxu0 %v5816_v19 }
 0xd05   :  { %5273 = vmatpush3.bf16.msra.mxu1 %v5821_v63 }
 0xd06   :  { %5257 = vmatpush3.bf16.msra.mxu0 %v5818_v59  ;;  %5274 = vmatprep.subr.bf16.mxu1 %v5822_v0  ;;  %v5828_v0 = vld [vmem:[%s7566_s12] sm:$0xff]  }
 0xd07   :  { %5505 = vmatprep.subr.bf16.mxu0 %v5984_v3 }
 0xd09   :  { %5275 = vmatpush3.bf16.msra.mxu1 %v5823_v1 }
 0xd0a   :  { %5276 = vmatprep.subr.bf16.mxu1 %v5824_v6 }
 0xd0d   :  { %5277 = vmatpush3.bf16.msra.mxu1 %v5825_v2 }
 0xd0e   :  { %5278 = vmatprep.subr.bf16.mxu1 %v5826_v26 }
 0xd11   :  { %5279 = vmatpush3.bf16.msra.mxu1 %v5827_v9 }
 0xd12   :  { %5525 = vmatprep.subr.bf16.mxu1 %v5984_v3 }
 0xd8f   :  { %v3286_v10 = vpop.f32.mrb[68].mxu1 }
 0xd90   :  { %v5419_v8 = vpop.f32.mrb[69].mxu1 }
 0xd91   :  { %v3289_v5 = vpop.f32.mrb[70].mxu1  ;;  %v5829_v8 = vld [vmem:[%s7566_s12 + $0x8] sm:$0xff]  }
 0xd92   :  { %v5420_v16 = vpop.f32.mrb[71].mxu1  ;;  %v5830_v5 = vld [vmem:[%s7566_s12 + $0x10] sm:$0xff]  }
 0xd93   :  { %v5831_v16 = vld [vmem:[%s7566_s12 + $0x18] sm:$0xff]  }
 0xd97   :  { %v3388_v28 = vpop.f32.mrb[72].mxu1 }
 0xd98   :  { %v5431_v18 = vpop.f32.mrb[73].mxu1 }
 0xd99   :  { %v3391_v17 = vpop.f32.mrb[74].mxu1  ;;  %v5833_v18 = vld [vmem:[%s7566_s12 + $0x28] sm:$0xff]  }
 0xd9a   :  { %v5432_v30 = vpop.f32.mrb[75].mxu1  ;;  %v5834_v17 = vld [vmem:[%s7566_s12 + $0x30] sm:$0xff]  }
 0xd9b   :  { %v5835_v30 = vld [vmem:[%s7566_s12 + $0x38] sm:$0xff]  }
 0xd9f   :  { %v3490_v62 = vpop.f32.mrb[76].mxu1 }
 0xda0   :  { %v5443_v27 = vpop.f32.mrb[77].mxu1 }
 0xda1   :  { %v3493_v34 = vpop.f32.mrb[78].mxu1  ;;  %v5837_v27 = vld [vmem:[%s7568_s14 + $0x8] sm:$0xff]  }
 0xda2   :  { %v5444_v12 = vpop.f32.mrb[79].mxu1  ;;  %v5838_v34 = vld [vmem:[%s7568_s14 + $0x10] sm:$0xff]  }
 0xda3   :  { %v5839_v12 = vld [vmem:[%s7568_s14 + $0x18] sm:$0xff]  }
 0xda7   :  { %v3592_v32 = vpop.f32.mrb[80].mxu1 }
 0xda8   :  { %v5455_v54 = vpop.f32.mrb[81].mxu1 }
 0xda9   :  { %v3595_v33 = vpop.f32.mrb[82].mxu1  ;;  %v5841_v54 = vld [vmem:[%s7568_s14 + $0x28] sm:$0xff]  }
 0xdaa   :  { %v5456_v29 = vpop.f32.mrb[83].mxu1 }
 0xdaf   :  { %v3694_v41 = vpop.f32.mrb[84].mxu1 }
 0xdb0   :  { %v4015_v38 = vpack.c.bf16 %v3694_v41, %v3286_v10  ;;  %v5467_v44 = vpop.f32.mrb[85].mxu1 }
 0xdb1   :  { %v3697_v22 = vpop.f32.mrb[86].mxu1 }
 0xdb2   :  { %v5468_v45 = vpop.f32.mrb[87].mxu1 }
 0xdb7   :  { %v3796_v23 = vpop.f32.mrb[88].mxu1 }
 0xdb8   :  { %v4016_v47 = vpack.c.bf16 %v3796_v23, %v3388_v28  ;;  %v5479_v15 = vpop.f32.mrb[89].mxu1  ;;  %v5832_v28 = vld [vmem:[%s7566_s12 + $0x20] sm:$0xff]  }
 0xdb9   :  { %v3799_v31 = vpop.f32.mrb[90].mxu1 }
 0xdba   :  { %v5480_v39 = vpop.f32.mrb[91].mxu1  ;;  %4314 = vmatprep.mubr.bf16.mxu0 %v4016_v47 }
 0xdbb   :  { %4315 = vmatmul.mubr.bf16.vlgmr.msra.gmra.mrb[84].mxu0 %v4015_v38 }
 0xdbc   :  { %5521 = vmatprep.mubr.msk.bf16.mxu0 %vm5985_vm0, %v5984_v3  ;;  %5506 = vmatpush3.bf16.msra.mxu0 %v5828_v0 }
 0xdbd   :  { %5507 = vmatprep.subr.bf16.mxu0 %v5984_v3 }
 0xdbf   :  { %v3898_v37 = vpop.f32.mrb[92].mxu1 }
 0xdc0   :  { %v4017_v36 = vpack.c.bf16 %v3898_v37, %v3490_v62  ;;  %v5491_v7 = vpop.f32.mrb[93].mxu1  ;;  %5508 = vmatpush3.bf16.msra.mxu0 %v5829_v8  ;;  %v5836_v62 = vld [vmem:[%s7568_s14] sm:$0xff]  }
 0xdc1   :  { %v3901_v40 = vpop.f32.mrb[94].mxu1  ;;  %5509 = vmatprep.subr.bf16.mxu0 %v5984_v3 }
 0xdc2   :  { %v5492_v42 = vpop.f32.mrb[95].mxu1 }
 0xdc4   :  { %5510 = vmatpush3.bf16.msra.mxu0 %v5830_v5 }
 0xdc5   :  { %5511 = vmatprep.subr.bf16.mxu0 %v5984_v3 }
 0xdc7   :  { %v4000_v48 = vpop.f32.mrb[96].mxu1 }
 0xdc8   :  { %v4018_v49 = vpack.c.bf16 %v4000_v48, %v3592_v32  ;;  %v5503_v24 = vpop.f32.mrb[97].mxu1  ;;  %5512 = vmatpush3.bf16.msra.mxu0 %v5831_v16  ;;  %v5840_v32 = vld [vmem:[%s7568_s14 + $0x20] sm:$0xff]  }
 0xdc9   :  { %v4003_v51 = vpop.f32.mrb[98].mxu1  ;;  %5513 = vmatprep.subr.bf16.mxu0 %v5984_v3 }
 0xdca   :  { %v5504_v52 = vpop.f32.mrb[99].mxu1  ;;  %4355 = vmatprep.mubr.bf16.mxu1 %v4018_v49  ;;  %v5104_v49 = vld [vmem:[%s7575_s21] ss:$0 sm:$0xff] }
 0xdcb   :  { %4356 = vmatmul.mubr.bf16.vlgmr.msra.gmra.mrb[100].mxu1 %v4017_v36  ;;  %v5103_v36 = vld [vmem:[%s7574_s20] ss:$0 sm:$0xff] }
 0xdcc   :  { %5541 = vmatprep.mubr.msk.bf16.mxu1 %vm5985_vm0, %v5984_v3  ;;  %5514 = vmatpush3.bf16.msra.mxu0 %v5832_v28 }
 0xdcd   :  { %5515 = vmatprep.subr.bf16.mxu0 %v5984_v3  ;;  %5526 = vmatpush3.bf16.msra.mxu1 %v5836_v62  ;;  %v5849_v62 = vld [vmem:[%s7578_s24 + $0x28] sm:$0xff]  }
 0xdce   :  { %5527 = vmatprep.subr.bf16.mxu1 %v5984_v3 }
 0xdd0   :  { %5516 = vmatpush3.bf16.msra.mxu0 %v5833_v18  ;;  %v5846_v18 = vld [vmem:[%s7578_s24 + $0x10] sm:$0xff]  }
 0xdd1   :  { %5517 = vmatprep.subr.bf16.mxu0 %v5984_v3  ;;  %5528 = vmatpush3.bf16.msra.mxu1 %v5837_v27  ;;  %v5850_v27 = vld [vmem:[%s7578_s24 + $0x30] sm:$0xff]  }
 0xdd2   :  { %5529 = vmatprep.subr.bf16.mxu1 %v5984_v3 }
 0xdd4   :  { %5518 = vmatpush3.bf16.msra.mxu0 %v5834_v17  ;;  %v5847_v17 = vld [vmem:[%s7578_s24 + $0x18] sm:$0xff]  }
 0xdd5   :  { %5519 = vmatprep.subr.bf16.mxu0 %v5984_v3  ;;  %5530 = vmatpush3.bf16.msra.mxu1 %v5838_v34  ;;  %v5851_v34 = vld [vmem:[%s7578_s24 + $0x38] sm:$0xff]  }
 0xdd6   :  { %5531 = vmatprep.subr.bf16.mxu1 %v5984_v3 }
 0xdd8   :  { %5520 = vmatpush3.bf16.msra.mxu0 %v5835_v30  ;;  %v5848_v30 = vld [vmem:[%s7578_s24 + $0x20] sm:$0xff]  }
 0xdd9   :  { %5545 = vmatprep.subr.bf16.mxu0 %v5984_v3  ;;  %5532 = vmatpush3.bf16.msra.mxu1 %v5839_v12 }
 0xdda   :  { %5533 = vmatprep.subr.bf16.mxu1 %v5984_v3 }
 0xddd   :  { %5534 = vmatpush3.bf16.msra.mxu1 %v5840_v32 }
 0xdde   :  { %5535 = vmatprep.subr.bf16.mxu1 %v5984_v3 }
 0xde1   :  { %5536 = vmatpush3.bf16.msra.mxu1 %v5841_v54 }
 0xde2   :  { %5537 = vmatprep.subr.bf16.mxu1 %v5984_v3 }
 0xe8e   :  { %v5258_v35 = vpop.f32.mrb[84].mxu0 }
 0xe8f   :  { %v5259_v53 = vpop.f32.mrb[85].mxu0 }
 0xe90   :  { %v5260_v46 = vadd.f32 %v5259_v53, %v5258_v35  ;;  %v5261_v50 = vpop.f32.mrb[86].mxu0  ;;  %v5842_v53 = vld [vmem:[%s7568_s14 + $0x30] sm:$0xff]  }
 0xe91   :  { %v5262_v4 = vpop.f32.mrb[87].mxu0  ;;  %5538 = vmatpush3.bf16.msra.mxu1 %v5842_v53 }
 0xe92   :  { %v5263_v55 = vadd.f32 %v5262_v4, %v5261_v50  ;;  %v4317_v43 = vadd.f32 %v5260_v46, %v5070_v25  ;;  %5539 = vmatprep.subr.bf16.mxu1 %v5984_v3  ;;  %v5843_v46 = vld [vmem:[%s7568_s14 + $0x38] sm:$0xff]   ;;  %v5105_v50 = vld [vmem:[%s7567_s13] ss:$0 sm:$0xff] }
 0xe94   :  { %v4320_v19 = vadd.f32 %v5263_v55, %v5070_v25 }
 0xe95   :  { %5540 = vmatpush3.bf16.msra.mxu1 %v5843_v46 }
 0xe9e   :  { %v5280_v56 = vpop.f32.mrb[100].mxu1 }
 0xe9f   :  { %v5281_v57 = vpop.f32.mrb[101].mxu1 }
 0xea0   :  { %v5282_v13 = vadd.f32 %v5281_v57, %v5280_v56  ;;  %v5283_v20 = vpop.f32.mrb[102].mxu1 }
 0xea1   :  { %v5284_v11 = vpop.f32.mrb[103].mxu1 }
 0xea2   :  { %v4358_v58 = vadd.f32 %v5282_v13, %v4317_v43  ;;  %v5285_v59 = vadd.f32 %v5284_v11, %v5283_v20 }
 0xea4   :  { %v4361_v60 = vadd.f32 %v5285_v59, %v4320_v19  ;;  %v7417_v61 = vadd.f32 %v4358_v58, %v6805_v14  ;;  %v5114_v19 = vld [vmem:[%s7569_s15] ss:$0 sm:$0xff] }
 0xea6   :  { %4368 = vadd.xlane.f32.xlu0 %v7417_v61  ;;  %v7421_v63 = vadd.f32 %v4361_v60, %v6811_v21 }
 0xea8   :  { %4370 = vadd.xlane.f32.xlu1 %v7421_v63 }
 0xf33   :  { %v4369_v1 = vpop.xlane.xlu0 %4368 }
 0xf34   :  { %v4372_v6 = vmul.f32 0.03125, %v4369_v1 }
 0xf35   :  { %v4371_v2 = vpop.xlane.xlu1 %4370 }
 0xf36   :  { %v4374_v14 = vsub.f32 %v7417_v61, %v4372_v6  ;;  %v4373_v26 = vmul.f32 0.03125, %v4371_v2  ;;  %v4382_v33 = vmul.f32 %v4372_v6, %v4372_v6 }
 0xf38   :  { %v4375_v9 = vsub.f32 %v7421_v63, %v4373_v26  ;;  %v4376_v10 = vmul.f32 %v4374_v14, %v4374_v14  ;;  %v4383_v29 = vmul.f32 %v4373_v26, %v4373_v26  ;;  %v4384_v41 = vmul.f32 96.0, %v4382_v33  ;;  %v5844_v26 = vld [vmem:[%s7578_s24] sm:$0xff]  }
 0xf3a   :  { %4378 = vadd.xlane.f32.xlu0 %v4376_v10  ;;  %v4377_v21 = vmul.f32 %v4375_v9, %v4375_v9  ;;  %v4385_v22 = vmul.f32 96.0, %v4383_v29 }
 0xf3c   :  { %4380 = vadd.xlane.f32.xlu1 %v4377_v21 }
 0xfc7   :  { %v4379_v38 = vpop.xlane.xlu0 %4378 }
 0xfc8   :  { %v4386_v44 = vsub.f32 %v4379_v38, %v4384_v41 }
 0xfc9   :  { %v4381_v45 = vpop.xlane.xlu1 %4380 }
 0xfca   :  { %v4388_v23 = vmul.f32 0.03125, %v4386_v44  ;;  %v4387_v47 = vsub.f32 %v4381_v45, %v4385_v22 }
 0xfcc   :  { %v4390_v15 = vadd.f32 1e-05, %v4388_v23  ;;  %v4389_v31 = vmul.f32 0.03125, %v4387_v47 }
 0xfce   :  { %5924 = vrsqrt.f32 %v4390_v15  ;;  %v4391_v39 = vadd.f32 1e-05, %v4389_v31 }
 0xfd0   :  { %5926 = vrsqrt.f32 %v4391_v39 }
 0xfd8   :  { %v5925_v37 = vpop.eup %5924 }
 0xfd9   :  { %v4394_v7 = vmul.f32 %v5925_v37, %v4374_v14 }
 0xfda   :  { %v5927_v40 = vpop.eup %5926 }
 0xfdb   :  { %v4395_v42 = vmul.f32 %v5927_v40, %v4375_v9  ;;  %v4402_v48 = vmul.f32 %v5103_v36, %v4394_v7  ;;  %v5124_v7 = vld [vmem:[%s7577_s23] ss:$0 sm:$0xff] }
 0xfdd   :  { %v4403_v24 = vmul.f32 %v5103_v36, %v4395_v42  ;;  %v4410_v51 = vadd.f32 %v5104_v49, %v4402_v48 }
 0xfdf   :  { %v4411_v52 = vadd.f32 %v5104_v49, %v4403_v24  ;;  %v5125_v24 = vld [vmem:[#allocation4] ss:$0 sm:$0xff] }
 0xfe1   :  { %v4412_v35 = vpack.c.bf16 %v4411_v52, %v4410_v51 }
 0xfe3   :  { %5522 = vmatmul.mubr.bf16.vlgmr.msra.gmra.mrb[88].mxu0 %v4412_v35 }
 0xfe4   :  { %5561 = vmatprep.mubr.msk.bf16.mxu0 %vm5985_vm0, %v5984_v3  ;;  %5546 = vmatpush3.bf16.msra.mxu0 %v5844_v26 }
 0xfe5   :  { %5547 = vmatprep.subr.bf16.mxu0 %v5984_v3 }
0x10b6   :  { %v4518_v4 = vpop.f32.mrb[88].mxu0 }
0x10b7   :  { %v4519_v55 = vadd.f32 %v5105_v50, %v4518_v4  ;;  %v5523_v25 = vpop.f32.mrb[89].mxu0 }
0x10b8   :  { %v4521_v56 = vpop.f32.mrb[90].mxu0 }
0x10b9   :  { %v4522_v57 = vadd.f32 %v5105_v50, %v4521_v56  ;;  %v5524_v43 = vpop.f32.mrb[91].mxu0  ;;  %v4525_v13 = vmax.f32 %v4519_v55, 0.0 }
0x10bb   :  { %v4526_v20 = vmax.f32 %v4522_v57, 0.0 }
0x10bd   :  { %v4527_v11 = vpack.c.bf16 %v4526_v20, %v4525_v13 }
0x10bf   :  { %5542 = vmatmul.mubr.bf16.vlgmr.msra.gmra.mrb[104].mxu1 %v4527_v11 }
0x1192   :  { %v4633_v58 = vpop.f32.mrb[104].mxu1 }
0x1193   :  { %v4634_v59 = vadd.f32 %v5114_v19, %v4633_v58  ;;  %v5543_v60 = vpop.f32.mrb[105].mxu1 }
0x1194   :  { %v4636_v0 = vpop.f32.mrb[106].mxu1 }
0x1195   :  { %v4637_v1 = vadd.f32 %v5114_v19, %v4636_v0  ;;  %v5544_v6 = vpop.f32.mrb[107].mxu1  ;;  %v4640_v2 = vadd.f32 %v4634_v59, %v7417_v61 }
0x1197   :  { %4649 = vadd.xlane.f32.xlu0 %v4640_v2  ;;  %v4641_v14 = vadd.f32 %v4637_v1, %v7421_v63  ;;  %v5845_v63 = vld [vmem:[%s7578_s24 + $0x8] sm:$0xff]  }
0x1198   :  { %5548 = vmatpush3.bf16.msra.mxu0 %v5845_v63 }
0x1199   :  { %4651 = vadd.xlane.f32.xlu1 %v4641_v14  ;;  %5549 = vmatprep.subr.bf16.mxu0 %v5984_v3 }
0x119c   :  { %5550 = vmatpush3.bf16.msra.mxu0 %v5846_v18 }
0x119d   :  { %5551 = vmatprep.subr.bf16.mxu0 %v5984_v3 }
0x11a0   :  { %5552 = vmatpush3.bf16.msra.mxu0 %v5847_v17 }
0x11a1   :  { %5553 = vmatprep.subr.bf16.mxu0 %v5984_v3 }
0x11a4   :  { %5554 = vmatpush3.bf16.msra.mxu0 %v5848_v30 }
0x11a5   :  { %5555 = vmatprep.subr.bf16.mxu0 %v5984_v3 }
0x11a8   :  { %5556 = vmatpush3.bf16.msra.mxu0 %v5849_v62 }
0x11a9   :  { %5557 = vmatprep.subr.bf16.mxu0 %v5984_v3 }
0x11ac   :  { %5558 = vmatpush3.bf16.msra.mxu0 %v5850_v27 }
0x11ad   :  { %5559 = vmatprep.subr.bf16.mxu0 %v5984_v3  ;;  %v5123_v3 = vld [vmem:[%s7576_s22] ss:$0 sm:$0xff]  ;;  %s5956_s22 = scalar_lea.vmem %s4814_s10, 256 }
0x11ae   :  { %p5957_p8 = scmp.ne.s32.totalorder %s4814_s10, %s5956_s22  ;;  %p5962_p10 = scmp.lt.s32.totalorder %s5956_s22, %s5956_s22 }
0x11b0   :  { %5560 = vmatpush3.bf16.msra.mxu0 %v5851_v34  ;;  %p5963_p11 = por %p5962_p10, %p5961_p9 }
0x11b2   :  { %p5964_p12 = pnand %p5963_p11, %p5957_p8 }
0x1224   :  { %v4650_v9 = vpop.xlane.xlu0 %4649 }
0x1225   :  { %v4653_v10 = vmul.f32 0.03125, %v4650_v9 }
0x1226   :  { %v4652_v21 = vpop.xlane.xlu1 %4651 }
0x1227   :  { %v4655_v8 = vsub.f32 %v4640_v2, %v4653_v10  ;;  %v4654_v5 = vmul.f32 0.03125, %v4652_v21  ;;  %v4663_v12 = vmul.f32 %v4653_v10, %v4653_v10 }
0x1229   :  { %v4656_v16 = vsub.f32 %v4641_v14, %v4654_v5  ;;  %v4657_v28 = vmul.f32 %v4655_v8, %v4655_v8  ;;  %v4664_v32 = vmul.f32 %v4654_v5, %v4654_v5  ;;  %v4665_v54 = vmul.f32 96.0, %v4663_v12 }
0x122b   :  { %4659 = vadd.xlane.f32.xlu0 %v4657_v28  ;;  %v4658_v61 = vmul.f32 %v4656_v16, %v4656_v16  ;;  %v4666_v41 = vmul.f32 96.0, %v4664_v32 }
0x122d   :  { %4661 = vadd.xlane.f32.xlu1 %v4658_v61 }
0x12b8   :  { %v4660_v33 = vpop.xlane.xlu0 %4659 }
0x12b9   :  { %v4667_v29 = vsub.f32 %v4660_v33, %v4665_v54 }
0x12ba   :  { %v4662_v38 = vpop.xlane.xlu1 %4661 }
0x12bb   :  { %v4669_v44 = vmul.f32 0.03125, %v4667_v29  ;;  %v4668_v22 = vsub.f32 %v4662_v38, %v4666_v41 }
0x12bd   :  { %v4671_v45 = vadd.f32 1e-05, %v4669_v44  ;;  %v4670_v23 = vmul.f32 0.03125, %v4668_v22 }
0x12bf   :  { %5928 = vrsqrt.f32 %v4671_v45  ;;  %v4672_v47 = vadd.f32 1e-05, %v4670_v23 }
0x12c1   :  { %5930 = vrsqrt.f32 %v4672_v47 }
0x12c9   :  { %v5929_v15 = vpop.eup %5928 }
0x12ca   :  { %v4675_v31 = vmul.f32 %v5929_v15, %v4655_v8 }
0x12cb   :  { %v5931_v39 = vpop.eup %5930 }
0x12cc   :  { %v4676_v37 = vmul.f32 %v5931_v39, %v4656_v16  ;;  %v4683_v36 = vmul.f32 %v5123_v3, %v4675_v31 }
0x12ce   :  { %v4684_v40 = vmul.f32 %v5123_v3, %v4676_v37  ;;  %v4691_v42 = vadd.f32 %v5124_v7, %v4683_v36 }
0x12d0   :  { %v4692_v48 = vadd.f32 %v5124_v7, %v4684_v40 }
0x12d2   :  { %v4693_v49 = vpack.c.bf16 %v4692_v48, %v4691_v42 }
0x12d4   :  { %5562 = vmatmul.mubr.bf16.vlgmr.msra.gmra.mrb[92].mxu0 %v4693_v49 }
0x13a7   :  { %v4799_v51 = vpop.f32.mrb[92].mxu0 }
0x13a8   :  { %v4800_v52 = vadd.f32 %v5125_v24, %v4799_v51  ;;  %v5563_v35 = vpop.f32.mrb[93].mxu0 }
0x13a9   :  { %v4802_v53 = vpop.f32.mrb[94].mxu0 }
0x13aa   :  { %4806 = vst [vmem:[#allocation7] sm:$0xff] %v4800_v52  ;;  %v4803_v46 = vadd.f32 %v5125_v24, %v4802_v53  ;;  %v5564_v50 = vpop.f32.mrb[95].mxu0 }
0x13ac   :  { %4807 = vst [vmem:[#allocation7 + $0x8] sm:$0xff] %v4803_v46 }
0x13ad   :  { %5967 = shalt.err (!%p5964_p12)
}
0x13ae   :  { %s5968_s7 = scalar_lea.hbm %s7580_s26, 256 }
0x13af   :  { %p5969_p13 = scmp.ne.s32.totalorder %s7580_s26, %s5968_s7  ;;  %p5972_p0 = scmp.lt.u32.totalorder %s5968_s7, %s7580_s26 }
0x13b1   :  { %p5974_p1 = pnand %p5972_p0, %p5969_p13 }
0x13b3   :  { %5977 = shalt.err (!%p5974_p1)
}
0x13b4   :  { %s5987_s13 = smov 128   ;;  %s5988_s14 = smov 8  }
0x13b5   :  { %4819 = dma.vmem_to_hbm [thread:$0]  %s4814_s10, 256, %s7580_s26, [#allocation6], %s5987_s13, %s5987_s13, %s5988_s14  }
0x13b6   :  { %5980 = dma.done.wait [#allocation6], 256  }
0x13b7   :  { %5981 = vsyncadd [#allocation6], 4294967040 }
0x13b8   :  { %4823 = vsyncpa [#allocation5], 1 }
0x13b9   :  { %4824 = vsyncpa [#allocation6], 1 }

// kernel: transformer_forward.3
= control target key start
LH: loop header
LB: loop body
LE: loop exit
PB: predicated region body
PF: predicated region fallthrough
CT: control target
= control target key end

     0   :  { %12 = vsyncpa [#allocation3], 0  ;;  %s9241_s0 = inlined_call_operand.vmem [shape: f32[2,115,129], index: 0, kind: input, shape index: {}]   ;;  %s9242_s1 = inlined_call_operand.vmem [shape: bf16[11,129,128], index: 1, kind: input, shape index: {}]   ;;  %s9243_s2 = inlined_call_operand.vmem [shape: f32[1,128], index: 2, kind: input, shape index: {}]   ;;  %s9244_s3 = inlined_call_operand.hbm [shape: bf16[11,128,128], index: 3, kind: input, shape index: {}]   ;;  %s9245_s4 = inlined_call_operand.vmem [shape: f32[1,128], index: 4, kind: input, shape index: {}]   ;;  %s9246_s5 = inlined_call_operand.hbm [shape: bf16[11,128,128], index: 5, kind: input, shape index: {}]   ;;  %s9247_s6 = inlined_call_operand.vmem [shape: f32[1,128], index: 6, kind: input, shape index: {}]   ;;  %s9248_s7 = inlined_call_operand.vmem [shape: f32[2,8,128], index: 7, kind: output, shape index: {}]  }
   0x1   :  { %13 = vsyncpa [#allocation5], 0  ;;  %s7621_s24 = smov 0  }
   0x2 LB: > { %s7627_s25 = sadd.s32 4294967295, %s7572_s24   ;;  %p5802_p0 = scmp.ge.s32.totalorder %s7572_s24, 1  ;;  %s7572_s24 = sphi %s7621_s24, %s19_s24  }
   0x3   : > { %p202_p1 = scmp.lt.s32.totalorder %s7572_s24, 3  ;;  %s7574_s26 = smov [#allocation2]  }
   0x4   : > { %s220_s27 = sshll.u32 %s7574_s26, 4  ;;  %p9249_p3 = scmp.eq.s32.totalorder %s7627_s25, 0  ;;  %s221_s27 = int_to_ptr.vmem [resolvable:$true] %s220_s27 }
   0x5   : > { %p7631_p2 = pnand %p5802_p0, %p202_p1  ;;  %s7575_s29 = smov [#allocation4]  }
   0x6   : > { %s236_s30 = sshll.u32 %s7575_s29, 4  ;;  %s7502_s11 = scalar_lea.hbm %s9244_s3, 11264  ;;  %s7644_s30 = int_to_ptr.vmem [resolvable:$true] %s236_s30 }
   0x7   : > { %s9292_s28 = scalar_select %p7631_p2, 1, 0 }
   0x8   : > { %p7201_p4 = pneg %p7631_p2  ;;  %p7503_p6 = scmp.ne.s32.totalorder %s9244_s3, %s7502_s11 }
   0x9   : > { %p7509_p10 = scmp.lt.u32.totalorder %s7502_s11, %s9244_s3 }
   0xa   : > { %p7640_p5 = pnand %p9249_p3, %p7201_p4 }
   0xc   : > { %p7504_p7 = pneg %p7640_p5 }
   0xe   : > { %p7505_p8 = pnand %p7504_p7, %p7503_p6 }
  0x10   : > { %p7506_p9 = pneg %p7505_p8 }
  0x12   : > { %p7511_p11 = pnand %p7509_p10, %p7506_p9 }
  0x14   : > { %7514 = shalt.err (!%p7511_p11)
}
  0x15   : > { %s7515_s16 = scalar_lea.vmem %s221_s27, 11264  ;;  %p7523_p1 = scmp.lt.s32.totalorder %s221_s27, %s221_s27 }
  0x16   : > { %p7516_p12 = scmp.ne.s32.totalorder %s221_s27, %s7515_s16  ;;  %p7524_p4 = scmp.lt.s32.totalorder %s7515_s16, %s7515_s16 }
  0x18   : > { %p7518_p13 = pnand %p7516_p12, %p7504_p7  ;;  %p7525_p3 = por %p7524_p4, %p7523_p1 }
  0x1a   : > { %p7519_p0 = pneg %p7518_p13 }
  0x1c   : > { %p7526_p2 = pnand %p7525_p3, %p7519_p0 }
  0x1e   : > { %7529 = shalt.err (!%p7526_p2)
}
  0x1f   : > { %s7576_s17 = smov 64   ;;  %s7577_s18 = smov 4  }
  0x20   : > { %7204 = dma.hbm_to_vmem [thread:$0]  (!%p7640_p5), %s9244_s3, 11264, %s221_s27, [#allocation3], %s7576_s17, %s7576_s17, %s7577_s18  }
  0x21   : > { %s7530_s23 = scalar_lea.hbm %s9246_s5, 11264 }
  0x22   : > { %p7531_p6 = scmp.ne.s32.totalorder %s9246_s5, %s7530_s23  ;;  %p7537_p8 = scmp.lt.u32.totalorder %s7530_s23, %s9246_s5 }
  0x24   : > { %p7533_p2 = pnand %p7531_p6, %p7504_p7 }
  0x26   : > { %p7534_p3 = pneg %p7533_p2 }
  0x28   : > { %p7539_p9 = pnand %p7537_p8, %p7534_p3 }
  0x2a   : > { %7542 = shalt.err (!%p7539_p9)
}
  0x2b   : > { %s7543_s27 = scalar_lea.vmem %s7644_s30, 11264  ;;  %p7551_p13 = scmp.lt.s32.totalorder %s7644_s30, %s7644_s30 }
  0x2c   : > { %p7544_p10 = scmp.ne.s32.totalorder %s7644_s30, %s7543_s27  ;;  %p7552_p0 = scmp.lt.s32.totalorder %s7543_s27, %s7543_s27 }
  0x2e   : > { %p7546_p11 = pnand %p7544_p10, %p7504_p7  ;;  %p7553_p1 = por %p7552_p0, %p7551_p13 }
  0x30   : > { %p7547_p12 = pneg %p7546_p11 }
  0x32   : > { %p7554_p4 = pnand %p7553_p1, %p7547_p12 }
  0x34   : > { %7557 = shalt.err (!%p7554_p4)
}
  0x35   : > { %7207 = dma.hbm_to_vmem [thread:$0]  (!%p7640_p5), %s9246_s5, 11264, %s7644_s30, [#allocation5], %s7576_s17, %s7576_s17, %s7577_s18  }
  0x36   : > { %p9294_p6 = scmp.ne.s32.totalorder %s9292_s28, 0 }
  0x38   : > { %263 = sbr.rel (%p9294_p6) target bundleno = 1981 (0x7bd), region = 48 }
  0x3f   : > { %p9295_p2 = scmp.eq.s32.totalorder %s7627_s25, 0 }
  0x41   : > { %7563 = dma.done.wait (%p9295_p2), [#allocation3], 11264   ;;  %p9296_p7 = pmov %p9295_p2 }
  0x42   : > { %p9297_p3 = pmov %p9295_p2 }
  0x43   : > { %7565 = vsyncadd (%p9296_p7), [#allocation3], 4294956032 }
  0x44   : > { %7567 = dma.done.wait (%p9297_p3), [#allocation5], 11264   ;;  %p9298_p8 = pmov %p9295_p2 }
  0x45   : > { %p298_p9 = scmp.lt.s32.totalorder %s7627_s25, 1  ;;  %v338_v0 = vlaneseq  ;;  %v9251_v1 = vmov 0.0   ;;  %vm438_vm9 = vcmask 1042432   ;;  %v7229_v30 = vld [vmem:[%s9242_s1 + $0x4c] sm:$0xff]   ;;  %v7231_v33 = vld [vmem:[%s9242_s1 + $0x54] sm:$0xff]  }
  0x46   : > { %7569 = vsyncadd (%p9298_p8), [#allocation5], 4294956032  ;;  %509 = vmatprep.mubr.f32.mxu0 %v9251_v1  ;;  %646 = vmatprep.mubr.f32.mxu1 %v9251_v1 }
  0x47   : > { %s9429_s25 = smov (!%p298_p9, %s7627_s25), 1  ;;  %v339_v2 = vshrl.u32 %v338_v0, 7  ;;  %v7721_v12 = vand.u32 127, %v338_v0 }
  0x48   : > { %s7192_s28 = smul.u32 240, %s9429_s25  ;;  %s5810_s11 = sshll.u32 %s9429_s25, 3 }
  0x49   : > { %v349_v3 = vmul.u32 2, %v339_v2  ;;  %v340_v4 = vadd.s32 8, %v339_v2  ;;  %v341_v13 = vadd.s32 16, %v339_v2  ;;  %v7727_v22 = vadd.s32 24, %v339_v2  ;;  %s306_s30 = scalar_lea.vmem %s9248_s7, %s5810_s11 }
  0x4a   : > { %s7713_s13 = scalar_lea.vmem %s9241_s0, %s7192_s28  ;;  %v343_v27 = vadd.s32 32, %v339_v2  ;;  %v344_v36 = vadd.s32 40, %v339_v2  ;;  %v345_v37 = vadd.s32 48, %v339_v2  ;;  %v7745_v38 = vadd.s32 56, %v339_v2 }
  0x4b   : > { %v309_v5 = vld [vmem:[%s7713_s13 + $0x8] sm:$0xff]  ;;  %v311_v6 = vld [vmem:[%s7713_s13 + $0x18] sm:$0xff]  ;;  %v308_v7 = vld [vmem:[%s7713_s13] sm:$0xff]  ;;  %v5811_v19 = vadd.s32 4294967295, %v349_v3  ;;  %v350_v20 = vmul.u32 2, %v340_v4  ;;  %vm7735_vm1 = vcmp.eq.s32.totalorder %v7721_v12, %v349_v3  ;;  %v351_v32 = vmul.u32 2, %v341_v13 }
  0x4c   : > { %v7104_v8 = vpack.c.bf16 %v311_v6, %v309_v5  ;;  %v310_v9 = vld [vmem:[%s7713_s13 + $0x10] sm:$0xff]  ;;  %v313_v10 = vld [vmem:[%s7713_s13 + $0x28] sm:$0xff]  ;;  %v315_v11 = vld [vmem:[%s7713_s13 + $0x38] sm:$0xff]  ;;  %v352_v34 = vmul.u32 2, %v7727_v22  ;;  %v7757_v43 = vsel %vm7735_vm1, 1.0, %v9251_v1  ;;  %v353_v44 = vmul.u32 2, %v343_v27 }
  0x4d   : > { %v7106_v14 = vpack.c.bf16 %v310_v9, %v308_v7  ;;  %v7108_v15 = vpack.c.bf16 %v315_v11, %v313_v10  ;;  %v312_v16 = vld [vmem:[%s7713_s13 + $0x20] sm:$0xff]  ;;  %v314_v17 = vld [vmem:[%s7713_s13 + $0x30] sm:$0xff]  ;;  %v317_v18 = vld [vmem:[%s7713_s13 + $0x48] sm:$0xff]  ;;  %vm365_vm0 = vcmp.eq.s32.totalorder %v7721_v12, %v5811_v19  ;;  %v5812_v31 = vadd.s32 4294967295, %v350_v20  ;;  %9304 = vst [vmem:[#allocation9_spill] sm:$0xff] %v7757_v43 }
  0x4e   : > { %7105 = vmatprep.subr.bf16.mxu0 %v7104_v8  ;;  %7133 = vmatprep.subr.bf16.mxu1 %v7104_v8  ;;  %v319_v21 = vld [vmem:[%s7713_s13 + $0x58] sm:$0xff]  ;;  %v7110_v23 = vpack.c.bf16 %v314_v17, %v312_v16  ;;  %v316_v25 = vld [vmem:[%s7713_s13 + $0x40] sm:$0xff]  ;;  %v318_v26 = vld [vmem:[%s7713_s13 + $0x50] sm:$0xff]  ;;  %vm7740_vm2 = vcmp.eq.s32.totalorder %v7721_v12, %v350_v20  ;;  %v7752_v42 = vsel %vm365_vm0, 1.0, %v9251_v1  ;;  %v5813_v48 = vadd.s32 4294967295, %v351_v32 }
  0x4f   : > { %7107 = vmatpush1.bf16.msra.mxu0 %v7106_v14  ;;  %7135 = vmatpush1.bf16.msra.mxu1 %v7106_v14  ;;  %v7112_v24 = vpack.c.bf16 %v319_v21, %v317_v18  ;;  %v321_v28 = vld [vmem:[%s7713_s13 + $0x68] sm:$0xff]  ;;  %v323_v29 = vld [vmem:[%s7713_s13 + $0x78] sm:$0xff]  ;;  %v7114_v35 = vpack.c.bf16 %v318_v26, %v316_v25  ;;  %v320_v40 = vld [vmem:[%s7713_s13 + $0x60] sm:$0xff]  ;;  %9303 = vst [vmem:[#allocation8_spill] sm:$0xff] %v7752_v42  ;;  %v7765_v47 = vsel %vm7740_vm2, 1.0, %v9251_v1  ;;  %v5814_v50 = vadd.s32 4294967295, %v352_v34 }
  0x50   : > { %7109 = vmatprep.subr.bf16.mxu0 %v7108_v15  ;;  %7137 = vmatprep.subr.bf16.mxu1 %v7108_v15  ;;  %v7116_v39 = vpack.c.bf16 %v323_v29, %v321_v28  ;;  %v322_v41 = vld [vmem:[%s7713_s13 + $0x70] sm:$0xff]  ;;  %v325_v45 = vld [vmem:[%s7713_s13 + $0x88] sm:$0xff]  ;;  %v327_v46 = vld [vmem:[%s7713_s13 + $0x98] sm:$0xff]  ;;  %vm366_vm3 = vcmp.eq.s32.totalorder %v7721_v12, %v5812_v31  ;;  %9305 = vst [vmem:[#allocation10_spill] sm:$0xff] %v7765_v47  ;;  %v354_v53 = vmul.u32 2, %v344_v36  ;;  %v5815_v61 = vadd.s32 4294967295, %v353_v44 }
  0x51   : > { %vm391_vm4 = vcmp.eq.s32.totalorder %v7721_v12, %v351_v32  ;;  %v324_v49 = vld [vmem:[%s7713_s13 + $0x80] sm:$0xff]  ;;  %v7118_v51 = vpack.c.bf16 %v322_v41, %v320_v40  ;;  %v326_v52 = vld [vmem:[%s7713_s13 + $0x90] sm:$0xff]  ;;  %v7120_v54 = vpack.c.bf16 %v327_v46, %v325_v45  ;;  %v329_v55 = vld [vmem:[%s7713_s13 + $0xa8] sm:$0xff]  ;;  %v7775_v57 = vsel %vm366_vm3, 1.0, %v9251_v1 }
  0x52   : > { %v331_v56 = vld [vmem:[%s7713_s13 + $0xb8] sm:$0xff]  ;;  %9306 = vst [vmem:[#allocation11_spill] sm:$0xff] %v7775_v57  ;;  %v7778_v58 = vsel %vm391_vm4, 1.0, %v9251_v1  ;;  %v328_v59 = vld [vmem:[%s7713_s13 + $0xa0] sm:$0xff]  ;;  %v330_v60 = vld [vmem:[%s7713_s13 + $0xb0] sm:$0xff]  ;;  %vm367_vm5 = vcmp.eq.s32.totalorder %v7721_v12, %v5813_v48  ;;  %v355_v62 = vmul.u32 2, %v345_v37  ;;  %v7122_v0 = vpack.c.bf16 %v326_v52, %v324_v49 }
  0x53   : > { %7111 = vmatpush1.bf16.msra.mxu0 %v7110_v23  ;;  %7139 = vmatpush1.bf16.msra.mxu1 %v7110_v23  ;;  %9307 = vst [vmem:[#allocation12_spill] sm:$0xff] %v7778_v58  ;;  %v356_v63 = vmul.u32 2, %v7745_v38  ;;  %v333_v2 = vld [vmem:[%s7713_s13 + $0xc8] sm:$0xff]  ;;  %vm368_vm6 = vcmp.eq.s32.totalorder %v7721_v12, %v5814_v50  ;;  %vm392_vm7 = vcmp.eq.s32.totalorder %v7721_v12, %v352_v34  ;;  %v5816_v3 = vadd.s32 4294967295, %v354_v53  ;;  %v335_v7 = vld [vmem:[%s7713_s13 + $0xd8] sm:$0xff]  ;;  %v332_v10 = vld [vmem:[%s7713_s13 + $0xc0] sm:$0xff] }
  0x54   : > { %7113 = vmatprep.subr.bf16.mxu0 %v7112_v24  ;;  %7141 = vmatprep.subr.bf16.mxu1 %v7112_v24  ;;  %v7124_v4 = vpack.c.bf16 %v331_v56, %v329_v55  ;;  %vm393_vm8 = vcmp.eq.s32.totalorder %v7721_v12, %v353_v44  ;;  %v5817_v5 = vadd.s32 4294967295, %v355_v62  ;;  %v7792_v8 = vsel %vm367_vm5, 1.0, %v9251_v1  ;;  %v334_v18 = vld [vmem:[%s7713_s13 + $0xd0] sm:$0xff]  ;;  %v337_v24 = vld [vmem:[%s7713_s13 + $0xe8] sm:$0x7]  ;;  %v7228_v29 = vld [vmem:[%s9242_s1] sm:$0xff]  }
  0x55   : > { %v5818_v6 = vadd.s32 4294967295, %v356_v63  ;;  %9308 = vst [vmem:[#allocation13_spill] sm:$0xff] %v7792_v8  ;;  %vm369_vm10 = vcmp.eq.s32.totalorder %v7721_v12, %v5815_v61  ;;  %v7126_v9 = vpack.c.bf16 %v330_v60, %v328_v59  ;;  %v7797_v11 = vsel %vm392_vm7, 1.0, %v9251_v1  ;;  %v336_v27 = vld [vmem:[%s7713_s13 + $0xe0] sm:$0x7]  ;;  %v7227_v28 = vld [vmem:[%s9242_s1 + $0x44] sm:$0xff]  }
  0x56   : > { %9309 = vst [vmem:[#allocation14_spill] sm:$0xff] %v7797_v11  ;;  %vm7800_vm11 = vcmp.eq.s32.totalorder %v7721_v12, %v354_v53  ;;  %vm7805_vm12 = vcmp.eq.s32.totalorder %v7721_v12, %v355_v62  ;;  %v7812_v15 = vsel %vm368_vm6, 1.0, %v9251_v1  ;;  %v7815_v16 = vsel %vm393_vm8, 1.0, %v9251_v1  ;;  %v7230_v31 = vld [vmem:[%s9242_s1 + $0x8] sm:$0xff]   ;;  %v7232_v34 = vld [vmem:[%s9242_s1 + $0x10] sm:$0xff]   ;;  %v7234_v36 = vld [vmem:[%s9242_s1 + $0x18] sm:$0xff]  }
  0x57   : > { %7115 = vmatpush1.bf16.msra.mxu0 %v7114_v35  ;;  %7143 = vmatpush1.bf16.msra.mxu1 %v7114_v35  ;;  %9314 = vst [vmem:[#allocation15_spill] sm:$0xff] %v7812_v15  ;;  %vm370_vm13 = vcmp.eq.s32.totalorder %v7721_v12, %v5816_v3  ;;  %vm396_vm14 = vcmp.eq.s32.totalorder %v7721_v12, %v356_v63  ;;  %v7823_v19 = vsel %vm369_vm10, 1.0, %v9251_v1  ;;  %vm413_vm1 = vcmask 941056   ;;  %v7233_v35 = vld [vmem:[%s9242_s1 + $0x5c] sm:$0xff]   ;;  %v7235_v37 = vld [vmem:[%s9242_s1 + $0x64] sm:$0xff]   ;;  %v7239_v41 = vld [vmem:[%s9242_s1 + $0x74] sm:$0xff]  }
  0x58   : > { %7117 = vmatprep.subr.bf16.mxu0 %v7116_v39  ;;  %7145 = vmatprep.subr.bf16.mxu1 %v7116_v39  ;;  %v7128_v17 = vpack.c.bf16 %v335_v7, %v333_v2  ;;  %vm371_vm15 = vcmp.eq.s32.totalorder %v7721_v12, %v5817_v5  ;;  %vm372_vm0 = vcmp.eq.s32.totalorder %v7721_v12, %v5818_v6  ;;  %v7830_v20 = vsel %vm7800_vm11, 1.0, %v9251_v1  ;;  %v7236_v38 = vld [vmem:[%s9242_s1 + $0x20] sm:$0xff]   ;;  %v7237_v39 = vld [vmem:[%s9242_s1 + $0x6c] sm:$0xff]   ;;  %v7242_v46 = vld [vmem:[%s9242_s1 + $0x38] sm:$0xff]  }
  0x59   : > { %v7835_v21 = vsel %vm7805_vm12, 1.0, %v9251_v1  ;;  %v7838_v22 = vsel %vm370_vm13, 1.0, %v9251_v1  ;;  %v7841_v23 = vsel %vm396_vm14, 1.0, %v9251_v1  ;;  %v7130_v12 = vpack.c.bf16 %v334_v18, %v332_v10  ;;  %v7238_v40 = vld [vmem:[%s9242_s1 + $0x28] sm:$0xff]   ;;  %v7240_v44 = vld [vmem:[%s9242_s1 + $0x30] sm:$0xff]   ;;  %v7241_v45 = vld [vmem:[%s9242_s1 + $0x7c] sm:$0xff]  }
  0x5a   : > { %v7845_v25 = vsel %vm371_vm15, 1.0, %v9251_v1  ;;  %v7848_v26 = vsel %vm372_vm0, 1.0, %v9251_v1  ;;  %v9260_v32 = vmov 0   ;;  %v7243_v48 = vld [vmem:[%s9242_s1 + $0x84] ss:$0 sps:$4 sm:$0x11]  }
  0x5b   : > { %7119 = vmatpush1.bf16.msra.mxu0 %v7118_v51  ;;  %7147 = vmatpush1.bf16.msra.mxu1 %v7118_v51  ;;  %vm810_vm2 = vcmask 1040384   ;;  %v7244_v50 = vld [vmem:[%s9242_s1 + $0x40] ss:$0 sps:$4 sm:$0x11]   ;;  %vm797_vm3 = vcmask 7168   ;;  %v7245_v6 = vld [vmem:[%s9242_s1 + $0x88] sm:$0xff]  }
  0x5c   : > { %7121 = vmatprep.subr.bf16.mxu0 %v7120_v54  ;;  %7149 = vmatprep.subr.bf16.mxu1 %v7120_v54  ;;  %v7971_v49 = vsel %vm810_vm2, 65535, %v9260_v32  ;;  %v7983_v61 = vld [vmem:[%s9242_s1 + $0xc8] ss:$0 sps:$4 sm:$0x11]   ;;  %v7246_v7 = vld [vmem:[%s9242_s1 + $0xcc] sm:$0xff]   ;;  %vm1471_vm5 = vcmask 1046528  }
  0x5d   : > { %9315 = vst [vmem:[#allocation16_spill] sm:$0xff] %v7971_v49  ;;  %v814_v51 = vand.u32 %v7243_v48, %v7971_v49  ;;  %v944_v52 = vand.u32 %v7244_v50, %v7971_v49  ;;  %v7992_v3 = vld [vmem:[%s9242_s1 + $0x10c] ss:$0 sps:$4 sm:$0x11]   ;;  %vm1028_vm4 = vsmask.f32 7424 }
  0x5e   : > { %vm1828_vm6 = vsmask.f32 6400  ;;  %vm2231_vm7 = vcmask 1045504   ;;  %vm2580_vm8 = vsmask.f32 5376  ;;  %vm4347_vm10 = vcmask 187392  }
  0x5f   : > { %7123 = vmatpush1.bf16.msra.mxu0 %v7122_v0  ;;  %7151 = vmatpush1.bf16.msra.mxu1 %v7122_v0  ;;  %vm7580_vm11 = vmmov 0  }
  0x60   : > { %7125 = vmatprep.subr.bf16.mxu0 %v7124_v4  ;;  %7153 = vmatprep.subr.bf16.mxu1 %v7124_v4 }
  0x63   : > { %7127 = vmatpush1.bf16.msra.mxu0 %v7126_v9  ;;  %7155 = vmatpush1.bf16.msra.mxu1 %v7126_v9 }
  0x64   : > { %7129 = vmatprep.subr.bf16.mxu0 %v7128_v17  ;;  %7157 = vmatprep.subr.bf16.mxu1 %v7128_v17 }
  0x67   : > { %7131 = vmatpush1.bf16.msra.mxu0 %v7130_v12  ;;  %7159 = vmatpush1.bf16.msra.mxu1 %v7130_v12 }
  0x68   : > { %5835 = vmatprep.subr.msk.mxu0 %vm438_vm9, %v337_v24  ;;  %5845 = vmatprep.subr.msk.mxu1 %vm438_vm9, %v337_v24 }
  0x6b   : > { %5836 = vmatpush1.msk.msra.mxu0 %vm438_vm9, %v336_v27  ;;  %5846 = vmatpush1.msk.msra.mxu1 %vm438_vm9, %v336_v27  ;;  %v7248_v27 = vld [vmem:[%s9242_s1 + $0xd4] sm:$0xff]   ;;  %vm2773_vm9 = vcmask 441344  }
  0x6c   : > { %5837 = vmatmul.mubr.msk.f32.vlgmr.msra.gmra.mrb[0].mxu0 %vm413_vm1, %v7752_v42  ;;  %5847 = vmatmul.mubr.msk.f32.vlgmr.msra.gmra.mrb[0].mxu1 %vm413_vm1, %v7757_v43 }
  0x6d   : > { %515 = vmatprep.mubr.f32.mxu0 %v9251_v1  ;;  %652 = vmatprep.mubr.f32.mxu1 %v9251_v1 }
  0x6e   : > { %816 = vmatprep.subr.bf16.mxu0 %v9260_v32  ;;  %946 = vmatprep.subr.bf16.mxu1 %v9260_v32 }
  0x6f   : > { %817 = vmatpush1.bf16.msra.mxu0 %v7227_v28  ;;  %947 = vmatpush1.bf16.msra.mxu1 %v7228_v29 }
  0x70   : > { %5838 = vmatmul.mubr.msk.f32.gmra.mrb[2].mxu0 %vm413_vm1, %v7775_v57  ;;  %5848 = vmatmul.mubr.msk.f32.gmra.mrb[2].mxu1 %vm413_vm1, %v7765_v47 }
  0x71   : > { %521 = vmatprep.mubr.f32.mxu0 %v9251_v1  ;;  %658 = vmatprep.mubr.f32.mxu1 %v9251_v1 }
  0x72   : > { %818 = vmatprep.subr.bf16.mxu0 %v9260_v32  ;;  %948 = vmatprep.subr.bf16.mxu1 %v9260_v32 }
  0x73   : > { %819 = vmatpush1.bf16.msra.mxu0 %v7229_v30  ;;  %949 = vmatpush1.bf16.msra.mxu1 %v7230_v31 }
  0x74   : > { %5839 = vmatmul.mubr.msk.f32.gmra.mrb[4].mxu0 %vm413_vm1, %v7792_v8  ;;  %5849 = vmatmul.mubr.msk.f32.gmra.mrb[4].mxu1 %vm413_vm1, %v7778_v58 }
  0x75   : > { %527 = vmatprep.mubr.f32.mxu0 %v9251_v1  ;;  %664 = vmatprep.mubr.f32.mxu1 %v9251_v1 }
  0x76   : > { %820 = vmatprep.subr.bf16.mxu0 %v9260_v32  ;;  %950 = vmatprep.subr.bf16.mxu1 %v9260_v32 }
  0x77   : > { %821 = vmatpush1.bf16.msra.mxu0 %v7231_v33  ;;  %951 = vmatpush1.bf16.msra.mxu1 %v7232_v34 }
  0x78   : > { %5840 = vmatmul.mubr.msk.f32.gmra.mrb[6].mxu0 %vm413_vm1, %v7812_v15  ;;  %5850 = vmatmul.mubr.msk.f32.gmra.mrb[6].mxu1 %vm413_vm1, %v7797_v11 }
  0x79   : > { %533 = vmatprep.mubr.f32.mxu0 %v9251_v1  ;;  %670 = vmatprep.mubr.f32.mxu1 %v9251_v1 }
  0x7a   : > { %822 = vmatprep.subr.bf16.mxu0 %v9260_v32  ;;  %952 = vmatprep.subr.bf16.mxu1 %v9260_v32 }
  0x7b   : > { %823 = vmatpush1.bf16.msra.mxu0 %v7233_v35  ;;  %953 = vmatpush1.bf16.msra.mxu1 %v7234_v36 }
  0x7c   : > { %5841 = vmatmul.mubr.msk.f32.gmra.mrb[8].mxu0 %vm413_vm1, %v7823_v19  ;;  %5851 = vmatmul.mubr.msk.f32.gmra.mrb[8].mxu1 %vm413_vm1, %v7815_v16 }
  0x7d   : > { %539 = vmatprep.mubr.f32.mxu0 %v9251_v1  ;;  %676 = vmatprep.mubr.f32.mxu1 %v9251_v1 }
  0x7e   : > { %824 = vmatprep.subr.bf16.mxu0 %v9260_v32  ;;  %954 = vmatprep.subr.bf16.mxu1 %v9260_v32 }
  0x7f   : > { %825 = vmatpush1.bf16.msra.mxu0 %v7235_v37  ;;  %955 = vmatpush1.bf16.msra.mxu1 %v7236_v38 }
  0x80   : > { %5842 = vmatmul.mubr.msk.f32.gmra.mrb[10].mxu0 %vm413_vm1, %v7838_v22  ;;  %5852 = vmatmul.mubr.msk.f32.gmra.mrb[10].mxu1 %vm413_vm1, %v7830_v20 }
  0x81   : > { %682 = vmatprep.mubr.f32.mxu1 %v9251_v1  ;;  %545 = vmatprep.mubr.f32.mxu0 %v9251_v1 }
  0x82   : > { %826 = vmatprep.subr.bf16.mxu0 %v9260_v32  ;;  %956 = vmatprep.subr.bf16.mxu1 %v9260_v32 }
  0x83   : > { %827 = vmatpush1.bf16.msra.mxu0 %v7237_v39  ;;  %957 = vmatpush1.bf16.msra.mxu1 %v7238_v40 }
  0x84   : > { %5853 = vmatmul.mubr.msk.f32.gmra.mrb[12].mxu1 %vm413_vm1, %v7835_v21  ;;  %5843 = vmatmul.mubr.msk.f32.gmra.mrb[12].mxu0 %vm413_vm1, %v7845_v25 }
  0x85   : > { %688 = vmatprep.mubr.f32.mxu1 %v9251_v1  ;;  %551 = vmatprep.mubr.f32.mxu0 %v9251_v1 }
  0x86   : > { %828 = vmatprep.subr.bf16.mxu0 %v9260_v32  ;;  %958 = vmatprep.subr.bf16.mxu1 %v9260_v32 }
  0x87   : > { %829 = vmatpush1.bf16.msra.mxu0 %v7239_v41  ;;  %959 = vmatpush1.bf16.msra.mxu1 %v7240_v44 }
  0x88   : > { %5854 = vmatmul.mubr.msk.f32.gmra.mrb[14].mxu1 %vm413_vm1, %v7841_v23  ;;  %5844 = vmatmul.mubr.msk.f32.gmra.mrb[14].mxu0 %vm413_vm1, %v7848_v26  ;;  %v7247_v26 = vld [vmem:[%s9242_s1 + $0x90] sm:$0xff]  }
  0x89   : > { %830 = vmatprep.subr.bf16.mxu0 %v9260_v32  ;;  %960 = vmatprep.subr.bf16.mxu1 %v9260_v32 }
  0x8b   : > { %831 = vmatpush1.bf16.msra.mxu0 %v7241_v45  ;;  %961 = vmatpush1.bf16.msra.mxu1 %v7242_v46 }
  0x8c   : > { %832 = vmatprep.subr.bf16.mxu0 %v9260_v32  ;;  %962 = vmatprep.subr.bf16.mxu1 %v9260_v32 }
  0x8f   : > { %833 = vmatpush1.bf16.msra.mxu0 %v814_v51  ;;  %963 = vmatpush1.bf16.msra.mxu1 %v944_v52 }
  0x90   : > { %1157 = vmatprep.subr.bf16.mxu0 %v9260_v32  ;;  %1374 = vmatprep.subr.bf16.mxu1 %v9260_v32 }
 0x13f   : > { %v648_v53 = vpop.f32.mrb[0].mxu1  ;;  %v511_v54 = vpop.f32.mrb[0].mxu0 }
 0x140   : > { %v650_v55 = vpop.f32.mrb[1].mxu1  ;;  %v513_v56 = vpop.f32.mrb[1].mxu0 }
 0x143   : > { %v517_v59 = vpop.f32.mrb[2].mxu0  ;;  %v654_v60 = vpop.f32.mrb[2].mxu1 }
 0x144   : > { %v7985_v62 = vpack.c.bf16 %v517_v59, %v511_v54  ;;  %v7987_v63 = vpack.c.bf16 %v654_v60, %v648_v53  ;;  %v519_v0 = vpop.f32.mrb[3].mxu0  ;;  %v656_v2 = vpop.f32.mrb[3].mxu1 }
 0x145   : > { %v7994_v4 = vpack.c.bf16 %v519_v0, %v513_v56  ;;  %v7996_v5 = vpack.c.bf16 %v656_v2, %v650_v55  ;;  %v7249_v55 = vld [vmem:[%s9242_s1 + $0x98] sm:$0xff]  }
 0x146   : > { %v8005_v9 = vshrl.u32 %v7985_v62, 16  ;;  %v8008_v10 = vshll.u32 %v7985_v62, 16  ;;  %v9254_v13 = vshll.u32 %v7987_v63, 16  ;;  %v9255_v29 = vshrl.u32 %v7987_v63, 16  ;;  %v7250_v56 = vld [vmem:[%s9242_s1 + $0xdc] sm:$0xff]  }
 0x147   : > { %9316 = vst [vmem:[#allocation17_spill] sm:$0xff] %v7994_v4  ;;  %9317 = vst [vmem:[#allocation18_spill] sm:$0xff] %v7996_v5  ;;  %v8012_v14 = vshll.u32 %v7994_v4, 16  ;;  %5881 = vmatprep.mubr.msk.bf16.mxu0 %vm797_vm3, %v7996_v5  ;;  %5894 = vmatprep.mubr.msk.bf16.mxu1 %vm797_vm3, %v7994_v4  ;;  %v523_v16 = vpop.f32.mrb[4].mxu0  ;;  %v660_v17 = vpop.f32.mrb[4].mxu1  ;;  %v8019_v18 = vshrl.u32 %v7994_v4, 16 }
 0x148   : > { %v1258_v19 = vshrl.u32 %v7996_v5, 16  ;;  %v1260_v20 = vshll.u32 %v7996_v5, 16  ;;  %849 = vmatmul.mubr.bf16.vlgmr.msra.gmra.mrb[16].mxu0 %v7987_v63  ;;  %979 = vmatmul.mubr.bf16.vlgmr.msra.gmra.mrb[16].mxu1 %v7985_v62  ;;  %v525_v21 = vpop.f32.mrb[5].mxu0  ;;  %v662_v22 = vpop.f32.mrb[5].mxu1  ;;  %v1034_v24 = vrot.slane %v8008_v10, 1  ;;  %v1251_v25 = vrot.slane %v9254_v13, 1 }
 0x149   : > { %9318 = vst [vmem:[#allocation19_spill] sm:$0xff] %v8012_v14  ;;  %9319 = vst [vmem:[#allocation20_spill] sm:$0xff] %v8019_v18  ;;  %1158 = vmatpush1.bf16.msra.mxu0 %v7245_v6  ;;  %1375 = vmatpush1.bf16.msra.mxu1 %v7246_v7  ;;  %v1045_v28 = vrot.slane %v8012_v14, 1  ;;  %v1475_v30 = vrot.slane %v7994_v4, 1  ;;  %v1656_v31 = vrot.slane %v7996_v5, 1  ;;  %v1836_v35 = vrot.slane %v8019_v18, 1 }
 0x14a   : > { %1159 = vmatprep.subr.bf16.mxu0 %v9260_v32  ;;  %1376 = vmatprep.subr.bf16.mxu1 %v9260_v32  ;;  %v1262_v33 = vrot.slane %v1260_v20, 1  ;;  %v1837_v36 = vrot.slane %v8012_v14, 2  ;;  %v1035_v39 = vor.u32 %v1034_v24, %v8005_v9  ;;  %v1252_v40 = vor.u32 %v1251_v25, %v9255_v29 }
 0x14b   : > { %v529_v37 = vpop.f32.mrb[6].mxu0  ;;  %v666_v38 = vpop.f32.mrb[6].mxu1  ;;  %v8050_v41 = vrot.slane %v1258_v19, 1  ;;  %v8052_v44 = vrot.slane %v1260_v20, 2  ;;  %v1046_v51 = vor.u32 %v1045_v28, %v8019_v18 }
 0x14c   : > { %v8054_v45 = vpack.c.bf16 %v529_v37, %v523_v16  ;;  %v8056_v46 = vpack.c.bf16 %v666_v38, %v660_v17  ;;  %v531_v48 = vpop.f32.mrb[7].mxu0  ;;  %v668_v50 = vpop.f32.mrb[7].mxu1  ;;  %v8059_v52 = vor.u32 %v1837_v36, %v1836_v35  ;;  %v1263_v2 = vor.u32 %v1262_v33, %v1258_v19  ;;  %v7251_v35 = vld [vmem:[%s9242_s1 + $0xa0] sm:$0xff]  }
 0x14d   : > { %v8061_v53 = vpack.c.bf16 %v531_v48, %v525_v21  ;;  %v8063_v54 = vpack.c.bf16 %v668_v50, %v662_v22  ;;  %1160 = vmatpush1.bf16.msra.mxu0 %v7247_v26  ;;  %1377 = vmatpush1.bf16.msra.mxu1 %v7248_v27  ;;  %v7252_v36 = vld [vmem:[%s9242_s1 + $0xe4] sm:$0xff]  }
 0x14e   : > { %v8075_v0 = vshll.u32 %v8054_v45, 16  ;;  %1161 = vmatprep.subr.bf16.mxu0 %v9260_v32  ;;  %1378 = vmatprep.subr.bf16.mxu1 %v9260_v32  ;;  %v9253_v6 = vshll.u32 %v8056_v46, 16  ;;  %v1268_v7 = vshrl.u32 %v8056_v46, 16  ;;  %v8097_v28 = vshrl.u32 %v8054_v45, 16 }
 0x14f   : > { %5882 = vmatprep.mubr.msk.bf16.mxu0 %vm797_vm3, %v8063_v54  ;;  %5895 = vmatprep.mubr.msk.bf16.mxu1 %vm797_vm3, %v8061_v53  ;;  %v535_v16 = vpop.f32.mrb[8].mxu0  ;;  %v672_v17 = vpop.f32.mrb[8].mxu1  ;;  %v8086_v20 = vshll.u32 %v8061_v53, 16  ;;  %v9256_v21 = vshll.u32 %v8063_v54, 16  ;;  %v9259_v33 = vrot.slane %v8061_v53, 1  ;;  %v8110_v48 = vshrl.u32 %v8061_v53, 16 }
 0x150   : > { %857 = vmatmul.mubr.bf16.gmra.mrb[20].mxu0 %v8056_v46  ;;  %987 = vmatmul.mubr.bf16.gmra.mrb[20].mxu1 %v8054_v45  ;;  %v537_v24 = vpop.f32.mrb[9].mxu0  ;;  %v674_v25 = vpop.f32.mrb[9].mxu1  ;;  %v1039_v26 = vrot.slane %v8075_v0, 1  ;;  %v1256_v27 = vrot.slane %v9253_v6, 1  ;;  %v9258_v50 = vrot.slane %v8063_v54, 1  ;;  %v9257_v1 = vshrl.u32 %v8063_v54, 16 }
 0x151   : > { %1162 = vmatpush1.bf16.msra.mxu0 %v7249_v55  ;;  %1379 = vmatpush1.bf16.msra.mxu1 %v7250_v56  ;;  %v1049_v37 = vrot.slane %v8086_v20, 1  ;;  %v1266_v38 = vrot.slane %v9256_v21, 1  ;;  %v8122_v60 = vrot.slane %v1268_v7, 1 }
 0x152   : > { %1163 = vmatprep.subr.bf16.mxu0 %v9260_v32  ;;  %1380 = vmatprep.subr.bf16.mxu1 %v9260_v32  ;;  %v8116_v55 = vsel %vm1028_vm4, %v1035_v39, %v1039_v26  ;;  %v8119_v56 = vsel %vm1028_vm4, %v1252_v40, %v1256_v27  ;;  %v1053_v22 = vor.u32 %v8097_v28, %v1039_v26  ;;  %v7255_v39 = vld [vmem:[%s9242_s1 + $0xb0] sm:$0xff]  }
 0x153   : > { %v541_v6 = vpop.f32.mrb[10].mxu0  ;;  %v678_v13 = vpop.f32.mrb[10].mxu1  ;;  %v8125_v29 = vsel %vm1028_vm4, %v1046_v51, %v1049_v37  ;;  %v8128_v19 = vsel %vm1028_vm4, %v1263_v2, %v1266_v38  ;;  %v1061_v59 = vor.u32 %v8110_v48, %v1049_v37  ;;  %v8142_v51 = vsel %vm1471_vm5, %v1475_v30, %v9259_v33 }
 0x154   : > { %v8132_v21 = vpack.c.bf16 %v541_v6, %v535_v16  ;;  %v8134_v40 = vpack.c.bf16 %v678_v13, %v672_v17  ;;  %v543_v12 = vpop.f32.mrb[11].mxu0  ;;  %v680_v23 = vpop.f32.mrb[11].mxu1  ;;  %9320 = vst [vmem:[#allocation21_spill] sm:$0xff] %v8142_v51  ;;  %v7253_v13 = vld [vmem:[%s9242_s1 + $0xa8] sm:$0xff]   ;;  %v8159_v30 = vsel %vm1471_vm5, %v1656_v31, %v9258_v50  ;;  %v1270_v17 = vor.u32 %v1268_v7, %v1256_v27 }
 0x155   : > { %v8144_v2 = vpack.c.bf16 %v543_v12, %v537_v24  ;;  %v8146_v26 = vpack.c.bf16 %v680_v23, %v674_v25  ;;  %1164 = vmatpush1.bf16.msra.mxu0 %v7251_v35  ;;  %1381 = vmatpush1.bf16.msra.mxu1 %v7252_v36  ;;  %v7254_v6 = vld [vmem:[%s9242_s1 + $0xec] sm:$0xff]   ;;  %9321 = vst [vmem:[#allocation22_spill] sm:$0xff] %v8159_v30  ;;  %v9326_v23 = vmov 0  }
 0x156   : > { %1165 = vmatprep.subr.bf16.mxu0 %v9260_v32  ;;  %1382 = vmatprep.subr.bf16.mxu1 %v9260_v32  ;;  %v1278_v12 = vor.u32 %v9257_v1, %v1266_v38  ;;  %v8167_v16 = vshll.u32 %v8132_v21, 16  ;;  %v9262_v24 = vshll.u32 %v8134_v40, 16  ;;  %v8179_v37 = vshrl.u32 %v8132_v21, 16  ;;  %v7256_v32 = vld [vmem:[%s9242_s1 + $0xf4] sm:$0xff]  }
 0x157   : > { %v684_v25 = vpop.f32.mrb[12].mxu1  ;;  %5883 = vmatprep.mubr.msk.bf16.mxu0 %vm797_vm3, %v8146_v26  ;;  %5896 = vmatprep.mubr.msk.bf16.mxu1 %vm797_vm3, %v8144_v2  ;;  %v547_v31 = vpop.f32.mrb[12].mxu0  ;;  %v8175_v35 = vshll.u32 %v8144_v2, 16  ;;  %v8215_v58 = vshrl.u32 %v8144_v2, 16 }
 0x158   : > { %9322 = vst [vmem:[#allocation23_spill] sm:$0xff] %v8167_v16  ;;  %9323 = vst [vmem:[#allocation24_spill] sm:$0xff] %v8179_v37  ;;  %v686_v27 = vpop.f32.mrb[13].mxu1  ;;  %865 = vmatmul.mubr.bf16.gmra.mrb[24].mxu0 %v8134_v40  ;;  %995 = vmatmul.mubr.bf16.gmra.mrb[24].mxu1 %v8132_v21  ;;  %v8184_v38 = vpack.c.bf16 %v547_v31, %v547_v31  ;;  %v549_v1 = vpop.f32.mrb[13].mxu0  ;;  %v1057_v50 = vrot.slane %v8167_v16, 1  ;;  %v8189_v33 = vrot.slane %v9262_v24, 1 }
 0x159   : > { %v8192_v34 = vpack.c.bf16 %v686_v27, %v686_v27  ;;  %1166 = vmatpush1.bf16.msra.mxu0 %v7253_v13  ;;  %1383 = vmatpush1.bf16.msra.mxu1 %v7254_v6  ;;  %v8194_v7 = vpack.c.bf16 %v549_v1, %v549_v1  ;;  %v1064_v36 = vrot.slane %v8175_v35, 1  ;;  %v9325_v24 = vshll.u32 %v8146_v26, 16  ;;  %9329 = vst [vmem:[#allocation28_spill] sm:$0xff] %v8215_v58 }
 0x15a   : > { %1167 = vmatprep.subr.bf16.mxu0 %v9326_v23  ;;  %1384 = vmatprep.subr.bf16.mxu1 %v9326_v23  ;;  %v8208_v13 = vsel %vm1028_vm4, %v1053_v22, %v1057_v50  ;;  %v8212_v6 = vsel %vm1028_vm4, %v1270_v17, %v8189_v33  ;;  %v1070_v8 = vshll.u32 %v8184_v38, 16  ;;  %v8230_v57 = vpack.c.bf16 %v684_v25, %v684_v25 }
 0x15b   : > { %9324 = vst [vmem:[#allocation25_spill] sm:$0xff] %v8192_v34  ;;  %v1281_v11 = vrot.slane %v9325_v24, 1  ;;  %9327 = vst [vmem:[#allocation26_spill] sm:$0xff] %v8208_v13  ;;  %v690_v43 = vpop.f32.mrb[14].mxu1  ;;  %5884 = vmatprep.mubr.msk.bf16.mxu0 %vm797_vm3, %v8192_v34  ;;  %5897 = vmatprep.mubr.msk.bf16.mxu1 %vm797_vm3, %v8194_v7  ;;  %v553_v24 = vpop.f32.mrb[14].mxu0  ;;  %v8223_v22 = vsel %vm1028_vm4, %v1061_v59, %v1064_v36  ;;  %v1077_v17 = vshll.u32 %v8194_v7, 16 }
 0x15c   : > { %9328 = vst [vmem:[#allocation27_spill] sm:$0xff] %v8212_v6  ;;  %v8232_v47 = vpack.c.bf16 %v690_v43, %v684_v25  ;;  %v692_v42 = vpop.f32.mrb[15].mxu1  ;;  %v8234_v30 = vpack.c.bf16 %v553_v24, %v547_v31  ;;  %v555_v51 = vpop.f32.mrb[15].mxu0  ;;  %v1068_v14 = vor.u32 %v8179_v37, %v1057_v50  ;;  %v7257_v59 = vld [vmem:[%s9242_s1 + $0xb8] sm:$0xff]   ;;  %v1076_v25 = vor.u32 %v8215_v58, %v1064_v36 }
 0x15d   : > { %v8226_v15 = vsel %vm1028_vm4, %v1278_v12, %v1281_v11  ;;  %v8237_v18 = vpack.c.bf16 %v692_v42, %v686_v27  ;;  %1168 = vmatpush1.bf16.msra.mxu0 %v7255_v39  ;;  %1385 = vmatpush1.bf16.msra.mxu1 %v7256_v32  ;;  %v7258_v12 = vld [vmem:[%s9242_s1 + $0xfc] sm:$0xff]   ;;  %v8245_v43 = vpack.c.bf16 %v555_v51, %v549_v1  ;;  %v1294_v31 = vshll.u32 %v8192_v34, 16 }
 0x15e   : > { %9330 = vst [vmem:[#allocation29_spill] sm:$0xff] %v8232_v47  ;;  %v2053_v50 = vshrl.u32 %v8232_v47, 16  ;;  %v2056_v42 = vshll.u32 %v8232_v47, 16  ;;  %1169 = vmatprep.subr.bf16.mxu0 %v9326_v23  ;;  %1386 = vmatprep.subr.bf16.mxu1 %v9326_v23  ;;  %v1852_v32 = vshrl.u32 %v8234_v30, 16  ;;  %v8254_v39 = vrot.slane %v1077_v17, 1 }
 0x15f   : > { %v2062_v27 = vshrl.u32 %v8237_v18, 16  ;;  %v2065_v1 = vshll.u32 %v8237_v18, 16  ;;  %v1855_v51 = vshll.u32 %v8234_v30, 16  ;;  %v8259_v36 = vrot.slane %v1070_v8, 1  ;;  %v7259_v8 = vld [vmem:[%s9242_s1 + $0xc0] sm:$0xff]  }
 0x160   : > { %v8261_v24 = vrot.slane %v2053_v50, 1  ;;  %873 = vmatmul.mubr.bf16.gmra.mrb[28].mxu0 %v8230_v57  ;;  %1003 = vmatmul.mubr.bf16.gmra.mrb[28].mxu1 %v8184_v38  ;;  %v9331_v17 = vshrl.u32 %v8146_v26, 16  ;;  %v8269_v13 = vrot.slane %v2056_v42, 2  ;;  %v7260_v50 = vld [vmem:[%s9242_s1 + $0x104] sm:$0xff]   ;;  %v8277_v5 = vrot.slane %v1852_v32, 1 }
 0x161   : > { %v2064_v16 = vrot.slane %v2062_v27, 1  ;;  %v2067_v37 = vrot.slane %v2065_v1, 2  ;;  %1170 = vmatpush1.bf16.msra.mxu0 %v7257_v59  ;;  %1387 = vmatpush1.bf16.msra.mxu1 %v7258_v12  ;;  %v1861_v12 = vshrl.u32 %v8245_v43, 16  ;;  %v1864_v42 = vshll.u32 %v8245_v43, 16 }
 0x162   : > { %v1293_v6 = vor.u32 %v9331_v17, %v1281_v11  ;;  %5924 = vmatprep.mubr.msk.bf16.mxu0 %vm797_vm3, %v8125_v29  ;;  %5954 = vmatprep.mubr.msk.bf16.mxu1 %vm797_vm3, %v8128_v19  ;;  %v8283_v11 = vrot.slane %v1855_v51, 2  ;;  %v8290_v27 = vrot.slane %v1852_v32, 2  ;;  %v8294_v29 = vsel %vm1028_vm4, %v1076_v25, %v8254_v39 }
 0x163   : > { %1171 = vmatprep.subr.bf16.mxu0 %v9326_v23  ;;  %1388 = vmatprep.subr.bf16.mxu1 %v9326_v23  ;;  %v1296_v1 = vrot.slane %v1294_v31, 1  ;;  %v8298_v19 = vsel %vm1028_vm4, %v1068_v14, %v8259_v36  ;;  %v8300_v17 = vor.u32 %v2067_v37, %v2064_v16  ;;  %v8302_v59 = vrot.slane %v1855_v51, 3 }
 0x164   : > { %9332 = vst [vmem:[#allocation30_spill] sm:$0xff] %v8290_v27  ;;  %v8304_v4 = vrot.slane %v1861_v12, 1  ;;  %v8307_v32 = vrot.slane %v1864_v42, 2  ;;  %v1287_v31 = vshll.u32 %v8230_v57, 16  ;;  %v1301_v14 = vshrl.u32 %v8192_v34, 16 }
 0x165   : > { %9333 = vst [vmem:[#allocation31_spill] sm:$0xff] %v8302_v59  ;;  %1172 = vmatpush1.bf16.msra.mxu0 %v7259_v8  ;;  %1389 = vmatpush1.bf16.msra.mxu1 %v7260_v50  ;;  %v8310_v25 = vsel %vm1028_vm4, %v1293_v6, %v1296_v1  ;;  %v8316_v16 = vrot.slane %v1861_v12, 2  ;;  %v8318_v37 = vrot.slane %v1864_v42, 3  ;;  %v9336_v51 = vshrl.u32 %v8134_v40, 16 }
 0x166   : > { %1173 = vmatprep.subr.bf16.mxu0 %v9326_v23  ;;  %1390 = vmatprep.subr.bf16.mxu1 %v9326_v23  ;;  %v9337_v6 = vrot.slane %v8054_v45, 1  ;;  %v9338_v50 = vrot.slane %v7985_v62, 1  ;;  %v8330_v59 = vrot.slane %v1287_v31, 1  ;;  %v9341_v12 = vrot.slane %v8056_v46, 1 }
 0x167   : > { %9334 = vst [vmem:[#allocation32_spill] sm:$0xff] %v8316_v16  ;;  %9335 = vst [vmem:[#allocation33_spill] sm:$0xff] %v8318_v37  ;;  %v1285_v8 = vor.u32 %v9336_v51, %v8189_v33  ;;  %v9342_v42 = vrot.slane %v7987_v63, 1  ;;  %v1480_v33 = vrot.slane %v8144_v2, 1  ;;  %v1478_v31 = vrot.slane %v8132_v21, 1 }
 0x168   : > { %v8328_v47 = vsel %vm1471_vm5, %v9338_v50, %v9337_v6  ;;  %9340 = vst [vmem:[#allocation35_spill] sm:$0xff] %v8330_v59  ;;  %v1661_v6 = vrot.slane %v8146_v26, 1  ;;  %v9344_v50 = vand.u32 %v7983_v61, %v7971_v49  ;;  %v9345_v27 = vand.u32 %v7992_v3, %v7971_v49  ;;  %v7263_v61 = vld [vmem:[%s9242_s1 + $0x110] sm:$0xff]  }
 0x169   : > { %9339 = vst [vmem:[#allocation34_spill] sm:$0xff] %v8328_v47  ;;  %v8338_v37 = vsel %vm1471_vm5, %v9342_v42, %v9341_v12  ;;  %v8353_v12 = vsel %vm1028_vm4, %v1285_v8, %v8330_v59  ;;  %v8355_v42 = vor.u32 %v1301_v14, %v1296_v1  ;;  %v9346_v16 = vrot.slane %v8061_v53, 1  ;;  %v7264_v3 = vld [vmem:[%s9242_s1 + $0x154] sm:$0xff]  }
 0x16a   : > { %9343 = vst [vmem:[#allocation36_spill] sm:$0xff] %v8338_v37  ;;  %1174 = vmatpush1.bf16.msra.mxu0 %v9344_v50  ;;  %1391 = vmatpush1.bf16.msra.mxu1 %v9345_v27  ;;  %v1659_v37 = vrot.slane %v8134_v40, 1  ;;  %v9348_v27 = vrot.slane %v8063_v54, 1  ;;  %v9350_v14 = vrot.slane %v8054_v45, 1  ;;  %v9289_v8 = vrot.slane %v8194_v7, 1 }
 0x16b   : > { %v8360_v51 = vsel %vm1471_vm5, %v9346_v16, %v1480_v33  ;;  %1556 = vmatprep.subr.bf16.mxu0 %v9326_v23  ;;  %1737 = vmatprep.subr.bf16.mxu1 %v9326_v23  ;;  %v9288_v50 = vrot.slane %v8192_v34, 1  ;;  %v9356_v49 = vshrl.u32 %v8063_v54, 16  ;;  %v9357_v59 = vshll.u32 %v8063_v54, 16 }
 0x16c   : > { %9347 = vst [vmem:[#allocation37_spill] sm:$0xff] %v8360_v51  ;;  %v8374_v1 = vsel %vm1471_vm5, %v9348_v27, %v1661_v6  ;;  %v8379_v16 = vsel %vm1471_vm5, %v9350_v14, %v1478_v31  ;;  %v9352_v51 = vrot.slane %v8056_v46, 1  ;;  %v1840_v27 = vrot.slane %v8086_v20, 2 }
 0x16d   : > { %9349 = vst [vmem:[#allocation38_spill] sm:$0xff] %v8374_v1  ;;  %9351 = vst [vmem:[#allocation39_spill] sm:$0xff] %v8379_v16  ;;  %1190 = vmatmul.mubr.bf16.vlgmr.msra.gmra.mrb[32].mxu0 %v8116_v55  ;;  %1407 = vmatmul.mubr.bf16.vlgmr.msra.gmra.mrb[32].mxu1 %v8119_v56  ;;  %v8396_v14 = vsel %vm1471_vm5, %v1480_v33, %v9289_v8  ;;  %v2041_v16 = vrot.slane %v9357_v59, 2  ;;  %v9358_v55 = vrot.slane %v8184_v38, 1  ;;  %v9360_v33 = vrot.slane %v8230_v57, 1  ;;  %v9372_v1 = vld [vmem:[#allocation24_spill] sm:$0xff] }
 0x16e   : > { %v8386_v47 = vsel %vm1471_vm5, %v9352_v51, %v1659_v37  ;;  %9354 = vst [vmem:[#allocation41_spill] sm:$0xff] %v8396_v14  ;;  %v8401_v51 = vsel %vm1471_vm5, %v1661_v6, %v9288_v50  ;;  %5925 = vmatprep.mubr.msk.bf16.mxu0 %vm797_vm3, %v8223_v22  ;;  %5955 = vmatprep.mubr.msk.bf16.mxu1 %vm797_vm3, %v8226_v15  ;;  %v1832_v59 = vrot.slane %v8097_v28, 1  ;;  %v7265_v15 = vld [vmem:[%s9242_s1 + $0x118] sm:$0xff]   ;;  %v9368_v8 = vshll.u32 %v8056_v46, 16 }
 0x16f   : > { %9353 = vst [vmem:[#allocation40_spill] sm:$0xff] %v8386_v47  ;;  %9355 = vst [vmem:[#allocation42_spill] sm:$0xff] %v8401_v51  ;;  %v2040_v47 = vrot.slane %v9356_v49, 1  ;;  %v8414_v56 = vsel %vm1471_vm5, %v1478_v31, %v9358_v55  ;;  %v8419_v6 = vsel %vm1471_vm5, %v1659_v37, %v9360_v33  ;;  %v9362_v49 = vrot.slane %v8110_v48, 1  ;;  %1557 = vmatpush1.bf16.msra.mxu0 %v7263_v61  ;;  %v7266_v22 = vld [vmem:[%s9242_s1 + $0x15c] sm:$0xff]  }
 0x170   : > { %9359 = vst [vmem:[#allocation43_spill] sm:$0xff] %v8414_v56  ;;  %9361 = vst [vmem:[#allocation44_spill] sm:$0xff] %v8419_v6  ;;  %1738 = vmatpush1.bf16.msra.mxu1 %v7264_v3  ;;  %v9363_v55 = vrot.slane %v8005_v9, 1  ;;  %v9364_v37 = vrot.slane %v8008_v10, 2  ;;  %1558 = vmatprep.subr.bf16.mxu0 %v9326_v23  ;;  %v1848_v56 = vrot.slane %v8175_v35, 2  ;;  %v9371_v14 = vshll.u32 %v8146_v26, 16 }
 0x171   : > { %v1841_v50 = vor.u32 %v1840_v27, %v9362_v49  ;;  %v2042_v31 = vor.u32 %v2041_v16, %v2040_v47  ;;  %v1833_v27 = vrot.slane %v8075_v0, 2  ;;  %v9365_v49 = vshrl.u32 %v7987_v63, 16  ;;  %1739 = vmatprep.subr.bf16.mxu1 %v9326_v23 }
 0x172   : > { %v1831_v33 = vor.u32 %v9364_v37, %v9363_v55  ;;  %v9367_v47 = vshll.u32 %v7987_v63, 16  ;;  %v2034_v55 = vrot.slane %v9368_v8, 2  ;;  %v1847_v37 = vrot.slane %v8215_v58, 1 }
 0x173   : > { %v2030_v61 = vrot.slane %v9365_v49, 1  ;;  %v8441_v3 = vsel %vm1828_vm6, %v8059_v52, %v1841_v50  ;;  %v9369_v49 = vor.u32 %v8052_v44, %v8050_v41  ;;  %v1834_v6 = vor.u32 %v1833_v27, %v1832_v59  ;;  %1559 = vmatpush1.bf16.msra.mxu0 %v7265_v15  ;;  %v7267_v41 = vld [vmem:[%s9242_s1 + $0x120] sm:$0xff]  }
 0x174   : > { %9366 = vst [vmem:[#allocation45_spill] sm:$0xff] %v8441_v3  ;;  %v2031_v16 = vrot.slane %v9367_v47, 2  ;;  %v9370_v52 = vshrl.u32 %v8146_v26, 16  ;;  %v2035_v47 = vor.u32 %v2034_v55, %v8122_v60  ;;  %v2049_v8 = vrot.slane %v9371_v14, 2  ;;  %1740 = vmatpush1.bf16.msra.mxu1 %v7266_v22  ;;  %v7268_v44 = vld [vmem:[%s9242_s1 + $0x164] sm:$0xff]   ;;  %v9373_v60 = vld [vmem:[#allocation23_spill] sm:$0xff]  ;;  %1560 = vmatprep.subr.bf16.mxu0 %v9326_v23 }
 0x175   : > { %v8452_v34 = vsel %vm1828_vm6, %v9369_v49, %v2042_v31  ;;  %v1843_v58 = vrot.slane %v9372_v1, 1  ;;  %v8468_v59 = vsel %vm1828_vm6, %v1831_v33, %v1834_v6  ;;  %v1849_v27 = vor.u32 %v1848_v56, %v1847_v37  ;;  %1741 = vmatprep.subr.bf16.mxu1 %v9326_v23  ;;  %v9376_v56 = vld [vmem:[#allocation26_spill] sm:$0xff]  ;;  %v9377_v37 = vld [vmem:[#allocation27_spill] sm:$0xff] }
 0x176   : > { %v2048_v3 = vrot.slane %v9370_v52, 1  ;;  %v2032_v51 = vor.u32 %v2031_v16, %v2030_v61  ;;  %v1844_v61 = vrot.slane %v9373_v60, 2  ;;  %v9374_v14 = vshrl.u32 %v8134_v40, 16  ;;  %1198 = vmatmul.mubr.bf16.gmra.mrb[36].mxu0 %v9376_v56  ;;  %1415 = vmatmul.mubr.bf16.gmra.mrb[36].mxu1 %v9377_v37 }
 0x177   : > { %v9375_v55 = vshll.u32 %v8134_v40, 16  ;;  %v8482_v33 = vor.u32 %v8307_v32, %v8304_v4  ;;  %v8487_v52 = vsel %vm1828_vm6, %v1841_v50, %v1849_v27  ;;  %5926 = vmatprep.mubr.msk.bf16.mxu0 %vm797_vm3, %v8294_v29  ;;  %5956 = vmatprep.mubr.msk.bf16.mxu1 %vm797_vm3, %v8310_v25  ;;  %v2233_v56 = vrot.slane %v8054_v45, 2 }
 0x178   : > { %v2044_v16 = vrot.slane %v9374_v14, 1  ;;  %v8476_v15 = vsel %vm1828_vm6, %v2032_v51, %v2035_v47  ;;  %v2050_v22 = vor.u32 %v2049_v8, %v2048_v3  ;;  %v1845_v14 = vor.u32 %v1844_v61, %v1843_v58  ;;  %v9378_v3 = vld [vmem:[#allocation17_spill] sm:$0xff]  ;;  %1561 = vmatpush1.bf16.msra.mxu0 %v7267_v41  ;;  %1742 = vmatpush1.bf16.msra.mxu1 %v7268_v44 }
 0x179   : > { %v2045_v49 = vrot.slane %v9375_v55, 2  ;;  %v8491_v51 = vor.u32 %v8283_v11, %v8277_v5  ;;  %v2235_v8 = vrot.slane %v9378_v3, 2  ;;  %v8503_v50 = vsel %vm1828_vm6, %v1849_v27, %v8482_v33  ;;  %v7269_v5 = vld [vmem:[%s9242_s1 + $0x128] sm:$0xff]   ;;  %1562 = vmatprep.subr.bf16.mxu0 %v9326_v23  ;;  %1743 = vmatprep.subr.bf16.mxu1 %v9326_v23 }
 0x17a   : > { %v8499_v4 = vsel %vm1828_vm6, %v2042_v31, %v2050_v22  ;;  %v2236_v58 = vrot.slane %v8061_v53, 2  ;;  %v7270_v11 = vld [vmem:[%s9242_s1 + $0x16c] sm:$0xff]   ;;  %v8513_v29 = vsel %vm1828_vm6, %v1834_v6, %v1845_v14  ;;  %v8517_v25 = vsel %vm1828_vm6, %v2050_v22, %v8300_v17 }
 0x17b   : > { %v2046_v32 = vor.u32 %v2045_v49, %v2044_v16  ;;  %v8521_v53 = vsel %vm1828_vm6, %v1845_v14, %v8491_v51  ;;  %v9379_v31 = vld [vmem:[#allocation18_spill] sm:$0xff]  ;;  %v8531_v6 = vor.u32 %v8269_v13, %v8261_v24  ;;  %v2411_v61 = vrot.slane %v8063_v54, 2 }
 0x17c   : > { %v2410_v41 = vrot.slane %v9379_v31, 2  ;;  %v8534_v27 = vsel %vm2231_vm7, %v2235_v8, %v2236_v58  ;;  %v9380_v16 = vshrl.u32 %v8194_v7, 16  ;;  %v9381_v55 = vshrl.u32 %v8184_v38, 16  ;;  %1563 = vmatpush1.bf16.msra.mxu0 %v7269_v5  ;;  %1744 = vmatpush1.bf16.msra.mxu1 %v7270_v11  ;;  %v9382_v8 = vld [vmem:[#allocation20_spill] sm:$0xff]  ;;  %v9383_v5 = vld [vmem:[#allocation19_spill] sm:$0xff] }
 0x17d   : > { %v8527_v44 = vsel %vm1828_vm6, %v2035_v47, %v2046_v32  ;;  %v2232_v47 = vrot.slane %v7985_v62, 2  ;;  %v8549_v13 = vsel %vm1828_vm6, %v2046_v32, %v8531_v6  ;;  %v2407_v54 = vrot.slane %v7987_v63, 2  ;;  %v7272_v62 = vld [vmem:[%s9242_s1 + $0x174] sm:$0xff]   ;;  %1564 = vmatprep.subr.bf16.mxu0 %v9326_v23  ;;  %1745 = vmatprep.subr.bf16.mxu1 %v9326_v23 }
 0x17e   : > { %v1086_v22 = vor.u32 %v9380_v16, %v8254_v39  ;;  %v8543_v49 = vor.u32 %v9381_v55, %v8259_v36  ;;  %v8552_v24 = vsel %vm2231_vm7, %v2410_v41, %v2411_v61  ;;  %v2408_v39 = vrot.slane %v8056_v46, 2  ;;  %v7271_v36 = vld [vmem:[%s9242_s1 + $0x130] sm:$0xff]   ;;  %1206 = vmatmul.mubr.bf16.gmra.mrb[40].mxu0 %v8298_v19  ;;  %1423 = vmatmul.mubr.bf16.gmra.mrb[40].mxu1 %v8353_v12  ;;  %v9387_v55 = vld [vmem:[#allocation29_spill] sm:$0xff] }
 0x17f   : > { %v8563_v45 = vsel %vm2231_vm7, %v2232_v47, %v2233_v56  ;;  %v2240_v37 = vrot.slane %v8144_v2, 2  ;;  %v2415_v14 = vrot.slane %v8146_v26, 2  ;;  %v2238_v63 = vrot.slane %v8132_v21, 2  ;;  %5957 = vmatprep.mubr.msk.bf16.mxu1 %vm797_vm3, %v8355_v42  ;;  %v7273_v42 = vld [vmem:[%s9242_s1 + $0x138] sm:$0xff]  }
 0x180   : > { %v8571_v46 = vsel %vm2231_vm7, %v2407_v54, %v2408_v39  ;;  %v2413_v3 = vrot.slane %v8134_v40, 2  ;;  %v2588_v32 = vrot.slane %v9382_v8, 2  ;;  %v2589_v11 = vrot.slane %v9383_v5, 3  ;;  %5927 = vmatprep.mubr.msk.bf16.mxu0 %vm797_vm3, %v1086_v22  ;;  %1565 = vmatpush1.bf16.msra.mxu0 %v7271_v36 }
 0x181   : > { %v8579_v2 = vsel %vm2231_vm7, %v2236_v58, %v2240_v37  ;;  %v8582_v21 = vsel %vm2231_vm7, %v2411_v61, %v2415_v14  ;;  %v8585_v26 = vsel %vm2231_vm7, %v2233_v56, %v2238_v63  ;;  %v2591_v31 = vrot.slane %v8110_v48, 2  ;;  %1746 = vmatpush1.bf16.msra.mxu1 %v7272_v62  ;;  %v7274_v61 = vld [vmem:[%s9242_s1 + $0x17c] sm:$0xff]   ;;  %1566 = vmatprep.subr.bf16.mxu0 %v9326_v23 }
 0x182   : > { %v8592_v40 = vsel %vm2231_vm7, %v2408_v39, %v2413_v3  ;;  %v9384_v19 = vrot.slane %v8245_v43, 2  ;;  %v9385_v58 = vrot.slane %v8237_v18, 2  ;;  %v2592_v48 = vrot.slane %v8086_v20, 3  ;;  %1747 = vmatprep.subr.bf16.mxu1 %v9326_v23  ;;  %v9389_v39 = vld [vmem:[#allocation35_spill] sm:$0xff] }
 0x183   : > { %v9386_v16 = vrot.slane %v8234_v30, 2  ;;  %v9388_v47 = vrot.slane %v9387_v55, 2  ;;  %v2590_v20 = vor.u32 %v2589_v11, %v2588_v32  ;;  %v2581_v54 = vrot.slane %v8005_v9, 2 }
 0x184   : > { %v8597_v12 = vsel %vm2231_vm7, %v2240_v37, %v9384_v19  ;;  %v8602_v41 = vsel %vm2231_vm7, %v2415_v14, %v9385_v58  ;;  %v9390_v36 = vshrl.u32 %v8230_v57, 16  ;;  %v2593_v37 = vor.u32 %v2592_v48, %v2591_v31  ;;  %v9393_v31 = vld [vmem:[#allocation33_spill] sm:$0xff]  ;;  %1567 = vmatpush1.bf16.msra.mxu0 %v7273_v42 }
 0x185   : > { %v8614_v22 = vsel %vm2231_vm7, %v2238_v63, %v9386_v16  ;;  %v8619_v56 = vsel %vm2231_vm7, %v2413_v3, %v9388_v47  ;;  %v2582_v14 = vrot.slane %v8008_v10, 3  ;;  %v2584_v63 = vrot.slane %v8097_v28, 2  ;;  %v9391_v3 = vld [vmem:[#allocation28_spill] sm:$0xff]  ;;  %1748 = vmatpush1.bf16.msra.mxu1 %v7274_v61  ;;  %v9395_v47 = vld [vmem:[#allocation31_spill] sm:$0xff]  ;;  %1568 = vmatprep.subr.bf16.mxu0 %v9326_v23 }
 0x186   : > { %v1300_v62 = vor.u32 %v9390_v36, %v9389_v39  ;;  %v2585_v8 = vrot.slane %v8075_v0, 3  ;;  %v2599_v5 = vrot.slane %v9391_v3, 2  ;;  %v2600_v32 = vrot.slane %v8175_v35, 3  ;;  %v9392_v16 = vld [vmem:[#allocation32_spill] sm:$0xff]  ;;  %1749 = vmatprep.subr.bf16.mxu1 %v9326_v23  ;;  %1214 = vmatmul.mubr.bf16.gmra.mrb[44].mxu0 %v8543_v49  ;;  %v9396_v39 = vld [vmem:[#allocation21_spill] sm:$0xff]  ;;  %v9397_v36 = vld [vmem:[#allocation22_spill] sm:$0xff] }
 0x187   : > { %v2595_v9 = vrot.slane %v9372_v1, 2  ;;  %v8634_v11 = vsel %vm2580_vm8, %v2590_v20, %v2593_v37  ;;  %v2583_v19 = vor.u32 %v2582_v14, %v2581_v54  ;;  %v2596_v58 = vrot.slane %v9373_v60, 3  ;;  %v7275_v10 = vld [vmem:[%s9242_s1 + $0x140] sm:$0xff]   ;;  %v9394_v1 = vld [vmem:[#allocation30_spill] sm:$0xff]  ;;  %5984 = vmatprep.mubr.msk.bf16.mxu0 %vm797_vm3, %v9396_v39  ;;  %v7277_v49 = vld [vmem:[%s9242_s1 + $0x148] sm:$0xff]  }
 0x188   : > { %v8639_v48 = vor.u32 %v9393_v31, %v9392_v16  ;;  %v7276_v0 = vld [vmem:[%s9242_s1 + $0x184] sm:$0xff]   ;;  %v2586_v28 = vor.u32 %v2585_v8, %v2584_v63  ;;  %v2601_v35 = vor.u32 %v2600_v32, %v2599_v5  ;;  %v8649_v20 = vor.u32 %v9395_v47, %v9394_v1  ;;  %1431 = vmatmul.mubr.bf16.gmra.mrb[44].mxu1 %v1300_v62  ;;  %v7278_v62 = vld [vmem:[%s9242_s1 + $0x18c] sm:$0xff]   ;;  %v7280_v8 = vld [vmem:[%s9242_s1 + $0x194] ss:$0 sps:$4 sm:$0x11]  }
 0x189   : > { %v2597_v60 = vor.u32 %v2596_v58, %v2595_v9  ;;  %6014 = vmatprep.mubr.msk.bf16.mxu1 %vm797_vm3, %v9397_v36  ;;  %1569 = vmatpush1.bf16.msra.mxu0 %v7275_v10  ;;  %v7279_v63 = vld [vmem:[%s9242_s1 + $0x150] ss:$0 sps:$4 sm:$0x11]   ;;  %v9398_v3 = vld [vmem:[#allocation16_spill] sm:$0xff]  ;;  %v7281_v9 = vld [vmem:[%s9242_s1 + $0x198] sm:$0xff]  }
 0x18a   : > { %v8655_v42 = vsel %vm2580_vm8, %v2583_v19, %v2586_v28  ;;  %v8658_v61 = vsel %vm2580_vm8, %v2593_v37, %v2601_v35  ;;  %v8662_v54 = vsel %vm2580_vm8, %v2601_v35, %v8639_v48  ;;  %1750 = vmatpush1.bf16.msra.mxu1 %v7276_v0  ;;  %1570 = vmatprep.subr.bf16.mxu0 %v9326_v23  ;;  %v7282_v19 = vld [vmem:[%s9242_s1 + $0x1dc] sm:$0xff]   ;;  %v9399_v58 = vld [vmem:[#allocation34_spill] sm:$0xff]  ;;  %v9401_v31 = vld [vmem:[#allocation37_spill] sm:$0xff] }
 0x18b   : > { %v8675_v37 = vsel %vm2580_vm8, %v2586_v28, %v2597_v60  ;;  %v8679_v14 = vsel %vm2580_vm8, %v2597_v60, %v8649_v20  ;;  %1751 = vmatprep.subr.bf16.mxu1 %v9326_v23  ;;  %v1554_v5 = vand.u32 %v7279_v63, %v9398_v3  ;;  %v1735_v32 = vand.u32 %v7280_v8, %v9398_v3  ;;  %v9400_v16 = vld [vmem:[#allocation36_spill] sm:$0xff]  ;;  %v9402_v10 = vld [vmem:[#allocation38_spill] sm:$0xff]  ;;  %v7285_v35 = vld [vmem:[%s9242_s1 + $0x1a8] sm:$0xff]  }
 0x18c   : > { %v7283_v0 = vld [vmem:[%s9242_s1 + $0x1a0] sm:$0xff]   ;;  %v7286_v1 = vld [vmem:[%s9242_s1 + $0x1ec] sm:$0xff]   ;;  %v9403_v47 = vld [vmem:[#allocation39_spill] sm:$0xff] }
 0x18d   : > { %1571 = vmatpush1.bf16.msra.mxu0 %v7277_v49  ;;  %v7284_v28 = vld [vmem:[%s9242_s1 + $0x1e4] sm:$0xff]   ;;  %v9406_v36 = vld [vmem:[#allocation42_spill] sm:$0xff]  ;;  %v7289_v63 = vld [vmem:[%s9242_s1 + $0x1b8] sm:$0xff]  }
 0x18e   : > { %1752 = vmatpush1.bf16.msra.mxu1 %v7278_v62  ;;  %1572 = vmatprep.subr.bf16.mxu0 %v9326_v23  ;;  %v9404_v60 = vld [vmem:[#allocation40_spill] sm:$0xff]  ;;  %v9405_v39 = vld [vmem:[#allocation41_spill] sm:$0xff]  ;;  %v7287_v49 = vld [vmem:[%s9242_s1 + $0x1b0] sm:$0xff]  }
 0x18f   : > { %1753 = vmatprep.subr.bf16.mxu1 %v9326_v23  ;;  %v7288_v62 = vld [vmem:[%s9242_s1 + $0x1f4] sm:$0xff]   ;;  %v7290_v8 = vld [vmem:[%s9242_s1 + $0x1fc] sm:$0xff]  }
 0x191   : > { %1573 = vmatpush1.bf16.msra.mxu0 %v1554_v5  ;;  %v9407_v5 = vld [vmem:[#allocation43_spill] sm:$0xff] }
 0x192   : > { %1754 = vmatpush1.bf16.msra.mxu1 %v1735_v32  ;;  %1939 = vmatprep.subr.bf16.mxu0 %v9326_v23  ;;  %v9408_v32 = vld [vmem:[#allocation44_spill] sm:$0xff] }
 0x193   : > { %2140 = vmatprep.subr.bf16.mxu1 %v9326_v23 }
 0x194   : > { %1589 = vmatmul.mubr.bf16.vlgmr.msra.gmra.mrb[48].mxu0 %v9399_v58 }
 0x195   : > { %1770 = vmatmul.mubr.bf16.vlgmr.msra.gmra.mrb[48].mxu1 %v9400_v16  ;;  %5985 = vmatprep.mubr.msk.bf16.mxu0 %vm797_vm3, %v9401_v31  ;;  %v7291_v16 = vld [vmem:[%s9242_s1 + $0x1c0] sm:$0xff]  }
 0x196   : > { %6015 = vmatprep.mubr.msk.bf16.mxu1 %vm797_vm3, %v9402_v10  ;;  %1940 = vmatpush1.bf16.msra.mxu0 %v7281_v9  ;;  %v9409_v9 = vrot.slane %v8194_v7, 1  ;;  %v7292_v31 = vld [vmem:[%s9242_s1 + $0x204] sm:$0xff]   ;;  %v7294_v10 = vld [vmem:[%s9242_s1 + $0x20c] sm:$0xff]  }
 0x197   : > { %2141 = vmatpush1.bf16.msra.mxu1 %v7282_v19  ;;  %1941 = vmatprep.subr.bf16.mxu0 %v9326_v23  ;;  %v9410_v19 = vld [vmem:[#allocation25_spill] sm:$0xff] }
 0x198   : > { %2142 = vmatprep.subr.bf16.mxu1 %v9326_v23  ;;  %v9411_v58 = vrot.slane %v9410_v19, 1  ;;  %v7293_v7 = vld [vmem:[%s9242_s1 + $0x1c8] sm:$0xff]  }
 0x19a   : > { %1942 = vmatpush1.bf16.msra.mxu0 %v7283_v0  ;;  %v9412_v0 = vrot.slane %v8184_v38, 1  ;;  %v7298_v38 = vld [vmem:[%s9242_s1 + $0x21c] ss:$0 sps:$4 sm:$0x11]  }
 0x19b   : > { %2143 = vmatpush1.bf16.msra.mxu1 %v7284_v28  ;;  %1943 = vmatprep.subr.bf16.mxu0 %v9326_v23  ;;  %v9413_v28 = vrot.slane %v8230_v57, 1  ;;  %v7297_v57 = vld [vmem:[%s9242_s1 + $0x1d8] ss:$0 sps:$4 sm:$0x11]  }
 0x19c   : > { %2144 = vmatprep.subr.bf16.mxu1 %v9326_v23  ;;  %1597 = vmatmul.mubr.bf16.gmra.mrb[52].mxu0 %v9403_v47  ;;  %v7296_v47 = vld [vmem:[%s9242_s1 + $0x214] sm:$0xff]  }
 0x19d   : > { %1778 = vmatmul.mubr.bf16.gmra.mrb[52].mxu1 %v9404_v60  ;;  %5986 = vmatprep.mubr.msk.bf16.mxu0 %vm797_vm3, %v9405_v39  ;;  %v2138_v60 = vand.u32 %v7298_v38, %v9398_v3  ;;  %v7299_v39 = vld [vmem:[%s9242_s1 + $0x220] sm:$0xff]  }
 0x19e   : > { %6016 = vmatprep.mubr.msk.bf16.mxu1 %vm797_vm3, %v9406_v36  ;;  %1944 = vmatpush1.bf16.msra.mxu0 %v7285_v35  ;;  %v9414_v35 = vld [vmem:[#allocation45_spill] sm:$0xff] }
 0x19f   : > { %2145 = vmatpush1.bf16.msra.mxu1 %v7286_v1  ;;  %1945 = vmatprep.subr.bf16.mxu0 %v9326_v23  ;;  %v7295_v1 = vld [vmem:[%s9242_s1 + $0x1d0] sm:$0xff]   ;;  %v7300_v36 = vld [vmem:[%s9242_s1 + $0x264] sm:$0xff]  }
 0x1a0   : > { %2146 = vmatprep.subr.bf16.mxu1 %v9326_v23 }
 0x1a2   : > { %1946 = vmatpush1.bf16.msra.mxu0 %v7287_v49  ;;  %v7301_v49 = vld [vmem:[%s9242_s1 + $0x228] sm:$0xff]  }
 0x1a3   : > { %2147 = vmatpush1.bf16.msra.mxu1 %v7288_v62  ;;  %1947 = vmatprep.subr.bf16.mxu0 %v9326_v23  ;;  %v7302_v62 = vld [vmem:[%s9242_s1 + $0x26c] sm:$0xff]  }
 0x1a4   : > { %2148 = vmatprep.subr.bf16.mxu1 %v9326_v23  ;;  %1605 = vmatmul.mubr.bf16.gmra.mrb[56].mxu0 %v9407_v5 }
 0x1a5   : > { %1786 = vmatmul.mubr.bf16.gmra.mrb[56].mxu1 %v9408_v32  ;;  %5987 = vmatprep.mubr.msk.bf16.mxu0 %vm797_vm3, %v9409_v9 }
 0x1a6   : > { %6017 = vmatprep.mubr.msk.bf16.mxu1 %vm797_vm3, %v9411_v58  ;;  %1948 = vmatpush1.bf16.msra.mxu0 %v7289_v63  ;;  %v7317_v63 = vld [vmem:[%s9242_s1 + $0x2a8] sm:$0xff]  }
 0x1a7   : > { %2149 = vmatpush1.bf16.msra.mxu1 %v7290_v8  ;;  %1949 = vmatprep.subr.bf16.mxu0 %v9326_v23  ;;  %v7318_v8 = vld [vmem:[%s9242_s1 + $0x2b0] sm:$0xff]  }
 0x1a8   : > { %2150 = vmatprep.subr.bf16.mxu1 %v9326_v23 }
 0x1aa   : > { %1950 = vmatpush1.bf16.msra.mxu0 %v7291_v16 }
 0x1ab   : > { %2151 = vmatpush1.bf16.msra.mxu1 %v7292_v31  ;;  %1951 = vmatprep.subr.bf16.mxu0 %v9326_v23 }
 0x1ac   : > { %2152 = vmatprep.subr.bf16.mxu1 %v9326_v23  ;;  %1613 = vmatmul.mubr.bf16.gmra.mrb[60].mxu0 %v9412_v0 }
 0x1ad   : > { %1794 = vmatmul.mubr.bf16.gmra.mrb[60].mxu1 %v9413_v28  ;;  %6044 = vmatprep.mubr.msk.bf16.mxu0 %vm797_vm3, %v9414_v35 }
 0x1ae   : > { %6074 = vmatprep.mubr.msk.bf16.mxu1 %vm797_vm3, %v8452_v34  ;;  %1952 = vmatpush1.bf16.msra.mxu0 %v7293_v7  ;;  %v1937_v34 = vand.u32 %v7297_v57, %v9398_v3 }
 0x1af   : > { %2153 = vmatpush1.bf16.msra.mxu1 %v7294_v10  ;;  %1953 = vmatprep.subr.bf16.mxu0 %v9326_v23 }
 0x1b0   : > { %2154 = vmatprep.subr.bf16.mxu1 %v9326_v23 }
 0x1b2   : > { %1954 = vmatpush1.bf16.msra.mxu0 %v7295_v1 }
 0x1b3   : > { %2155 = vmatpush1.bf16.msra.mxu1 %v7296_v47  ;;  %1955 = vmatprep.subr.bf16.mxu0 %v9326_v23 }
 0x1b4   : > { %2156 = vmatprep.subr.bf16.mxu1 %v9326_v23 }
 0x1b6   : > { %1956 = vmatpush1.bf16.msra.mxu0 %v1937_v34 }
 0x1b7   : > { %2157 = vmatpush1.bf16.msra.mxu1 %v2138_v60  ;;  %2316 = vmatprep.subr.bf16.mxu0 %v9326_v23 }
 0x1b8   : > { %2491 = vmatprep.subr.bf16.mxu1 %v9326_v23 }
 0x1b9   : > { %1972 = vmatmul.mubr.bf16.vlgmr.msra.gmra.mrb[64].mxu0 %v8468_v59  ;;  %v7303_v59 = vld [vmem:[%s9242_s1 + $0x230] sm:$0xff]  }
 0x1ba   : > { %2173 = vmatmul.mubr.bf16.vlgmr.msra.gmra.mrb[64].mxu1 %v8476_v15  ;;  %6045 = vmatprep.mubr.msk.bf16.mxu0 %vm797_vm3, %v8487_v52  ;;  %v7304_v15 = vld [vmem:[%s9242_s1 + $0x274] sm:$0xff]  }
 0x1bb   : > { %6075 = vmatprep.mubr.msk.bf16.mxu1 %vm797_vm3, %v8499_v4  ;;  %2317 = vmatpush1.bf16.msra.mxu0 %v7299_v39  ;;  %v7305_v52 = vld [vmem:[%s9242_s1 + $0x238] sm:$0xff]  }
 0x1bc   : > { %2492 = vmatpush1.bf16.msra.mxu1 %v7300_v36  ;;  %2318 = vmatprep.subr.bf16.mxu0 %v9326_v23  ;;  %v7306_v4 = vld [vmem:[%s9242_s1 + $0x27c] sm:$0xff]  }
 0x1bd   : > { %2493 = vmatprep.subr.bf16.mxu1 %v9326_v23 }
 0x1bf   : > { %2319 = vmatpush1.bf16.msra.mxu0 %v7301_v49 }
 0x1c0   : > { %2494 = vmatpush1.bf16.msra.mxu1 %v7302_v62  ;;  %2320 = vmatprep.subr.bf16.mxu0 %v9326_v23 }
 0x1c1   : > { %2495 = vmatprep.subr.bf16.mxu1 %v9326_v23  ;;  %1980 = vmatmul.mubr.bf16.gmra.mrb[68].mxu0 %v8513_v29  ;;  %v7308_v29 = vld [vmem:[%s9242_s1 + $0x284] sm:$0xff]  }
 0x1c2   : > { %2181 = vmatmul.mubr.bf16.gmra.mrb[68].mxu1 %v8527_v44  ;;  %6046 = vmatprep.mubr.msk.bf16.mxu0 %vm797_vm3, %v8503_v50  ;;  %v7307_v50 = vld [vmem:[%s9242_s1 + $0x240] sm:$0xff]   ;;  %v7310_v44 = vld [vmem:[%s9242_s1 + $0x28c] sm:$0xff]  }
 0x1c3   : > { %6076 = vmatprep.mubr.msk.bf16.mxu1 %vm797_vm3, %v8517_v25  ;;  %2321 = vmatpush1.bf16.msra.mxu0 %v7303_v59  ;;  %v7309_v25 = vld [vmem:[%s9242_s1 + $0x248] sm:$0xff]  }
 0x1c4   : > { %2496 = vmatpush1.bf16.msra.mxu1 %v7304_v15  ;;  %2322 = vmatprep.subr.bf16.mxu0 %v9326_v23 }
 0x1c5   : > { %2497 = vmatprep.subr.bf16.mxu1 %v9326_v23 }
 0x1c7   : > { %2323 = vmatpush1.bf16.msra.mxu0 %v7305_v52 }
 0x1c8   : > { %2498 = vmatpush1.bf16.msra.mxu1 %v7306_v4  ;;  %2324 = vmatprep.subr.bf16.mxu0 %v9326_v23 }
 0x1c9   : > { %2499 = vmatprep.subr.bf16.mxu1 %v9326_v23  ;;  %1988 = vmatmul.mubr.bf16.gmra.mrb[72].mxu0 %v8521_v53  ;;  %v7313_v53 = vld [vmem:[%s9242_s1 + $0x258] sm:$0xff]  }
 0x1ca   : > { %2189 = vmatmul.mubr.bf16.gmra.mrb[72].mxu1 %v8549_v13  ;;  %6047 = vmatprep.mubr.msk.bf16.mxu0 %vm797_vm3, %v8482_v33  ;;  %v7312_v33 = vld [vmem:[%s9242_s1 + $0x294] sm:$0xff]   ;;  %v7314_v13 = vld [vmem:[%s9242_s1 + $0x29c] sm:$0xff]  }
 0x1cb   : > { %6077 = vmatprep.mubr.msk.bf16.mxu1 %vm797_vm3, %v8300_v17  ;;  %2325 = vmatpush1.bf16.msra.mxu0 %v7307_v50  ;;  %v7311_v17 = vld [vmem:[%s9242_s1 + $0x250] sm:$0xff]  }
 0x1cc   : > { %2500 = vmatpush1.bf16.msra.mxu1 %v7308_v29  ;;  %2326 = vmatprep.subr.bf16.mxu0 %v9326_v23 }
 0x1cd   : > { %2501 = vmatprep.subr.bf16.mxu1 %v9326_v23 }
 0x1cf   : > { %2327 = vmatpush1.bf16.msra.mxu0 %v7309_v25 }
 0x1d0   : > { %2502 = vmatpush1.bf16.msra.mxu1 %v7310_v44  ;;  %2328 = vmatprep.subr.bf16.mxu0 %v9326_v23 }
 0x1d1   : > { %2503 = vmatprep.subr.bf16.mxu1 %v9326_v23  ;;  %1996 = vmatmul.mubr.bf16.gmra.mrb[76].mxu0 %v8491_v51  ;;  %v7315_v51 = vld [vmem:[%s9242_s1 + $0x260] ss:$0 sps:$4 sm:$0x11]  }
 0x1d2   : > { %2197 = vmatmul.mubr.bf16.gmra.mrb[76].mxu1 %v8531_v6  ;;  %6104 = vmatprep.mubr.msk.bf16.mxu0 %vm797_vm3, %v8534_v27  ;;  %v7316_v6 = vld [vmem:[%s9242_s1 + $0x2a4] ss:$0 sps:$4 sm:$0x11]   ;;  %v2314_v27 = vand.u32 %v7315_v51, %v9398_v3 }
 0x1d3   : > { %6134 = vmatprep.mubr.msk.bf16.mxu1 %vm797_vm3, %v8552_v24  ;;  %2329 = vmatpush1.bf16.msra.mxu0 %v7311_v17  ;;  %v2489_v24 = vand.u32 %v7316_v6, %v9398_v3 }
 0x1d4   : > { %2504 = vmatpush1.bf16.msra.mxu1 %v7312_v33  ;;  %2330 = vmatprep.subr.bf16.mxu0 %v9326_v23 }
 0x1d5   : > { %2505 = vmatprep.subr.bf16.mxu1 %v9326_v23 }
 0x1d7   : > { %2331 = vmatpush1.bf16.msra.mxu0 %v7313_v53 }
 0x1d8   : > { %2506 = vmatpush1.bf16.msra.mxu1 %v7314_v13  ;;  %2332 = vmatprep.subr.bf16.mxu0 %v9326_v23 }
 0x1d9   : > { %2507 = vmatprep.subr.bf16.mxu1 %v9326_v23 }
 0x1db   : > { %2333 = vmatpush1.bf16.msra.mxu0 %v2314_v27 }
 0x1dc   : > { %2508 = vmatpush1.bf16.msra.mxu1 %v2489_v24  ;;  %2681 = vmatprep.subr.bf16.mxu0 %v9326_v23 }
 0x1de   : > { %2349 = vmatmul.mubr.bf16.vlgmr.msra.gmra.mrb[80].mxu0 %v8563_v45  ;;  %v7319_v45 = vld [vmem:[%s9242_s1 + $0x2b8] sm:$0xff]  }
 0x1df   : > { %2524 = vmatmul.mubr.bf16.vlgmr.msra.gmra.mrb[80].mxu1 %v8571_v46  ;;  %6105 = vmatprep.mubr.msk.bf16.mxu0 %vm797_vm3, %v8579_v2  ;;  %v7320_v46 = vld [vmem:[%s9242_s1 + $0x2c0] sm:$0xff]   ;;  %v7321_v2 = vld [vmem:[%s9242_s1 + $0x2c8] sm:$0xff]  }
 0x1e0   : > { %6135 = vmatprep.mubr.msk.bf16.mxu1 %vm797_vm3, %v8582_v21  ;;  %2682 = vmatpush1.bf16.msra.mxu0 %v7317_v63  ;;  %v9415_v21 = vrot.slane %v8245_v43, 2  ;;  %v9417_v43 = vrot.slane %v8234_v30, 2 }
 0x1e1   : > { %2683 = vmatprep.subr.bf16.mxu0 %v9326_v23 }
 0x1e4   : > { %2684 = vmatpush1.bf16.msra.mxu0 %v7318_v8 }
 0x1e5   : > { %2685 = vmatprep.subr.bf16.mxu0 %v9326_v23 }
 0x1e6   : > { %2357 = vmatmul.mubr.bf16.gmra.mrb[84].mxu0 %v8585_v26  ;;  %v9416_v26 = vrot.slane %v8237_v18, 2  ;;  %v9418_v18 = vrot.slane %v9387_v55, 2 }
 0x1e7   : > { %2532 = vmatmul.mubr.bf16.gmra.mrb[84].mxu1 %v8592_v40  ;;  %6106 = vmatprep.mubr.msk.bf16.mxu0 %vm797_vm3, %v8597_v12  ;;  %v7322_v40 = vld [vmem:[%s9242_s1 + $0x2d0] sm:$0xff]   ;;  %v7323_v12 = vld [vmem:[%s9242_s1 + $0x2d8] sm:$0xff]  }
 0x1e8   : > { %6136 = vmatprep.mubr.msk.bf16.mxu1 %vm797_vm3, %v8602_v41  ;;  %2686 = vmatpush1.bf16.msra.mxu0 %v7319_v45  ;;  %v7324_v41 = vld [vmem:[%s9242_s1 + $0x2e0] sm:$0xff]  }
 0x1e9   : > { %2687 = vmatprep.subr.bf16.mxu0 %v9326_v23 }
 0x1ec   : > { %2688 = vmatpush1.bf16.msra.mxu0 %v7320_v46 }
 0x1ed   : > { %2689 = vmatprep.subr.bf16.mxu0 %v9326_v23 }
 0x1ee   : > { %2365 = vmatmul.mubr.bf16.gmra.mrb[88].mxu0 %v8614_v22  ;;  %v7325_v22 = vld [vmem:[%s9242_s1 + $0x2e8] ss:$0 sps:$4 sm:$0x11]  }
 0x1ef   : > { %2540 = vmatmul.mubr.bf16.gmra.mrb[88].mxu1 %v8619_v56  ;;  %6107 = vmatprep.mubr.msk.bf16.mxu0 %vm797_vm3, %v9415_v21  ;;  %v2679_v30 = vand.u32 %v7325_v22, %v9398_v3 }
 0x1f0   : > { %6137 = vmatprep.mubr.msk.bf16.mxu1 %vm797_vm3, %v9416_v26  ;;  %2690 = vmatpush1.bf16.msra.mxu0 %v7321_v2 }
 0x1f1   : > { %2691 = vmatprep.subr.bf16.mxu0 %v9326_v23 }
 0x1f4   : > { %2692 = vmatpush1.bf16.msra.mxu0 %v7322_v40 }
 0x1f5   : > { %2693 = vmatprep.subr.bf16.mxu0 %v9326_v23 }
 0x1f6   : > { %2373 = vmatmul.mubr.bf16.gmra.mrb[92].mxu0 %v9417_v43 }
 0x1f7   : > { %2548 = vmatmul.mubr.bf16.gmra.mrb[92].mxu1 %v9418_v18  ;;  %6164 = vmatprep.mubr.msk.bf16.mxu0 %vm797_vm3, %v8634_v11 }
 0x1f8   : > { %2694 = vmatpush1.bf16.msra.mxu0 %v7323_v12 }
 0x1f9   : > { %2695 = vmatprep.subr.bf16.mxu0 %v9326_v23 }
 0x1fc   : > { %2696 = vmatpush1.bf16.msra.mxu0 %v7324_v41 }
 0x1fd   : > { %2697 = vmatprep.subr.bf16.mxu0 %v9326_v23 }
 0x200   : > { %2698 = vmatpush1.bf16.msra.mxu0 %v2679_v30 }
 0x203   : > { %2714 = vmatmul.mubr.bf16.vlgmr.msra.gmra.mrb[96].mxu0 %v8655_v42 }
 0x204   : > { %6165 = vmatprep.mubr.msk.bf16.mxu0 %vm797_vm3, %v8658_v61 }
 0x20b   : > { %2722 = vmatmul.mubr.bf16.gmra.mrb[100].mxu0 %v8675_v37 }
 0x20c   : > { %6166 = vmatprep.mubr.msk.bf16.mxu0 %vm797_vm3, %v8662_v54 }
 0x213   : > { %2730 = vmatmul.mubr.bf16.gmra.mrb[104].mxu0 %v8679_v14 }
 0x214   : > { %6167 = vmatprep.mubr.msk.bf16.mxu0 %vm797_vm3, %v8639_v48 }
 0x21b   : > { %2738 = vmatmul.mubr.bf16.gmra.mrb[108].mxu0 %v8649_v20  ;;  %v850_v55 = vpop.f32.mrb[16].mxu0  ;;  %v980_v23 = vpop.f32.mrb[16].mxu1 }
 0x21c   : > { %v981_v56 = vadd.f32 %v980_v23, %v850_v55  ;;  %v852_v11 = vpop.f32.mrb[17].mxu0  ;;  %v982_v42 = vpop.f32.mrb[17].mxu1 }
 0x21d   : > { %v853_v3 = vpop.f32.mrb[18].mxu0  ;;  %v983_v5 = vpop.f32.mrb[18].mxu1 }
 0x21e   : > { %v984_v61 = vadd.f32 %v983_v5, %v853_v3  ;;  %v855_v32 = vpop.f32.mrb[19].mxu0  ;;  %v985_v37 = vpop.f32.mrb[19].mxu1 }
 0x223   : > { %v858_v9 = vpop.f32.mrb[20].mxu0  ;;  %v988_v19 = vpop.f32.mrb[20].mxu1 }
 0x224   : > { %v989_v54 = vadd.f32 %v988_v19, %v858_v9  ;;  %v860_v58 = vpop.f32.mrb[21].mxu0  ;;  %v990_v14 = vpop.f32.mrb[21].mxu1 }
 0x225   : > { %v861_v16 = vpop.f32.mrb[22].mxu0  ;;  %v991_v31 = vpop.f32.mrb[22].mxu1 }
 0x226   : > { %v992_v48 = vadd.f32 %v991_v31, %v861_v16  ;;  %v863_v7 = vpop.f32.mrb[23].mxu0  ;;  %v993_v20 = vpop.f32.mrb[23].mxu1 }
 0x22b   : > { %v866_v10 = vpop.f32.mrb[24].mxu0  ;;  %v996_v0 = vpop.f32.mrb[24].mxu1 }
 0x22c   : > { %v997_v28 = vadd.f32 %v996_v0, %v866_v10  ;;  %v868_v35 = vpop.f32.mrb[25].mxu0  ;;  %v998_v1 = vpop.f32.mrb[25].mxu1 }
 0x22d   : > { %v869_v47 = vpop.f32.mrb[26].mxu0  ;;  %v999_v57 = vpop.f32.mrb[26].mxu1 }
 0x22e   : > { %v1000_v38 = vadd.f32 %v999_v57, %v869_v47  ;;  %v871_v34 = vpop.f32.mrb[27].mxu0  ;;  %v1001_v60 = vpop.f32.mrb[27].mxu1 }
 0x233   : > { %v874_v39 = vpop.f32.mrb[28].mxu0  ;;  %v1004_v36 = vpop.f32.mrb[28].mxu1 }
 0x234   : > { %v876_v49 = vpop.f32.mrb[29].mxu0  ;;  %v1005_v62 = vadd.f32 %v1004_v36, %v874_v39  ;;  %v1006_v59 = vpop.f32.mrb[29].mxu1 }
 0x235   : > { %v877_v15 = vpop.f32.mrb[30].mxu0  ;;  %v1007_v52 = vpop.f32.mrb[30].mxu1 }
 0x236   : > { %v878_v4 = vpop.f32.mrb[31].mxu0  ;;  %v1008_v50 = vpop.f32.mrb[31].mxu1 }
 0x240   : > { %v1191_v29 = vpop.f32.mrb[32].mxu0  ;;  %v1408_v25 = vpop.f32.mrb[32].mxu1 }
 0x241   : > { %v1221_v44 = vadd.f32 %v1191_v29, %v981_v56  ;;  %v1193_v17 = vpop.f32.mrb[33].mxu0  ;;  %v1410_v33 = vpop.f32.mrb[33].mxu1 }
 0x242   : > { %v1194_v53 = vpop.f32.mrb[34].mxu0  ;;  %v1411_v13 = vpop.f32.mrb[34].mxu1 }
 0x243   : > { %v1438_v51 = vadd.f32 %v1408_v25, %v1221_v44  ;;  %v1222_v6 = vadd.f32 %v1194_v53, %v984_v61  ;;  %v1196_v27 = vpop.f32.mrb[35].mxu0  ;;  %v1413_v24 = vpop.f32.mrb[35].mxu1 }
 0x245   : > { %v1439_v63 = vadd.f32 %v1411_v13, %v1222_v6  ;;  %v9419_v6 = vld [vmem:[#allocation8_spill] sm:$0xff] }
 0x246   : > { %6620 = vmatprep.mubr.msk.f32.mxu1 %vm2773_vm9, %v9419_v6 }
 0x249   : > { %v1199_v8 = vpop.f32.mrb[36].mxu0  ;;  %v1416_v45 = vpop.f32.mrb[36].mxu1 }
 0x24a   : > { %v1223_v46 = vadd.f32 %v1199_v8, %v989_v54  ;;  %v1201_v2 = vpop.f32.mrb[37].mxu0  ;;  %v1418_v21 = vpop.f32.mrb[37].mxu1 }
 0x24b   : > { %v1202_v26 = vpop.f32.mrb[38].mxu0  ;;  %v1419_v40 = vpop.f32.mrb[38].mxu1 }
 0x24c   : > { %v1440_v12 = vadd.f32 %v1416_v45, %v1223_v46  ;;  %v1224_v43 = vadd.f32 %v1202_v26, %v992_v48  ;;  %v1204_v18 = vpop.f32.mrb[39].mxu0  ;;  %v1421_v41 = vpop.f32.mrb[39].mxu1 }
 0x24e   : > { %v1441_v22 = vadd.f32 %v1419_v40, %v1224_v43 }
 0x251   : > { %v1207_v30 = vpop.f32.mrb[40].mxu0  ;;  %v1424_v55 = vpop.f32.mrb[40].mxu1 }
 0x252   : > { %v1225_v23 = vadd.f32 %v1207_v30, %v997_v28  ;;  %v1209_v56 = vpop.f32.mrb[41].mxu0  ;;  %v1426_v11 = vpop.f32.mrb[41].mxu1 }
 0x253   : > { %v1210_v42 = vpop.f32.mrb[42].mxu0  ;;  %v1427_v3 = vpop.f32.mrb[42].mxu1 }
 0x254   : > { %v1442_v5 = vadd.f32 %v1424_v55, %v1225_v23  ;;  %v1226_v61 = vadd.f32 %v1210_v42, %v1000_v38  ;;  %v1212_v32 = vpop.f32.mrb[43].mxu0  ;;  %v1429_v37 = vpop.f32.mrb[43].mxu1 }
 0x256   : > { %v1443_v9 = vadd.f32 %v1427_v3, %v1226_v61 }
 0x259   : > { %v1215_v19 = vpop.f32.mrb[44].mxu0 }
 0x25a   : > { %v1227_v58 = vadd.f32 %v1215_v19, %v1005_v62  ;;  %v1217_v14 = vpop.f32.mrb[45].mxu0 }
 0x25b   : > { %v1432_v54 = vpop.f32.mrb[44].mxu1  ;;  %v1218_v31 = vpop.f32.mrb[46].mxu0 }
 0x25c   : > { %v1434_v16 = vpop.f32.mrb[45].mxu1  ;;  %v1444_v7 = vadd.f32 %v1432_v54, %v1227_v58  ;;  %v1219_v20 = vpop.f32.mrb[47].mxu0  ;;  %v7330_v31 = vld [vmem:[#allocation2 + $0x40] sm:$0xff]  }
 0x25d   : > { %v1435_v48 = vpop.f32.mrb[46].mxu1  ;;  %6646 = vmatprep.subr.bf16.mxu0 %v7330_v31 }
 0x25e   : > { %v1436_v10 = vpop.f32.mrb[47].mxu1  ;;  %6647 = vmatpush3.bf16.msra.mxu0 %v7330_v31 }
 0x267   : > { %v1590_v0 = vpop.f32.mrb[48].mxu0 }
 0x268   : > { %v1771_v28 = vpop.f32.mrb[48].mxu1  ;;  %v1620_v35 = vadd.f32 %v1590_v0, %v1438_v51  ;;  %v1592_v1 = vpop.f32.mrb[49].mxu0 }
 0x269   : > { %v1773_v47 = vpop.f32.mrb[49].mxu1  ;;  %v1593_v57 = vpop.f32.mrb[50].mxu0  ;;  %v7332_v1 = vld [vmem:[#allocation2 + $0x48] sm:$0xff]  }
 0x26a   : > { %v1774_v38 = vpop.f32.mrb[50].mxu1  ;;  %v1801_v34 = vadd.f32 %v1771_v28, %v1620_v35  ;;  %v1621_v60 = vadd.f32 %v1593_v57, %v1439_v63  ;;  %v1595_v39 = vpop.f32.mrb[51].mxu0  ;;  %6648 = vmatprep.subr.bf16.mxu0 %v7332_v1 }
 0x26b   : > { %v1776_v36 = vpop.f32.mrb[51].mxu1  ;;  %6649 = vmatpush3.bf16.msra.mxu0 %v7332_v1  ;;  %v7334_v39 = vld [vmem:[#allocation2 + $0x50] sm:$0xff]  }
 0x26c   : > { %v1802_v49 = vadd.f32 %v1774_v38, %v1621_v60  ;;  %6650 = vmatprep.subr.bf16.mxu0 %v7334_v39 }
 0x26f   : > { %v1598_v62 = vpop.f32.mrb[52].mxu0  ;;  %6651 = vmatpush3.bf16.msra.mxu0 %v7334_v39 }
 0x270   : > { %v1779_v59 = vpop.f32.mrb[52].mxu1  ;;  %v1622_v15 = vadd.f32 %v1598_v62, %v1440_v12  ;;  %v1600_v52 = vpop.f32.mrb[53].mxu0 }
 0x271   : > { %v1781_v4 = vpop.f32.mrb[53].mxu1  ;;  %v1601_v50 = vpop.f32.mrb[54].mxu0 }
 0x272   : > { %v1782_v29 = vpop.f32.mrb[54].mxu1  ;;  %v1803_v25 = vadd.f32 %v1779_v59, %v1622_v15  ;;  %v1623_v44 = vadd.f32 %v1601_v50, %v1441_v22  ;;  %v1603_v17 = vpop.f32.mrb[55].mxu0  ;;  %v7336_v50 = vld [vmem:[#allocation2 + $0x58] sm:$0xff]  }
 0x273   : > { %v1784_v33 = vpop.f32.mrb[55].mxu1  ;;  %6652 = vmatprep.subr.bf16.mxu0 %v7336_v50 }
 0x274   : > { %v1804_v53 = vadd.f32 %v1782_v29, %v1623_v44  ;;  %6653 = vmatpush3.bf16.msra.mxu0 %v7336_v50  ;;  %v6168_v50 = vld [vmem:[%s9243_s2] ss:$0 sm:$0xff] }
 0x277   : > { %v1606_v13 = vpop.f32.mrb[56].mxu0 }
 0x278   : > { %v1787_v51 = vpop.f32.mrb[56].mxu1  ;;  %v1624_v27 = vadd.f32 %v1606_v13, %v1442_v5  ;;  %v1608_v24 = vpop.f32.mrb[57].mxu0 }
 0x279   : > { %v1789_v63 = vpop.f32.mrb[57].mxu1  ;;  %v1609_v8 = vpop.f32.mrb[58].mxu0 }
 0x27a   : > { %v1790_v45 = vpop.f32.mrb[58].mxu1  ;;  %v1805_v46 = vadd.f32 %v1787_v51, %v1624_v27  ;;  %v1625_v2 = vadd.f32 %v1609_v8, %v1443_v9  ;;  %v1611_v21 = vpop.f32.mrb[59].mxu0 }
 0x27b   : > { %v1792_v26 = vpop.f32.mrb[59].mxu1 }
 0x27c   : > { %v1806_v40 = vadd.f32 %v1790_v45, %v1625_v2 }
 0x27f   : > { %v1614_v12 = vpop.f32.mrb[60].mxu0 }
 0x280   : > { %v1795_v43 = vpop.f32.mrb[60].mxu1  ;;  %v1626_v18 = vadd.f32 %v1614_v12, %v1444_v7  ;;  %v1616_v41 = vpop.f32.mrb[61].mxu0 }
 0x281   : > { %v1797_v22 = vpop.f32.mrb[61].mxu1  ;;  %v1617_v30 = vpop.f32.mrb[62].mxu0 }
 0x282   : > { %v1798_v55 = vpop.f32.mrb[62].mxu1  ;;  %v1807_v23 = vadd.f32 %v1795_v43, %v1626_v18  ;;  %v1618_v56 = vpop.f32.mrb[63].mxu0 }
 0x283   : > { %v1799_v11 = vpop.f32.mrb[63].mxu1 }
 0x28c   : > { %v1973_v42 = vpop.f32.mrb[64].mxu0 }
 0x28d   : > { %v2174_v3 = vpop.f32.mrb[64].mxu1  ;;  %v2003_v5 = vadd.f32 %v1973_v42, %v1801_v34  ;;  %v1975_v61 = vpop.f32.mrb[65].mxu0 }
 0x28e   : > { %v2176_v32 = vpop.f32.mrb[65].mxu1  ;;  %v1976_v37 = vpop.f32.mrb[66].mxu0 }
 0x28f   : > { %v2177_v9 = vpop.f32.mrb[66].mxu1  ;;  %v2204_v19 = vadd.f32 %v2174_v3, %v2003_v5  ;;  %v2004_v54 = vadd.f32 %v1976_v37, %v1802_v49  ;;  %v1978_v58 = vpop.f32.mrb[67].mxu0 }
 0x290   : > { %v2179_v14 = vpop.f32.mrb[67].mxu1 }
 0x291   : > { %v2205_v16 = vadd.f32 %v2177_v9, %v2004_v54 }
 0x294   : > { %v1981_v48 = vpop.f32.mrb[68].mxu0 }
 0x295   : > { %v2182_v7 = vpop.f32.mrb[68].mxu1  ;;  %v2005_v20 = vadd.f32 %v1981_v48, %v1803_v25  ;;  %v1983_v10 = vpop.f32.mrb[69].mxu0 }
 0x296   : > { %v2184_v0 = vpop.f32.mrb[69].mxu1  ;;  %v1984_v28 = vpop.f32.mrb[70].mxu0 }
 0x297   : > { %v2185_v35 = vpop.f32.mrb[70].mxu1  ;;  %v2206_v47 = vadd.f32 %v2182_v7, %v2005_v20  ;;  %v2006_v57 = vadd.f32 %v1984_v28, %v1804_v53  ;;  %v1986_v38 = vpop.f32.mrb[71].mxu0 }
 0x298   : > { %v2187_v34 = vpop.f32.mrb[71].mxu1 }
 0x299   : > { %v2207_v60 = vadd.f32 %v2185_v35, %v2006_v57 }
 0x29c   : > { %v1989_v36 = vpop.f32.mrb[72].mxu0 }
 0x29d   : > { %v2190_v49 = vpop.f32.mrb[72].mxu1  ;;  %v2007_v62 = vadd.f32 %v1989_v36, %v1805_v46  ;;  %v1991_v59 = vpop.f32.mrb[73].mxu0 }
 0x29e   : > { %v2192_v15 = vpop.f32.mrb[73].mxu1  ;;  %v1992_v52 = vpop.f32.mrb[74].mxu0 }
 0x29f   : > { %v2193_v4 = vpop.f32.mrb[74].mxu1  ;;  %v2208_v29 = vadd.f32 %v2190_v49, %v2007_v62  ;;  %v2008_v25 = vadd.f32 %v1992_v52, %v1806_v40  ;;  %v1994_v44 = vpop.f32.mrb[75].mxu0 }
 0x2a0   : > { %v2195_v17 = vpop.f32.mrb[75].mxu1 }
 0x2a1   : > { %v2209_v33 = vadd.f32 %v2193_v4, %v2008_v25 }
 0x2a4   : > { %v1997_v53 = vpop.f32.mrb[76].mxu0 }
 0x2a5   : > { %v2198_v13 = vpop.f32.mrb[76].mxu1  ;;  %v2009_v51 = vadd.f32 %v1997_v53, %v1807_v23  ;;  %v1999_v27 = vpop.f32.mrb[77].mxu0 }
 0x2a6   : > { %v2200_v24 = vpop.f32.mrb[77].mxu1  ;;  %v2000_v63 = vpop.f32.mrb[78].mxu0 }
 0x2a7   : > { %v2201_v8 = vpop.f32.mrb[78].mxu1  ;;  %v2210_v45 = vadd.f32 %v2198_v13, %v2009_v51  ;;  %v2001_v46 = vpop.f32.mrb[79].mxu0 }
 0x2a8   : > { %v2202_v2 = vpop.f32.mrb[79].mxu1 }
 0x2b1   : > { %v2350_v21 = vpop.f32.mrb[80].mxu0 }
 0x2b2   : > { %v2525_v26 = vpop.f32.mrb[80].mxu1  ;;  %v2380_v12 = vadd.f32 %v2350_v21, %v2204_v19  ;;  %v2352_v43 = vpop.f32.mrb[81].mxu0 }
 0x2b3   : > { %v2527_v40 = vpop.f32.mrb[81].mxu1  ;;  %v2353_v18 = vpop.f32.mrb[82].mxu0 }
 0x2b4   : > { %v2528_v41 = vpop.f32.mrb[82].mxu1  ;;  %v2555_v22 = vadd.f32 %v2525_v26, %v2380_v12  ;;  %v2381_v30 = vadd.f32 %v2353_v18, %v2205_v16  ;;  %v2355_v55 = vpop.f32.mrb[83].mxu0 }
 0x2b5   : > { %v2530_v56 = vpop.f32.mrb[83].mxu1 }
 0x2b6   : > { %v2556_v11 = vadd.f32 %v2528_v41, %v2381_v30 }
 0x2b9   : > { %v2358_v23 = vpop.f32.mrb[84].mxu0 }
 0x2ba   : > { %v2533_v42 = vpop.f32.mrb[84].mxu1  ;;  %v2382_v3 = vadd.f32 %v2358_v23, %v2206_v47  ;;  %v2360_v5 = vpop.f32.mrb[85].mxu0 }
 0x2bb   : > { %v2535_v61 = vpop.f32.mrb[85].mxu1  ;;  %v2361_v32 = vpop.f32.mrb[86].mxu0 }
 0x2bc   : > { %v2536_v37 = vpop.f32.mrb[86].mxu1  ;;  %v2557_v9 = vadd.f32 %v2533_v42, %v2382_v3  ;;  %v2383_v54 = vadd.f32 %v2361_v32, %v2207_v60  ;;  %v2363_v58 = vpop.f32.mrb[87].mxu0 }
 0x2bd   : > { %v2538_v19 = vpop.f32.mrb[87].mxu1 }
 0x2be   : > { %v2558_v14 = vadd.f32 %v2536_v37, %v2383_v54 }
 0x2c1   : > { %v2366_v31 = vpop.f32.mrb[88].mxu0 }
 0x2c2   : > { %v2541_v48 = vpop.f32.mrb[88].mxu1  ;;  %v2384_v7 = vadd.f32 %v2366_v31, %v2208_v29  ;;  %v2368_v20 = vpop.f32.mrb[89].mxu0  ;;  %v9420_v31 = vld [vmem:[#allocation11_spill] sm:$0xff] }
 0x2c3   : > { %v2543_v16 = vpop.f32.mrb[89].mxu1  ;;  %v2369_v10 = vpop.f32.mrb[90].mxu0  ;;  %v9423_v20 = vld [vmem:[#allocation9_spill] sm:$0xff] }
 0x2c4   : > { %v2544_v0 = vpop.f32.mrb[90].mxu1  ;;  %v2559_v28 = vadd.f32 %v2541_v48, %v2384_v7  ;;  %v2385_v35 = vadd.f32 %v2369_v10, %v2209_v33  ;;  %v2371_v1 = vpop.f32.mrb[91].mxu0  ;;  %v9421_v48 = vld [vmem:[#allocation13_spill] sm:$0xff]  ;;  %v9422_v7 = vld [vmem:[#allocation15_spill] sm:$0xff]  ;;  %v7326_v16 = vld [vmem:[#allocation2] sm:$0xff]  }
 0x2c5   : > { %v2546_v47 = vpop.f32.mrb[91].mxu1  ;;  %v7327_v10 = vld [vmem:[#allocation2 + $0x8] sm:$0xff]   ;;  %v9426_v1 = vld [vmem:[#allocation14_spill] sm:$0xff] }
 0x2c6   : > { %v2560_v57 = vadd.f32 %v2544_v0, %v2385_v35  ;;  %v9424_v0 = vld [vmem:[#allocation10_spill] sm:$0xff]  ;;  %v7329_v47 = vld [vmem:[#allocation2 + $0x18] sm:$0xff]  }
 0x2c7   : > { %v7328_v35 = vld [vmem:[#allocation2 + $0x10] sm:$0xff]  }
 0x2c9   : > { %v2374_v38 = vpop.f32.mrb[92].mxu0 }
 0x2ca   : > { %v2549_v34 = vpop.f32.mrb[92].mxu1  ;;  %v2386_v39 = vadd.f32 %v2374_v38, %v2210_v45  ;;  %v2376_v36 = vpop.f32.mrb[93].mxu0  ;;  %v7333_v38 = vld [vmem:[#allocation2 + $0x28] sm:$0xff]  }
 0x2cb   : > { %v2551_v60 = vpop.f32.mrb[93].mxu1  ;;  %v2377_v49 = vpop.f32.mrb[94].mxu0  ;;  %v7338_v36 = vld [vmem:[#allocation2 + $0x60] sm:$0xff]  }
 0x2cc   : > { %v2552_v62 = vpop.f32.mrb[94].mxu1  ;;  %v2561_v59 = vadd.f32 %v2549_v34, %v2386_v39  ;;  %v2378_v15 = vpop.f32.mrb[95].mxu0  ;;  %v7335_v34 = vld [vmem:[#allocation2 + $0x30] sm:$0xff]   ;;  %v7337_v39 = vld [vmem:[#allocation2 + $0x38] sm:$0xff]   ;;  %v7339_v60 = vld [vmem:[#allocation2 + $0xc0] sm:$0xff]   ;;  %6654 = vmatprep.subr.bf16.mxu0 %v7338_v36 }
 0x2cd   : > { %v2553_v52 = vpop.f32.mrb[95].mxu1  ;;  %v7340_v49 = vld [vmem:[#allocation2 + $0x68] sm:$0xff]   ;;  %6655 = vmatpush3.bf16.msra.mxu0 %v7338_v36  ;;  %v7342_v62 = vld [vmem:[#allocation2 + $0x70] sm:$0xff]   ;;  %v8989_v15 = vld [vmem:[#allocation2 + $0x80] sm:$0xff]  }
 0x2ce   : > { %6656 = vmatprep.subr.bf16.mxu0 %v7340_v49 }
 0x2d1   : > { %6657 = vmatpush3.bf16.msra.mxu0 %v7340_v49 }
 0x2d2   : > { %6658 = vmatprep.subr.bf16.mxu0 %v7342_v62 }
 0x2d5   : > { %6659 = vmatpush3.bf16.msra.mxu0 %v7342_v62 }
 0x2d6   : > { %v2715_v4 = vpop.f32.mrb[96].mxu0 }
 0x2d7   : > { %v2745_v29 = vadd.f32 %v2715_v4, %v2555_v22  ;;  %v2717_v25 = vpop.f32.mrb[97].mxu0 }
 0x2d8   : > { %v2718_v44 = vpop.f32.mrb[98].mxu0 }
 0x2d9   : > { %v2759_v17 = vadd.f32 %v6168_v50, %v2745_v29  ;;  %v2746_v33 = vadd.f32 %v2718_v44, %v2556_v11  ;;  %v2720_v53 = vpop.f32.mrb[99].mxu0 }
 0x2db   : > { %v2760_v13 = vadd.f32 %v6168_v50, %v2746_v33  ;;  %v2766_v51 = vmax.f32 %v2759_v17, 0.0 }
 0x2dd   : > { %v2767_v27 = vmax.f32 %v2760_v13, 0.0  ;;  %v7341_v13 = vld [vmem:[#allocation2 + $0xc8] sm:$0xff]  }
 0x2de   : > { %v2723_v24 = vpop.f32.mrb[100].mxu0 }
 0x2df   : > { %v7160_v63 = vpack.c.bf16 %v2767_v27, %v2766_v51  ;;  %v2747_v8 = vadd.f32 %v2723_v24, %v2557_v9  ;;  %v2725_v45 = vpop.f32.mrb[101].mxu0 }
 0x2e0   : > { %v2726_v46 = vpop.f32.mrb[102].mxu0 }
 0x2e1   : > { %v2761_v2 = vadd.f32 %v6168_v50, %v2747_v8  ;;  %v2748_v21 = vadd.f32 %v2726_v46, %v2558_v14  ;;  %v2728_v26 = vpop.f32.mrb[103].mxu0  ;;  %7161 = vmatprep.subr.bf16.mxu1 %v7160_v63 }
 0x2e2   : > { %7163 = vmatpush3.bf16.msra.mxu1 %v7160_v63 }
 0x2e3   : > { %v2762_v12 = vadd.f32 %v6168_v50, %v2748_v21  ;;  %v2768_v43 = vmax.f32 %v2761_v2, 0.0 }
 0x2e5   : > { %v2769_v40 = vmax.f32 %v2762_v12, 0.0 }
 0x2e6   : > { %v2731_v18 = vpop.f32.mrb[104].mxu0 }
 0x2e7   : > { %v7164_v41 = vpack.c.bf16 %v2769_v40, %v2768_v43  ;;  %v2749_v22 = vadd.f32 %v2731_v18, %v2559_v28  ;;  %v2733_v30 = vpop.f32.mrb[105].mxu0  ;;  %v9425_v28 = vld [vmem:[#allocation12_spill] sm:$0xff] }
 0x2e8   : > { %v2734_v55 = vpop.f32.mrb[106].mxu0 }
 0x2e9   : > { %v2763_v56 = vadd.f32 %v6168_v50, %v2749_v22  ;;  %v2750_v11 = vadd.f32 %v2734_v55, %v2560_v57  ;;  %v2736_v23 = vpop.f32.mrb[107].mxu0  ;;  %7165 = vmatprep.subr.bf16.mxu1 %v7164_v41  ;;  %v7331_v57 = vld [vmem:[#allocation2 + $0x20] sm:$0xff]  }
 0x2ea   : > { %7167 = vmatpush3.bf16.msra.mxu1 %v7164_v41 }
 0x2eb   : > { %v2764_v42 = vadd.f32 %v6168_v50, %v2750_v11  ;;  %v2770_v3 = vmax.f32 %v2763_v56, 0.0 }
 0x2ed   : > { %v2771_v5 = vmax.f32 %v2764_v42, 0.0 }
 0x2ee   : > { %v2739_v61 = vpop.f32.mrb[108].mxu0 }
 0x2ef   : > { %v7168_v32 = vpack.c.bf16 %v2771_v5, %v2770_v3  ;;  %v2751_v37 = vadd.f32 %v2739_v61, %v2561_v59  ;;  %v2741_v9 = vpop.f32.mrb[109].mxu0  ;;  %v7344_v59 = vld [vmem:[#allocation2 + $0x78] sm:$0xff]  }
 0x2f0   : > { %v2742_v54 = vpop.f32.mrb[110].mxu0  ;;  %6660 = vmatprep.subr.bf16.mxu0 %v7344_v59  ;;  %v7345_v9 = vld [vmem:[#allocation2 + $0xd8] sm:$0xff]  }
 0x2f1   : > { %v2765_v58 = vadd.f32 %v6168_v50, %v2751_v37  ;;  %v2743_v19 = vpop.f32.mrb[111].mxu0  ;;  %7169 = vmatprep.subr.bf16.mxu1 %v7168_v32  ;;  %6661 = vmatpush3.bf16.msra.mxu0 %v7344_v59 }
 0x2f2   : > { %7171 = vmatpush3.bf16.msra.mxu1 %v7168_v32  ;;  %6686 = vmatprep.subr.bf16.mxu0 %v8989_v15 }
 0x2f3   : > { %v2772_v14 = vmax.f32 %v2765_v58, 0.0 }
 0x2f5   : > { %6618 = vmatprep.subr.msk.mxu1 %vm2231_vm7, %v2772_v14 }
 0x2f6   : > { %6619 = vmatpush3.msk.msra.mxu1 %vm2231_vm7, %v2772_v14 }
 0x2f7   : > { %6621 = vmatmul.mubr.msk.f32.vlgmr.msra.gmra.mrb[96].mxu1 %vm2773_vm9, %v9420_v31  ;;  %7173 = vmatprep.subr.bf16.mxu1 %v7160_v63 }
 0x2f8   : > { %7175 = vmatpush3.bf16.msra.mxu1 %v7160_v63  ;;  %6623 = vmatprep.mubr.msk.f32.mxu1 %vm2773_vm9, %v9421_v48 }
 0x2f9   : > { %7177 = vmatprep.subr.bf16.mxu1 %v7164_v41 }
 0x2fb   : > { %6624 = vmatmul.mubr.msk.f32.gmra.mrb[98].mxu1 %vm2773_vm9, %v9422_v7  ;;  %v7347_v7 = vld [vmem:[#allocation2 + $0xe0] sm:$0xff]  }
 0x2fc   : > { %7179 = vmatpush3.bf16.msra.mxu1 %v7164_v41  ;;  %6640 = vmatprep.mubr.msk.f32.mxu1 %vm2773_vm9, %v9423_v20  ;;  %v7343_v41 = vld [vmem:[#allocation2 + $0xd0] sm:$0xff]  }
 0x2fd   : > { %7181 = vmatprep.subr.bf16.mxu1 %v7168_v32 }
 0x300   : > { %7183 = vmatpush3.bf16.msra.mxu1 %v7168_v32 }
 0x301   : > { %6638 = vmatprep.subr.msk.mxu1 %vm2231_vm7, %v2772_v14 }
 0x304   : > { %6639 = vmatpush3.msk.msra.mxu1 %vm2231_vm7, %v2772_v14 }
 0x305   : > { %6641 = vmatmul.mubr.msk.f32.vlgmr.msra.gmra.mrb[100].mxu1 %vm2773_vm9, %v9424_v0  ;;  %6666 = vmatprep.subr.bf16.mxu1 %v7326_v16 }
 0x306   : > { %6643 = vmatprep.mubr.msk.f32.mxu1 %vm2773_vm9, %v9425_v28  ;;  %6667 = vmatpush3.bf16.msra.mxu1 %v7326_v16 }
 0x307   : > { %6668 = vmatprep.subr.bf16.mxu1 %v7327_v10 }
 0x309   : > { %6644 = vmatmul.mubr.msk.f32.gmra.mrb[102].mxu1 %vm2773_vm9, %v9426_v1 }
 0x30a   : > { %6669 = vmatpush3.bf16.msra.mxu1 %v7327_v10 }
 0x30b   : > { %6670 = vmatprep.subr.bf16.mxu1 %v7328_v35 }
 0x30e   : > { %6671 = vmatpush3.bf16.msra.mxu1 %v7328_v35 }
 0x30f   : > { %6672 = vmatprep.subr.bf16.mxu1 %v7329_v47 }
 0x312   : > { %6673 = vmatpush3.bf16.msra.mxu1 %v7329_v47  ;;  %v7348_v47 = vld [vmem:[#allocation2 + $0x88] sm:$0xff]  }
 0x313   : > { %6674 = vmatprep.subr.bf16.mxu1 %v7331_v57 }
 0x316   : > { %6675 = vmatpush3.bf16.msra.mxu1 %v7331_v57 }
 0x317   : > { %6676 = vmatprep.subr.bf16.mxu1 %v7333_v38 }
 0x31a   : > { %6677 = vmatpush3.bf16.msra.mxu1 %v7333_v38 }
 0x31b   : > { %6678 = vmatprep.subr.bf16.mxu1 %v7335_v34 }
 0x31e   : > { %6679 = vmatpush3.bf16.msra.mxu1 %v7335_v34 }
 0x31f   : > { %6680 = vmatprep.subr.bf16.mxu1 %v7337_v39 }
 0x322   : > { %6681 = vmatpush3.bf16.msra.mxu1 %v7337_v39  ;;  %v7349_v39 = vld [vmem:[#allocation2 + $0xe8] sm:$0xff]  }
 0x323   : > { %6706 = vmatprep.subr.bf16.mxu1 %v7339_v60 }
 0x3ca   : > { %v6622_v52 = vpop.f32.mrb[96].mxu1 }
 0x3cb   : > { %v2852_v4 = vpop.f32.mrb[97].mxu1 }
 0x3cc   : > { %v2964_v50 = vpack.c.bf16 %v6622_v52, %v2852_v4 }
 0x3ce   : > { %v6625_v29 = vpop.f32.mrb[98].mxu1  ;;  %6682 = vmatprep.mubr.bf16.mxu1 %v2964_v50  ;;  %v3211_v25 = vshrl.u32 %v2964_v50, 16  ;;  %v3213_v44 = vshll.u32 %v2964_v50, 16  ;;  %v3479_v24 = vrot.slane %v2964_v50, 1  ;;  %v3984_v26 = vrot.slane %v2964_v50, 2  ;;  %v7350_v50 = vld [vmem:[#allocation2 + $0x90] sm:$0xff]  }
 0x3cf   : > { %v2862_v17 = vpop.f32.mrb[99].mxu1 }
 0x3d0   : > { %v8992_v33 = vpack.c.bf16 %v2862_v17, %v2862_v17  ;;  %v8994_v53 = vpack.c.bf16 %v6625_v29, %v2862_v17  ;;  %v3215_v51 = vrot.slane %v3213_v44, 1  ;;  %v3724_v27 = vrot.slane %v3211_v25, 1 }
 0x3d1   : > { %v3725_v63 = vrot.slane %v3213_v44, 2  ;;  %v4226_v8 = vrot.slane %v3211_v25, 2  ;;  %v4227_v45 = vrot.slane %v3213_v44, 3 }
 0x3d2   : > { %v3218_v46 = vshll.u32 %v8992_v33, 16  ;;  %v3728_v2 = vshrl.u32 %v8994_v53, 16  ;;  %v3731_v21 = vshll.u32 %v8994_v53, 16  ;;  %6683 = vmatmul.mubr.bf16.vlgmr.msra.gmra.mrb[104].mxu1 %v8992_v33  ;;  %v3216_v12 = vor.u32 %v3215_v51, %v3211_v25 }
 0x3d3   : > { %6707 = vmatpush3.bf16.msra.mxu1 %v7339_v60  ;;  %v3480_v43 = vrot.slane %v8994_v53, 1  ;;  %v3726_v40 = vor.u32 %v3725_v63, %v3724_v27  ;;  %v3985_v18 = vrot.slane %v8994_v53, 2  ;;  %v4228_v56 = vor.u32 %v4227_v45, %v4226_v8  ;;  %v7351_v27 = vld [vmem:[#allocation2 + $0xf0] sm:$0xff]   ;;  %v7352_v8 = vld [vmem:[#allocation2 + $0x98] sm:$0xff]  }
 0x3d4   : > { %6708 = vmatprep.subr.bf16.mxu1 %v7341_v13  ;;  %v9002_v22 = vrot.slane %v3218_v46, 1  ;;  %v3730_v30 = vrot.slane %v3728_v2, 1  ;;  %v3733_v55 = vrot.slane %v3731_v21, 2  ;;  %v4229_v42 = vrot.slane %v3728_v2, 2  ;;  %v7353_v46 = vld [vmem:[#allocation2 + $0xf8] sm:$0xff]   ;;  %v7354_v2 = vld [vmem:[#allocation2 + $0xa0] sm:$0xff]  }
 0x3d5   : > { %v9007_v11 = vsel %vm1471_vm5, %v3479_v24, %v3480_v43  ;;  %v9012_v23 = vsel %vm2231_vm7, %v3984_v26, %v3985_v18  ;;  %v4230_v3 = vrot.slane %v3731_v21, 3  ;;  %v7355_v21 = vld [vmem:[#allocation2 + $0x140] sm:$0xff]   ;;  %v7413_v53 = vld [vmem:[#allocation2 + $0x2b8] sm:$0xff]  }
 0x3d6   : > { %v3221_v5 = vsel %vm1028_vm4, %v3216_v12, %v9002_v22  ;;  %v9016_v61 = vor.u32 %v3733_v55, %v3730_v30  ;;  %v7356_v12 = vld [vmem:[#allocation2 + $0xa8] sm:$0xff]   ;;  %v7358_v30 = vld [vmem:[#allocation2 + $0xb0] sm:$0xff]  }
 0x3d7   : > { %6709 = vmatpush3.bf16.msra.mxu1 %v7341_v13  ;;  %v9018_v32 = vor.u32 %v4230_v3, %v4229_v42  ;;  %v7359_v55 = vld [vmem:[#allocation2 + $0x150] sm:$0xff]   ;;  %v7361_v42 = vld [vmem:[#allocation2 + $0x158] sm:$0xff]   ;;  %v3222_v3 = vshrl.u32 %v8992_v33, 16 }
 0x3d8   : > { %6710 = vmatprep.subr.bf16.mxu1 %v7343_v41  ;;  %v6642_v37 = vpop.f32.mrb[100].mxu1  ;;  %v9022_v54 = vsel %vm1828_vm6, %v3726_v40, %v9016_v61  ;;  %v7367_v33 = vld [vmem:[#allocation2 + $0x170] sm:$0xff]  }
 0x3d9   : > { %v2945_v58 = vpop.f32.mrb[101].mxu1  ;;  %v9026_v19 = vsel %vm2580_vm8, %v4228_v56, %v9018_v32  ;;  %v7360_v56 = vld [vmem:[#allocation2 + $0xb8] sm:$0xff]  }
 0x3da   : > { %v2982_v14 = vpack.c.bf16 %v6642_v37, %v2945_v58  ;;  %v7363_v37 = vld [vmem:[#allocation2 + $0x160] sm:$0xff]   ;;  %v7364_v58 = vld [vmem:[#allocation2 + $0x108] sm:$0xff]  }
 0x3db   : > { %6711 = vmatpush3.bf16.msra.mxu1 %v7343_v41  ;;  %v7357_v41 = vld [vmem:[#allocation2 + $0x148] sm:$0xff]  }
 0x3dc   : > { %v6645_v48 = vpop.f32.mrb[102].mxu1  ;;  %6712 = vmatprep.subr.bf16.mxu1 %v7345_v9  ;;  %6662 = vmatprep.mubr.bf16.mxu0 %v2982_v14  ;;  %v3344_v16 = vshrl.u32 %v2982_v14, 16  ;;  %v3346_v10 = vshll.u32 %v2982_v14, 16  ;;  %v3603_v38 = vrot.slane %v2982_v14, 1  ;;  %v4105_v49 = vrot.slane %v2982_v14, 2  ;;  %v7365_v14 = vld [vmem:[#allocation2 + $0x168] sm:$0xff]  }
 0x3dd   : > { %v2955_v28 = vpop.f32.mrb[103].mxu1 }
 0x3de   : > { %v2983_v35 = vpack.c.bf16 %v2955_v28, %v2955_v28  ;;  %v9028_v1 = vpack.c.bf16 %v6645_v48, %v2955_v28  ;;  %v3348_v57 = vrot.slane %v3346_v10, 1  ;;  %v3854_v60 = vrot.slane %v3344_v16, 1  ;;  %v7366_v48 = vld [vmem:[#allocation2 + $0x110] sm:$0xff]   ;;  %v7373_v28 = vld [vmem:[#allocation2 + $0x1c8] sm:$0xff]  }
 0x3df   : > { %6713 = vmatpush3.bf16.msra.mxu1 %v7345_v9  ;;  %v3855_v62 = vrot.slane %v3346_v10, 2  ;;  %v3224_v9 = vor.u32 %v3222_v3, %v9002_v22  ;;  %v7369_v22 = vld [vmem:[#allocation2 + $0x178] sm:$0xff]   ;;  %v7371_v10 = vld [vmem:[#allocation2 + $0x1c0] sm:$0xff]  }
 0x3e0   : > { %v3351_v34 = vshll.u32 %v2983_v35, 16  ;;  %6663 = vmatmul.mubr.bf16.vlgmr.msra.gmra.mrb[112].mxu0 %v2983_v35  ;;  %6714 = vmatprep.subr.bf16.mxu1 %v7347_v7  ;;  %v3604_v36 = vrot.slane %v9028_v1, 1  ;;  %v3858_v59 = vshrl.u32 %v9028_v1, 16  ;;  %v3861_v52 = vshll.u32 %v9028_v1, 16 }
 0x3e1   : > { %6687 = vmatpush3.bf16.msra.mxu0 %v8989_v15  ;;  %6702 = vmatprep.mubr.bf16.mxu0 %v3221_v5  ;;  %v4106_v4 = vrot.slane %v9028_v1, 2  ;;  %v3349_v29 = vor.u32 %v3348_v57, %v3344_v16  ;;  %v3856_v24 = vor.u32 %v3855_v62, %v3854_v60  ;;  %v3355_v26 = vshrl.u32 %v2983_v35, 16  ;;  %v7362_v5 = vld [vmem:[#allocation2 + $0x100] sm:$0xff]   ;;  %v7374_v35 = vld [vmem:[#allocation2 + $0x130] sm:$0xff]   ;;  %v7376_v57 = vld [vmem:[#allocation2 + $0x138] sm:$0xff]  }
 0x3e2   : > { %6688 = vmatprep.subr.bf16.mxu0 %v7348_v47  ;;  %v3353_v25 = vrot.slane %v3351_v34, 1  ;;  %v3605_v44 = vsel %vm1471_vm5, %v3603_v38, %v3604_v36  ;;  %v3860_v17 = vrot.slane %v3858_v59, 1  ;;  %v3863_v13 = vrot.slane %v3861_v52, 2  ;;  %v7370_v16 = vld [vmem:[#allocation2 + $0x120] sm:$0xff]   ;;  %v7377_v38 = vld [vmem:[#allocation2 + $0x1d8] sm:$0xff]   ;;  %v7381_v60 = vld [vmem:[#allocation2 + $0x1e8] sm:$0xff]  }
 0x3e3   : > { %6715 = vmatpush3.bf16.msra.mxu1 %v7347_v7  ;;  %v9041_v15 = vsel %vm2231_vm7, %v4105_v49, %v4106_v4  ;;  %v7368_v7 = vld [vmem:[#allocation2 + $0x118] sm:$0xff]   ;;  %v7378_v34 = vld [vmem:[#allocation2 + $0x180] sm:$0xff]   ;;  %v7382_v49 = vld [vmem:[#allocation2 + $0x190] sm:$0xff]  }
 0x3e4   : > { %6716 = vmatprep.subr.bf16.mxu1 %v7349_v39  ;;  %v3354_v51 = vsel %vm1028_vm4, %v3349_v29, %v3353_v25  ;;  %v9044_v63 = vor.u32 %v3863_v13, %v3860_v17  ;;  %v3357_v40 = vor.u32 %v3355_v26, %v3353_v25  ;;  %v7383_v62 = vld [vmem:[#allocation2 + $0x1f0] sm:$0xff]   ;;  %v7384_v59 = vld [vmem:[#allocation2 + $0x198] sm:$0xff]   ;;  %v7389_v29 = vld [vmem:[#allocation2 + $0x248] sm:$0xff]  }
 0x3e5   : > { %6689 = vmatpush3.bf16.msra.mxu0 %v7348_v47  ;;  %6722 = vmatprep.mubr.bf16.mxu1 %v3354_v51  ;;  %v7375_v47 = vld [vmem:[#allocation2 + $0x1d0] sm:$0xff]   ;;  %v7385_v52 = vld [vmem:[#allocation2 + $0x1f8] sm:$0xff]   ;;  %v7394_v51 = vld [vmem:[#allocation2 + $0x200] sm:$0xff]  }
 0x3e6   : > { %6690 = vmatprep.subr.bf16.mxu0 %v7350_v50  ;;  %v9048_v45 = vsel %vm1828_vm6, %v3856_v24, %v9044_v63  ;;  %v7390_v25 = vld [vmem:[#allocation2 + $0x1b0] sm:$0xff]   ;;  %v7392_v17 = vld [vmem:[#allocation2 + $0x1b8] sm:$0xff]   ;;  %v7396_v24 = vld [vmem:[#allocation2 + $0x208] sm:$0xff]  }
 0x3e7   : > { %6717 = vmatpush3.bf16.msra.mxu1 %v7349_v39  ;;  %v7379_v39 = vld [vmem:[#allocation2 + $0x1e0] sm:$0xff]   ;;  %v7393_v13 = vld [vmem:[#allocation2 + $0x258] sm:$0xff]   ;;  %v7408_v1 = vld [vmem:[#allocation2 + $0x290] sm:$0xff]  }
 0x3e8   : > { %6718 = vmatprep.subr.bf16.mxu1 %v7351_v27  ;;  %v7405_v26 = vld [vmem:[#allocation2 + $0x238] sm:$0xff]  }
 0x3e9   : > { %6691 = vmatpush3.bf16.msra.mxu0 %v7350_v50  ;;  %v7386_v50 = vld [vmem:[#allocation2 + $0x1a0] sm:$0xff]  }
 0x3ea   : > { %6692 = vmatprep.subr.bf16.mxu0 %v7352_v8 }
 0x3eb   : > { %6719 = vmatpush3.bf16.msra.mxu1 %v7351_v27  ;;  %v7395_v27 = vld [vmem:[#allocation2 + $0x260] sm:$0xff]  }
 0x3ec   : > { %6720 = vmatprep.subr.bf16.mxu1 %v7353_v46 }
 0x3ed   : > { %6693 = vmatpush3.bf16.msra.mxu0 %v7352_v8  ;;  %v7399_v8 = vld [vmem:[#allocation2 + $0x270] sm:$0xff]  }
 0x3ee   : > { %6694 = vmatprep.subr.bf16.mxu0 %v7354_v2 }
 0x3ef   : > { %6721 = vmatpush3.bf16.msra.mxu1 %v7353_v46  ;;  %v7401_v46 = vld [vmem:[#allocation2 + $0x278] sm:$0xff]  }
 0x3f0   : > { %6746 = vmatprep.subr.bf16.mxu1 %v7355_v21 }
 0x3f1   : > { %6695 = vmatpush3.bf16.msra.mxu0 %v7354_v2  ;;  %v7402_v2 = vld [vmem:[#allocation2 + $0x220] sm:$0xff]  }
 0x3f2   : > { %6723 = vmatmul.mubr.bf16.vlgmr.msra.gmra.mrb[108].mxu1 %v3357_v40  ;;  %6696 = vmatprep.subr.bf16.mxu0 %v7356_v12  ;;  %v7407_v40 = vld [vmem:[#allocation2 + $0x288] sm:$0xff]  }
 0x3f3   : > { %6747 = vmatpush3.bf16.msra.mxu1 %v7355_v21  ;;  %6762 = vmatprep.mubr.bf16.mxu1 %v3605_v44  ;;  %v7391_v44 = vld [vmem:[#allocation2 + $0x250] sm:$0xff]  }
 0x3f4   : > { %6748 = vmatprep.subr.bf16.mxu1 %v7357_v41  ;;  %v7404_v21 = vld [vmem:[#allocation2 + $0x230] sm:$0xff]  }
 0x3f5   : > { %6697 = vmatpush3.bf16.msra.mxu0 %v7356_v12  ;;  %v7406_v12 = vld [vmem:[#allocation2 + $0x280] sm:$0xff]  }
 0x3f6   : > { %6698 = vmatprep.subr.bf16.mxu0 %v7358_v30 }
 0x3f7   : > { %6749 = vmatpush3.bf16.msra.mxu1 %v7357_v41  ;;  %v7410_v41 = vld [vmem:[#allocation2 + $0x2a0] sm:$0xff]  }
 0x3f8   : > { %6750 = vmatprep.subr.bf16.mxu1 %v7359_v55 }
 0x3f9   : > { %6699 = vmatpush3.bf16.msra.mxu0 %v7358_v30  ;;  %v7411_v30 = vld [vmem:[#allocation2 + $0x2a8] sm:$0xff]  }
 0x3fa   : > { %6700 = vmatprep.subr.bf16.mxu0 %v7360_v56 }
 0x3fb   : > { %6751 = vmatpush3.bf16.msra.mxu1 %v7359_v55  ;;  %v7412_v55 = vld [vmem:[#allocation2 + $0x2b0] sm:$0xff]  }
 0x3fc   : > { %6752 = vmatprep.subr.bf16.mxu1 %v7361_v42 }
 0x3fd   : > { %6701 = vmatpush3.bf16.msra.mxu0 %v7360_v56 }
 0x3fe   : > { %6726 = vmatprep.subr.bf16.mxu0 %v7362_v5 }
 0x3ff   : > { %6753 = vmatpush3.bf16.msra.mxu1 %v7361_v42 }
 0x400   : > { %6703 = vmatmul.mubr.bf16.vlgmr.msra.gmra.mrb[116].mxu0 %v3224_v9  ;;  %6754 = vmatprep.subr.bf16.mxu1 %v7363_v37 }
 0x401   : > { %6727 = vmatpush3.bf16.msra.mxu0 %v7362_v5  ;;  %6742 = vmatprep.mubr.bf16.mxu0 %v9007_v11  ;;  %v7372_v11 = vld [vmem:[#allocation2 + $0x128] sm:$0xff]  }
 0x402   : > { %6728 = vmatprep.subr.bf16.mxu0 %v7364_v58 }
 0x403   : > { %6755 = vmatpush3.bf16.msra.mxu1 %v7363_v37 }
 0x404   : > { %6756 = vmatprep.subr.bf16.mxu1 %v7365_v14 }
 0x405   : > { %6729 = vmatpush3.bf16.msra.mxu0 %v7364_v58 }
 0x406   : > { %6730 = vmatprep.subr.bf16.mxu0 %v7366_v48 }
 0x407   : > { %6757 = vmatpush3.bf16.msra.mxu1 %v7365_v14 }
 0x408   : > { %6758 = vmatprep.subr.bf16.mxu1 %v7367_v33 }
 0x409   : > { %6731 = vmatpush3.bf16.msra.mxu0 %v7366_v48 }
 0x40a   : > { %6732 = vmatprep.subr.bf16.mxu0 %v7368_v7 }
 0x40b   : > { %6759 = vmatpush3.bf16.msra.mxu1 %v7367_v33 }
 0x40c   : > { %6760 = vmatprep.subr.bf16.mxu1 %v7369_v22 }
 0x40d   : > { %6733 = vmatpush3.bf16.msra.mxu0 %v7368_v7 }
 0x40e   : > { %6734 = vmatprep.subr.bf16.mxu0 %v7370_v16 }
 0x40f   : > { %6761 = vmatpush3.bf16.msra.mxu1 %v7369_v22 }
 0x410   : > { %6786 = vmatprep.subr.bf16.mxu1 %v7371_v10 }
 0x411   : > { %6735 = vmatpush3.bf16.msra.mxu0 %v7370_v16 }
 0x412   : > { %6763 = vmatmul.mubr.bf16.vlgmr.msra.gmra.mrb[112].mxu1 %v3604_v36  ;;  %6736 = vmatprep.subr.bf16.mxu0 %v7372_v11  ;;  %v7380_v36 = vld [vmem:[#allocation2 + $0x188] sm:$0xff]  }
 0x413   : > { %6787 = vmatpush3.bf16.msra.mxu1 %v7371_v10  ;;  %6802 = vmatprep.mubr.bf16.mxu1 %v9048_v45  ;;  %v7400_v45 = vld [vmem:[#allocation2 + $0x218] sm:$0xff]  }
 0x414   : > { %6788 = vmatprep.subr.bf16.mxu1 %v7373_v28 }
 0x415   : > { %6737 = vmatpush3.bf16.msra.mxu0 %v7372_v11 }
 0x416   : > { %6738 = vmatprep.subr.bf16.mxu0 %v7374_v35 }
 0x417   : > { %6789 = vmatpush3.bf16.msra.mxu1 %v7373_v28 }
 0x418   : > { %6790 = vmatprep.subr.bf16.mxu1 %v7375_v47 }
 0x419   : > { %6739 = vmatpush3.bf16.msra.mxu0 %v7374_v35 }
 0x41a   : > { %6740 = vmatprep.subr.bf16.mxu0 %v7376_v57 }
 0x41b   : > { %6791 = vmatpush3.bf16.msra.mxu1 %v7375_v47 }
 0x41c   : > { %6792 = vmatprep.subr.bf16.mxu1 %v7377_v38 }
 0x41d   : > { %6741 = vmatpush3.bf16.msra.mxu0 %v7376_v57 }
 0x41e   : > { %6766 = vmatprep.subr.bf16.mxu0 %v7378_v34 }
 0x41f   : > { %6793 = vmatpush3.bf16.msra.mxu1 %v7377_v38 }
 0x420   : > { %6743 = vmatmul.mubr.bf16.vlgmr.msra.gmra.mrb[120].mxu0 %v3480_v43  ;;  %6794 = vmatprep.subr.bf16.mxu1 %v7379_v39  ;;  %v7387_v43 = vld [vmem:[#allocation2 + $0x240] sm:$0xff]  }
 0x421   : > { %6767 = vmatpush3.bf16.msra.mxu0 %v7378_v34  ;;  %6782 = vmatprep.mubr.bf16.mxu0 %v9022_v54  ;;  %v7388_v54 = vld [vmem:[#allocation2 + $0x1a8] sm:$0xff]  }
 0x422   : > { %6768 = vmatprep.subr.bf16.mxu0 %v7380_v36 }
 0x423   : > { %6795 = vmatpush3.bf16.msra.mxu1 %v7379_v39 }
 0x424   : > { %6796 = vmatprep.subr.bf16.mxu1 %v7381_v60 }
 0x425   : > { %6769 = vmatpush3.bf16.msra.mxu0 %v7380_v36 }
 0x426   : > { %6770 = vmatprep.subr.bf16.mxu0 %v7382_v49 }
 0x427   : > { %6797 = vmatpush3.bf16.msra.mxu1 %v7381_v60 }
 0x428   : > { %6798 = vmatprep.subr.bf16.mxu1 %v7383_v62 }
 0x429   : > { %6771 = vmatpush3.bf16.msra.mxu0 %v7382_v49 }
 0x42a   : > { %6772 = vmatprep.subr.bf16.mxu0 %v7384_v59 }
 0x42b   : > { %6799 = vmatpush3.bf16.msra.mxu1 %v7383_v62 }
 0x42c   : > { %6800 = vmatprep.subr.bf16.mxu1 %v7385_v52 }
 0x42d   : > { %6773 = vmatpush3.bf16.msra.mxu0 %v7384_v59  ;;  %v7416_v59 = vld [vmem:[#allocation4 + $0x40] sm:$0xff]  }
 0x42e   : > { %6774 = vmatprep.subr.bf16.mxu0 %v7386_v50 }
 0x42f   : > { %6801 = vmatpush3.bf16.msra.mxu1 %v7385_v52 }
 0x430   : > { %6826 = vmatprep.subr.bf16.mxu1 %v7387_v43 }
 0x431   : > { %6775 = vmatpush3.bf16.msra.mxu0 %v7386_v50 }
 0x432   : > { %6803 = vmatmul.mubr.bf16.vlgmr.msra.gmra.mrb[116].mxu1 %v9044_v63  ;;  %6776 = vmatprep.subr.bf16.mxu0 %v7388_v54  ;;  %v7398_v63 = vld [vmem:[#allocation2 + $0x210] sm:$0xff]  }
 0x433   : > { %6827 = vmatpush3.bf16.msra.mxu1 %v7387_v43  ;;  %6842 = vmatprep.mubr.bf16.mxu1 %v9041_v15  ;;  %v7397_v15 = vld [vmem:[#allocation2 + $0x268] sm:$0xff]  }
 0x434   : > { %6828 = vmatprep.subr.bf16.mxu1 %v7389_v29 }
 0x435   : > { %6777 = vmatpush3.bf16.msra.mxu0 %v7388_v54  ;;  %v7418_v54 = vld [vmem:[#allocation4 + $0x48] sm:$0xff]  }
 0x436   : > { %6778 = vmatprep.subr.bf16.mxu0 %v7390_v25 }
 0x437   : > { %6829 = vmatpush3.bf16.msra.mxu1 %v7389_v29 }
 0x438   : > { %6830 = vmatprep.subr.bf16.mxu1 %v7391_v44 }
 0x439   : > { %6779 = vmatpush3.bf16.msra.mxu0 %v7390_v25 }
 0x43a   : > { %6780 = vmatprep.subr.bf16.mxu0 %v7392_v17 }
 0x43b   : > { %6831 = vmatpush3.bf16.msra.mxu1 %v7391_v44 }
 0x43c   : > { %6832 = vmatprep.subr.bf16.mxu1 %v7393_v13 }
 0x43d   : > { %6781 = vmatpush3.bf16.msra.mxu0 %v7392_v17 }
 0x43e   : > { %6806 = vmatprep.subr.bf16.mxu0 %v7394_v51 }
 0x43f   : > { %6833 = vmatpush3.bf16.msra.mxu1 %v7393_v13 }
 0x440   : > { %6783 = vmatmul.mubr.bf16.vlgmr.msra.gmra.mrb[124].mxu0 %v9016_v61  ;;  %6834 = vmatprep.subr.bf16.mxu1 %v7395_v27  ;;  %v7403_v61 = vld [vmem:[#allocation2 + $0x228] sm:$0xff]  }
 0x441   : > { %6807 = vmatpush3.bf16.msra.mxu0 %v7394_v51  ;;  %6822 = vmatprep.mubr.bf16.mxu0 %v9012_v23  ;;  %v9427_v23 = vmov 0.0  }
 0x442   : > { %6808 = vmatprep.subr.bf16.mxu0 %v7396_v24 }
 0x443   : > { %6835 = vmatpush3.bf16.msra.mxu1 %v7395_v27 }
 0x444   : > { %6836 = vmatprep.subr.bf16.mxu1 %v7397_v15 }
 0x445   : > { %6809 = vmatpush3.bf16.msra.mxu0 %v7396_v24  ;;  %v7422_v24 = vld [vmem:[#allocation4 + $0x58] sm:$0xff]  }
 0x446   : > { %6810 = vmatprep.subr.bf16.mxu0 %v7398_v63 }
 0x447   : > { %6837 = vmatpush3.bf16.msra.mxu1 %v7397_v15  ;;  %v7424_v15 = vld [vmem:[#allocation4 + $0x60] sm:$0xff]  }
 0x448   : > { %6838 = vmatprep.subr.bf16.mxu1 %v7399_v8 }
 0x449   : > { %6811 = vmatpush3.bf16.msra.mxu0 %v7398_v63  ;;  %v7426_v63 = vld [vmem:[#allocation4 + $0x68] sm:$0xff]  }
 0x44a   : > { %6812 = vmatprep.subr.bf16.mxu0 %v7400_v45 }
 0x44b   : > { %6839 = vmatpush3.bf16.msra.mxu1 %v7399_v8 }
 0x44c   : > { %6840 = vmatprep.subr.bf16.mxu1 %v7401_v46 }
 0x44d   : > { %6813 = vmatpush3.bf16.msra.mxu0 %v7400_v45 }
 0x44e   : > { %6814 = vmatprep.subr.bf16.mxu0 %v7402_v2 }
 0x44f   : > { %6841 = vmatpush3.bf16.msra.mxu1 %v7401_v46 }
 0x450   : > { %6884 = vmatprep.subr.bf16.mxu1 %v9427_v23 }
 0x451   : > { %6815 = vmatpush3.bf16.msra.mxu0 %v7402_v2 }
 0x452   : > { %6843 = vmatmul.mubr.bf16.vlgmr.msra.gmra.mrb[120].mxu1 %v4106_v4  ;;  %6816 = vmatprep.subr.bf16.mxu0 %v7403_v61  ;;  %v7409_v4 = vld [vmem:[#allocation2 + $0x298] sm:$0xff]  }
 0x453   : > { %6885 = vmatpush3.bf16.msra.mxu1 %v7416_v59  ;;  %v7415_v59 = vld [vmem:[#allocation4 + $0x8] sm:$0xff]   ;;  %6900 = vmatprep.mubr.msk.bf16.mxu1 %vm7580_vm11, %v9427_v23 }
 0x454   : > { %6886 = vmatprep.subr.bf16.mxu1 %v9427_v23 }
 0x455   : > { %6817 = vmatpush3.bf16.msra.mxu0 %v7403_v61 }
 0x456   : > { %6818 = vmatprep.subr.bf16.mxu0 %v7404_v21 }
 0x457   : > { %6887 = vmatpush3.bf16.msra.mxu1 %v7418_v54  ;;  %v7428_v54 = vld [vmem:[#allocation4 + $0x70] sm:$0xff]  }
 0x458   : > { %6888 = vmatprep.subr.bf16.mxu1 %v9427_v23 }
 0x459   : > { %6819 = vmatpush3.bf16.msra.mxu0 %v7404_v21 }
 0x45a   : > { %6820 = vmatprep.subr.bf16.mxu0 %v7405_v26 }
 0x45d   : > { %6821 = vmatpush3.bf16.msra.mxu0 %v7405_v26 }
 0x45e   : > { %6846 = vmatprep.subr.bf16.mxu0 %v7406_v12 }
 0x460   : > { %6823 = vmatmul.mubr.bf16.vlgmr.msra.gmra.mrb[128].mxu0 %v3985_v18 }
 0x461   : > { %6847 = vmatpush3.bf16.msra.mxu0 %v7406_v12  ;;  %6862 = vmatprep.mubr.bf16.mxu0 %v9026_v19 }
 0x462   : > { %6848 = vmatprep.subr.bf16.mxu0 %v7407_v40 }
 0x465   : > { %6849 = vmatpush3.bf16.msra.mxu0 %v7407_v40 }
 0x466   : > { %6850 = vmatprep.subr.bf16.mxu0 %v7408_v1 }
 0x469   : > { %6851 = vmatpush3.bf16.msra.mxu0 %v7408_v1 }
 0x46a   : > { %6852 = vmatprep.subr.bf16.mxu0 %v7409_v4 }
 0x46d   : > { %6853 = vmatpush3.bf16.msra.mxu0 %v7409_v4 }
 0x46e   : > { %6854 = vmatprep.subr.bf16.mxu0 %v7410_v41 }
 0x471   : > { %6855 = vmatpush3.bf16.msra.mxu0 %v7410_v41 }
 0x472   : > { %6856 = vmatprep.subr.bf16.mxu0 %v7411_v30 }
 0x475   : > { %6857 = vmatpush3.bf16.msra.mxu0 %v7411_v30 }
 0x476   : > { %6858 = vmatprep.subr.bf16.mxu0 %v7412_v55 }
 0x479   : > { %6859 = vmatpush3.bf16.msra.mxu0 %v7412_v55 }
 0x47a   : > { %6860 = vmatprep.subr.bf16.mxu0 %v7413_v53 }
 0x47d   : > { %6861 = vmatpush3.bf16.msra.mxu0 %v7413_v53 }
 0x480   : > { %6863 = vmatmul.mubr.bf16.vlgmr.msra.gmra.mrb[132].mxu0 %v9018_v32 }
 0x481   : > { %6872 = vmatprep.mubr.msk.f32.mxu0 %vm4347_vm10, %v9419_v6  ;;  %v7420_v6 = vld [vmem:[#allocation4 + $0x50] sm:$0xff]  }
 0x482   : > { %6889 = vmatpush3.bf16.msra.mxu1 %v7420_v6 }
 0x483   : > { %6890 = vmatprep.subr.bf16.mxu1 %v9427_v23 }
 0x486   : > { %6891 = vmatpush3.bf16.msra.mxu1 %v7422_v24  ;;  %v7431_v24 = vld [vmem:[#allocation4 + $0xc8] sm:$0xff]  }
 0x487   : > { %6892 = vmatprep.subr.bf16.mxu1 %v9427_v23 }
 0x48a   : > { %6893 = vmatpush3.bf16.msra.mxu1 %v7424_v15 }
 0x48b   : > { %6894 = vmatprep.subr.bf16.mxu1 %v9427_v23 }
 0x48e   : > { %6895 = vmatpush3.bf16.msra.mxu1 %v7426_v63 }
 0x48f   : > { %6896 = vmatprep.subr.bf16.mxu1 %v9427_v23 }
 0x492   : > { %6897 = vmatpush3.bf16.msra.mxu1 %v7428_v54 }
 0x493   : > { %6898 = vmatprep.subr.bf16.mxu1 %v9427_v23 }
 0x4a5   : > { %v6684_v18 = vpop.f32.mrb[104].mxu1 }
 0x4a6   : > { %v3179_v19 = vpop.f32.mrb[105].mxu1 }
 0x4a7   : > { %v6685_v56 = vpop.f32.mrb[106].mxu1 }
 0x4a8   : > { %v3182_v42 = vpop.f32.mrb[107].mxu1 }
 0x4b3   : > { %v6664_v3 = vpop.f32.mrb[112].mxu0 }
 0x4b4   : > { %v3188_v5 = vadd.f32 %v6684_v18, %v6664_v3  ;;  %v3083_v37 = vpop.f32.mrb[113].mxu0 }
 0x4b5   : > { %v3180_v9 = vadd.f32 %v3179_v19, %v3083_v37  ;;  %v6665_v58 = vpop.f32.mrb[114].mxu0 }
 0x4b6   : > { %v3086_v14 = vpop.f32.mrb[115].mxu0 }
 0x4b7   : > { %v3183_v48 = vadd.f32 %v3182_v42, %v3086_v14 }
 0x4c5   : > { %v6724_v33 = vpop.f32.mrb[108].mxu1 }
 0x4c6   : > { %v3442_v7 = vpop.f32.mrb[109].mxu1 }
 0x4c7   : > { %v6725_v22 = vpop.f32.mrb[110].mxu1 }
 0x4c8   : > { %v3445_v16 = vpop.f32.mrb[111].mxu1 }
 0x4d3   : > { %v6704_v10 = vpop.f32.mrb[116].mxu0 }
 0x4d4   : > { %v3325_v11 = vadd.f32 %v6704_v10, %v3188_v5  ;;  %v3309_v28 = vpop.f32.mrb[117].mxu0  ;;  %v6267_v10 = vld [vmem:[%s9245_s4] ss:$0 sm:$0xff] }
 0x4d5   : > { %v3323_v35 = vadd.f32 %v3309_v28, %v3180_v9  ;;  %v6705_v32 = vpop.f32.mrb[118].mxu0 }
 0x4d6   : > { %v3312_v47 = vpop.f32.mrb[119].mxu0  ;;  %v3458_v57 = vadd.f32 %v6724_v33, %v3325_v11 }
 0x4d7   : > { %v3324_v38 = vadd.f32 %v3312_v47, %v3183_v48  ;;  %v3456_v34 = vadd.f32 %v3442_v7, %v3323_v35 }
 0x4d9   : > { %v3457_v39 = vadd.f32 %v3445_v16, %v3324_v38 }
 0x4e5   : > { %v6764_v36 = vpop.f32.mrb[112].mxu1 }
 0x4e6   : > { %v3690_v60 = vpop.f32.mrb[113].mxu1 }
 0x4e7   : > { %v6765_v49 = vpop.f32.mrb[114].mxu1 }
 0x4e8   : > { %v3693_v62 = vpop.f32.mrb[115].mxu1 }
 0x4f3   : > { %v6744_v52 = vpop.f32.mrb[120].mxu0 }
 0x4f4   : > { %v3582_v50 = vadd.f32 %v6744_v52, %v3458_v57  ;;  %v3566_v43 = vpop.f32.mrb[121].mxu0  ;;  %v7421_v52 = vld [vmem:[#allocation4 + $0x20] sm:$0xff]  }
 0x4f5   : > { %v3580_v29 = vadd.f32 %v3566_v43, %v3456_v34  ;;  %v6745_v25 = vpop.f32.mrb[122].mxu0  ;;  %v7427_v43 = vld [vmem:[#allocation4 + $0x38] sm:$0xff]  }
 0x4f6   : > { %v3569_v44 = vpop.f32.mrb[123].mxu0  ;;  %v3706_v17 = vadd.f32 %v6764_v36, %v3582_v50  ;;  %v7425_v50 = vld [vmem:[#allocation4 + $0x30] sm:$0xff]  }
 0x4f7   : > { %v3581_v13 = vadd.f32 %v3569_v44, %v3457_v39  ;;  %v3704_v51 = vadd.f32 %v3690_v60, %v3580_v29  ;;  %v7430_v29 = vld [vmem:[#allocation4 + $0x78] sm:$0xff]  }
 0x4f8   : > { %6899 = vmatpush3.bf16.msra.mxu1 %v7430_v29  ;;  %v7465_v29 = vld [vmem:[#allocation4 + $0x1d0] sm:$0xff]  }
 0x4f9   : > { %v3705_v27 = vadd.f32 %v3693_v62, %v3581_v13  ;;  %v7414_v62 = vld [vmem:[#allocation4] sm:$0xff]   ;;  %6924 = vmatprep.subr.bf16.mxu1 %v9427_v23 }
 0x505   : > { %v6804_v8 = vpop.f32.mrb[116].mxu1 }
 0x506   : > { %v3950_v45 = vpop.f32.mrb[117].mxu1 }
 0x507   : > { %v6805_v46 = vpop.f32.mrb[118].mxu1 }
 0x508   : > { %v3953_v2 = vpop.f32.mrb[119].mxu1 }
 0x513   : > { %v6784_v61 = vpop.f32.mrb[124].mxu0 }
 0x514   : > { %v3836_v21 = vadd.f32 %v6784_v61, %v3706_v17  ;;  %v3820_v26 = vpop.f32.mrb[125].mxu0  ;;  %v7429_v17 = vld [vmem:[#allocation4 + $0xc0] sm:$0xff]  }
 0x515   : > { %v3834_v12 = vadd.f32 %v3820_v26, %v3704_v51  ;;  %v6785_v40 = vpop.f32.mrb[126].mxu0 }
 0x516   : > { %v3823_v1 = vpop.f32.mrb[127].mxu0  ;;  %v3966_v4 = vadd.f32 %v6804_v8, %v3836_v21  ;;  %v7433_v40 = vld [vmem:[#allocation4 + $0xd0] sm:$0xff]  }
 0x517   : > { %v3835_v41 = vadd.f32 %v3823_v1, %v3705_v27  ;;  %v3964_v30 = vadd.f32 %v3950_v45, %v3834_v12 }
 0x519   : > { %v3965_v55 = vadd.f32 %v3953_v2, %v3835_v41  ;;  %v7432_v2 = vld [vmem:[#allocation4 + $0x80] sm:$0xff]  }
 0x525   : > { %v6844_v53 = vpop.f32.mrb[120].mxu1 }
 0x526   : > { %v4192_v18 = vpop.f32.mrb[121].mxu1 }
 0x527   : > { %v6845_v19 = vpop.f32.mrb[122].mxu1 }
 0x528   : > { %v4195_v56 = vpop.f32.mrb[123].mxu1 }
 0x533   : > { %v6824_v42 = vpop.f32.mrb[128].mxu0 }
 0x534   : > { %v4087_v3 = vadd.f32 %v6824_v42, %v3966_v4  ;;  %v4071_v5 = vpop.f32.mrb[129].mxu0  ;;  %v7437_v42 = vld [vmem:[#allocation4 + $0xe0] sm:$0xff]  }
 0x535   : > { %v4085_v37 = vadd.f32 %v4071_v5, %v3964_v30  ;;  %v6825_v9 = vpop.f32.mrb[130].mxu0  ;;  %v7434_v30 = vld [vmem:[#allocation4 + $0x88] sm:$0xff]  }
 0x536   : > { %v4074_v58 = vpop.f32.mrb[131].mxu0  ;;  %v4208_v14 = vadd.f32 %v6844_v53, %v4087_v3  ;;  %v7438_v3 = vld [vmem:[#allocation4 + $0x98] sm:$0xff]   ;;  %v7439_v5 = vld [vmem:[#allocation4 + $0xe8] sm:$0xff]   ;;  %v7441_v9 = vld [vmem:[#allocation4 + $0xf0] sm:$0xff]  }
 0x537   : > { %v4086_v48 = vadd.f32 %v4074_v58, %v3965_v55  ;;  %v4206_v33 = vadd.f32 %v4192_v18, %v4085_v37  ;;  %v7435_v18 = vld [vmem:[#allocation4 + $0xd8] sm:$0xff]   ;;  %v7440_v37 = vld [vmem:[#allocation4 + $0xa0] sm:$0xff]   ;;  %v7442_v58 = vld [vmem:[#allocation4 + $0xa8] sm:$0xff]  }
 0x539   : > { %v4207_v7 = vadd.f32 %v4195_v56, %v4086_v48  ;;  %v7436_v56 = vld [vmem:[#allocation4 + $0x90] sm:$0xff]  }
 0x553   : > { %v6864_v22 = vpop.f32.mrb[132].mxu0 }
 0x554   : > { %v4333_v16 = vadd.f32 %v6864_v22, %v4208_v14  ;;  %v4317_v11 = vpop.f32.mrb[133].mxu0  ;;  %v7443_v14 = vld [vmem:[#allocation4 + $0xf8] sm:$0xff]  }
 0x555   : > { %v4331_v28 = vadd.f32 %v4317_v11, %v4206_v33  ;;  %v6865_v35 = vpop.f32.mrb[134].mxu0  ;;  %v7444_v33 = vld [vmem:[#allocation4 + $0xb0] sm:$0xff]   ;;  %v7447_v11 = vld [vmem:[#allocation4 + $0x148] sm:$0xff]  }
 0x556   : > { %v4320_v32 = vpop.f32.mrb[135].mxu0  ;;  %v4343_v34 = vadd.f32 %v6267_v10, %v4333_v16  ;;  %v7446_v16 = vld [vmem:[#allocation4 + $0xb8] sm:$0xff]  }
 0x557   : > { %v4341_v47 = vadd.f32 %v6267_v10, %v4331_v28  ;;  %v4332_v57 = vadd.f32 %v4320_v32, %v4207_v7  ;;  %v7445_v7 = vld [vmem:[#allocation4 + $0x140] sm:$0xff]   ;;  %v7449_v32 = vld [vmem:[#allocation4 + $0x150] sm:$0xff]  }
 0x558   : > { %v4346_v49 = vmax.f32 %v4343_v34, 0.0  ;;  %v7448_v28 = vld [vmem:[#allocation4 + $0x100] sm:$0xff]  }
 0x559   : > { %v4342_v38 = vadd.f32 %v6267_v10, %v4332_v57  ;;  %v4344_v39 = vmax.f32 %v4341_v47, 0.0  ;;  %v7450_v47 = vld [vmem:[#allocation4 + $0x108] sm:$0xff]   ;;  %v7451_v57 = vld [vmem:[#allocation4 + $0x158] sm:$0xff]   ;;  %v7453_v34 = vld [vmem:[#allocation4 + $0x160] sm:$0xff]  }
 0x55b   : > { %v4345_v36 = vmax.f32 %v4342_v38, 0.0  ;;  %v7452_v38 = vld [vmem:[#allocation4 + $0x110] sm:$0xff]  }
 0x55d   : > { %v7184_v60 = vpack.c.bf16 %v4345_v36, %v4344_v39  ;;  %v7454_v39 = vld [vmem:[#allocation4 + $0x118] sm:$0xff]   ;;  %v7455_v36 = vld [vmem:[#allocation4 + $0x168] sm:$0xff]  }
 0x55f   : > { %7185 = vmatprep.subr.bf16.mxu0 %v7184_v60 }
 0x560   : > { %7187 = vmatpush3.bf16.msra.mxu0 %v7184_v60 }
 0x561   : > { %6870 = vmatprep.subr.msk.mxu0 %vm1471_vm5, %v4346_v49 }
 0x564   : > { %6871 = vmatpush3.msk.msra.mxu0 %vm1471_vm5, %v4346_v49 }
 0x565   : > { %6873 = vmatmul.mubr.msk.f32.vlgmr.msra.gmra.mrb[136].mxu0 %vm4347_vm10, %v9420_v31  ;;  %7189 = vmatprep.subr.bf16.mxu0 %v7184_v60  ;;  %v7417_v31 = vld [vmem:[#allocation4 + $0x10] sm:$0xff]  }
 0x566   : > { %7191 = vmatpush3.bf16.msra.mxu0 %v7184_v60  ;;  %6881 = vmatprep.mubr.msk.f32.mxu0 %vm4347_vm10, %v9423_v20  ;;  %v7419_v20 = vld [vmem:[#allocation4 + $0x18] sm:$0xff]   ;;  %v7456_v60 = vld [vmem:[#allocation4 + $0x120] sm:$0xff]  }
 0x567   : > { %6879 = vmatprep.subr.msk.mxu0 %vm1471_vm5, %v4346_v49 }
 0x56a   : > { %6880 = vmatpush3.msk.msra.mxu0 %vm1471_vm5, %v4346_v49  ;;  %v7457_v49 = vld [vmem:[#allocation4 + $0x170] sm:$0xff]  }
 0x56b   : > { %6882 = vmatmul.mubr.msk.f32.vlgmr.msra.gmra.mrb[138].mxu0 %vm4347_vm10, %v9424_v0  ;;  %6904 = vmatprep.subr.bf16.mxu0 %v9427_v23  ;;  %v7423_v0 = vld [vmem:[#allocation4 + $0x28] sm:$0xff]  }
 0x56c   : > { %6905 = vmatpush3.bf16.msra.mxu0 %v7414_v62  ;;  %6920 = vmatprep.mubr.msk.bf16.mxu0 %vm7580_vm11, %v9427_v23  ;;  %v7458_v62 = vld [vmem:[#allocation4 + $0x128] sm:$0xff]  }
 0x56d   : > { %6906 = vmatprep.subr.bf16.mxu0 %v9427_v23 }
 0x570   : > { %6907 = vmatpush3.bf16.msra.mxu0 %v7415_v59  ;;  %v7459_v59 = vld [vmem:[#allocation4 + $0x178] sm:$0xff]  }
 0x571   : > { %6908 = vmatprep.subr.bf16.mxu0 %v9427_v23 }
 0x574   : > { %6909 = vmatpush3.bf16.msra.mxu0 %v7417_v31  ;;  %v7460_v31 = vld [vmem:[#allocation4 + $0x130] sm:$0xff]  }
 0x575   : > { %6910 = vmatprep.subr.bf16.mxu0 %v9427_v23 }
 0x578   : > { %6911 = vmatpush3.bf16.msra.mxu0 %v7419_v20  ;;  %v7461_v20 = vld [vmem:[#allocation4 + $0x1c0] sm:$0xff]  }
 0x579   : > { %6912 = vmatprep.subr.bf16.mxu0 %v9427_v23 }
 0x57c   : > { %6913 = vmatpush3.bf16.msra.mxu0 %v7421_v52 }
 0x57d   : > { %6914 = vmatprep.subr.bf16.mxu0 %v9427_v23 }
 0x580   : > { %6915 = vmatpush3.bf16.msra.mxu0 %v7423_v0  ;;  %v7462_v0 = vld [vmem:[#allocation4 + $0x138] sm:$0xff]  }
 0x581   : > { %6916 = vmatprep.subr.bf16.mxu0 %v9427_v23 }
 0x584   : > { %6917 = vmatpush3.bf16.msra.mxu0 %v7425_v50  ;;  %v7463_v50 = vld [vmem:[#allocation4 + $0x1c8] sm:$0xff]  }
 0x585   : > { %6918 = vmatprep.subr.bf16.mxu0 %v9427_v23 }
 0x588   : > { %6919 = vmatpush3.bf16.msra.mxu0 %v7427_v43  ;;  %v7464_v43 = vld [vmem:[#allocation4 + $0x180] sm:$0xff]  }
 0x589   : > { %6944 = vmatprep.subr.bf16.mxu0 %v9427_v23 }
 0x638   : > { %v6874_v25 = vpop.f32.mrb[136].mxu0 }
 0x639   : > { %v4422_v44 = vpop.f32.mrb[137].mxu0 }
 0x63a   : > { %v4510_v13 = vpack.c.bf16 %v4422_v44, %v4422_v44  ;;  %v9106_v51 = vpack.c.bf16 %v6874_v25, %v4422_v44  ;;  %v7466_v25 = vld [vmem:[#allocation4 + $0x188] sm:$0xff]   ;;  %v7467_v44 = vld [vmem:[#allocation4 + $0x1d8] sm:$0xff]  }
 0x63c   : > { %v9109_v6 = vshrl.u32 %v9106_v51, 16  ;;  %v9112_v27 = vshll.u32 %v9106_v51, 16  ;;  %6921 = vmatmul.mubr.bf16.vlgmr.msra.gmra.mrb[140].mxu0 %v4510_v13  ;;  %v4969_v54 = vrot.slane %v9106_v51, 1  ;;  %v7469_v13 = vld [vmem:[#allocation4 + $0x1e0] sm:$0xff]  }
 0x63d   : > { %6945 = vmatpush3.bf16.msra.mxu0 %v7429_v17  ;;  %6960 = vmatprep.mubr.msk.bf16.mxu0 %vm7580_vm11, %v9427_v23  ;;  %v7468_v17 = vld [vmem:[#allocation4 + $0x190] sm:$0xff]  }
 0x63e   : > { %v6883_v15 = vpop.f32.mrb[138].mxu0  ;;  %6946 = vmatprep.subr.bf16.mxu0 %v9427_v23  ;;  %v5186_v63 = vrot.slane %v9109_v6, 1  ;;  %v5187_v8 = vrot.slane %v9112_v27, 2  ;;  %v5622_v45 = vrot.slane %v9109_v6, 2  ;;  %v5623_v61 = vrot.slane %v9112_v27, 3 }
 0x63f   : > { %v4501_v46 = vpop.f32.mrb[139].mxu0  ;;  %v4744_v10 = vrot.slane %v9112_v27, 1  ;;  %v7471_v27 = vld [vmem:[#allocation4 + $0x1e8] sm:$0xff]  }
 0x640   : > { %v4527_v21 = vpack.c.bf16 %v4501_v46, %v4501_v46  ;;  %v9121_v26 = vpack.c.bf16 %v6883_v15, %v4501_v46  ;;  %v9123_v12 = vor.u32 %v5187_v8, %v5186_v63  ;;  %v9125_v1 = vor.u32 %v5623_v61, %v5622_v45  ;;  %v7473_v15 = vld [vmem:[#allocation4 + $0x1f0] sm:$0xff]   ;;  %v7474_v63 = vld [vmem:[#allocation4 + $0x1a8] sm:$0xff]   ;;  %v7475_v8 = vld [vmem:[#allocation4 + $0x1f8] sm:$0xff]  }
 0x641   : > { %6947 = vmatpush3.bf16.msra.mxu0 %v7431_v24  ;;  %v4745_v35 = vor.u32 %v4744_v10, %v9109_v6  ;;  %v7470_v6 = vld [vmem:[#allocation4 + $0x198] sm:$0xff]   ;;  %v7472_v24 = vld [vmem:[#allocation4 + $0x1a0] sm:$0xff]   ;;  %v7476_v45 = vld [vmem:[#allocation4 + $0x1b0] sm:$0xff]  }
 0x642   : > { %v4857_v4 = vshll.u32 %v9121_v26, 16  ;;  %6901 = vmatmul.mubr.bf16.vlgmr.msra.gmra.mrb[124].mxu1 %v4527_v21  ;;  %6948 = vmatprep.subr.bf16.mxu0 %v9427_v23  ;;  %v4855_v41 = vshrl.u32 %v9121_v26, 16  ;;  %v5078_v52 = vrot.slane %v9121_v26, 1  ;;  %v7477_v46 = vld [vmem:[#allocation4 + $0x240] sm:$0xff]   ;;  %v7479_v61 = vld [vmem:[#allocation4 + $0x248] sm:$0xff]  }
 0x643   : > { %6925 = vmatpush3.bf16.msra.mxu1 %v7432_v2  ;;  %6940 = vmatprep.mubr.msk.bf16.mxu1 %vm7580_vm11, %v9427_v23  ;;  %v7478_v2 = vld [vmem:[#allocation4 + $0x1b8] sm:$0xff]   ;;  %v7480_v21 = vld [vmem:[#allocation4 + $0x200] sm:$0xff]  }
 0x644   : > { %6926 = vmatprep.subr.bf16.mxu1 %v9427_v23  ;;  %v9133_v55 = vrot.slane %v4855_v41, 1  ;;  %v9135_v53 = vrot.slane %v4857_v4, 2  ;;  %v4859_v48 = vrot.slane %v4857_v4, 1  ;;  %v7482_v4 = vld [vmem:[#allocation4 + $0x208] sm:$0xff]  }
 0x645   : > { %6949 = vmatpush3.bf16.msra.mxu0 %v7433_v40  ;;  %v7481_v40 = vld [vmem:[#allocation4 + $0x250] sm:$0xff]  }
 0x646   : > { %6950 = vmatprep.subr.bf16.mxu0 %v9427_v23  ;;  %v5298_v19 = vor.u32 %v9135_v53, %v9133_v55  ;;  %v4860_v22 = vor.u32 %v4859_v48, %v4855_v41  ;;  %v7483_v41 = vld [vmem:[#allocation4 + $0x258] sm:$0xff]   ;;  %v7485_v55 = vld [vmem:[#allocation4 + $0x260] sm:$0xff]   ;;  %v7487_v53 = vld [vmem:[#allocation4 + $0x268] sm:$0xff]  }
 0x647   : > { %6927 = vmatpush3.bf16.msra.mxu1 %v7434_v30  ;;  %v7484_v30 = vld [vmem:[#allocation4 + $0x210] sm:$0xff]   ;;  %v7497_v48 = vld [vmem:[#allocation4 + $0x298] sm:$0xff]  }
 0x648   : > { %6928 = vmatprep.subr.bf16.mxu1 %v9427_v23 }
 0x649   : > { %6951 = vmatpush3.bf16.msra.mxu0 %v7435_v18  ;;  %v7488_v18 = vld [vmem:[#allocation4 + $0x220] sm:$0xff]  }
 0x64a   : > { %6952 = vmatprep.subr.bf16.mxu0 %v9427_v23 }
 0x64b   : > { %6929 = vmatpush3.bf16.msra.mxu1 %v7436_v56  ;;  %v7490_v56 = vld [vmem:[#allocation4 + $0x228] sm:$0xff]  }
 0x64c   : > { %6930 = vmatprep.subr.bf16.mxu1 %v9427_v23 }
 0x64d   : > { %6953 = vmatpush3.bf16.msra.mxu0 %v7437_v42  ;;  %v7491_v42 = vld [vmem:[#allocation4 + $0x278] sm:$0xff]  }
 0x64e   : > { %6954 = vmatprep.subr.bf16.mxu0 %v9427_v23 }
 0x64f   : > { %6931 = vmatpush3.bf16.msra.mxu1 %v7438_v3  ;;  %v7492_v3 = vld [vmem:[#allocation4 + $0x230] sm:$0xff]  }
 0x650   : > { %6932 = vmatprep.subr.bf16.mxu1 %v9427_v23 }
 0x651   : > { %6955 = vmatpush3.bf16.msra.mxu0 %v7439_v5  ;;  %v5514_v5 = vrot.slane %v9121_v26, 2  ;;  %v7496_v26 = vld [vmem:[#allocation4 + $0x290] sm:$0xff]  }
 0x652   : > { %6956 = vmatprep.subr.bf16.mxu0 %v9427_v23 }
 0x653   : > { %6933 = vmatpush3.bf16.msra.mxu1 %v7440_v37  ;;  %v7493_v37 = vld [vmem:[#allocation4 + $0x238] sm:$0xff]  }
 0x654   : > { %6934 = vmatprep.subr.bf16.mxu1 %v9427_v23 }
 0x655   : > { %6957 = vmatpush3.bf16.msra.mxu0 %v7441_v9  ;;  %v7494_v9 = vld [vmem:[#allocation4 + $0x280] sm:$0xff]  }
 0x656   : > { %6958 = vmatprep.subr.bf16.mxu0 %v9427_v23 }
 0x657   : > { %6935 = vmatpush3.bf16.msra.mxu1 %v7442_v58  ;;  %v5406_v58 = vrot.slane %v9106_v51, 2  ;;  %v7498_v51 = vld [vmem:[#allocation4 + $0x2a0] sm:$0xff]  }
 0x658   : > { %6936 = vmatprep.subr.bf16.mxu1 %v9427_v23 }
 0x659   : > { %6959 = vmatpush3.bf16.msra.mxu0 %v7443_v14  ;;  %v7495_v14 = vld [vmem:[#allocation4 + $0x288] sm:$0xff]  }
 0x65a   : > { %6984 = vmatprep.subr.bf16.mxu0 %v9427_v23 }
 0x65b   : > { %6937 = vmatpush3.bf16.msra.mxu1 %v7444_v33  ;;  %v7499_v33 = vld [vmem:[#allocation4 + $0x2a8] sm:$0xff]  }
 0x65c   : > { %6961 = vmatmul.mubr.bf16.vlgmr.msra.gmra.mrb[144].mxu0 %v4860_v22  ;;  %6938 = vmatprep.subr.bf16.mxu1 %v9427_v23  ;;  %v7501_v22 = vld [vmem:[#allocation4 + $0x2b8] sm:$0xff]  }
 0x65d   : > { %6985 = vmatpush3.bf16.msra.mxu0 %v7445_v7  ;;  %7000 = vmatprep.mubr.msk.bf16.mxu0 %vm7580_vm11, %v9427_v23  ;;  %v7500_v7 = vld [vmem:[#allocation4 + $0x2b0] sm:$0xff]  }
 0x65e   : > { %6986 = vmatprep.subr.bf16.mxu0 %v9427_v23 }
 0x65f   : > { %6939 = vmatpush3.bf16.msra.mxu1 %v7446_v16 }
 0x660   : > { %6964 = vmatprep.subr.bf16.mxu1 %v9427_v23 }
 0x661   : > { %6987 = vmatpush3.bf16.msra.mxu0 %v7447_v11 }
 0x662   : > { %6941 = vmatmul.mubr.bf16.vlgmr.msra.gmra.mrb[128].mxu1 %v4745_v35  ;;  %6988 = vmatprep.subr.bf16.mxu0 %v9427_v23 }
 0x663   : > { %6965 = vmatpush3.bf16.msra.mxu1 %v7448_v28  ;;  %6980 = vmatprep.mubr.msk.bf16.mxu1 %vm7580_vm11, %v9427_v23 }
 0x664   : > { %6966 = vmatprep.subr.bf16.mxu1 %v9427_v23 }
 0x665   : > { %6989 = vmatpush3.bf16.msra.mxu0 %v7449_v32 }
 0x666   : > { %6990 = vmatprep.subr.bf16.mxu0 %v9427_v23 }
 0x667   : > { %6967 = vmatpush3.bf16.msra.mxu1 %v7450_v47 }
 0x668   : > { %6968 = vmatprep.subr.bf16.mxu1 %v9427_v23 }
 0x669   : > { %6991 = vmatpush3.bf16.msra.mxu0 %v7451_v57 }
 0x66a   : > { %6992 = vmatprep.subr.bf16.mxu0 %v9427_v23 }
 0x66b   : > { %6969 = vmatpush3.bf16.msra.mxu1 %v7452_v38 }
 0x66c   : > { %6970 = vmatprep.subr.bf16.mxu1 %v9427_v23 }
 0x66d   : > { %6993 = vmatpush3.bf16.msra.mxu0 %v7453_v34 }
 0x66e   : > { %6994 = vmatprep.subr.bf16.mxu0 %v9427_v23 }
 0x66f   : > { %6971 = vmatpush3.bf16.msra.mxu1 %v7454_v39 }
 0x670   : > { %6972 = vmatprep.subr.bf16.mxu1 %v9427_v23 }
 0x671   : > { %6995 = vmatpush3.bf16.msra.mxu0 %v7455_v36 }
 0x672   : > { %6996 = vmatprep.subr.bf16.mxu0 %v9427_v23 }
 0x673   : > { %6973 = vmatpush3.bf16.msra.mxu1 %v7456_v60 }
 0x674   : > { %6974 = vmatprep.subr.bf16.mxu1 %v9427_v23 }
 0x675   : > { %6997 = vmatpush3.bf16.msra.mxu0 %v7457_v49 }
 0x676   : > { %6998 = vmatprep.subr.bf16.mxu0 %v9427_v23 }
 0x677   : > { %6975 = vmatpush3.bf16.msra.mxu1 %v7458_v62 }
 0x678   : > { %6976 = vmatprep.subr.bf16.mxu1 %v9427_v23 }
 0x679   : > { %6999 = vmatpush3.bf16.msra.mxu0 %v7459_v59 }
 0x67a   : > { %7024 = vmatprep.subr.bf16.mxu0 %v9427_v23 }
 0x67b   : > { %6977 = vmatpush3.bf16.msra.mxu1 %v7460_v31 }
 0x67c   : > { %7001 = vmatmul.mubr.bf16.vlgmr.msra.gmra.mrb[148].mxu0 %v5078_v52  ;;  %6978 = vmatprep.subr.bf16.mxu1 %v9427_v23 }
 0x67d   : > { %7025 = vmatpush3.bf16.msra.mxu0 %v7461_v20  ;;  %7040 = vmatprep.mubr.msk.bf16.mxu0 %vm7580_vm11, %v9427_v23 }
 0x67e   : > { %7026 = vmatprep.subr.bf16.mxu0 %v9427_v23 }
 0x67f   : > { %6979 = vmatpush3.bf16.msra.mxu1 %v7462_v0 }
 0x680   : > { %7004 = vmatprep.subr.bf16.mxu1 %v9427_v23 }
 0x681   : > { %7027 = vmatpush3.bf16.msra.mxu0 %v7463_v50 }
 0x682   : > { %6981 = vmatmul.mubr.bf16.vlgmr.msra.gmra.mrb[132].mxu1 %v4969_v54  ;;  %7028 = vmatprep.subr.bf16.mxu0 %v9427_v23 }
 0x683   : > { %7005 = vmatpush3.bf16.msra.mxu1 %v7464_v43  ;;  %7020 = vmatprep.mubr.msk.bf16.mxu1 %vm7580_vm11, %v9427_v23 }
 0x684   : > { %7006 = vmatprep.subr.bf16.mxu1 %v9427_v23 }
 0x685   : > { %7029 = vmatpush3.bf16.msra.mxu0 %v7465_v29 }
 0x686   : > { %7030 = vmatprep.subr.bf16.mxu0 %v9427_v23 }
 0x687   : > { %7007 = vmatpush3.bf16.msra.mxu1 %v7466_v25 }
 0x688   : > { %7008 = vmatprep.subr.bf16.mxu1 %v9427_v23 }
 0x689   : > { %7031 = vmatpush3.bf16.msra.mxu0 %v7467_v44 }
 0x68a   : > { %7032 = vmatprep.subr.bf16.mxu0 %v9427_v23 }
 0x68b   : > { %7009 = vmatpush3.bf16.msra.mxu1 %v7468_v17 }
 0x68c   : > { %7010 = vmatprep.subr.bf16.mxu1 %v9427_v23 }
 0x68d   : > { %7033 = vmatpush3.bf16.msra.mxu0 %v7469_v13 }
 0x68e   : > { %7034 = vmatprep.subr.bf16.mxu0 %v9427_v23 }
 0x68f   : > { %7011 = vmatpush3.bf16.msra.mxu1 %v7470_v6 }
 0x690   : > { %7012 = vmatprep.subr.bf16.mxu1 %v9427_v23 }
 0x691   : > { %7035 = vmatpush3.bf16.msra.mxu0 %v7471_v27 }
 0x692   : > { %7036 = vmatprep.subr.bf16.mxu0 %v9427_v23 }
 0x693   : > { %7013 = vmatpush3.bf16.msra.mxu1 %v7472_v24 }
 0x694   : > { %7014 = vmatprep.subr.bf16.mxu1 %v9427_v23 }
 0x695   : > { %7037 = vmatpush3.bf16.msra.mxu0 %v7473_v15 }
 0x696   : > { %7038 = vmatprep.subr.bf16.mxu0 %v9427_v23 }
 0x697   : > { %7015 = vmatpush3.bf16.msra.mxu1 %v7474_v63 }
 0x698   : > { %7016 = vmatprep.subr.bf16.mxu1 %v9427_v23 }
 0x699   : > { %7039 = vmatpush3.bf16.msra.mxu0 %v7475_v8 }
 0x69a   : > { %7064 = vmatprep.subr.bf16.mxu0 %v9427_v23 }
 0x69b   : > { %7017 = vmatpush3.bf16.msra.mxu1 %v7476_v45 }
 0x69c   : > { %7041 = vmatmul.mubr.bf16.vlgmr.msra.gmra.mrb[152].mxu0 %v5298_v19  ;;  %7018 = vmatprep.subr.bf16.mxu1 %v9427_v23  ;;  %v7489_v19 = vld [vmem:[#allocation4 + $0x270] sm:$0xff]  }
 0x69d   : > { %7065 = vmatpush3.bf16.msra.mxu0 %v7477_v46  ;;  %7080 = vmatprep.mubr.msk.bf16.mxu0 %vm7580_vm11, %v9427_v23 }
 0x69e   : > { %7066 = vmatprep.subr.bf16.mxu0 %v9427_v23 }
 0x69f   : > { %7019 = vmatpush3.bf16.msra.mxu1 %v7478_v2 }
 0x6a0   : > { %7044 = vmatprep.subr.bf16.mxu1 %v9427_v23 }
 0x6a1   : > { %7067 = vmatpush3.bf16.msra.mxu0 %v7479_v61 }
 0x6a2   : > { %7021 = vmatmul.mubr.bf16.vlgmr.msra.gmra.mrb[136].mxu1 %v9123_v12  ;;  %7068 = vmatprep.subr.bf16.mxu0 %v9427_v23  ;;  %v7486_v12 = vld [vmem:[#allocation4 + $0x218] sm:$0xff]  }
 0x6a3   : > { %7045 = vmatpush3.bf16.msra.mxu1 %v7480_v21  ;;  %7060 = vmatprep.mubr.msk.bf16.mxu1 %vm7580_vm11, %v9427_v23 }
 0x6a4   : > { %7046 = vmatprep.subr.bf16.mxu1 %v9427_v23 }
 0x6a5   : > { %7069 = vmatpush3.bf16.msra.mxu0 %v7481_v40 }
 0x6a6   : > { %7070 = vmatprep.subr.bf16.mxu0 %v9427_v23 }
 0x6a7   : > { %7047 = vmatpush3.bf16.msra.mxu1 %v7482_v4 }
 0x6a8   : > { %7048 = vmatprep.subr.bf16.mxu1 %v9427_v23 }
 0x6a9   : > { %7071 = vmatpush3.bf16.msra.mxu0 %v7483_v41 }
 0x6aa   : > { %7072 = vmatprep.subr.bf16.mxu0 %v9427_v23 }
 0x6ab   : > { %7049 = vmatpush3.bf16.msra.mxu1 %v7484_v30 }
 0x6ac   : > { %7050 = vmatprep.subr.bf16.mxu1 %v9427_v23 }
 0x6ad   : > { %7073 = vmatpush3.bf16.msra.mxu0 %v7485_v55 }
 0x6ae   : > { %7074 = vmatprep.subr.bf16.mxu0 %v9427_v23 }
 0x6af   : > { %7051 = vmatpush3.bf16.msra.mxu1 %v7486_v12 }
 0x6b0   : > { %7052 = vmatprep.subr.bf16.mxu1 %v9427_v23 }
 0x6b1   : > { %7075 = vmatpush3.bf16.msra.mxu0 %v7487_v53 }
 0x6b2   : > { %7076 = vmatprep.subr.bf16.mxu0 %v9427_v23 }
 0x6b3   : > { %7053 = vmatpush3.bf16.msra.mxu1 %v7488_v18 }
 0x6b4   : > { %7054 = vmatprep.subr.bf16.mxu1 %v9427_v23 }
 0x6b5   : > { %7077 = vmatpush3.bf16.msra.mxu0 %v7489_v19 }
 0x6b6   : > { %7078 = vmatprep.subr.bf16.mxu0 %v9427_v23 }
 0x6b7   : > { %7055 = vmatpush3.bf16.msra.mxu1 %v7490_v56  ;;  %v6362_v56 = vld [vmem:[%s9247_s6] ss:$0 sm:$0xff] }
 0x6b8   : > { %7056 = vmatprep.subr.bf16.mxu1 %v9427_v23 }
 0x6b9   : > { %7079 = vmatpush3.bf16.msra.mxu0 %v7491_v42 }
 0x6bb   : > { %7057 = vmatpush3.bf16.msra.mxu1 %v7492_v3 }
 0x6bc   : > { %7081 = vmatmul.mubr.bf16.vlgmr.msra.gmra.mrb[156].mxu0 %v5514_v5  ;;  %7058 = vmatprep.subr.bf16.mxu1 %v9427_v23 }
 0x6bf   : > { %7059 = vmatpush3.bf16.msra.mxu1 %v7493_v37 }
 0x6c0   : > { %7084 = vmatprep.subr.bf16.mxu1 %v9427_v23 }
 0x6c2   : > { %7061 = vmatmul.mubr.bf16.vlgmr.msra.gmra.mrb[140].mxu1 %v5406_v58 }
 0x6c3   : > { %7085 = vmatpush3.bf16.msra.mxu1 %v7494_v9  ;;  %7100 = vmatprep.mubr.msk.bf16.mxu1 %vm7580_vm11, %v9427_v23 }
 0x6c4   : > { %7086 = vmatprep.subr.bf16.mxu1 %v9427_v23 }
 0x6c7   : > { %7087 = vmatpush3.bf16.msra.mxu1 %v7495_v14 }
 0x6c8   : > { %7088 = vmatprep.subr.bf16.mxu1 %v9427_v23 }
 0x6cb   : > { %7089 = vmatpush3.bf16.msra.mxu1 %v7496_v26 }
 0x6cc   : > { %7090 = vmatprep.subr.bf16.mxu1 %v9427_v23 }
 0x6cf   : > { %7091 = vmatpush3.bf16.msra.mxu1 %v7497_v48 }
 0x6d0   : > { %7092 = vmatprep.subr.bf16.mxu1 %v9427_v23 }
 0x6d3   : > { %7093 = vmatpush3.bf16.msra.mxu1 %v7498_v51 }
 0x6d4   : > { %7094 = vmatprep.subr.bf16.mxu1 %v9427_v23 }
 0x6d7   : > { %7095 = vmatpush3.bf16.msra.mxu1 %v7499_v33 }
 0x6d8   : > { %7096 = vmatprep.subr.bf16.mxu1 %v9427_v23 }
 0x6db   : > { %7097 = vmatpush3.bf16.msra.mxu1 %v7500_v7 }
 0x6dc   : > { %7098 = vmatprep.subr.bf16.mxu1 %v9427_v23 }
 0x6df   : > { %7099 = vmatpush3.bf16.msra.mxu1 %v7501_v22 }
 0x6e2   : > { %7101 = vmatmul.mubr.bf16.vlgmr.msra.gmra.mrb[144].mxu1 %v9125_v1 }
 0x70f   : > { %v4715_v16 = vpop.f32.mrb[140].mxu0 }
 0x710   : > { %v6922_v10 = vpop.f32.mrb[141].mxu0 }
 0x711   : > { %v4718_v11 = vpop.f32.mrb[142].mxu0 }
 0x712   : > { %v6923_v28 = vpop.f32.mrb[143].mxu0 }
 0x715   : > { %v4627_v35 = vpop.f32.mrb[124].mxu1 }
 0x716   : > { %v4716_v32 = vadd.f32 %v4715_v16, %v4627_v35  ;;  %v6902_v47 = vpop.f32.mrb[125].mxu1 }
 0x717   : > { %v4630_v57 = vpop.f32.mrb[126].mxu1 }
 0x718   : > { %v6903_v38 = vpop.f32.mrb[127].mxu1 }
 0x72f   : > { %v4944_v34 = vpop.f32.mrb[144].mxu0 }
 0x730   : > { %v6962_v39 = vpop.f32.mrb[145].mxu0 }
 0x731   : > { %v4947_v36 = vpop.f32.mrb[146].mxu0 }
 0x732   : > { %v6963_v60 = vpop.f32.mrb[147].mxu0 }
 0x735   : > { %v4829_v49 = vpop.f32.mrb[128].mxu1 }
 0x736   : > { %v4835_v62 = vadd.f32 %v4829_v49, %v4716_v32  ;;  %v6942_v59 = vpop.f32.mrb[129].mxu1 }
 0x737   : > { %v4832_v23 = vpop.f32.mrb[130].mxu1 }
 0x738   : > { %v6943_v31 = vpop.f32.mrb[131].mxu1  ;;  %v4950_v20 = vadd.f32 %v4944_v34, %v4835_v62 }
 0x74f   : > { %v5162_v1 = vpop.f32.mrb[148].mxu0 }
 0x750   : > { %v7002_v52 = vpop.f32.mrb[149].mxu0 }
 0x751   : > { %v5165_v0 = vpop.f32.mrb[150].mxu0 }
 0x752   : > { %v7003_v50 = vpop.f32.mrb[151].mxu0 }
 0x755   : > { %v5053_v43 = vpop.f32.mrb[132].mxu1 }
 0x756   : > { %v5059_v54 = vadd.f32 %v5053_v43, %v4950_v20  ;;  %v6982_v29 = vpop.f32.mrb[133].mxu1 }
 0x757   : > { %v5056_v25 = vpop.f32.mrb[134].mxu1 }
 0x758   : > { %v6983_v44 = vpop.f32.mrb[135].mxu1  ;;  %v5168_v17 = vadd.f32 %v5162_v1, %v5059_v54 }
 0x76f   : > { %v5382_v13 = vpop.f32.mrb[152].mxu0 }
 0x770   : > { %v7042_v6 = vpop.f32.mrb[153].mxu0 }
 0x771   : > { %v5385_v27 = vpop.f32.mrb[154].mxu0 }
 0x772   : > { %v7043_v24 = vpop.f32.mrb[155].mxu0 }
 0x775   : > { %v5272_v15 = vpop.f32.mrb[136].mxu1 }
 0x776   : > { %v5278_v63 = vadd.f32 %v5272_v15, %v5168_v17  ;;  %v7022_v8 = vpop.f32.mrb[137].mxu1 }
 0x777   : > { %v5275_v45 = vpop.f32.mrb[138].mxu1 }
 0x778   : > { %v7023_v46 = vpop.f32.mrb[139].mxu1  ;;  %v5388_v2 = vadd.f32 %v5382_v13, %v5278_v63 }
 0x78f   : > { %v5598_v61 = vpop.f32.mrb[156].mxu0 }
 0x790   : > { %v7082_v21 = vpop.f32.mrb[157].mxu0 }
 0x791   : > { %v5601_v40 = vpop.f32.mrb[158].mxu0 }
 0x792   : > { %v7083_v4 = vpop.f32.mrb[159].mxu0 }
 0x795   : > { %v5490_v41 = vpop.f32.mrb[140].mxu1 }
 0x796   : > { %v5496_v30 = vadd.f32 %v5490_v41, %v5388_v2  ;;  %v7062_v55 = vpop.f32.mrb[141].mxu1 }
 0x797   : > { %v5493_v12 = vpop.f32.mrb[142].mxu1 }
 0x798   : > { %v7063_v53 = vpop.f32.mrb[143].mxu1  ;;  %v5604_v18 = vadd.f32 %v5598_v61, %v5496_v30 }
 0x7b5   : > { %v5708_v19 = vpop.f32.mrb[144].mxu1 }
 0x7b6   : > { %v5714_v42 = vadd.f32 %v5708_v19, %v5604_v18  ;;  %v7102_v3 = vpop.f32.mrb[145].mxu1 }
 0x7b7   : > { %v5711_v5 = vpop.f32.mrb[146].mxu1 }
 0x7b8   : > { %v5722_v37 = vadd.f32 %v6362_v56, %v5714_v42  ;;  %v7103_v9 = vpop.f32.mrb[147].mxu1 }
 0x7ba   : > { %v5723_v58 = vmax.f32 %v5722_v37, 0.0 }
 0x7bc   : > { %5724 = vst [vmem:[%s306_s30] sm:$0xff] %v5723_v58 }
 0x7bd PF: > { %s19_s24 = sadd.s32 1, %s7572_s24  }
 0x7be   : > { %p16_p5 = scmp.ge.s32.totalorder %s19_s24, 4  }
 0x7c0   :  { %18 = sbr.rel (!%p16_p5) target bundleno = 2 (0x2), region = 117 }
 0x7c7   :  { %5744 = vsyncpa [#allocation3], 1 }
 0x7c8   :  { %5746 = vsyncpa [#allocation3 + $0x1], 1 }
 0x7c9   :  { %5747 = vsyncpa [#allocation5], 1 }

</bundles_post_ra>
